<compile_context>
chip_gen: v5e
topology: v5e:2x2
jax: 0.10.0
libtpu: 0.0.40
codegen_flags: <defaults>
</compile_context>

<pallas_src>
import math
from functools import partial

import jax
import jax.numpy as jnp
from jax.experimental import pallas as pl
from jax.experimental.pallas import tpu as pltpu

NEG_INF = -1e30  # stand-in for float('-inf'); softmax result identical.
# NOTE: no softmax row is ever fully masked (the BOS column is always visible),
# so NEG_INF never degenerates into a uniform distribution.


# ----------------------- in-kernel helper functions ------------------------

def _ln(x, g, b, eps):
    mu = jnp.mean(x, axis=-1, keepdims=True)
    var = jnp.mean(jnp.square(x - mu), axis=-1, keepdims=True)
    return (x - mu) * jax.lax.rsqrt(var + eps) * g + b


def _erf(x):
    # Abramowitz & Stegun 7.1.26, |err| <= 1.5e-7 (exact-GELU to f32 precision)
    a1, a2, a3, a4, a5 = 0.254829592, -0.284496736, 1.421413741, -1.453152027, 1.061405429
    pp = 0.3275911
    sgn = jnp.where(x >= 0.0, 1.0, -1.0)
    ax = jnp.abs(x)
    t = pl.reciprocal(1.0 + pp * ax, approx=False)
    poly = ((((a5 * t + a4) * t + a3) * t + a2) * t + a1) * t
    return sgn * (1.0 - poly * jnp.exp(-ax * ax))


def _gelu(x):
    return 0.5 * x * (1.0 + _erf(x * 0.7071067811865476))


def _softmax_rows(s):
    m = jnp.max(s, axis=-1, keepdims=True)
    p = jnp.exp(s - m)
    return p * pl.reciprocal(jnp.sum(p, axis=-1, keepdims=True), approx=False)


def _mha(q, k, v, bias, wo, bo, nh, ctx_ref):
    """All heads of one MHA.  Per-head contexts are written into lane slices of
    a VMEM scratch; a single full-depth (rows,D)@(D,D) matmul then does the
    output projection (instead of nh shallow dh-deep matmuls)."""
    rows, D = q.shape
    dh = D // nh
    for h in range(nh):
        sl = slice(h * dh, (h + 1) * dh)
        s = jax.lax.dot_general(q[:, sl], k[:, sl],
                                (((1,), (1,)), ((), ())),
                                preferred_element_type=jnp.float32)
        if bias is not None:
            s = s + bias
        p = _softmax_rows(s)
        ctx_ref[0:rows, sl] = jnp.dot(p, v[:, sl],
                                      preferred_element_type=jnp.float32)
    return jnp.dot(ctx_ref[0:rows, :], wo,
                   preferred_element_type=jnp.float32) + bo


# ------------------------------ Pallas kernels ------------------------------

def _enc_stack_kernel(x_ref, ln1g, ln1b, qkvw, qkvb, projw, projb,
                      ln2g, ln2b, fc1w, fc1b, fc2w, fc2b,
                      o_ref, ctx_scr, *, nh):
    """One ViT block.  grid=(B, depth); the activation lives in o_ref (resident
    in VMEM across the 'arbitrary' depth axis), layer weights stream per depth."""
    @pl.when(pl.program_id(1) == 0)
    def _():
        o_ref[0] = x_ref[0]

    x = o_ref[0]                                           # (N, D)
    D = x.shape[-1]
    h = _ln(x, ln1g[0], ln1b[0], 1e-6)
    qkv = jnp.dot(h, qkvw[0], preferred_element_type=jnp.float32) + qkvb[0]
    x = x + _mha(qkv[:, :D], qkv[:, D:2 * D], qkv[:, 2 * D:], None,
                 projw[0], projb[0], nh, ctx_scr)
    h = _ln(x, ln2g[0], ln2b[0], 1e-6)
    h = _gelu(jnp.dot(h, fc1w[0], preferred_element_type=jnp.float32) + fc1b[0])
    x = x + jnp.dot(h, fc2w[0], preferred_element_type=jnp.float32) + fc2b[0]
    o_ref[0] = x


def _decoder_kernel(x_ref, posq_ref, emb_ref, eng_ref, enb_ref,
                    nqg, nqb, ncg, ncb,
                    sa_w, sa_b, sa_wo, sa_bo,
                    n1g, n1b,
                    ca_wq, ca_bq, ca_wkv, ca_bkv, ca_wo, ca_bo,
                    n2g, n2b, fc1w, fc1b, fc2w, fc2b,
                    dng, dnb, hw, hb,
                    o_ref,
                    content, kc, vc, padb, ctx_scr,
                    *, nh, eos_id, bos_id, num_classes):
    """Whole greedy AR decode + refinement for ONE batch item.  All decoder
    weights stay resident in VMEM; the per-step query is a single row (KV-cache
    decode); the refinement pass reuses the in-kernel content buffer."""
    L, D = posq_ref.shape
    V = emb_ref.shape[0]
    f32 = jnp.float32

    # encoder final norm + cross-attn K/V projection, once per batch item
    mem = _ln(x_ref[0], eng_ref[...], enb_ref[...], 1e-6)
    mkv = jnp.dot(mem, ca_wkv[...], preferred_element_type=f32) + ca_bkv[...]
    mk, mv = mkv[:, :D], mkv[:, D:]

    def query_stream(tgt, q, k, v, bias):
        # query-stream pass of one DecoderLayer + final norm + classification head
        tgt = tgt + _mha(q, k, v, bias, sa_wo[...], sa_bo[...], nh, ctx_scr)
        qc = jnp.dot(_ln(tgt, n1g[...], n1b[...], 1e-5), ca_wq[...],
                     preferred_element_type=f32) + ca_bq[...]
        tgt = tgt + _mha(qc, mk, mv, None, ca_wo[...], ca_bo[...], nh, ctx_scr)
        h = _gelu(jnp.dot(_ln(tgt, n2g[...], n2b[...], 1e-5), fc1w[...],
                          preferred_element_type=f32) + fc1b[...])
        tgt = tgt + jnp.dot(h, fc2w[...], preferred_element_type=f32) + fc2b[...]
        return jnp.dot(_ln(tgt, dng[...], dnb[...], 1e-5), hw[...],
                       preferred_element_type=f32) + hb[...]

    # per-item decode state
    content[...] = jnp.zeros_like(content)
    kc[...] = jnp.zeros_like(kc)
    vc[...] = jnp.zeros_like(vc)
    padb[...] = jnp.zeros_like(padb)
    v_iota = jax.lax.broadcasted_iota(jnp.int32, (1, V), 1)
    bos_onehot = (v_iota == bos_id).astype(f32)
    content[0:1, :] = jnp.dot(bos_onehot, emb_ref[...],
                              preferred_element_type=f32)      # BOS content (no pos)

    col_l = jax.lax.broadcasted_iota(jnp.int32, (1, L), 1)

    # ---- greedy AR decode, steps 0..L-2.  Step L-1's logits are never used by
    #      the refinement pass, so it is skipped entirely. ----
    @pl.loop(0, L - 1)
    def _ar(i):
        # project the newest content row into the K/V cache (row i)
        cn = _ln(content[pl.ds(i, 1), :], ncg[...], ncb[...], 1e-5)
        kv = jnp.dot(cn, sa_w[:, D:], preferred_element_type=f32) + sa_b[:, D:]
        kc[pl.ds(i, 1), :] = kv[:, :D]
        vc[pl.ds(i, 1), :] = kv[:, D:]
        # query-stream row i (causal mask: keys > i are invisible, so the
        # not-yet-written cache rows are never read through the softmax)
        pq = posq_ref[pl.ds(i, 1), :]
        q = jnp.dot(_ln(pq, nqg[...], nqb[...], 1e-5), sa_w[:, :D],
                    preferred_element_type=f32) + sa_b[:, :D]
        bias = jnp.where(col_l > i, NEG_INF, 0.0)
        logits = query_stream(pq, q, kc[...], vc[...], bias)        # (1, VP)
        # greedy token: first arg-max over the real (unpadded) classes
        vp_iota = jax.lax.broadcasted_iota(jnp.int32, logits.shape, 1)
        valid = vp_iota < num_classes
        lmax = jnp.max(jnp.where(valid, logits, -jnp.inf), axis=-1, keepdims=True)
        tok = jnp.min(jnp.where(valid & (logits == lmax), vp_iota,
                                jnp.int32(2 ** 30)),
                      axis=-1, keepdims=True)                        # (1, 1)
        onehot = (v_iota == tok).astype(f32)
        content[pl.ds(i + 1, 1), :] = pq + jnp.dot(onehot, emb_ref[...],
                                                   preferred_element_type=f32)
        # key-padding bias for the refinement pass: all columns >= first EOS
        eos_gate = jnp.where(tok == eos_id, NEG_INF, 0.0)            # (1, 1)
        padb[...] = jnp.minimum(padb[...],
                                jnp.where(col_l >= i + 1, eos_gate, 0.0))

    # TODO(synk): PyTorch's host-side all-EOS early break is omitted; with
    # refine_iters=1 the refined output is identical because all content
    # positions at/after the first EOS are key-padding-masked anyway.

    # ---- iterative refinement (refine_iters = 1) over the full sequence ----
    cn = _ln(content[...], ncg[...], ncb[...], 1e-5)
    kv = jnp.dot(cn, sa_w[:, D:], preferred_element_type=f32) + sa_b[:, D:]
    pq = posq_ref[...]
    q = jnp.dot(_ln(pq, nqg[...], nqb[...], 1e-5), sa_w[:, :D],
                preferred_element_type=f32) + sa_b[:, :D]
    row = jax.lax.broadcasted_iota(jnp.int32, (L, L), 0)
    col = jax.lax.broadcasted_iota(jnp.int32, (L, L), 1)
    bias = jnp.where(col == row + 1, NEG_INF, 0.0) + padb[...]
    o_ref[0] = query_stream(pq, q, kv[:, :D], kv[:, D:], bias)


# --------------------------- pallas_call wrappers ----------------------------

_ENC_KEYS = ('ln1_g', 'ln1_b', 'qkv_w', 'qkv_b', 'proj_w', 'proj_b',
             'ln2_g', 'ln2_b', 'fc1_w', 'fc1_b', 'fc2_w', 'fc2_b')

_DEC_ORDER = ('posq', 'embed', 'enc_ng', 'enc_nb',
              'nq_g', 'nq_b', 'nc_g', 'nc_b',
              'sa_w', 'sa_b', 'sa_wo', 'sa_bo',
              'n1_g', 'n1_b',
              'ca_wq', 'ca_bq', 'ca_wkv', 'ca_bkv', 'ca_wo', 'ca_bo',
              'n2_g', 'n2_b', 'fc1_w', 'fc1_b', 'fc2_w', 'fc2_b',
              'dn_g', 'dn_b', 'head_w', 'head_b')


def _enc_bspec(shape):
    nt = len(shape) - 1
    return pl.BlockSpec((1,) + tuple(shape[1:]), lambda b, d: (b,) + (0,) * nt)


def _enc_wspec(shape):
    nt = len(shape) - 1
    return pl.BlockSpec((1,) + tuple(shape[1:]), lambda b, d: (d,) + (0,) * nt)


def _dec_bspec(shape):
    nt = len(shape) - 1
    return pl.BlockSpec((1,) + tuple(shape[1:]), lambda b: (b,) + (0,) * nt)


def _dec_pspec(shape):
    n = len(shape)
    return pl.BlockSpec(tuple(shape), lambda b: (0,) * n)


def _encoder_call(x, es, nh, depth):
    B, N, D = x.shape
    return pl.pallas_call(
        partial(_enc_stack_kernel, nh=nh),
        grid=(B, depth),
        in_specs=[_enc_bspec(x.shape)] + [_enc_wspec(es[k].shape) for k in _ENC_KEYS],
        out_specs=_enc_bspec(x.shape),
        out_shape=jax.ShapeDtypeStruct(x.shape, jnp.float32),
        scratch_shapes=[pltpu.VMEM((N, D), jnp.float32)],
        compiler_params=pltpu.CompilerParams(
            dimension_semantics=("parallel", "arbitrary"),
            vmem_limit_bytes=64 * 1024 * 1024),
    )(x, *(es[k] for k in _ENC_KEYS))


def _decoder_call(x, dp, cfg):
    B, N, D = x.shape
    L = dp['posq'].shape[0]
    VP = dp['head_w'].shape[1]
    out_shape = (B, L, VP)
    return pl.pallas_call(
        partial(_decoder_kernel, nh=cfg['dec_heads'], eos_id=cfg['eos_id'],
                bos_id=cfg['bos_id'], num_classes=cfg['num_classes']),
        grid=(B,),
        in_specs=[_dec_bspec(x.shape)] + [_dec_pspec(dp[k].shape) for k in _DEC_ORDER],
        out_specs=_dec_bspec(out_shape),
        out_shape=jax.ShapeDtypeStruct(out_shape, jnp.float32),
        scratch_shapes=[pltpu.VMEM((L, D), jnp.float32),   # content stream
                        pltpu.VMEM((L, D), jnp.float32),   # self-attn K cache
                        pltpu.VMEM((L, D), jnp.float32),   # self-attn V cache
                        pltpu.VMEM((1, L), jnp.float32),   # key-padding bias
                        pltpu.VMEM((L, D), jnp.float32)],  # MHA context scratch
        compiler_params=pltpu.CompilerParams(
            dimension_semantics=("parallel",),
            vmem_limit_bytes=64 * 1024 * 1024),
    )(x, *(dp[k] for k in _DEC_ORDER))


# --------------------------------- forward ----------------------------------

def parseq_forward(images, R, cfg):
    D = cfg['embed_dim']
    ph, pw = cfg['patch_size']
    B, C, H, W = images.shape
    gh, gw = H // ph, W // pw
    N = gh * gw
    Vh = cfg['num_classes']

    # patch embedding (conv stride==kernel  <=>  matmul) + pos embed, plain XLA
    xp = images.reshape(B, C, gh, ph, gw, pw).transpose(0, 2, 4, 1, 3, 5)
    xp = xp.reshape(B, N, C * ph * pw)
    x = jnp.dot(xp, R['patch_w']) + R['patch_b'] + R['pos_embed']

    # fused encoder stack (one pallas_call, depth streamed as 'arbitrary' axis)
    x = _encoder_call(x, R['enc'], cfg['enc_heads'], cfg['enc_depth'])

    # fused greedy AR decode + refinement (one pallas_call)
    out = _decoder_call(x, R['dec'], cfg)
    return out[:, :, :Vh]                                  # drop head lane padding


# ------------------------------ parameter prep -------------------------------

def prepare_params(P, cfg):
    """Stack encoder layers on a depth axis and fold constant scales into the
    weights (attention 1/sqrt(dh), embedding sqrt(D))."""
    D = cfg['embed_dim']
    L = cfg['max_label_length'] + 1
    enc_scale = 1.0 / math.sqrt(D // cfg['enc_heads'])
    dec_scale = 1.0 / math.sqrt(D // cfg['dec_heads'])

    enc = {k: jnp.stack([blk[k] for blk in P['enc_blocks']], axis=0)
           for k in _ENC_KEYS}
    enc['qkv_w'] = enc['qkv_w'].at[..., :D].multiply(enc_scale)
    enc['qkv_b'] = enc['qkv_b'].at[..., :D].multiply(enc_scale)

    d = P['dec']
    dec = dict(
        posq=P['pos_queries'][0, :L],
        embed=math.sqrt(D) * P['embed_w'],
        enc_ng=P['enc_norm_g'], enc_nb=P['enc_norm_b'],
        nq_g=d['nq_g'], nq_b=d['nq_b'], nc_g=d['nc_g'], nc_b=d['nc_b'],
        sa_w=d['sa_w'].at[:, :D].multiply(dec_scale),
        sa_b=d['sa_b'].at[:, :D].multiply(dec_scale),
        sa_wo=d['sa_wo'], sa_bo=d['sa_bo'],
        n1_g=d['n1_g'], n1_b=d['n1_b'],
        ca_wq=dec_scale * d['ca_wq'], ca_bq=dec_scale * d['ca_bq'],
        ca_wkv=d['ca_wkv'], ca_bkv=d['ca_bkv'],
        ca_wo=d['ca_wo'], ca_bo=d['ca_bo'],
        n2_g=d['n2_g'], n2_b=d['n2_b'],
        fc1_w=d['fc1_w'], fc1_b=d['fc1_b'],
        fc2_w=d['fc2_w'], fc2_b=d['fc2_b'],
        dn_g=d['dn_g'], dn_b=d['dn_b'],
        head_w=d['head_w'], head_b=d['head_b'],
    )
    return dict(patch_w=P['patch_w'], patch_b=P['patch_b'],
                pos_embed=P['pos_embed'], enc=enc, dec=dec)


# ------------------------------ parameter init ------------------------------

def init_params(cfg, key):
    D = cfg['embed_dim']
    C = 3
    ph, pw = cfg['patch_size']
    gh, gw = cfg['img_size'][0] // ph, cfg['img_size'][1] // pw
    npatch = gh * gw
    V = cfg['charset_size'] + 3            # charset + [E], [B], [P]
    Vh = V - 2
    VP = ((Vh + 127) // 128) * 128         # lane-dense head width
    mlp_e = cfg['enc_mlp_ratio'] * D
    mlp_d = cfg['dec_mlp_ratio'] * D

    keys = iter(jax.random.split(key, 128))

    def w(shape, std=0.02):
        return std * jax.random.normal(next(keys), shape, jnp.float32)

    zeros = lambda s: jnp.zeros(s, jnp.float32)
    ones = lambda s: jnp.ones(s, jnp.float32)

    enc_blocks = []
    for _ in range(cfg['enc_depth']):
        enc_blocks.append(dict(
            ln1_g=ones((1, D)), ln1_b=zeros((1, D)),
            qkv_w=w((D, 3 * D)), qkv_b=zeros((1, 3 * D)),
            proj_w=w((D, D)), proj_b=zeros((1, D)),
            ln2_g=ones((1, D)), ln2_b=zeros((1, D)),
            fc1_w=w((D, mlp_e)), fc1_b=zeros((1, mlp_e)),
            fc2_w=w((mlp_e, D)), fc2_b=zeros((1, D)),
        ))

    head_w = jnp.zeros((D, VP), jnp.float32).at[:, :Vh].set(w((D, Vh)))
    head_b = zeros((1, VP))

    dec = dict(
        nq_g=ones((1, D)), nq_b=zeros((1, D)),
        nc_g=ones((1, D)), nc_b=zeros((1, D)),
        sa_w=w((D, 3 * D)), sa_b=zeros((1, 3 * D)),       # packed q|k|v in-proj
        sa_wo=w((D, D)), sa_bo=zeros((1, D)),
        n1_g=ones((1, D)), n1_b=zeros((1, D)),
        ca_wq=w((D, D)), ca_bq=zeros((1, D)),
        ca_wkv=w((D, 2 * D)), ca_bkv=zeros((1, 2 * D)),   # packed k|v in-proj
        ca_wo=w((D, D)), ca_bo=zeros((1, D)),
        n2_g=ones((1, D)), n2_b=zeros((1, D)),
        fc1_w=w((D, mlp_d)), fc1_b=zeros((1, mlp_d)),
        fc2_w=w((mlp_d, D)), fc2_b=zeros((1, D)),
        dn_g=ones((1, D)), dn_b=zeros((1, D)),
        head_w=head_w, head_b=head_b,
    )

    return dict(
        patch_w=w((C * ph * pw, D)), patch_b=zeros((1, D)),
        pos_embed=w((1, npatch, D)),
        enc_blocks=enc_blocks,
        enc_norm_g=ones((1, D)), enc_norm_b=zeros((1, D)),
        dec=dec,
        embed_w=w((V, D)),
        pos_queries=w((1, cfg['max_label_length'] + 1, D)),
    )


# ----------------------------------- main ------------------------------------

if __name__ == "__main__":
    # Scaled-down PARSeq config (structure identical to the PyTorch module).
    cfg = dict(img_size=(16, 32), patch_size=(4, 8), embed_dim=32,
               enc_depth=2, enc_heads=4, enc_mlp_ratio=4,
               dec_heads=4, dec_mlp_ratio=4,
               max_label_length=7, charset_size=20)
    V = cfg['charset_size'] + 3
    cfg['num_classes'] = V - 2      # head dim = len(tokenizer) - 2
    cfg['eos_id'] = 0               # Tokenizer: [E]=0, charset=1..N, [B]=N+1, [P]=N+2
    cfg['bos_id'] = V - 2
    cfg['pad_id'] = V - 1

    key = jax.random.PRNGKey(0)
    pkey, xkey = jax.random.split(key)
    params = init_params(cfg, pkey)
    run_params = prepare_params(params, cfg)

    # NCHW images, matching PyTorch Conv2d patch embedding
    images = jax.random.normal(
        xkey, (2, 3, cfg['img_size'][0], cfg['img_size'][1]), jnp.float32)

    forward = jax.jit(lambda imgs, prms: parseq_forward(imgs, prms, cfg))
    logits = jax.block_until_ready(forward(images, run_params))

    assert logits.shape == (2, cfg['max_label_length'] + 1, cfg['num_classes'])
    assert bool(jnp.all(jnp.isfinite(logits)))
    print("KERNEL_OK")
</pallas_src>

<mosaic_0001>
module attributes {stable_mosaic.version = 11 : i64} {
  func.func @_enc_stack_kernel(%arg0: i32, %arg1: i32, %arg2: memref<1x16x32xf32, #tpu.memory_space<vmem>>, %arg3: memref<1x1x32xf32, #tpu.memory_space<vmem>>, %arg4: memref<1x1x32xf32, #tpu.memory_space<vmem>>, %arg5: memref<1x32x96xf32, #tpu.memory_space<vmem>>, %arg6: memref<1x1x96xf32, #tpu.memory_space<vmem>>, %arg7: memref<1x32x32xf32, #tpu.memory_space<vmem>>, %arg8: memref<1x1x32xf32, #tpu.memory_space<vmem>>, %arg9: memref<1x1x32xf32, #tpu.memory_space<vmem>>, %arg10: memref<1x1x32xf32, #tpu.memory_space<vmem>>, %arg11: memref<1x32x128xf32, #tpu.memory_space<vmem>>, %arg12: memref<1x1x128xf32, #tpu.memory_space<vmem>>, %arg13: memref<1x128x32xf32, #tpu.memory_space<vmem>>, %arg14: memref<1x1x32xf32, #tpu.memory_space<vmem>>, %arg15: memref<1x16x32xf32, #tpu.memory_space<vmem>>, %arg16: memref<16x32xf32, #tpu.memory_space<vmem>>) attributes {dimension_semantics = [#tpu.dimension_semantics<parallel>, #tpu.dimension_semantics<arbitrary>], iteration_bounds = array<i64: 2, 2>, scalar_prefetch = 0 : i64, scratch_operands = 1 : i64, tpu.core_type = #tpu.core_type<tc>, window_params = [{transform_indices = @transform_0, window_bounds = array<i64: 1, 16, 32>}, {transform_indices = @transform_1, window_bounds = array<i64: 1, 1, 32>}, {transform_indices = @transform_2, window_bounds = array<i64: 1, 1, 32>}, {transform_indices = @transform_3, window_bounds = array<i64: 1, 32, 96>}, {transform_indices = @transform_4, window_bounds = array<i64: 1, 1, 96>}, {transform_indices = @transform_5, window_bounds = array<i64: 1, 32, 32>}, {transform_indices = @transform_6, window_bounds = array<i64: 1, 1, 32>}, {transform_indices = @transform_7, window_bounds = array<i64: 1, 1, 32>}, {transform_indices = @transform_8, window_bounds = array<i64: 1, 1, 32>}, {transform_indices = @transform_9, window_bounds = array<i64: 1, 32, 128>}, {transform_indices = @transform_10, window_bounds = array<i64: 1, 1, 128>}, {transform_indices = @transform_11, window_bounds = array<i64: 1, 128, 32>}, {transform_indices = @transform_12, window_bounds = array<i64: 1, 1, 32>}, {transform_indices = @transform_13, window_bounds = array<i64: 1, 16, 32>}]} {
    %c0_i32 = arith.constant 0 : i32
    %0 = arith.cmpi eq, %arg1, %c0_i32 : i32
    %1 = arith.extui %0 : i1 to i32
    %c0_i32_0 = arith.constant 0 : i32
    %2 = arith.cmpi ne, %1, %c0_i32_0 : i32
    scf.if %2 {
      %c0_93 = arith.constant 0 : index
      %c0_94 = arith.constant 0 : index
      %c0_95 = arith.constant 0 : index
      %198 = vector.load %arg2[%c0_93, %c0_94, %c0_95] : memref<1x16x32xf32, #tpu.memory_space<vmem>>, vector<1x16x32xf32>
      %199 = vector.shape_cast %198 : vector<1x16x32xf32> to vector<16x32xf32>
      %c0_96 = arith.constant 0 : index
      %c0_97 = arith.constant 0 : index
      %c0_98 = arith.constant 0 : index
      %200 = vector.load %arg15[%c0_96, %c0_97, %c0_98] : memref<1x16x32xf32, #tpu.memory_space<vmem>>, vector<1x16x32xf32>
      %201 = vector.shape_cast %200 : vector<1x16x32xf32> to vector<16x32xf32>
      %202 = vector.shape_cast %199 : vector<16x32xf32> to vector<1x16x32xf32>
      tpu.vector_store %arg15[%c0_96, %c0_97, %c0_98], %202 {strides = array<i32>} : memref<1x16x32xf32, #tpu.memory_space<vmem>>, vector<1x16x32xf32>,
    } else {
    }
    %c0 = arith.constant 0 : index
    %c0_1 = arith.constant 0 : index
    %c0_2 = arith.constant 0 : index
    %3 = vector.load %arg15[%c0, %c0_1, %c0_2] : memref<1x16x32xf32, #tpu.memory_space<vmem>>, vector<1x16x32xf32>
    %4 = vector.shape_cast %3 : vector<1x16x32xf32> to vector<16x32xf32>
    %c0_3 = arith.constant 0 : index
    %c0_4 = arith.constant 0 : index
    %c0_5 = arith.constant 0 : index
    %5 = vector.load %arg3[%c0_3, %c0_4, %c0_5] : memref<1x1x32xf32, #tpu.memory_space<vmem>>, vector<1x1x32xf32>
    %6 = vector.shape_cast %5 : vector<1x1x32xf32> to vector<1x32xf32>
    %c0_6 = arith.constant 0 : index
    %c0_7 = arith.constant 0 : index
    %c0_8 = arith.constant 0 : index
    %7 = vector.load %arg4[%c0_6, %c0_7, %c0_8] : memref<1x1x32xf32, #tpu.memory_space<vmem>>, vector<1x1x32xf32>
    %8 = vector.shape_cast %7 : vector<1x1x32xf32> to vector<1x32xf32>
    %cst = arith.constant dense<0.000000e+00> : vector<16xf32>
    %9 = vector.multi_reduction <add>, %4, %cst [1] : vector<16x32xf32> to vector<16xf32>
    %10 = vector.shape_cast %9 : vector<16xf32> to vector<16x1xf32>
    %cst_9 = arith.constant 3.200000e+01 : f32
    %11 = vector.broadcast %cst_9 : f32 to vector<16x1xf32>
    %12 = arith.divf %10, %11 : vector<16x1xf32>
    %13 = vector.broadcast %12 : vector<16x1xf32> to vector<16x32xf32>
    %14 = arith.subf %4, %13 : vector<16x32xf32>
    %15 = arith.mulf %14, %14 : vector<16x32xf32>
    %cst_10 = arith.constant dense<0.000000e+00> : vector<16xf32>
    %16 = vector.multi_reduction <add>, %15, %cst_10 [1] : vector<16x32xf32> to vector<16xf32>
    %17 = vector.shape_cast %16 : vector<16xf32> to vector<16x1xf32>
    %cst_11 = arith.constant 3.200000e+01 : f32
    %18 = vector.broadcast %cst_11 : f32 to vector<16x1xf32>
    %19 = arith.divf %17, %18 : vector<16x1xf32>
    %20 = vector.broadcast %12 : vector<16x1xf32> to vector<16x32xf32>
    %21 = arith.subf %4, %20 : vector<16x32xf32>
    %cst_12 = arith.constant 9.99999997E-7 : f32
    %22 = vector.broadcast %cst_12 : f32 to vector<16x1xf32>
    %23 = arith.addf %19, %22 : vector<16x1xf32>
    %24 = math.rsqrt %23 : vector<16x1xf32>
    %25 = vector.broadcast %24 : vector<16x1xf32> to vector<16x32xf32>
    %26 = arith.mulf %21, %25 : vector<16x32xf32>
    %27 = vector.broadcast %6 : vector<1x32xf32> to vector<16x32xf32>
    %28 = arith.mulf %26, %27 : vector<16x32xf32>
    %29 = vector.broadcast %8 : vector<1x32xf32> to vector<16x32xf32>
    %30 = arith.addf %28, %29 : vector<16x32xf32>
    %c0_13 = arith.constant 0 : index
    %c0_14 = arith.constant 0 : index
    %c0_15 = arith.constant 0 : index
    %31 = vector.load %arg5[%c0_13, %c0_14, %c0_15] : memref<1x32x96xf32, #tpu.memory_space<vmem>>, vector<1x32x96xf32>
    %32 = vector.shape_cast %31 : vector<1x32x96xf32> to vector<32x96xf32>
    %cst_16 = arith.constant dense<0.000000e+00> : vector<16x96xf32>
    %33 = tpu.matmul %30, %32, %cst_16 {dimension_numbers = #tpu.dot_dimension_numbers<[1], [0], [0], [1], [0, 0, 1, 1], [], []>} : vector<16x32xf32>, vector<32x96xf32>, vector<16x96xf32> -> vector<16x96xf32>
    %c0_17 = arith.constant 0 : index
    %c0_18 = arith.constant 0 : index
    %c0_19 = arith.constant 0 : index
    %34 = vector.load %arg6[%c0_17, %c0_18, %c0_19] : memref<1x1x96xf32, #tpu.memory_space<vmem>>, vector<1x1x96xf32>
    %35 = vector.shape_cast %34 : vector<1x1x96xf32> to vector<1x96xf32>
    %36 = vector.broadcast %35 : vector<1x96xf32> to vector<16x96xf32>
    %37 = arith.addf %33, %36 : vector<16x96xf32>
    %38 = vector.extract_strided_slice %37 {offsets = [0, 0], sizes = [16, 32], strides = [1, 1]} : vector<16x96xf32> to vector<16x32xf32>
    %39 = vector.extract_strided_slice %37 {offsets = [0, 32], sizes = [16, 32], strides = [1, 1]} : vector<16x96xf32> to vector<16x32xf32>
    %40 = vector.extract_strided_slice %37 {offsets = [0, 64], sizes = [16, 32], strides = [1, 1]} : vector<16x96xf32> to vector<16x32xf32>
    %c0_20 = arith.constant 0 : index
    %c0_21 = arith.constant 0 : index
    %c0_22 = arith.constant 0 : index
    %41 = vector.load %arg7[%c0_20, %c0_21, %c0_22] : memref<1x32x32xf32, #tpu.memory_space<vmem>>, vector<1x32x32xf32>
    %42 = vector.shape_cast %41 : vector<1x32x32xf32> to vector<32x32xf32>
    %c0_23 = arith.constant 0 : index
    %c0_24 = arith.constant 0 : index
    %c0_25 = arith.constant 0 : index
    %43 = vector.load %arg8[%c0_23, %c0_24, %c0_25] : memref<1x1x32xf32, #tpu.memory_space<vmem>>, vector<1x1x32xf32>
    %44 = vector.shape_cast %43 : vector<1x1x32xf32> to vector<1x32xf32>
    %45 = vector.extract_strided_slice %38 {offsets = [0, 0], sizes = [16, 8], strides = [1, 1]} : vector<16x32xf32> to vector<16x8xf32>
    %46 = vector.extract_strided_slice %39 {offsets = [0, 0], sizes = [16, 8], strides = [1, 1]} : vector<16x32xf32> to vector<16x8xf32>
    %cst_26 = arith.constant dense<0.000000e+00> : vector<16x16xf32>
    %47 = tpu.matmul %45, %46, %cst_26 {dimension_numbers = #tpu.dot_dimension_numbers<[1], [1], [0], [0], [0, 0, 1, 0], [], []>} : vector<16x8xf32>, vector<16x8xf32>, vector<16x16xf32> -> vector<16x16xf32>
    %cst_27 = arith.constant dense<0xFF800000> : vector<16xf32>
    %48 = vector.multi_reduction <maximumf>, %47, %cst_27 [1] : vector<16x16xf32> to vector<16xf32>
    %49 = vector.shape_cast %48 : vector<16xf32> to vector<16x1xf32>
    %50 = vector.broadcast %49 : vector<16x1xf32> to vector<16x16xf32>
    %51 = arith.subf %47, %50 : vector<16x16xf32>
    %52 = math.exp %51 : vector<16x16xf32>
    %cst_28 = arith.constant dense<0.000000e+00> : vector<16xf32>
    %53 = vector.multi_reduction <add>, %52, %cst_28 [1] : vector<16x16xf32> to vector<16xf32>
    %54 = vector.shape_cast %53 : vector<16xf32> to vector<16x1xf32>
    %55 = tpu.reciprocal %54 : vector<16x1xf32> -> vector<16x1xf32>
    %56 = vector.broadcast %55 : vector<16x1xf32> to vector<16x16xf32>
    %57 = arith.mulf %52, %56 : vector<16x16xf32>
    %58 = vector.extract_strided_slice %40 {offsets = [0, 0], sizes = [16, 8], strides = [1, 1]} : vector<16x32xf32> to vector<16x8xf32>
    %cst_29 = arith.constant dense<0.000000e+00> : vector<16x8xf32>
    %59 = tpu.matmul %57, %58, %cst_29 {dimension_numbers = #tpu.dot_dimension_numbers<[1], [0], [0], [1], [0, 0, 1, 1], [], []>} : vector<16x16xf32>, vector<16x8xf32>, vector<16x8xf32> -> vector<16x8xf32>
    %c0_30 = arith.constant 0 : index
    %c0_31 = arith.constant 0 : index
    %60 = vector.load %arg16[%c0_30, %c0_31] : memref<16x32xf32, #tpu.memory_space<vmem>>, vector<16x8xf32>
    tpu.vector_store %arg16[%c0_30, %c0_31], %59 {strides = array<i32>} : memref<16x32xf32, #tpu.memory_space<vmem>>, vector<16x8xf32>,
    %61 = vector.extract_strided_slice %38 {offsets = [0, 8], sizes = [16, 8], strides = [1, 1]} : vector<16x32xf32> to vector<16x8xf32>
    %62 = vector.extract_strided_slice %39 {offsets = [0, 8], sizes = [16, 8], strides = [1, 1]} : vector<16x32xf32> to vector<16x8xf32>
    %cst_32 = arith.constant dense<0.000000e+00> : vector<16x16xf32>
    %63 = tpu.matmul %61, %62, %cst_32 {dimension_numbers = #tpu.dot_dimension_numbers<[1], [1], [0], [0], [0, 0, 1, 0], [], []>} : vector<16x8xf32>, vector<16x8xf32>, vector<16x16xf32> -> vector<16x16xf32>
    %cst_33 = arith.constant dense<0xFF800000> : vector<16xf32>
    %64 = vector.multi_reduction <maximumf>, %63, %cst_33 [1] : vector<16x16xf32> to vector<16xf32>
    %65 = vector.shape_cast %64 : vector<16xf32> to vector<16x1xf32>
    %66 = vector.broadcast %65 : vector<16x1xf32> to vector<16x16xf32>
    %67 = arith.subf %63, %66 : vector<16x16xf32>
    %68 = math.exp %67 : vector<16x16xf32>
    %cst_34 = arith.constant dense<0.000000e+00> : vector<16xf32>
    %69 = vector.multi_reduction <add>, %68, %cst_34 [1] : vector<16x16xf32> to vector<16xf32>
    %70 = vector.shape_cast %69 : vector<16xf32> to vector<16x1xf32>
    %71 = tpu.reciprocal %70 : vector<16x1xf32> -> vector<16x1xf32>
    %72 = vector.broadcast %71 : vector<16x1xf32> to vector<16x16xf32>
    %73 = arith.mulf %68, %72 : vector<16x16xf32>
    %74 = vector.extract_strided_slice %40 {offsets = [0, 8], sizes = [16, 8], strides = [1, 1]} : vector<16x32xf32> to vector<16x8xf32>
    %cst_35 = arith.constant dense<0.000000e+00> : vector<16x8xf32>
    %75 = tpu.matmul %73, %74, %cst_35 {dimension_numbers = #tpu.dot_dimension_numbers<[1], [0], [0], [1], [0, 0, 1, 1], [], []>} : vector<16x16xf32>, vector<16x8xf32>, vector<16x8xf32> -> vector<16x8xf32>
    %c0_36 = arith.constant 0 : index
    %c8 = arith.constant 8 : index
    %76 = vector.load %arg16[%c0_36, %c8] : memref<16x32xf32, #tpu.memory_space<vmem>>, vector<16x8xf32>
    tpu.vector_store %arg16[%c0_36, %c8], %75 {strides = array<i32>} : memref<16x32xf32, #tpu.memory_space<vmem>>, vector<16x8xf32>,
    %77 = vector.extract_strided_slice %38 {offsets = [0, 16], sizes = [16, 8], strides = [1, 1]} : vector<16x32xf32> to vector<16x8xf32>
    %78 = vector.extract_strided_slice %39 {offsets = [0, 16], sizes = [16, 8], strides = [1, 1]} : vector<16x32xf32> to vector<16x8xf32>
    %cst_37 = arith.constant dense<0.000000e+00> : vector<16x16xf32>
    %79 = tpu.matmul %77, %78, %cst_37 {dimension_numbers = #tpu.dot_dimension_numbers<[1], [1], [0], [0], [0, 0, 1, 0], [], []>} : vector<16x8xf32>, vector<16x8xf32>, vector<16x16xf32> -> vector<16x16xf32>
    %cst_38 = arith.constant dense<0xFF800000> : vector<16xf32>
    %80 = vector.multi_reduction <maximumf>, %79, %cst_38 [1] : vector<16x16xf32> to vector<16xf32>
    %81 = vector.shape_cast %80 : vector<16xf32> to vector<16x1xf32>
    %82 = vector.broadcast %81 : vector<16x1xf32> to vector<16x16xf32>
    %83 = arith.subf %79, %82 : vector<16x16xf32>
    %84 = math.exp %83 : vector<16x16xf32>
    %cst_39 = arith.constant dense<0.000000e+00> : vector<16xf32>
    %85 = vector.multi_reduction <add>, %84, %cst_39 [1] : vector<16x16xf32> to vector<16xf32>
    %86 = vector.shape_cast %85 : vector<16xf32> to vector<16x1xf32>
    %87 = tpu.reciprocal %86 : vector<16x1xf32> -> vector<16x1xf32>
    %88 = vector.broadcast %87 : vector<16x1xf32> to vector<16x16xf32>
    %89 = arith.mulf %84, %88 : vector<16x16xf32>
    %90 = vector.extract_strided_slice %40 {offsets = [0, 16], sizes = [16, 8], strides = [1, 1]} : vector<16x32xf32> to vector<16x8xf32>
    %cst_40 = arith.constant dense<0.000000e+00> : vector<16x8xf32>
    %91 = tpu.matmul %89, %90, %cst_40 {dimension_numbers = #tpu.dot_dimension_numbers<[1], [0], [0], [1], [0, 0, 1, 1], [], []>} : vector<16x16xf32>, vector<16x8xf32>, vector<16x8xf32> -> vector<16x8xf32>
    %c0_41 = arith.constant 0 : index
    %c16 = arith.constant 16 : index
    %92 = vector.load %arg16[%c0_41, %c16] : memref<16x32xf32, #tpu.memory_space<vmem>>, vector<16x8xf32>
    tpu.vector_store %arg16[%c0_41, %c16], %91 {strides = array<i32>} : memref<16x32xf32, #tpu.memory_space<vmem>>, vector<16x8xf32>,
    %93 = vector.extract_strided_slice %38 {offsets = [0, 24], sizes = [16, 8], strides = [1, 1]} : vector<16x32xf32> to vector<16x8xf32>
    %94 = vector.extract_strided_slice %39 {offsets = [0, 24], sizes = [16, 8], strides = [1, 1]} : vector<16x32xf32> to vector<16x8xf32>
    %cst_42 = arith.constant dense<0.000000e+00> : vector<16x16xf32>
    %95 = tpu.matmul %93, %94, %cst_42 {dimension_numbers = #tpu.dot_dimension_numbers<[1], [1], [0], [0], [0, 0, 1, 0], [], []>} : vector<16x8xf32>, vector<16x8xf32>, vector<16x16xf32> -> vector<16x16xf32>
    %cst_43 = arith.constant dense<0xFF800000> : vector<16xf32>
    %96 = vector.multi_reduction <maximumf>, %95, %cst_43 [1] : vector<16x16xf32> to vector<16xf32>
    %97 = vector.shape_cast %96 : vector<16xf32> to vector<16x1xf32>
    %98 = vector.broadcast %97 : vector<16x1xf32> to vector<16x16xf32>
    %99 = arith.subf %95, %98 : vector<16x16xf32>
    %100 = math.exp %99 : vector<16x16xf32>
    %cst_44 = arith.constant dense<0.000000e+00> : vector<16xf32>
    %101 = vector.multi_reduction <add>, %100, %cst_44 [1] : vector<16x16xf32> to vector<16xf32>
    %102 = vector.shape_cast %101 : vector<16xf32> to vector<16x1xf32>
    %103 = tpu.reciprocal %102 : vector<16x1xf32> -> vector<16x1xf32>
    %104 = vector.broadcast %103 : vector<16x1xf32> to vector<16x16xf32>
    %105 = arith.mulf %100, %104 : vector<16x16xf32>
    %106 = vector.extract_strided_slice %40 {offsets = [0, 24], sizes = [16, 8], strides = [1, 1]} : vector<16x32xf32> to vector<16x8xf32>
    %cst_45 = arith.constant dense<0.000000e+00> : vector<16x8xf32>
    %107 = tpu.matmul %105, %106, %cst_45 {dimension_numbers = #tpu.dot_dimension_numbers<[1], [0], [0], [1], [0, 0, 1, 1], [], []>} : vector<16x16xf32>, vector<16x8xf32>, vector<16x8xf32> -> vector<16x8xf32>
    %c0_46 = arith.constant 0 : index
    %c24 = arith.constant 24 : index
    %108 = vector.load %arg16[%c0_46, %c24] : memref<16x32xf32, #tpu.memory_space<vmem>>, vector<16x8xf32>
    tpu.vector_store %arg16[%c0_46, %c24], %107 {strides = array<i32>} : memref<16x32xf32, #tpu.memory_space<vmem>>, vector<16x8xf32>,
    %c0_47 = arith.constant 0 : index
    %c0_48 = arith.constant 0 : index
    %109 = vector.load %arg16[%c0_47, %c0_48] : memref<16x32xf32, #tpu.memory_space<vmem>>, vector<16x32xf32>
    %cst_49 = arith.constant dense<0.000000e+00> : vector<16x32xf32>
    %110 = tpu.matmul %109, %42, %cst_49 {dimension_numbers = #tpu.dot_dimension_numbers<[1], [0], [0], [1], [0, 0, 1, 1], [], []>} : vector<16x32xf32>, vector<32x32xf32>, vector<16x32xf32> -> vector<16x32xf32>
    %111 = vector.broadcast %44 : vector<1x32xf32> to vector<16x32xf32>
    %112 = arith.addf %110, %111 : vector<16x32xf32>
    %113 = arith.addf %4, %112 : vector<16x32xf32>
    %c0_50 = arith.constant 0 : index
    %c0_51 = arith.constant 0 : index
    %c0_52 = arith.constant 0 : index
    %114 = vector.load %arg9[%c0_50, %c0_51, %c0_52] : memref<1x1x32xf32, #tpu.memory_space<vmem>>, vector<1x1x32xf32>
    %115 = vector.shape_cast %114 : vector<1x1x32xf32> to vector<1x32xf32>
    %c0_53 = arith.constant 0 : index
    %c0_54 = arith.constant 0 : index
    %c0_55 = arith.constant 0 : index
    %116 = vector.load %arg10[%c0_53, %c0_54, %c0_55] : memref<1x1x32xf32, #tpu.memory_space<vmem>>, vector<1x1x32xf32>
    %117 = vector.shape_cast %116 : vector<1x1x32xf32> to vector<1x32xf32>
    %cst_56 = arith.constant dense<0.000000e+00> : vector<16xf32>
    %118 = vector.multi_reduction <add>, %113, %cst_56 [1] : vector<16x32xf32> to vector<16xf32>
    %119 = vector.shape_cast %118 : vector<16xf32> to vector<16x1xf32>
    %cst_57 = arith.constant 3.200000e+01 : f32
    %120 = vector.broadcast %cst_57 : f32 to vector<16x1xf32>
    %121 = arith.divf %119, %120 : vector<16x1xf32>
    %122 = vector.broadcast %121 : vector<16x1xf32> to vector<16x32xf32>
    %123 = arith.subf %113, %122 : vector<16x32xf32>
    %124 = arith.mulf %123, %123 : vector<16x32xf32>
    %cst_58 = arith.constant dense<0.000000e+00> : vector<16xf32>
    %125 = vector.multi_reduction <add>, %124, %cst_58 [1] : vector<16x32xf32> to vector<16xf32>
    %126 = vector.shape_cast %125 : vector<16xf32> to vector<16x1xf32>
    %cst_59 = arith.constant 3.200000e+01 : f32
    %127 = vector.broadcast %cst_59 : f32 to vector<16x1xf32>
    %128 = arith.divf %126, %127 : vector<16x1xf32>
    %129 = vector.broadcast %121 : vector<16x1xf32> to vector<16x32xf32>
    %130 = arith.subf %113, %129 : vector<16x32xf32>
    %cst_60 = arith.constant 9.99999997E-7 : f32
    %131 = vector.broadcast %cst_60 : f32 to vector<16x1xf32>
    %132 = arith.addf %128, %131 : vector<16x1xf32>
    %133 = math.rsqrt %132 : vector<16x1xf32>
    %134 = vector.broadcast %133 : vector<16x1xf32> to vector<16x32xf32>
    %135 = arith.mulf %130, %134 : vector<16x32xf32>
    %136 = vector.broadcast %115 : vector<1x32xf32> to vector<16x32xf32>
    %137 = arith.mulf %135, %136 : vector<16x32xf32>
    %138 = vector.broadcast %117 : vector<1x32xf32> to vector<16x32xf32>
    %139 = arith.addf %137, %138 : vector<16x32xf32>
    %c0_61 = arith.constant 0 : index
    %c0_62 = arith.constant 0 : index
    %c0_63 = arith.constant 0 : index
    %140 = vector.load %arg11[%c0_61, %c0_62, %c0_63] : memref<1x32x128xf32, #tpu.memory_space<vmem>>, vector<1x32x128xf32>
    %141 = vector.shape_cast %140 : vector<1x32x128xf32> to vector<32x128xf32>
    %cst_64 = arith.constant dense<0.000000e+00> : vector<16x128xf32>
    %142 = tpu.matmul %139, %141, %cst_64 {dimension_numbers = #tpu.dot_dimension_numbers<[1], [0], [0], [1], [0, 0, 1, 1], [], []>} : vector<16x32xf32>, vector<32x128xf32>, vector<16x128xf32> -> vector<16x128xf32>
    %c0_65 = arith.constant 0 : index
    %c0_66 = arith.constant 0 : index
    %c0_67 = arith.constant 0 : index
    %143 = vector.load %arg12[%c0_65, %c0_66, %c0_67] : memref<1x1x128xf32, #tpu.memory_space<vmem>>, vector<1x1x128xf32>
    %144 = vector.shape_cast %143 : vector<1x1x128xf32> to vector<1x128xf32>
    %145 = vector.broadcast %144 : vector<1x128xf32> to vector<16x128xf32>
    %146 = arith.addf %142, %145 : vector<16x128xf32>
    %cst_68 = arith.constant 5.000000e-01 : f32
    %147 = vector.broadcast %cst_68 : f32 to vector<16x128xf32>
    %148 = arith.mulf %147, %146 : vector<16x128xf32>
    %cst_69 = arith.constant 0.707106769 : f32
    %149 = vector.broadcast %cst_69 : f32 to vector<16x128xf32>
    %150 = arith.mulf %146, %149 : vector<16x128xf32>
    %cst_70 = arith.constant 0.000000e+00 : f32
    %151 = vector.broadcast %cst_70 : f32 to vector<16x128xf32>
    %152 = arith.cmpf oge, %150, %151 : vector<16x128xf32>
    %cst_71 = arith.constant 1.000000e+00 : f32
    %cst_72 = arith.constant -1.000000e+00 : f32
    %153 = vector.broadcast %cst_71 : f32 to vector<16x128xf32>
    %154 = vector.broadcast %cst_72 : f32 to vector<16x128xf32>
    %155 = arith.select %152, %153, %154 : vector<16x128xi1>, vector<16x128xf32>
    %156 = math.absf %150 : vector<16x128xf32>
    %cst_73 = arith.constant 0.327591091 : f32
    %157 = vector.broadcast %cst_73 : f32 to vector<16x128xf32>
    %158 = arith.mulf %157, %156 : vector<16x128xf32>
    %cst_74 = arith.constant 1.000000e+00 : f32
    %159 = vector.broadcast %cst_74 : f32 to vector<16x128xf32>
    %160 = arith.addf %159, %158 : vector<16x128xf32>
    %161 = tpu.reciprocal %160 : vector<16x128xf32> -> vector<16x128xf32>
    %cst_75 = arith.constant 1.06140542 : f32
    %162 = vector.broadcast %cst_75 : f32 to vector<16x128xf32>
    %163 = arith.mulf %162, %161 : vector<16x128xf32>
    %cst_76 = arith.constant -1.45315206 : f32
    %164 = vector.broadcast %cst_76 : f32 to vector<16x128xf32>
    %165 = arith.addf %163, %164 : vector<16x128xf32>
    %166 = arith.mulf %165, %161 : vector<16x128xf32>
    %cst_77 = arith.constant 1.42141378 : f32
    %167 = vector.broadcast %cst_77 : f32 to vector<16x128xf32>
    %168 = arith.addf %166, %167 : vector<16x128xf32>
    %169 = arith.mulf %168, %161 : vector<16x128xf32>
    %cst_78 = arith.constant -0.284496725 : f32
    %170 = vector.broadcast %cst_78 : f32 to vector<16x128xf32>
    %171 = arith.addf %169, %170 : vector<16x128xf32>
    %172 = arith.mulf %171, %161 : vector<16x128xf32>
    %cst_79 = arith.constant 0.254829586 : f32
    %173 = vector.broadcast %cst_79 : f32 to vector<16x128xf32>
    %174 = arith.addf %172, %173 : vector<16x128xf32>
    %175 = arith.mulf %174, %161 : vector<16x128xf32>
    %cst_80 = arith.constant 0.000000e+00 : f32
    %176 = vector.broadcast %cst_80 : f32 to vector<16x128xf32>
    %177 = arith.subf %176, %156 : vector<16x128xf32>
    %178 = arith.mulf %177, %156 : vector<16x128xf32>
    %179 = math.exp %178 : vector<16x128xf32>
    %180 = arith.mulf %175, %179 : vector<16x128xf32>
    %cst_81 = arith.constant 1.000000e+00 : f32
    %181 = vector.broadcast %cst_81 : f32 to vector<16x128xf32>
    %182 = arith.subf %181, %180 : vector<16x128xf32>
    %183 = arith.mulf %155, %182 : vector<16x128xf32>
    %cst_82 = arith.constant 1.000000e+00 : f32
    %184 = vector.broadcast %cst_82 : f32 to vector<16x128xf32>
    %185 = arith.addf %184, %183 : vector<16x128xf32>
    %186 = arith.mulf %148, %185 : vector<16x128xf32>
    %c0_83 = arith.constant 0 : index
    %c0_84 = arith.constant 0 : index
    %c0_85 = arith.constant 0 : index
    %187 = vector.load %arg13[%c0_83, %c0_84, %c0_85] : memref<1x128x32xf32, #tpu.memory_space<vmem>>, vector<1x128x32xf32>
    %188 = vector.shape_cast %187 : vector<1x128x32xf32> to vector<128x32xf32>
    %cst_86 = arith.constant dense<0.000000e+00> : vector<16x32xf32>
    %189 = tpu.matmul %186, %188, %cst_86 {dimension_numbers = #tpu.dot_dimension_numbers<[1], [0], [0], [1], [0, 0, 1, 1], [], []>} : vector<16x128xf32>, vector<128x32xf32>, vector<16x32xf32> -> vector<16x32xf32>
    %190 = arith.addf %113, %189 : vector<16x32xf32>
    %c0_87 = arith.constant 0 : index
    %c0_88 = arith.constant 0 : index
    %c0_89 = arith.constant 0 : index
    %191 = vector.load %arg14[%c0_87, %c0_88, %c0_89] : memref<1x1x32xf32, #tpu.memory_space<vmem>>, vector<1x1x32xf32>
    %192 = vector.shape_cast %191 : vector<1x1x32xf32> to vector<1x32xf32>
    %193 = vector.broadcast %192 : vector<1x32xf32> to vector<16x32xf32>
    %194 = arith.addf %190, %193 : vector<16x32xf32>
    %c0_90 = arith.constant 0 : index
    %c0_91 = arith.constant 0 : index
    %c0_92 = arith.constant 0 : index
    %195 = vector.load %arg15[%c0_90, %c0_91, %c0_92] : memref<1x16x32xf32, #tpu.memory_space<vmem>>, vector<1x16x32xf32>
    %196 = vector.shape_cast %195 : vector<1x16x32xf32> to vector<16x32xf32>
    %197 = vector.shape_cast %194 : vector<16x32xf32> to vector<1x16x32xf32>
    tpu.vector_store %arg15[%c0_90, %c0_91, %c0_92], %197 {strides = array<i32>} : memref<1x16x32xf32, #tpu.memory_space<vmem>>, vector<1x16x32xf32>,
    return
  }
  func.func @transform_0(%arg0: i32, %arg1: i32) -> (i32, i32, i32) {
    %c0_i32 = arith.constant 0 : i32
    %c0_i32_0 = arith.constant 0 : i32
    %c0_i32_1 = arith.constant 0 : i32
    return %arg0, %c0_i32, %c0_i32_0 : i32, i32, i32
  }
  func.func @transform_1(%arg0: i32, %arg1: i32) -> (i32, i32, i32) {
    %c0_i32 = arith.constant 0 : i32
    %c0_i32_0 = arith.constant 0 : i32
    %c0_i32_1 = arith.constant 0 : i32
    return %arg1, %c0_i32, %c0_i32_0 : i32, i32, i32
  }
  func.func @transform_2(%arg0: i32, %arg1: i32) -> (i32, i32, i32) {
    %c0_i32 = arith.constant 0 : i32
    %c0_i32_0 = arith.constant 0 : i32
    %c0_i32_1 = arith.constant 0 : i32
    return %arg1, %c0_i32, %c0_i32_0 : i32, i32, i32
  }
  func.func @transform_3(%arg0: i32, %arg1: i32) -> (i32, i32, i32) {
    %c0_i32 = arith.constant 0 : i32
    %c0_i32_0 = arith.constant 0 : i32
    %c0_i32_1 = arith.constant 0 : i32
    return %arg1, %c0_i32, %c0_i32_0 : i32, i32, i32
  }
  func.func @transform_4(%arg0: i32, %arg1: i32) -> (i32, i32, i32) {
    %c0_i32 = arith.constant 0 : i32
    %c0_i32_0 = arith.constant 0 : i32
    %c0_i32_1 = arith.constant 0 : i32
    return %arg1, %c0_i32, %c0_i32_0 : i32, i32, i32
  }
  func.func @transform_5(%arg0: i32, %arg1: i32) -> (i32, i32, i32) {
    %c0_i32 = arith.constant 0 : i32
    %c0_i32_0 = arith.constant 0 : i32
    %c0_i32_1 = arith.constant 0 : i32
    return %arg1, %c0_i32, %c0_i32_0 : i32, i32, i32
  }
  func.func @transform_6(%arg0: i32, %arg1: i32) -> (i32, i32, i32) {
    %c0_i32 = arith.constant 0 : i32
    %c0_i32_0 = arith.constant 0 : i32
    %c0_i32_1 = arith.constant 0 : i32
    return %arg1, %c0_i32, %c0_i32_0 : i32, i32, i32
  }
  func.func @transform_7(%arg0: i32, %arg1: i32) -> (i32, i32, i32) {
    %c0_i32 = arith.constant 0 : i32
    %c0_i32_0 = arith.constant 0 : i32
    %c0_i32_1 = arith.constant 0 : i32
    return %arg1, %c0_i32, %c0_i32_0 : i32, i32, i32
  }
  func.func @transform_8(%arg0: i32, %arg1: i32) -> (i32, i32, i32) {
    %c0_i32 = arith.constant 0 : i32
    %c0_i32_0 = arith.constant 0 : i32
    %c0_i32_1 = arith.constant 0 : i32
    return %arg1, %c0_i32, %c0_i32_0 : i32, i32, i32
  }
  func.func @transform_9(%arg0: i32, %arg1: i32) -> (i32, i32, i32) {
    %c0_i32 = arith.constant 0 : i32
    %c0_i32_0 = arith.constant 0 : i32
    %c0_i32_1 = arith.constant 0 : i32
    return %arg1, %c0_i32, %c0_i32_0 : i32, i32, i32
  }
  func.func @transform_10(%arg0: i32, %arg1: i32) -> (i32, i32, i32) {
    %c0_i32 = arith.constant 0 : i32
    %c0_i32_0 = arith.constant 0 : i32
    %c0_i32_1 = arith.constant 0 : i32
    return %arg1, %c0_i32, %c0_i32_0 : i32, i32, i32
  }
  func.func @transform_11(%arg0: i32, %arg1: i32) -> (i32, i32, i32) {
    %c0_i32 = arith.constant 0 : i32
    %c0_i32_0 = arith.constant 0 : i32
    %c0_i32_1 = arith.constant 0 : i32
    return %arg1, %c0_i32, %c0_i32_0 : i32, i32, i32
  }
  func.func @transform_12(%arg0: i32, %arg1: i32) -> (i32, i32, i32) {
    %c0_i32 = arith.constant 0 : i32
    %c0_i32_0 = arith.constant 0 : i32
    %c0_i32_1 = arith.constant 0 : i32
    return %arg1, %c0_i32, %c0_i32_0 : i32, i32, i32
  }
  func.func @transform_13(%arg0: i32, %arg1: i32) -> (i32, i32, i32) {
    %c0_i32 = arith.constant 0 : i32
    %c0_i32_0 = arith.constant 0 : i32
    %c0_i32_1 = arith.constant 0 : i32
    return %arg0, %c0_i32, %c0_i32_0 : i32, i32, i32
  }
}

module attributes {stable_mosaic.version = 11 : i64} {
  func.func @_decoder_kernel(%arg0: i32, %arg1: memref<1x16x32xf32, #tpu.memory_space<vmem>>, %arg2: memref<8x32xf32, #tpu.memory_space<vmem>>, %arg3: memref<23x32xf32, #tpu.memory_space<vmem>>, %arg4: memref<1x32xf32, #tpu.memory_space<vmem>>, %arg5: memref<1x32xf32, #tpu.memory_space<vmem>>, %arg6: memref<1x32xf32, #tpu.memory_space<vmem>>, %arg7: memref<1x32xf32, #tpu.memory_space<vmem>>, %arg8: memref<1x32xf32, #tpu.memory_space<vmem>>, %arg9: memref<1x32xf32, #tpu.memory_space<vmem>>, %arg10: memref<32x96xf32, #tpu.memory_space<vmem>>, %arg11: memref<1x96xf32, #tpu.memory_space<vmem>>, %arg12: memref<32x32xf32, #tpu.memory_space<vmem>>, %arg13: memref<1x32xf32, #tpu.memory_space<vmem>>, %arg14: memref<1x32xf32, #tpu.memory_space<vmem>>, %arg15: memref<1x32xf32, #tpu.memory_space<vmem>>, %arg16: memref<32x32xf32, #tpu.memory_space<vmem>>, %arg17: memref<1x32xf32, #tpu.memory_space<vmem>>, %arg18: memref<32x64xf32, #tpu.memory_space<vmem>>, %arg19: memref<1x64xf32, #tpu.memory_space<vmem>>, %arg20: memref<32x32xf32, #tpu.memory_space<vmem>>, %arg21: memref<1x32xf32, #tpu.memory_space<vmem>>, %arg22: memref<1x32xf32, #tpu.memory_space<vmem>>, %arg23: memref<1x32xf32, #tpu.memory_space<vmem>>, %arg24: memref<32x128xf32, #tpu.memory_space<vmem>>, %arg25: memref<1x128xf32, #tpu.memory_space<vmem>>, %arg26: memref<128x32xf32, #tpu.memory_space<vmem>>, %arg27: memref<1x32xf32, #tpu.memory_space<vmem>>, %arg28: memref<1x32xf32, #tpu.memory_space<vmem>>, %arg29: memref<1x32xf32, #tpu.memory_space<vmem>>, %arg30: memref<32x128xf32, #tpu.memory_space<vmem>>, %arg31: memref<1x128xf32, #tpu.memory_space<vmem>>, %arg32: memref<1x8x128xf32, #tpu.memory_space<vmem>>, %arg33: memref<8x32xf32, #tpu.memory_space<vmem>>, %arg34: memref<8x32xf32, #tpu.memory_space<vmem>>, %arg35: memref<8x32xf32, #tpu.memory_space<vmem>>, %arg36: memref<1x8xf32, #tpu.memory_space<vmem>>, %arg37: memref<8x32xf32, #tpu.memory_space<vmem>>) attributes {dimension_semantics = [#tpu.dimension_semantics<parallel>], iteration_bounds = array<i64: 2>, scalar_prefetch = 0 : i64, scratch_operands = 5 : i64, tpu.core_type = #tpu.core_type<tc>, window_params = [{transform_indices = @transform_0, window_bounds = array<i64: 1, 16, 32>}, {pipeline_mode = #tpu.pipeline_mode<synchronous>, transform_indices = @transform_1, window_bounds = array<i64: 8, 32>}, {pipeline_mode = #tpu.pipeline_mode<synchronous>, transform_indices = @transform_2, window_bounds = array<i64: 23, 32>}, {pipeline_mode = #tpu.pipeline_mode<synchronous>, transform_indices = @transform_3, window_bounds = array<i64: 1, 32>}, {pipeline_mode = #tpu.pipeline_mode<synchronous>, transform_indices = @transform_4, window_bounds = array<i64: 1, 32>}, {pipeline_mode = #tpu.pipeline_mode<synchronous>, transform_indices = @transform_5, window_bounds = array<i64: 1, 32>}, {pipeline_mode = #tpu.pipeline_mode<synchronous>, transform_indices = @transform_6, window_bounds = array<i64: 1, 32>}, {pipeline_mode = #tpu.pipeline_mode<synchronous>, transform_indices = @transform_7, window_bounds = array<i64: 1, 32>}, {pipeline_mode = #tpu.pipeline_mode<synchronous>, transform_indices = @transform_8, window_bounds = array<i64: 1, 32>}, {pipeline_mode = #tpu.pipeline_mode<synchronous>, transform_indices = @transform_9, window_bounds = array<i64: 32, 96>}, {pipeline_mode = #tpu.pipeline_mode<synchronous>, transform_indices = @transform_10, window_bounds = array<i64: 1, 96>}, {pipeline_mode = #tpu.pipeline_mode<synchronous>, transform_indices = @transform_11, window_bounds = array<i64: 32, 32>}, {pipeline_mode = #tpu.pipeline_mode<synchronous>, transform_indices = @transform_12, window_bounds = array<i64: 1, 32>}, {pipeline_mode = #tpu.pipeline_mode<synchronous>, transform_indices = @transform_13, window_bounds = array<i64: 1, 32>}, {pipeline_mode = #tpu.pipeline_mode<synchronous>, transform_indices = @transform_14, window_bounds = array<i64: 1, 32>}, {pipeline_mode = #tpu.pipeline_mode<synchronous>, transform_indices = @transform_15, window_bounds = array<i64: 32, 32>}, {pipeline_mode = #tpu.pipeline_mode<synchronous>, transform_indices = @transform_16, window_bounds = array<i64: 1, 32>}, {pipeline_mode = #tpu.pipeline_mode<synchronous>, transform_indices = @transform_17, window_bounds = array<i64: 32, 64>}, {pipeline_mode = #tpu.pipeline_mode<synchronous>, transform_indices = @transform_18, window_bounds = array<i64: 1, 64>}, {pipeline_mode = #tpu.pipeline_mode<synchronous>, transform_indices = @transform_19, window_bounds = array<i64: 32, 32>}, {pipeline_mode = #tpu.pipeline_mode<synchronous>, transform_indices = @transform_20, window_bounds = array<i64: 1, 32>}, {pipeline_mode = #tpu.pipeline_mode<synchronous>, transform_indices = @transform_21, window_bounds = array<i64: 1, 32>}, {pipeline_mode = #tpu.pipeline_mode<synchronous>, transform_indices = @transform_22, window_bounds = array<i64: 1, 32>}, {pipeline_mode = #tpu.pipeline_mode<synchronous>, transform_indices = @transform_23, window_bounds = array<i64: 32, 128>}, {pipeline_mode = #tpu.pipeline_mode<synchronous>, transform_indices = @transform_24, window_bounds = array<i64: 1, 128>}, {pipeline_mode = #tpu.pipeline_mode<synchronous>, transform_indices = @transform_25, window_bounds = array<i64: 128, 32>}, {pipeline_mode = #tpu.pipeline_mode<synchronous>, transform_indices = @transform_26, window_bounds = array<i64: 1, 32>}, {pipeline_mode = #tpu.pipeline_mode<synchronous>, transform_indices = @transform_27, window_bounds = array<i64: 1, 32>}, {pipeline_mode = #tpu.pipeline_mode<synchronous>, transform_indices = @transform_28, window_bounds = array<i64: 1, 32>}, {pipeline_mode = #tpu.pipeline_mode<synchronous>, transform_indices = @transform_29, window_bounds = array<i64: 32, 128>}, {pipeline_mode = #tpu.pipeline_mode<synchronous>, transform_indices = @transform_30, window_bounds = array<i64: 1, 128>}, {transform_indices = @transform_31, window_bounds = array<i64: 1, 8, 128>}]} {
    %c0 = arith.constant 0 : index
    %c0_0 = arith.constant 0 : index
    %c0_1 = arith.constant 0 : index
    %0 = vector.load %arg1[%c0, %c0_0, %c0_1] : memref<1x16x32xf32, #tpu.memory_space<vmem>>, vector<1x16x32xf32>
    %1 = vector.shape_cast %0 : vector<1x16x32xf32> to vector<16x32xf32>
    %c0_2 = arith.constant 0 : index
    %c0_3 = arith.constant 0 : index
    %2 = vector.load %arg4[%c0_2, %c0_3] : memref<1x32xf32, #tpu.memory_space<vmem>>, vector<1x32xf32>
    %c0_4 = arith.constant 0 : index
    %c0_5 = arith.constant 0 : index
    %3 = vector.load %arg5[%c0_4, %c0_5] : memref<1x32xf32, #tpu.memory_space<vmem>>, vector<1x32xf32>
    %cst = arith.constant dense<0.000000e+00> : vector<16xf32>
    %4 = vector.multi_reduction <add>, %1, %cst [1] : vector<16x32xf32> to vector<16xf32>
    %5 = vector.shape_cast %4 : vector<16xf32> to vector<16x1xf32>
    %cst_6 = arith.constant 3.200000e+01 : f32
    %6 = vector.broadcast %cst_6 : f32 to vector<16x1xf32>
    %7 = arith.divf %5, %6 : vector<16x1xf32>
    %8 = vector.broadcast %7 : vector<16x1xf32> to vector<16x32xf32>
    %9 = arith.subf %1, %8 : vector<16x32xf32>
    %10 = arith.mulf %9, %9 : vector<16x32xf32>
    %cst_7 = arith.constant dense<0.000000e+00> : vector<16xf32>
    %11 = vector.multi_reduction <add>, %10, %cst_7 [1] : vector<16x32xf32> to vector<16xf32>
    %12 = vector.shape_cast %11 : vector<16xf32> to vector<16x1xf32>
    %cst_8 = arith.constant 3.200000e+01 : f32
    %13 = vector.broadcast %cst_8 : f32 to vector<16x1xf32>
    %14 = arith.divf %12, %13 : vector<16x1xf32>
    %15 = vector.broadcast %7 : vector<16x1xf32> to vector<16x32xf32>
    %16 = arith.subf %1, %15 : vector<16x32xf32>
    %cst_9 = arith.constant 9.99999997E-7 : f32
    %17 = vector.broadcast %cst_9 : f32 to vector<16x1xf32>
    %18 = arith.addf %14, %17 : vector<16x1xf32>
    %19 = math.rsqrt %18 : vector<16x1xf32>
    %20 = vector.broadcast %19 : vector<16x1xf32> to vector<16x32xf32>
    %21 = arith.mulf %16, %20 : vector<16x32xf32>
    %22 = vector.broadcast %2 : vector<1x32xf32> to vector<16x32xf32>
    %23 = arith.mulf %21, %22 : vector<16x32xf32>
    %24 = vector.broadcast %3 : vector<1x32xf32> to vector<16x32xf32>
    %25 = arith.addf %23, %24 : vector<16x32xf32>
    %c0_10 = arith.constant 0 : index
    %c0_11 = arith.constant 0 : index
    %26 = vector.load %arg18[%c0_10, %c0_11] : memref<32x64xf32, #tpu.memory_space<vmem>>, vector<32x64xf32>
    %cst_12 = arith.constant dense<0.000000e+00> : vector<16x64xf32>
    %27 = tpu.matmul %25, %26, %cst_12 {dimension_numbers = #tpu.dot_dimension_numbers<[1], [0], [0], [1], [0, 0, 1, 1], [], []>} : vector<16x32xf32>, vector<32x64xf32>, vector<16x64xf32> -> vector<16x64xf32>
    %c0_13 = arith.constant 0 : index
    %c0_14 = arith.constant 0 : index
    %28 = vector.load %arg19[%c0_13, %c0_14] : memref<1x64xf32, #tpu.memory_space<vmem>>, vector<1x64xf32>
    %29 = vector.broadcast %28 : vector<1x64xf32> to vector<16x64xf32>
    %30 = arith.addf %27, %29 : vector<16x64xf32>
    %31 = vector.extract_strided_slice %30 {offsets = [0, 0], sizes = [16, 32], strides = [1, 1]} : vector<16x64xf32> to vector<16x32xf32>
    %32 = vector.extract_strided_slice %30 {offsets = [0, 32], sizes = [16, 32], strides = [1, 1]} : vector<16x64xf32> to vector<16x32xf32>
    %cst_15 = arith.constant 0.000000e+00 : f32
    %33 = vector.broadcast %cst_15 : f32 to vector<8x32xf32>
    %c0_16 = arith.constant 0 : index
    %c0_17 = arith.constant 0 : index
    %34 = vector.load %arg33[%c0_16, %c0_17] : memref<8x32xf32, #tpu.memory_space<vmem>>, vector<8x32xf32>
    tpu.vector_store %arg33[%c0_16, %c0_17], %33 {strides = array<i32>} : memref<8x32xf32, #tpu.memory_space<vmem>>, vector<8x32xf32>,
    %cst_18 = arith.constant 0.000000e+00 : f32
    %35 = vector.broadcast %cst_18 : f32 to vector<8x32xf32>
    %c0_19 = arith.constant 0 : index
    %c0_20 = arith.constant 0 : index
    %36 = vector.load %arg34[%c0_19, %c0_20] : memref<8x32xf32, #tpu.memory_space<vmem>>, vector<8x32xf32>
    tpu.vector_store %arg34[%c0_19, %c0_20], %35 {strides = array<i32>} : memref<8x32xf32, #tpu.memory_space<vmem>>, vector<8x32xf32>,
    %cst_21 = arith.constant 0.000000e+00 : f32
    %37 = vector.broadcast %cst_21 : f32 to vector<8x32xf32>
    %c0_22 = arith.constant 0 : index
    %c0_23 = arith.constant 0 : index
    %38 = vector.load %arg35[%c0_22, %c0_23] : memref<8x32xf32, #tpu.memory_space<vmem>>, vector<8x32xf32>
    tpu.vector_store %arg35[%c0_22, %c0_23], %37 {strides = array<i32>} : memref<8x32xf32, #tpu.memory_space<vmem>>, vector<8x32xf32>,
    %cst_24 = arith.constant 0.000000e+00 : f32
    %39 = vector.broadcast %cst_24 : f32 to vector<1x8xf32>
    %c0_25 = arith.constant 0 : index
    %c0_26 = arith.constant 0 : index
    %40 = vector.load %arg36[%c0_25, %c0_26] : memref<1x8xf32, #tpu.memory_space<vmem>>, vector<1x8xf32>
    tpu.vector_store %arg36[%c0_25, %c0_26], %39 {strides = array<i32>} : memref<1x8xf32, #tpu.memory_space<vmem>>, vector<1x8xf32>,
    %41 = tpu.iota {dimensions = array<i32: 1>} : vector<1x23xi32>
    %c21_i32 = arith.constant 21 : i32
    %42 = vector.broadcast %c21_i32 : i32 to vector<1x23xi32>
    %43 = arith.cmpi eq, %41, %42 : vector<1x23xi32>
    %44 = arith.extui %43 : vector<1x23xi1> to vector<1x23xi32>
    %45 = arith.sitofp %44 : vector<1x23xi32> to vector<1x23xf32>
    %c0_27 = arith.constant 0 : index
    %c0_28 = arith.constant 0 : index
    %46 = vector.load %arg3[%c0_27, %c0_28] : memref<23x32xf32, #tpu.memory_space<vmem>>, vector<23x32xf32>
    %cst_29 = arith.constant dense<0.000000e+00> : vector<1x32xf32>
    %47 = tpu.matmul %45, %46, %cst_29 {dimension_numbers = #tpu.dot_dimension_numbers<[1], [0], [0], [1], [0, 0, 1, 1], [], []>} : vector<1x23xf32>, vector<23x32xf32>, vector<1x32xf32> -> vector<1x32xf32>
    %c0_30 = arith.constant 0 : index
    %c0_31 = arith.constant 0 : index
    %48 = vector.load %arg33[%c0_30, %c0_31] : memref<8x32xf32, #tpu.memory_space<vmem>>, vector<1x32xf32>
    tpu.vector_store %arg33[%c0_30, %c0_31], %47 {strides = array<i32>} : memref<8x32xf32, #tpu.memory_space<vmem>>, vector<1x32xf32>,
    %49 = tpu.iota {dimensions = array<i32: 1>} : vector<1x8xi32>
    %c0_i32 = arith.constant 0 : i32
    %c7_i32 = arith.constant 7 : i32
    %50 = arith.addi %c0_i32, %c7_i32 : i32
    %c1_i32 = arith.constant 1 : i32
    scf.for %arg38 = %c0_i32 to %50 step %c1_i32  : i32 {
      %c1_i32_193 = arith.constant 1 : i32
      %406 = arith.muli %arg38, %c1_i32_193 : i32
      %c0_i32_194 = arith.constant 0 : i32
      %407 = arith.addi %c0_i32_194, %406 : i32
      %408 = arith.index_cast %407 : i32 to index
      %c0_195 = arith.constant 0 : index
      %409 = vector.load %arg33[%408, %c0_195] : memref<8x32xf32, #tpu.memory_space<vmem>>, vector<1x32xf32>
      %c0_196 = arith.constant 0 : index
      %c0_197 = arith.constant 0 : index
      %410 = vector.load %arg8[%c0_196, %c0_197] : memref<1x32xf32, #tpu.memory_space<vmem>>, vector<1x32xf32>
      %c0_198 = arith.constant 0 : index
      %c0_199 = arith.constant 0 : index
      %411 = vector.load %arg9[%c0_198, %c0_199] : memref<1x32xf32, #tpu.memory_space<vmem>>, vector<1x32xf32>
      %cst_200 = arith.constant dense<0.000000e+00> : vector<1xf32>
      %412 = vector.multi_reduction <add>, %409, %cst_200 [1] : vector<1x32xf32> to vector<1xf32>
      %413 = vector.shape_cast %412 : vector<1xf32> to vector<1x1xf32>
      %cst_201 = arith.constant 3.200000e+01 : f32
      %414 = vector.broadcast %cst_201 : f32 to vector<1x1xf32>
      %415 = arith.divf %413, %414 : vector<1x1xf32>
      %416 = vector.broadcast %415 : vector<1x1xf32> to vector<1x32xf32>
      %417 = arith.subf %409, %416 : vector<1x32xf32>
      %418 = arith.mulf %417, %417 : vector<1x32xf32>
      %cst_202 = arith.constant dense<0.000000e+00> : vector<1xf32>
      %419 = vector.multi_reduction <add>, %418, %cst_202 [1] : vector<1x32xf32> to vector<1xf32>
      %420 = vector.shape_cast %419 : vector<1xf32> to vector<1x1xf32>
      %cst_203 = arith.constant 3.200000e+01 : f32
      %421 = vector.broadcast %cst_203 : f32 to vector<1x1xf32>
      %422 = arith.divf %420, %421 : vector<1x1xf32>
      %423 = vector.broadcast %415 : vector<1x1xf32> to vector<1x32xf32>
      %424 = arith.subf %409, %423 : vector<1x32xf32>
      %cst_204 = arith.constant 9.99999974E-6 : f32
      %425 = vector.broadcast %cst_204 : f32 to vector<1x1xf32>
      %426 = arith.addf %422, %425 : vector<1x1xf32>
      %427 = math.rsqrt %426 : vector<1x1xf32>
      %428 = vector.broadcast %427 : vector<1x1xf32> to vector<1x32xf32>
      %429 = arith.mulf %424, %428 : vector<1x32xf32>
      %430 = arith.mulf %429, %410 : vector<1x32xf32>
      %431 = arith.addf %430, %411 : vector<1x32xf32>
      %c0_205 = arith.constant 0 : index
      %c32_206 = arith.constant 32 : index
      %432 = vector.load %arg10[%c0_205, %c32_206] : memref<32x96xf32, #tpu.memory_space<vmem>>, vector<32x64xf32>
      %cst_207 = arith.constant dense<0.000000e+00> : vector<1x64xf32>
      %433 = tpu.matmul %431, %432, %cst_207 {dimension_numbers = #tpu.dot_dimension_numbers<[1], [0], [0], [1], [0, 0, 1, 1], [], []>} : vector<1x32xf32>, vector<32x64xf32>, vector<1x64xf32> -> vector<1x64xf32>
      %c0_208 = arith.constant 0 : index
      %c32_209 = arith.constant 32 : index
      %434 = vector.load %arg11[%c0_208, %c32_209] : memref<1x96xf32, #tpu.memory_space<vmem>>, vector<1x64xf32>
      %435 = arith.addf %433, %434 : vector<1x64xf32>
      %436 = vector.extract_strided_slice %435 {offsets = [0, 0], sizes = [1, 32], strides = [1, 1]} : vector<1x64xf32> to vector<1x32xf32>
      %437 = arith.index_cast %407 : i32 to index
      %c0_210 = arith.constant 0 : index
      %438 = vector.load %arg34[%437, %c0_210] : memref<8x32xf32, #tpu.memory_space<vmem>>, vector<1x32xf32>
      tpu.vector_store %arg34[%437, %c0_210], %436 {strides = array<i32>} : memref<8x32xf32, #tpu.memory_space<vmem>>, vector<1x32xf32>,
      %439 = vector.extract_strided_slice %435 {offsets = [0, 32], sizes = [1, 32], strides = [1, 1]} : vector<1x64xf32> to vector<1x32xf32>
      %440 = arith.index_cast %407 : i32 to index
      %c0_211 = arith.constant 0 : index
      %441 = vector.load %arg35[%440, %c0_211] : memref<8x32xf32, #tpu.memory_space<vmem>>, vector<1x32xf32>
      tpu.vector_store %arg35[%440, %c0_211], %439 {strides = array<i32>} : memref<8x32xf32, #tpu.memory_space<vmem>>, vector<1x32xf32>,
      %442 = arith.index_cast %407 : i32 to index
      %c0_212 = arith.constant 0 : index
      %443 = vector.load %arg2[%442, %c0_212] : memref<8x32xf32, #tpu.memory_space<vmem>>, vector<1x32xf32>
      %c0_213 = arith.constant 0 : index
      %c0_214 = arith.constant 0 : index
      %444 = vector.load %arg6[%c0_213, %c0_214] : memref<1x32xf32, #tpu.memory_space<vmem>>, vector<1x32xf32>
      %c0_215 = arith.constant 0 : index
      %c0_216 = arith.constant 0 : index
      %445 = vector.load %arg7[%c0_215, %c0_216] : memref<1x32xf32, #tpu.memory_space<vmem>>, vector<1x32xf32>
      %cst_217 = arith.constant dense<0.000000e+00> : vector<1xf32>
      %446 = vector.multi_reduction <add>, %443, %cst_217 [1] : vector<1x32xf32> to vector<1xf32>
      %447 = vector.shape_cast %446 : vector<1xf32> to vector<1x1xf32>
      %cst_218 = arith.constant 3.200000e+01 : f32
      %448 = vector.broadcast %cst_218 : f32 to vector<1x1xf32>
      %449 = arith.divf %447, %448 : vector<1x1xf32>
      %450 = vector.broadcast %449 : vector<1x1xf32> to vector<1x32xf32>
      %451 = arith.subf %443, %450 : vector<1x32xf32>
      %452 = arith.mulf %451, %451 : vector<1x32xf32>
      %cst_219 = arith.constant dense<0.000000e+00> : vector<1xf32>
      %453 = vector.multi_reduction <add>, %452, %cst_219 [1] : vector<1x32xf32> to vector<1xf32>
      %454 = vector.shape_cast %453 : vector<1xf32> to vector<1x1xf32>
      %cst_220 = arith.constant 3.200000e+01 : f32
      %455 = vector.broadcast %cst_220 : f32 to vector<1x1xf32>
      %456 = arith.divf %454, %455 : vector<1x1xf32>
      %457 = vector.broadcast %449 : vector<1x1xf32> to vector<1x32xf32>
      %458 = arith.subf %443, %457 : vector<1x32xf32>
      %cst_221 = arith.constant 9.99999974E-6 : f32
      %459 = vector.broadcast %cst_221 : f32 to vector<1x1xf32>
      %460 = arith.addf %456, %459 : vector<1x1xf32>
      %461 = math.rsqrt %460 : vector<1x1xf32>
      %462 = vector.broadcast %461 : vector<1x1xf32> to vector<1x32xf32>
      %463 = arith.mulf %458, %462 : vector<1x32xf32>
      %464 = arith.mulf %463, %444 : vector<1x32xf32>
      %465 = arith.addf %464, %445 : vector<1x32xf32>
      %c0_222 = arith.constant 0 : index
      %c0_223 = arith.constant 0 : index
      %466 = vector.load %arg10[%c0_222, %c0_223] : memref<32x96xf32, #tpu.memory_space<vmem>>, vector<32x32xf32>
      %cst_224 = arith.constant dense<0.000000e+00> : vector<1x32xf32>
      %467 = tpu.matmul %465, %466, %cst_224 {dimension_numbers = #tpu.dot_dimension_numbers<[1], [0], [0], [1], [0, 0, 1, 1], [], []>} : vector<1x32xf32>, vector<32x32xf32>, vector<1x32xf32> -> vector<1x32xf32>
      %c0_225 = arith.constant 0 : index
      %c0_226 = arith.constant 0 : index
      %468 = vector.load %arg11[%c0_225, %c0_226] : memref<1x96xf32, #tpu.memory_space<vmem>>, vector<1x32xf32>
      %469 = arith.addf %467, %468 : vector<1x32xf32>
      %470 = vector.broadcast %407 : i32 to vector<1x8xi32>
      %471 = arith.cmpi sgt, %49, %470 : vector<1x8xi32>
      %cst_227 = arith.constant -1.000000e+30 : f32
      %cst_228 = arith.constant 0.000000e+00 : f32
      %472 = vector.broadcast %cst_227 : f32 to vector<1x8xf32>
      %473 = vector.broadcast %cst_228 : f32 to vector<1x8xf32>
      %474 = arith.select %471, %472, %473 : vector<1x8xi1>, vector<1x8xf32>
      %c0_229 = arith.constant 0 : index
      %c0_230 = arith.constant 0 : index
      %475 = vector.load %arg34[%c0_229, %c0_230] : memref<8x32xf32, #tpu.memory_space<vmem>>, vector<8x32xf32>
      %c0_231 = arith.constant 0 : index
      %c0_232 = arith.constant 0 : index
      %476 = vector.load %arg35[%c0_231, %c0_232] : memref<8x32xf32, #tpu.memory_space<vmem>>, vector<8x32xf32>
      %c0_233 = arith.constant 0 : index
      %c0_234 = arith.constant 0 : index
      %477 = vector.load %arg12[%c0_233, %c0_234] : memref<32x32xf32, #tpu.memory_space<vmem>>, vector<32x32xf32>
      %c0_235 = arith.constant 0 : index
      %c0_236 = arith.constant 0 : index
      %478 = vector.load %arg13[%c0_235, %c0_236] : memref<1x32xf32, #tpu.memory_space<vmem>>, vector<1x32xf32>
      %479 = vector.extract_strided_slice %469 {offsets = [0, 0], sizes = [1, 8], strides = [1, 1]} : vector<1x32xf32> to vector<1x8xf32>
      %480 = vector.extract_strided_slice %475 {offsets = [0, 0], sizes = [8, 8], strides = [1, 1]} : vector<8x32xf32> to vector<8x8xf32>
      %cst_237 = arith.constant dense<0.000000e+00> : vector<1x8xf32>
      %481 = tpu.matmul %479, %480, %cst_237 {dimension_numbers = #tpu.dot_dimension_numbers<[1], [1], [0], [0], [0, 0, 1, 0], [], []>} : vector<1x8xf32>, vector<8x8xf32>, vector<1x8xf32> -> vector<1x8xf32>
      %482 = arith.addf %481, %474 : vector<1x8xf32>
      %cst_238 = arith.constant dense<0xFF800000> : vector<1xf32>
      %483 = vector.multi_reduction <maximumf>, %482, %cst_238 [1] : vector<1x8xf32> to vector<1xf32>
      %484 = vector.shape_cast %483 : vector<1xf32> to vector<1x1xf32>
      %485 = vector.broadcast %484 : vector<1x1xf32> to vector<1x8xf32>
      %486 = arith.subf %482, %485 : vector<1x8xf32>
      %487 = math.exp %486 : vector<1x8xf32>
      %cst_239 = arith.constant dense<0.000000e+00> : vector<1xf32>
      %488 = vector.multi_reduction <add>, %487, %cst_239 [1] : vector<1x8xf32> to vector<1xf32>
      %489 = vector.shape_cast %488 : vector<1xf32> to vector<1x1xf32>
      %490 = tpu.reciprocal %489 : vector<1x1xf32> -> vector<1x1xf32>
      %491 = vector.broadcast %490 : vector<1x1xf32> to vector<1x8xf32>
      %492 = arith.mulf %487, %491 : vector<1x8xf32>
      %493 = vector.extract_strided_slice %476 {offsets = [0, 0], sizes = [8, 8], strides = [1, 1]} : vector<8x32xf32> to vector<8x8xf32>
      %cst_240 = arith.constant dense<0.000000e+00> : vector<1x8xf32>
      %494 = tpu.matmul %492, %493, %cst_240 {dimension_numbers = #tpu.dot_dimension_numbers<[1], [0], [0], [1], [0, 0, 1, 1], [], []>} : vector<1x8xf32>, vector<8x8xf32>, vector<1x8xf32> -> vector<1x8xf32>
      %c0_241 = arith.constant 0 : index
      %c0_242 = arith.constant 0 : index
      %495 = vector.load %arg37[%c0_241, %c0_242] : memref<8x32xf32, #tpu.memory_space<vmem>>, vector<1x8xf32>
      tpu.vector_store %arg37[%c0_241, %c0_242], %494 {strides = array<i32>} : memref<8x32xf32, #tpu.memory_space<vmem>>, vector<1x8xf32>,
      %496 = vector.extract_strided_slice %469 {offsets = [0, 8], sizes = [1, 8], strides = [1, 1]} : vector<1x32xf32> to vector<1x8xf32>
      %497 = vector.extract_strided_slice %475 {offsets = [0, 8], sizes = [8, 8], strides = [1, 1]} : vector<8x32xf32> to vector<8x8xf32>
      %cst_243 = arith.constant dense<0.000000e+00> : vector<1x8xf32>
      %498 = tpu.matmul %496, %497, %cst_243 {dimension_numbers = #tpu.dot_dimension_numbers<[1], [1], [0], [0], [0, 0, 1, 0], [], []>} : vector<1x8xf32>, vector<8x8xf32>, vector<1x8xf32> -> vector<1x8xf32>
      %499 = arith.addf %498, %474 : vector<1x8xf32>
      %cst_244 = arith.constant dense<0xFF800000> : vector<1xf32>
      %500 = vector.multi_reduction <maximumf>, %499, %cst_244 [1] : vector<1x8xf32> to vector<1xf32>
      %501 = vector.shape_cast %500 : vector<1xf32> to vector<1x1xf32>
      %502 = vector.broadcast %501 : vector<1x1xf32> to vector<1x8xf32>
      %503 = arith.subf %499, %502 : vector<1x8xf32>
      %504 = math.exp %503 : vector<1x8xf32>
      %cst_245 = arith.constant dense<0.000000e+00> : vector<1xf32>
      %505 = vector.multi_reduction <add>, %504, %cst_245 [1] : vector<1x8xf32> to vector<1xf32>
      %506 = vector.shape_cast %505 : vector<1xf32> to vector<1x1xf32>
      %507 = tpu.reciprocal %506 : vector<1x1xf32> -> vector<1x1xf32>
      %508 = vector.broadcast %507 : vector<1x1xf32> to vector<1x8xf32>
      %509 = arith.mulf %504, %508 : vector<1x8xf32>
      %510 = vector.extract_strided_slice %476 {offsets = [0, 8], sizes = [8, 8], strides = [1, 1]} : vector<8x32xf32> to vector<8x8xf32>
      %cst_246 = arith.constant dense<0.000000e+00> : vector<1x8xf32>
      %511 = tpu.matmul %509, %510, %cst_246 {dimension_numbers = #tpu.dot_dimension_numbers<[1], [0], [0], [1], [0, 0, 1, 1], [], []>} : vector<1x8xf32>, vector<8x8xf32>, vector<1x8xf32> -> vector<1x8xf32>
      %c0_247 = arith.constant 0 : index
      %c8_248 = arith.constant 8 : index
      %512 = vector.load %arg37[%c0_247, %c8_248] : memref<8x32xf32, #tpu.memory_space<vmem>>, vector<1x8xf32>
      tpu.vector_store %arg37[%c0_247, %c8_248], %511 {strides = array<i32>} : memref<8x32xf32, #tpu.memory_space<vmem>>, vector<1x8xf32>,
      %513 = vector.extract_strided_slice %469 {offsets = [0, 16], sizes = [1, 8], strides = [1, 1]} : vector<1x32xf32> to vector<1x8xf32>
      %514 = vector.extract_strided_slice %475 {offsets = [0, 16], sizes = [8, 8], strides = [1, 1]} : vector<8x32xf32> to vector<8x8xf32>
      %cst_249 = arith.constant dense<0.000000e+00> : vector<1x8xf32>
      %515 = tpu.matmul %513, %514, %cst_249 {dimension_numbers = #tpu.dot_dimension_numbers<[1], [1], [0], [0], [0, 0, 1, 0], [], []>} : vector<1x8xf32>, vector<8x8xf32>, vector<1x8xf32> -> vector<1x8xf32>
      %516 = arith.addf %515, %474 : vector<1x8xf32>
      %cst_250 = arith.constant dense<0xFF800000> : vector<1xf32>
      %517 = vector.multi_reduction <maximumf>, %516, %cst_250 [1] : vector<1x8xf32> to vector<1xf32>
      %518 = vector.shape_cast %517 : vector<1xf32> to vector<1x1xf32>
      %519 = vector.broadcast %518 : vector<1x1xf32> to vector<1x8xf32>
      %520 = arith.subf %516, %519 : vector<1x8xf32>
      %521 = math.exp %520 : vector<1x8xf32>
      %cst_251 = arith.constant dense<0.000000e+00> : vector<1xf32>
      %522 = vector.multi_reduction <add>, %521, %cst_251 [1] : vector<1x8xf32> to vector<1xf32>
      %523 = vector.shape_cast %522 : vector<1xf32> to vector<1x1xf32>
      %524 = tpu.reciprocal %523 : vector<1x1xf32> -> vector<1x1xf32>
      %525 = vector.broadcast %524 : vector<1x1xf32> to vector<1x8xf32>
      %526 = arith.mulf %521, %525 : vector<1x8xf32>
      %527 = vector.extract_strided_slice %476 {offsets = [0, 16], sizes = [8, 8], strides = [1, 1]} : vector<8x32xf32> to vector<8x8xf32>
      %cst_252 = arith.constant dense<0.000000e+00> : vector<1x8xf32>
      %528 = tpu.matmul %526, %527, %cst_252 {dimension_numbers = #tpu.dot_dimension_numbers<[1], [0], [0], [1], [0, 0, 1, 1], [], []>} : vector<1x8xf32>, vector<8x8xf32>, vector<1x8xf32> -> vector<1x8xf32>
      %c0_253 = arith.constant 0 : index
      %c16_254 = arith.constant 16 : index
      %529 = vector.load %arg37[%c0_253, %c16_254] : memref<8x32xf32, #tpu.memory_space<vmem>>, vector<1x8xf32>
      tpu.vector_store %arg37[%c0_253, %c16_254], %528 {strides = array<i32>} : memref<8x32xf32, #tpu.memory_space<vmem>>, vector<1x8xf32>,
      %530 = vector.extract_strided_slice %469 {offsets = [0, 24], sizes = [1, 8], strides = [1, 1]} : vector<1x32xf32> to vector<1x8xf32>
      %531 = vector.extract_strided_slice %475 {offsets = [0, 24], sizes = [8, 8], strides = [1, 1]} : vector<8x32xf32> to vector<8x8xf32>
      %cst_255 = arith.constant dense<0.000000e+00> : vector<1x8xf32>
      %532 = tpu.matmul %530, %531, %cst_255 {dimension_numbers = #tpu.dot_dimension_numbers<[1], [1], [0], [0], [0, 0, 1, 0], [], []>} : vector<1x8xf32>, vector<8x8xf32>, vector<1x8xf32> -> vector<1x8xf32>
      %533 = arith.addf %532, %474 : vector<1x8xf32>
      %cst_256 = arith.constant dense<0xFF800000> : vector<1xf32>
      %534 = vector.multi_reduction <maximumf>, %533, %cst_256 [1] : vector<1x8xf32> to vector<1xf32>
      %535 = vector.shape_cast %534 : vector<1xf32> to vector<1x1xf32>
      %536 = vector.broadcast %535 : vector<1x1xf32> to vector<1x8xf32>
      %537 = arith.subf %533, %536 : vector<1x8xf32>
      %538 = math.exp %537 : vector<1x8xf32>
      %cst_257 = arith.constant dense<0.000000e+00> : vector<1xf32>
      %539 = vector.multi_reduction <add>, %538, %cst_257 [1] : vector<1x8xf32> to vector<1xf32>
      %540 = vector.shape_cast %539 : vector<1xf32> to vector<1x1xf32>
      %541 = tpu.reciprocal %540 : vector<1x1xf32> -> vector<1x1xf32>
      %542 = vector.broadcast %541 : vector<1x1xf32> to vector<1x8xf32>
      %543 = arith.mulf %538, %542 : vector<1x8xf32>
      %544 = vector.extract_strided_slice %476 {offsets = [0, 24], sizes = [8, 8], strides = [1, 1]} : vector<8x32xf32> to vector<8x8xf32>
      %cst_258 = arith.constant dense<0.000000e+00> : vector<1x8xf32>
      %545 = tpu.matmul %543, %544, %cst_258 {dimension_numbers = #tpu.dot_dimension_numbers<[1], [0], [0], [1], [0, 0, 1, 1], [], []>} : vector<1x8xf32>, vector<8x8xf32>, vector<1x8xf32> -> vector<1x8xf32>
      %c0_259 = arith.constant 0 : index
      %c24_260 = arith.constant 24 : index
      %546 = vector.load %arg37[%c0_259, %c24_260] : memref<8x32xf32, #tpu.memory_space<vmem>>, vector<1x8xf32>
      tpu.vector_store %arg37[%c0_259, %c24_260], %545 {strides = array<i32>} : memref<8x32xf32, #tpu.memory_space<vmem>>, vector<1x8xf32>,
      %c0_261 = arith.constant 0 : index
      %c0_262 = arith.constant 0 : index
      %547 = vector.load %arg37[%c0_261, %c0_262] : memref<8x32xf32, #tpu.memory_space<vmem>>, vector<1x32xf32>
      %cst_263 = arith.constant dense<0.000000e+00> : vector<1x32xf32>
      %548 = tpu.matmul %547, %477, %cst_263 {dimension_numbers = #tpu.dot_dimension_numbers<[1], [0], [0], [1], [0, 0, 1, 1], [], []>} : vector<1x32xf32>, vector<32x32xf32>, vector<1x32xf32> -> vector<1x32xf32>
      %549 = arith.addf %548, %478 : vector<1x32xf32>
      %550 = arith.addf %443, %549 : vector<1x32xf32>
      %c0_264 = arith.constant 0 : index
      %c0_265 = arith.constant 0 : index
      %551 = vector.load %arg14[%c0_264, %c0_265] : memref<1x32xf32, #tpu.memory_space<vmem>>, vector<1x32xf32>
      %c0_266 = arith.constant 0 : index
      %c0_267 = arith.constant 0 : index
      %552 = vector.load %arg15[%c0_266, %c0_267] : memref<1x32xf32, #tpu.memory_space<vmem>>, vector<1x32xf32>
      %cst_268 = arith.constant dense<0.000000e+00> : vector<1xf32>
      %553 = vector.multi_reduction <add>, %550, %cst_268 [1] : vector<1x32xf32> to vector<1xf32>
      %554 = vector.shape_cast %553 : vector<1xf32> to vector<1x1xf32>
      %cst_269 = arith.constant 3.200000e+01 : f32
      %555 = vector.broadcast %cst_269 : f32 to vector<1x1xf32>
      %556 = arith.divf %554, %555 : vector<1x1xf32>
      %557 = vector.broadcast %556 : vector<1x1xf32> to vector<1x32xf32>
      %558 = arith.subf %550, %557 : vector<1x32xf32>
      %559 = arith.mulf %558, %558 : vector<1x32xf32>
      %cst_270 = arith.constant dense<0.000000e+00> : vector<1xf32>
      %560 = vector.multi_reduction <add>, %559, %cst_270 [1] : vector<1x32xf32> to vector<1xf32>
      %561 = vector.shape_cast %560 : vector<1xf32> to vector<1x1xf32>
      %cst_271 = arith.constant 3.200000e+01 : f32
      %562 = vector.broadcast %cst_271 : f32 to vector<1x1xf32>
      %563 = arith.divf %561, %562 : vector<1x1xf32>
      %564 = vector.broadcast %556 : vector<1x1xf32> to vector<1x32xf32>
      %565 = arith.subf %550, %564 : vector<1x32xf32>
      %cst_272 = arith.constant 9.99999974E-6 : f32
      %566 = vector.broadcast %cst_272 : f32 to vector<1x1xf32>
      %567 = arith.addf %563, %566 : vector<1x1xf32>
      %568 = math.rsqrt %567 : vector<1x1xf32>
      %569 = vector.broadcast %568 : vector<1x1xf32> to vector<1x32xf32>
      %570 = arith.mulf %565, %569 : vector<1x32xf32>
      %571 = arith.mulf %570, %551 : vector<1x32xf32>
      %572 = arith.addf %571, %552 : vector<1x32xf32>
      %c0_273 = arith.constant 0 : index
      %c0_274 = arith.constant 0 : index
      %573 = vector.load %arg16[%c0_273, %c0_274] : memref<32x32xf32, #tpu.memory_space<vmem>>, vector<32x32xf32>
      %cst_275 = arith.constant dense<0.000000e+00> : vector<1x32xf32>
      %574 = tpu.matmul %572, %573, %cst_275 {dimension_numbers = #tpu.dot_dimension_numbers<[1], [0], [0], [1], [0, 0, 1, 1], [], []>} : vector<1x32xf32>, vector<32x32xf32>, vector<1x32xf32> -> vector<1x32xf32>
      %c0_276 = arith.constant 0 : index
      %c0_277 = arith.constant 0 : index
      %575 = vector.load %arg17[%c0_276, %c0_277] : memref<1x32xf32, #tpu.memory_space<vmem>>, vector<1x32xf32>
      %576 = arith.addf %574, %575 : vector<1x32xf32>
      %c0_278 = arith.constant 0 : index
      %c0_279 = arith.constant 0 : index
      %577 = vector.load %arg20[%c0_278, %c0_279] : memref<32x32xf32, #tpu.memory_space<vmem>>, vector<32x32xf32>
      %c0_280 = arith.constant 0 : index
      %c0_281 = arith.constant 0 : index
      %578 = vector.load %arg21[%c0_280, %c0_281] : memref<1x32xf32, #tpu.memory_space<vmem>>, vector<1x32xf32>
      %579 = vector.extract_strided_slice %576 {offsets = [0, 0], sizes = [1, 8], strides = [1, 1]} : vector<1x32xf32> to vector<1x8xf32>
      %580 = vector.extract_strided_slice %31 {offsets = [0, 0], sizes = [16, 8], strides = [1, 1]} : vector<16x32xf32> to vector<16x8xf32>
      %cst_282 = arith.constant dense<0.000000e+00> : vector<1x16xf32>
      %581 = tpu.matmul %579, %580, %cst_282 {dimension_numbers = #tpu.dot_dimension_numbers<[1], [1], [0], [0], [0, 0, 1, 0], [], []>} : vector<1x8xf32>, vector<16x8xf32>, vector<1x16xf32> -> vector<1x16xf32>
      %cst_283 = arith.constant dense<0xFF800000> : vector<1xf32>
      %582 = vector.multi_reduction <maximumf>, %581, %cst_283 [1] : vector<1x16xf32> to vector<1xf32>
      %583 = vector.shape_cast %582 : vector<1xf32> to vector<1x1xf32>
      %584 = vector.broadcast %583 : vector<1x1xf32> to vector<1x16xf32>
      %585 = arith.subf %581, %584 : vector<1x16xf32>
      %586 = math.exp %585 : vector<1x16xf32>
      %cst_284 = arith.constant dense<0.000000e+00> : vector<1xf32>
      %587 = vector.multi_reduction <add>, %586, %cst_284 [1] : vector<1x16xf32> to vector<1xf32>
      %588 = vector.shape_cast %587 : vector<1xf32> to vector<1x1xf32>
      %589 = tpu.reciprocal %588 : vector<1x1xf32> -> vector<1x1xf32>
      %590 = vector.broadcast %589 : vector<1x1xf32> to vector<1x16xf32>
      %591 = arith.mulf %586, %590 : vector<1x16xf32>
      %592 = vector.extract_strided_slice %32 {offsets = [0, 0], sizes = [16, 8], strides = [1, 1]} : vector<16x32xf32> to vector<16x8xf32>
      %cst_285 = arith.constant dense<0.000000e+00> : vector<1x8xf32>
      %593 = tpu.matmul %591, %592, %cst_285 {dimension_numbers = #tpu.dot_dimension_numbers<[1], [0], [0], [1], [0, 0, 1, 1], [], []>} : vector<1x16xf32>, vector<16x8xf32>, vector<1x8xf32> -> vector<1x8xf32>
      %c0_286 = arith.constant 0 : index
      %c0_287 = arith.constant 0 : index
      %594 = vector.load %arg37[%c0_286, %c0_287] : memref<8x32xf32, #tpu.memory_space<vmem>>, vector<1x8xf32>
      tpu.vector_store %arg37[%c0_286, %c0_287], %593 {strides = array<i32>} : memref<8x32xf32, #tpu.memory_space<vmem>>, vector<1x8xf32>,
      %595 = vector.extract_strided_slice %576 {offsets = [0, 8], sizes = [1, 8], strides = [1, 1]} : vector<1x32xf32> to vector<1x8xf32>
      %596 = vector.extract_strided_slice %31 {offsets = [0, 8], sizes = [16, 8], strides = [1, 1]} : vector<16x32xf32> to vector<16x8xf32>
      %cst_288 = arith.constant dense<0.000000e+00> : vector<1x16xf32>
      %597 = tpu.matmul %595, %596, %cst_288 {dimension_numbers = #tpu.dot_dimension_numbers<[1], [1], [0], [0], [0, 0, 1, 0], [], []>} : vector<1x8xf32>, vector<16x8xf32>, vector<1x16xf32> -> vector<1x16xf32>
      %cst_289 = arith.constant dense<0xFF800000> : vector<1xf32>
      %598 = vector.multi_reduction <maximumf>, %597, %cst_289 [1] : vector<1x16xf32> to vector<1xf32>
      %599 = vector.shape_cast %598 : vector<1xf32> to vector<1x1xf32>
      %600 = vector.broadcast %599 : vector<1x1xf32> to vector<1x16xf32>
      %601 = arith.subf %597, %600 : vector<1x16xf32>
      %602 = math.exp %601 : vector<1x16xf32>
      %cst_290 = arith.constant dense<0.000000e+00> : vector<1xf32>
      %603 = vector.multi_reduction <add>, %602, %cst_290 [1] : vector<1x16xf32> to vector<1xf32>
      %604 = vector.shape_cast %603 : vector<1xf32> to vector<1x1xf32>
      %605 = tpu.reciprocal %604 : vector<1x1xf32> -> vector<1x1xf32>
      %606 = vector.broadcast %605 : vector<1x1xf32> to vector<1x16xf32>
      %607 = arith.mulf %602, %606 : vector<1x16xf32>
      %608 = vector.extract_strided_slice %32 {offsets = [0, 8], sizes = [16, 8], strides = [1, 1]} : vector<16x32xf32> to vector<16x8xf32>
      %cst_291 = arith.constant dense<0.000000e+00> : vector<1x8xf32>
      %609 = tpu.matmul %607, %608, %cst_291 {dimension_numbers = #tpu.dot_dimension_numbers<[1], [0], [0], [1], [0, 0, 1, 1], [], []>} : vector<1x16xf32>, vector<16x8xf32>, vector<1x8xf32> -> vector<1x8xf32>
      %c0_292 = arith.constant 0 : index
      %c8_293 = arith.constant 8 : index
      %610 = vector.load %arg37[%c0_292, %c8_293] : memref<8x32xf32, #tpu.memory_space<vmem>>, vector<1x8xf32>
      tpu.vector_store %arg37[%c0_292, %c8_293], %609 {strides = array<i32>} : memref<8x32xf32, #tpu.memory_space<vmem>>, vector<1x8xf32>,
      %611 = vector.extract_strided_slice %576 {offsets = [0, 16], sizes = [1, 8], strides = [1, 1]} : vector<1x32xf32> to vector<1x8xf32>
      %612 = vector.extract_strided_slice %31 {offsets = [0, 16], sizes = [16, 8], strides = [1, 1]} : vector<16x32xf32> to vector<16x8xf32>
      %cst_294 = arith.constant dense<0.000000e+00> : vector<1x16xf32>
      %613 = tpu.matmul %611, %612, %cst_294 {dimension_numbers = #tpu.dot_dimension_numbers<[1], [1], [0], [0], [0, 0, 1, 0], [], []>} : vector<1x8xf32>, vector<16x8xf32>, vector<1x16xf32> -> vector<1x16xf32>
      %cst_295 = arith.constant dense<0xFF800000> : vector<1xf32>
      %614 = vector.multi_reduction <maximumf>, %613, %cst_295 [1] : vector<1x16xf32> to vector<1xf32>
      %615 = vector.shape_cast %614 : vector<1xf32> to vector<1x1xf32>
      %616 = vector.broadcast %615 : vector<1x1xf32> to vector<1x16xf32>
      %617 = arith.subf %613, %616 : vector<1x16xf32>
      %618 = math.exp %617 : vector<1x16xf32>
      %cst_296 = arith.constant dense<0.000000e+00> : vector<1xf32>
      %619 = vector.multi_reduction <add>, %618, %cst_296 [1] : vector<1x16xf32> to vector<1xf32>
      %620 = vector.shape_cast %619 : vector<1xf32> to vector<1x1xf32>
      %621 = tpu.reciprocal %620 : vector<1x1xf32> -> vector<1x1xf32>
      %622 = vector.broadcast %621 : vector<1x1xf32> to vector<1x16xf32>
      %623 = arith.mulf %618, %622 : vector<1x16xf32>
      %624 = vector.extract_strided_slice %32 {offsets = [0, 16], sizes = [16, 8], strides = [1, 1]} : vector<16x32xf32> to vector<16x8xf32>
      %cst_297 = arith.constant dense<0.000000e+00> : vector<1x8xf32>
      %625 = tpu.matmul %623, %624, %cst_297 {dimension_numbers = #tpu.dot_dimension_numbers<[1], [0], [0], [1], [0, 0, 1, 1], [], []>} : vector<1x16xf32>, vector<16x8xf32>, vector<1x8xf32> -> vector<1x8xf32>
      %c0_298 = arith.constant 0 : index
      %c16_299 = arith.constant 16 : index
      %626 = vector.load %arg37[%c0_298, %c16_299] : memref<8x32xf32, #tpu.memory_space<vmem>>, vector<1x8xf32>
      tpu.vector_store %arg37[%c0_298, %c16_299], %625 {strides = array<i32>} : memref<8x32xf32, #tpu.memory_space<vmem>>, vector<1x8xf32>,
      %627 = vector.extract_strided_slice %576 {offsets = [0, 24], sizes = [1, 8], strides = [1, 1]} : vector<1x32xf32> to vector<1x8xf32>
      %628 = vector.extract_strided_slice %31 {offsets = [0, 24], sizes = [16, 8], strides = [1, 1]} : vector<16x32xf32> to vector<16x8xf32>
      %cst_300 = arith.constant dense<0.000000e+00> : vector<1x16xf32>
      %629 = tpu.matmul %627, %628, %cst_300 {dimension_numbers = #tpu.dot_dimension_numbers<[1], [1], [0], [0], [0, 0, 1, 0], [], []>} : vector<1x8xf32>, vector<16x8xf32>, vector<1x16xf32> -> vector<1x16xf32>
      %cst_301 = arith.constant dense<0xFF800000> : vector<1xf32>
      %630 = vector.multi_reduction <maximumf>, %629, %cst_301 [1] : vector<1x16xf32> to vector<1xf32>
      %631 = vector.shape_cast %630 : vector<1xf32> to vector<1x1xf32>
      %632 = vector.broadcast %631 : vector<1x1xf32> to vector<1x16xf32>
      %633 = arith.subf %629, %632 : vector<1x16xf32>
      %634 = math.exp %633 : vector<1x16xf32>
      %cst_302 = arith.constant dense<0.000000e+00> : vector<1xf32>
      %635 = vector.multi_reduction <add>, %634, %cst_302 [1] : vector<1x16xf32> to vector<1xf32>
      %636 = vector.shape_cast %635 : vector<1xf32> to vector<1x1xf32>
      %637 = tpu.reciprocal %636 : vector<1x1xf32> -> vector<1x1xf32>
      %638 = vector.broadcast %637 : vector<1x1xf32> to vector<1x16xf32>
      %639 = arith.mulf %634, %638 : vector<1x16xf32>
      %640 = vector.extract_strided_slice %32 {offsets = [0, 24], sizes = [16, 8], strides = [1, 1]} : vector<16x32xf32> to vector<16x8xf32>
      %cst_303 = arith.constant dense<0.000000e+00> : vector<1x8xf32>
      %641 = tpu.matmul %639, %640, %cst_303 {dimension_numbers = #tpu.dot_dimension_numbers<[1], [0], [0], [1], [0, 0, 1, 1], [], []>} : vector<1x16xf32>, vector<16x8xf32>, vector<1x8xf32> -> vector<1x8xf32>
      %c0_304 = arith.constant 0 : index
      %c24_305 = arith.constant 24 : index
      %642 = vector.load %arg37[%c0_304, %c24_305] : memref<8x32xf32, #tpu.memory_space<vmem>>, vector<1x8xf32>
      tpu.vector_store %arg37[%c0_304, %c24_305], %641 {strides = array<i32>} : memref<8x32xf32, #tpu.memory_space<vmem>>, vector<1x8xf32>,
      %c0_306 = arith.constant 0 : index
      %c0_307 = arith.constant 0 : index
      %643 = vector.load %arg37[%c0_306, %c0_307] : memref<8x32xf32, #tpu.memory_space<vmem>>, vector<1x32xf32>
      %cst_308 = arith.constant dense<0.000000e+00> : vector<1x32xf32>
      %644 = tpu.matmul %643, %577, %cst_308 {dimension_numbers = #tpu.dot_dimension_numbers<[1], [0], [0], [1], [0, 0, 1, 1], [], []>} : vector<1x32xf32>, vector<32x32xf32>, vector<1x32xf32> -> vector<1x32xf32>
      %645 = arith.addf %644, %578 : vector<1x32xf32>
      %646 = arith.addf %550, %645 : vector<1x32xf32>
      %c0_309 = arith.constant 0 : index
      %c0_310 = arith.constant 0 : index
      %647 = vector.load %arg22[%c0_309, %c0_310] : memref<1x32xf32, #tpu.memory_space<vmem>>, vector<1x32xf32>
      %c0_311 = arith.constant 0 : index
      %c0_312 = arith.constant 0 : index
      %648 = vector.load %arg23[%c0_311, %c0_312] : memref<1x32xf32, #tpu.memory_space<vmem>>, vector<1x32xf32>
      %cst_313 = arith.constant dense<0.000000e+00> : vector<1xf32>
      %649 = vector.multi_reduction <add>, %646, %cst_313 [1] : vector<1x32xf32> to vector<1xf32>
      %650 = vector.shape_cast %649 : vector<1xf32> to vector<1x1xf32>
      %cst_314 = arith.constant 3.200000e+01 : f32
      %651 = vector.broadcast %cst_314 : f32 to vector<1x1xf32>
      %652 = arith.divf %650, %651 : vector<1x1xf32>
      %653 = vector.broadcast %652 : vector<1x1xf32> to vector<1x32xf32>
      %654 = arith.subf %646, %653 : vector<1x32xf32>
      %655 = arith.mulf %654, %654 : vector<1x32xf32>
      %cst_315 = arith.constant dense<0.000000e+00> : vector<1xf32>
      %656 = vector.multi_reduction <add>, %655, %cst_315 [1] : vector<1x32xf32> to vector<1xf32>
      %657 = vector.shape_cast %656 : vector<1xf32> to vector<1x1xf32>
      %cst_316 = arith.constant 3.200000e+01 : f32
      %658 = vector.broadcast %cst_316 : f32 to vector<1x1xf32>
      %659 = arith.divf %657, %658 : vector<1x1xf32>
      %660 = vector.broadcast %652 : vector<1x1xf32> to vector<1x32xf32>
      %661 = arith.subf %646, %660 : vector<1x32xf32>
      %cst_317 = arith.constant 9.99999974E-6 : f32
      %662 = vector.broadcast %cst_317 : f32 to vector<1x1xf32>
      %663 = arith.addf %659, %662 : vector<1x1xf32>
      %664 = math.rsqrt %663 : vector<1x1xf32>
      %665 = vector.broadcast %664 : vector<1x1xf32> to vector<1x32xf32>
      %666 = arith.mulf %661, %665 : vector<1x32xf32>
      %667 = arith.mulf %666, %647 : vector<1x32xf32>
      %668 = arith.addf %667, %648 : vector<1x32xf32>
      %c0_318 = arith.constant 0 : index
      %c0_319 = arith.constant 0 : index
      %669 = vector.load %arg24[%c0_318, %c0_319] : memref<32x128xf32, #tpu.memory_space<vmem>>, vector<32x128xf32>
      %cst_320 = arith.constant dense<0.000000e+00> : vector<1x128xf32>
      %670 = tpu.matmul %668, %669, %cst_320 {dimension_numbers = #tpu.dot_dimension_numbers<[1], [0], [0], [1], [0, 0, 1, 1], [], []>} : vector<1x32xf32>, vector<32x128xf32>, vector<1x128xf32> -> vector<1x128xf32>
      %c0_321 = arith.constant 0 : index
      %c0_322 = arith.constant 0 : index
      %671 = vector.load %arg25[%c0_321, %c0_322] : memref<1x128xf32, #tpu.memory_space<vmem>>, vector<1x128xf32>
      %672 = arith.addf %670, %671 : vector<1x128xf32>
      %cst_323 = arith.constant 5.000000e-01 : f32
      %673 = vector.broadcast %cst_323 : f32 to vector<1x128xf32>
      %674 = arith.mulf %673, %672 : vector<1x128xf32>
      %cst_324 = arith.constant 0.707106769 : f32
      %675 = vector.broadcast %cst_324 : f32 to vector<1x128xf32>
      %676 = arith.mulf %672, %675 : vector<1x128xf32>
      %cst_325 = arith.constant 0.000000e+00 : f32
      %677 = vector.broadcast %cst_325 : f32 to vector<1x128xf32>
      %678 = arith.cmpf oge, %676, %677 : vector<1x128xf32>
      %cst_326 = arith.constant 1.000000e+00 : f32
      %cst_327 = arith.constant -1.000000e+00 : f32
      %679 = vector.broadcast %cst_326 : f32 to vector<1x128xf32>
      %680 = vector.broadcast %cst_327 : f32 to vector<1x128xf32>
      %681 = arith.select %678, %679, %680 : vector<1x128xi1>, vector<1x128xf32>
      %682 = math.absf %676 : vector<1x128xf32>
      %cst_328 = arith.constant 0.327591091 : f32
      %683 = vector.broadcast %cst_328 : f32 to vector<1x128xf32>
      %684 = arith.mulf %683, %682 : vector<1x128xf32>
      %cst_329 = arith.constant 1.000000e+00 : f32
      %685 = vector.broadcast %cst_329 : f32 to vector<1x128xf32>
      %686 = arith.addf %685, %684 : vector<1x128xf32>
      %687 = tpu.reciprocal %686 : vector<1x128xf32> -> vector<1x128xf32>
      %cst_330 = arith.constant 1.06140542 : f32
      %688 = vector.broadcast %cst_330 : f32 to vector<1x128xf32>
      %689 = arith.mulf %688, %687 : vector<1x128xf32>
      %cst_331 = arith.constant -1.45315206 : f32
      %690 = vector.broadcast %cst_331 : f32 to vector<1x128xf32>
      %691 = arith.addf %689, %690 : vector<1x128xf32>
      %692 = arith.mulf %691, %687 : vector<1x128xf32>
      %cst_332 = arith.constant 1.42141378 : f32
      %693 = vector.broadcast %cst_332 : f32 to vector<1x128xf32>
      %694 = arith.addf %692, %693 : vector<1x128xf32>
      %695 = arith.mulf %694, %687 : vector<1x128xf32>
      %cst_333 = arith.constant -0.284496725 : f32
      %696 = vector.broadcast %cst_333 : f32 to vector<1x128xf32>
      %697 = arith.addf %695, %696 : vector<1x128xf32>
      %698 = arith.mulf %697, %687 : vector<1x128xf32>
      %cst_334 = arith.constant 0.254829586 : f32
      %699 = vector.broadcast %cst_334 : f32 to vector<1x128xf32>
      %700 = arith.addf %698, %699 : vector<1x128xf32>
      %701 = arith.mulf %700, %687 : vector<1x128xf32>
      %cst_335 = arith.constant 0.000000e+00 : f32
      %702 = vector.broadcast %cst_335 : f32 to vector<1x128xf32>
      %703 = arith.subf %702, %682 : vector<1x128xf32>
      %704 = arith.mulf %703, %682 : vector<1x128xf32>
      %705 = math.exp %704 : vector<1x128xf32>
      %706 = arith.mulf %701, %705 : vector<1x128xf32>
      %cst_336 = arith.constant 1.000000e+00 : f32
      %707 = vector.broadcast %cst_336 : f32 to vector<1x128xf32>
      %708 = arith.subf %707, %706 : vector<1x128xf32>
      %709 = arith.mulf %681, %708 : vector<1x128xf32>
      %cst_337 = arith.constant 1.000000e+00 : f32
      %710 = vector.broadcast %cst_337 : f32 to vector<1x128xf32>
      %711 = arith.addf %710, %709 : vector<1x128xf32>
      %712 = arith.mulf %674, %711 : vector<1x128xf32>
      %c0_338 = arith.constant 0 : index
      %c0_339 = arith.constant 0 : index
      %713 = vector.load %arg26[%c0_338, %c0_339] : memref<128x32xf32, #tpu.memory_space<vmem>>, vector<128x32xf32>
      %cst_340 = arith.constant dense<0.000000e+00> : vector<1x32xf32>
      %714 = tpu.matmul %712, %713, %cst_340 {dimension_numbers = #tpu.dot_dimension_numbers<[1], [0], [0], [1], [0, 0, 1, 1], [], []>} : vector<1x128xf32>, vector<128x32xf32>, vector<1x32xf32> -> vector<1x32xf32>
      %715 = arith.addf %646, %714 : vector<1x32xf32>
      %c0_341 = arith.constant 0 : index
      %c0_342 = arith.constant 0 : index
      %716 = vector.load %arg27[%c0_341, %c0_342] : memref<1x32xf32, #tpu.memory_space<vmem>>, vector<1x32xf32>
      %717 = arith.addf %715, %716 : vector<1x32xf32>
      %c0_343 = arith.constant 0 : index
      %c0_344 = arith.constant 0 : index
      %718 = vector.load %arg28[%c0_343, %c0_344] : memref<1x32xf32, #tpu.memory_space<vmem>>, vector<1x32xf32>
      %c0_345 = arith.constant 0 : index
      %c0_346 = arith.constant 0 : index
      %719 = vector.load %arg29[%c0_345, %c0_346] : memref<1x32xf32, #tpu.memory_space<vmem>>, vector<1x32xf32>
      %cst_347 = arith.constant dense<0.000000e+00> : vector<1xf32>
      %720 = vector.multi_reduction <add>, %717, %cst_347 [1] : vector<1x32xf32> to vector<1xf32>
      %721 = vector.shape_cast %720 : vector<1xf32> to vector<1x1xf32>
      %cst_348 = arith.constant 3.200000e+01 : f32
      %722 = vector.broadcast %cst_348 : f32 to vector<1x1xf32>
      %723 = arith.divf %721, %722 : vector<1x1xf32>
      %724 = vector.broadcast %723 : vector<1x1xf32> to vector<1x32xf32>
      %725 = arith.subf %717, %724 : vector<1x32xf32>
      %726 = arith.mulf %725, %725 : vector<1x32xf32>
      %cst_349 = arith.constant dense<0.000000e+00> : vector<1xf32>
      %727 = vector.multi_reduction <add>, %726, %cst_349 [1] : vector<1x32xf32> to vector<1xf32>
      %728 = vector.shape_cast %727 : vector<1xf32> to vector<1x1xf32>
      %cst_350 = arith.constant 3.200000e+01 : f32
      %729 = vector.broadcast %cst_350 : f32 to vector<1x1xf32>
      %730 = arith.divf %728, %729 : vector<1x1xf32>
      %731 = vector.broadcast %723 : vector<1x1xf32> to vector<1x32xf32>
      %732 = arith.subf %717, %731 : vector<1x32xf32>
      %cst_351 = arith.constant 9.99999974E-6 : f32
      %733 = vector.broadcast %cst_351 : f32 to vector<1x1xf32>
      %734 = arith.addf %730, %733 : vector<1x1xf32>
      %735 = math.rsqrt %734 : vector<1x1xf32>
      %736 = vector.broadcast %735 : vector<1x1xf32> to vector<1x32xf32>
      %737 = arith.mulf %732, %736 : vector<1x32xf32>
      %738 = arith.mulf %737, %718 : vector<1x32xf32>
      %739 = arith.addf %738, %719 : vector<1x32xf32>
      %c0_352 = arith.constant 0 : index
      %c0_353 = arith.constant 0 : index
      %740 = vector.load %arg30[%c0_352, %c0_353] : memref<32x128xf32, #tpu.memory_space<vmem>>, vector<32x128xf32>
      %cst_354 = arith.constant dense<0.000000e+00> : vector<1x128xf32>
      %741 = tpu.matmul %739, %740, %cst_354 {dimension_numbers = #tpu.dot_dimension_numbers<[1], [0], [0], [1], [0, 0, 1, 1], [], []>} : vector<1x32xf32>, vector<32x128xf32>, vector<1x128xf32> -> vector<1x128xf32>
      %c0_355 = arith.constant 0 : index
      %c0_356 = arith.constant 0 : index
      %742 = vector.load %arg31[%c0_355, %c0_356] : memref<1x128xf32, #tpu.memory_space<vmem>>, vector<1x128xf32>
      %743 = arith.addf %741, %742 : vector<1x128xf32>
      %744 = tpu.iota {dimensions = array<i32: 1>} : vector<1x128xi32>
      %c21_i32_357 = arith.constant 21 : i32
      %745 = vector.broadcast %c21_i32_357 : i32 to vector<1x128xi32>
      %746 = arith.cmpi slt, %744, %745 : vector<1x128xi32>
      %cst_358 = arith.constant 0xFF800000 : f32
      %747 = vector.broadcast %cst_358 : f32 to vector<1x128xf32>
      %748 = arith.select %746, %743, %747 : vector<1x128xi1>, vector<1x128xf32>
      %cst_359 = arith.constant dense<0xFF800000> : vector<1xf32>
      %749 = vector.multi_reduction <maximumf>, %748, %cst_359 [1] : vector<1x128xf32> to vector<1xf32>
      %750 = vector.shape_cast %749 : vector<1xf32> to vector<1x1xf32>
      %751 = vector.broadcast %750 : vector<1x1xf32> to vector<1x128xf32>
      %752 = arith.cmpf oeq, %743, %751 : vector<1x128xf32>
      %753 = arith.andi %746, %752 : vector<1x128xi1>
      %c1073741824_i32 = arith.constant 1073741824 : i32
      %754 = vector.broadcast %c1073741824_i32 : i32 to vector<1x128xi32>
      %755 = arith.select %753, %744, %754 : vector<1x128xi1>, vector<1x128xi32>
      %cst_360 = arith.constant dense<2147483647> : vector<1xi32>
      %756 = vector.multi_reduction <minsi>, %755, %cst_360 [1] : vector<1x128xi32> to vector<1xi32>
      %757 = vector.shape_cast %756 : vector<1xi32> to vector<1x1xi32>
      %758 = vector.broadcast %757 : vector<1x1xi32> to vector<1x23xi32>
      %759 = arith.cmpi eq, %41, %758 : vector<1x23xi32>
      %760 = arith.extui %759 : vector<1x23xi1> to vector<1x23xi32>
      %761 = arith.sitofp %760 : vector<1x23xi32> to vector<1x23xf32>
      %c0_361 = arith.constant 0 : index
      %c0_362 = arith.constant 0 : index
      %762 = vector.load %arg3[%c0_361, %c0_362] : memref<23x32xf32, #tpu.memory_space<vmem>>, vector<23x32xf32>
      %cst_363 = arith.constant dense<0.000000e+00> : vector<1x32xf32>
      %763 = tpu.matmul %761, %762, %cst_363 {dimension_numbers = #tpu.dot_dimension_numbers<[1], [0], [0], [1], [0, 0, 1, 1], [], []>} : vector<1x23xf32>, vector<23x32xf32>, vector<1x32xf32> -> vector<1x32xf32>
      %764 = arith.addf %443, %763 : vector<1x32xf32>
      %c1_i32_364 = arith.constant 1 : i32
      %765 = arith.addi %407, %c1_i32_364 : i32
      %766 = arith.index_cast %765 : i32 to index
      %c0_365 = arith.constant 0 : index
      %767 = vector.load %arg33[%766, %c0_365] : memref<8x32xf32, #tpu.memory_space<vmem>>, vector<1x32xf32>
      tpu.vector_store %arg33[%766, %c0_365], %764 {strides = array<i32>} : memref<8x32xf32, #tpu.memory_space<vmem>>, vector<1x32xf32>,
      %c0_i32_366 = arith.constant 0 : i32
      %768 = vector.broadcast %c0_i32_366 : i32 to vector<1x1xi32>
      %769 = arith.cmpi eq, %757, %768 : vector<1x1xi32>
      %cst_367 = arith.constant -1.000000e+30 : f32
      %cst_368 = arith.constant 0.000000e+00 : f32
      %770 = vector.broadcast %cst_367 : f32 to vector<1x1xf32>
      %771 = vector.broadcast %cst_368 : f32 to vector<1x1xf32>
      %772 = arith.select %769, %770, %771 : vector<1x1xi1>, vector<1x1xf32>
      %c0_369 = arith.constant 0 : index
      %c0_370 = arith.constant 0 : index
      %773 = vector.load %arg36[%c0_369, %c0_370] : memref<1x8xf32, #tpu.memory_space<vmem>>, vector<1x8xf32>
      %c1_i32_371 = arith.constant 1 : i32
      %774 = arith.addi %407, %c1_i32_371 : i32
      %775 = vector.broadcast %774 : i32 to vector<1x8xi32>
      %776 = arith.cmpi sge, %49, %775 : vector<1x8xi32>
      %cst_372 = arith.constant 0.000000e+00 : f32
      %777 = vector.shape_cast %772 : vector<1x1xf32> to vector<1x1xf32>
      %778 = vector.broadcast %777 : vector<1x1xf32> to vector<1x8xf32>
      %779 = vector.broadcast %cst_372 : f32 to vector<1x8xf32>
      %780 = arith.select %776, %778, %779 : vector<1x8xi1>, vector<1x8xf32>
      %781 = arith.minimumf %773, %780 : vector<1x8xf32>
      %c0_373 = arith.constant 0 : index
      %c0_374 = arith.constant 0 : index
      %782 = vector.load %arg36[%c0_373, %c0_374] : memref<1x8xf32, #tpu.memory_space<vmem>>, vector<1x8xf32>
      tpu.vector_store %arg36[%c0_373, %c0_374], %781 {strides = array<i32>} : memref<1x8xf32, #tpu.memory_space<vmem>>, vector<1x8xf32>,
    }
    %c7_i32_32 = arith.constant 7 : i32
    %c0_33 = arith.constant 0 : index
    %c0_34 = arith.constant 0 : index
    %51 = vector.load %arg33[%c0_33, %c0_34] : memref<8x32xf32, #tpu.memory_space<vmem>>, vector<8x32xf32>
    %c0_35 = arith.constant 0 : index
    %c0_36 = arith.constant 0 : index
    %52 = vector.load %arg8[%c0_35, %c0_36] : memref<1x32xf32, #tpu.memory_space<vmem>>, vector<1x32xf32>
    %c0_37 = arith.constant 0 : index
    %c0_38 = arith.constant 0 : index
    %53 = vector.load %arg9[%c0_37, %c0_38] : memref<1x32xf32, #tpu.memory_space<vmem>>, vector<1x32xf32>
    %cst_39 = arith.constant dense<0.000000e+00> : vector<8xf32>
    %54 = vector.multi_reduction <add>, %51, %cst_39 [1] : vector<8x32xf32> to vector<8xf32>
    %55 = vector.shape_cast %54 : vector<8xf32> to vector<8x1xf32>
    %cst_40 = arith.constant 3.200000e+01 : f32
    %56 = vector.broadcast %cst_40 : f32 to vector<8x1xf32>
    %57 = arith.divf %55, %56 : vector<8x1xf32>
    %58 = vector.broadcast %57 : vector<8x1xf32> to vector<8x32xf32>
    %59 = arith.subf %51, %58 : vector<8x32xf32>
    %60 = arith.mulf %59, %59 : vector<8x32xf32>
    %cst_41 = arith.constant dense<0.000000e+00> : vector<8xf32>
    %61 = vector.multi_reduction <add>, %60, %cst_41 [1] : vector<8x32xf32> to vector<8xf32>
    %62 = vector.shape_cast %61 : vector<8xf32> to vector<8x1xf32>
    %cst_42 = arith.constant 3.200000e+01 : f32
    %63 = vector.broadcast %cst_42 : f32 to vector<8x1xf32>
    %64 = arith.divf %62, %63 : vector<8x1xf32>
    %65 = vector.broadcast %57 : vector<8x1xf32> to vector<8x32xf32>
    %66 = arith.subf %51, %65 : vector<8x32xf32>
    %cst_43 = arith.constant 9.99999974E-6 : f32
    %67 = vector.broadcast %cst_43 : f32 to vector<8x1xf32>
    %68 = arith.addf %64, %67 : vector<8x1xf32>
    %69 = math.rsqrt %68 : vector<8x1xf32>
    %70 = vector.broadcast %69 : vector<8x1xf32> to vector<8x32xf32>
    %71 = arith.mulf %66, %70 : vector<8x32xf32>
    %72 = vector.broadcast %52 : vector<1x32xf32> to vector<8x32xf32>
    %73 = arith.mulf %71, %72 : vector<8x32xf32>
    %74 = vector.broadcast %53 : vector<1x32xf32> to vector<8x32xf32>
    %75 = arith.addf %73, %74 : vector<8x32xf32>
    %c0_44 = arith.constant 0 : index
    %c32 = arith.constant 32 : index
    %76 = vector.load %arg10[%c0_44, %c32] : memref<32x96xf32, #tpu.memory_space<vmem>>, vector<32x64xf32>
    %cst_45 = arith.constant dense<0.000000e+00> : vector<8x64xf32>
    %77 = tpu.matmul %75, %76, %cst_45 {dimension_numbers = #tpu.dot_dimension_numbers<[1], [0], [0], [1], [0, 0, 1, 1], [], []>} : vector<8x32xf32>, vector<32x64xf32>, vector<8x64xf32> -> vector<8x64xf32>
    %c0_46 = arith.constant 0 : index
    %c32_47 = arith.constant 32 : index
    %78 = vector.load %arg11[%c0_46, %c32_47] : memref<1x96xf32, #tpu.memory_space<vmem>>, vector<1x64xf32>
    %79 = vector.broadcast %78 : vector<1x64xf32> to vector<8x64xf32>
    %80 = arith.addf %77, %79 : vector<8x64xf32>
    %c0_48 = arith.constant 0 : index
    %c0_49 = arith.constant 0 : index
    %81 = vector.load %arg2[%c0_48, %c0_49] : memref<8x32xf32, #tpu.memory_space<vmem>>, vector<8x32xf32>
    %c0_50 = arith.constant 0 : index
    %c0_51 = arith.constant 0 : index
    %82 = vector.load %arg6[%c0_50, %c0_51] : memref<1x32xf32, #tpu.memory_space<vmem>>, vector<1x32xf32>
    %c0_52 = arith.constant 0 : index
    %c0_53 = arith.constant 0 : index
    %83 = vector.load %arg7[%c0_52, %c0_53] : memref<1x32xf32, #tpu.memory_space<vmem>>, vector<1x32xf32>
    %cst_54 = arith.constant dense<0.000000e+00> : vector<8xf32>
    %84 = vector.multi_reduction <add>, %81, %cst_54 [1] : vector<8x32xf32> to vector<8xf32>
    %85 = vector.shape_cast %84 : vector<8xf32> to vector<8x1xf32>
    %cst_55 = arith.constant 3.200000e+01 : f32
    %86 = vector.broadcast %cst_55 : f32 to vector<8x1xf32>
    %87 = arith.divf %85, %86 : vector<8x1xf32>
    %88 = vector.broadcast %87 : vector<8x1xf32> to vector<8x32xf32>
    %89 = arith.subf %81, %88 : vector<8x32xf32>
    %90 = arith.mulf %89, %89 : vector<8x32xf32>
    %cst_56 = arith.constant dense<0.000000e+00> : vector<8xf32>
    %91 = vector.multi_reduction <add>, %90, %cst_56 [1] : vector<8x32xf32> to vector<8xf32>
    %92 = vector.shape_cast %91 : vector<8xf32> to vector<8x1xf32>
    %cst_57 = arith.constant 3.200000e+01 : f32
    %93 = vector.broadcast %cst_57 : f32 to vector<8x1xf32>
    %94 = arith.divf %92, %93 : vector<8x1xf32>
    %95 = vector.broadcast %87 : vector<8x1xf32> to vector<8x32xf32>
    %96 = arith.subf %81, %95 : vector<8x32xf32>
    %cst_58 = arith.constant 9.99999974E-6 : f32
    %97 = vector.broadcast %cst_58 : f32 to vector<8x1xf32>
    %98 = arith.addf %94, %97 : vector<8x1xf32>
    %99 = math.rsqrt %98 : vector<8x1xf32>
    %100 = vector.broadcast %99 : vector<8x1xf32> to vector<8x32xf32>
    %101 = arith.mulf %96, %100 : vector<8x32xf32>
    %102 = vector.broadcast %82 : vector<1x32xf32> to vector<8x32xf32>
    %103 = arith.mulf %101, %102 : vector<8x32xf32>
    %104 = vector.broadcast %83 : vector<1x32xf32> to vector<8x32xf32>
    %105 = arith.addf %103, %104 : vector<8x32xf32>
    %c0_59 = arith.constant 0 : index
    %c0_60 = arith.constant 0 : index
    %106 = vector.load %arg10[%c0_59, %c0_60] : memref<32x96xf32, #tpu.memory_space<vmem>>, vector<32x32xf32>
    %cst_61 = arith.constant dense<0.000000e+00> : vector<8x32xf32>
    %107 = tpu.matmul %105, %106, %cst_61 {dimension_numbers = #tpu.dot_dimension_numbers<[1], [0], [0], [1], [0, 0, 1, 1], [], []>} : vector<8x32xf32>, vector<32x32xf32>, vector<8x32xf32> -> vector<8x32xf32>
    %c0_62 = arith.constant 0 : index
    %c0_63 = arith.constant 0 : index
    %108 = vector.load %arg11[%c0_62, %c0_63] : memref<1x96xf32, #tpu.memory_space<vmem>>, vector<1x32xf32>
    %109 = vector.broadcast %108 : vector<1x32xf32> to vector<8x32xf32>
    %110 = arith.addf %107, %109 : vector<8x32xf32>
    %111 = tpu.iota {dimensions = array<i32: 0>} : vector<8x8xi32>
    %112 = tpu.iota {dimensions = array<i32: 1>} : vector<8x8xi32>
    %c1_i32_64 = arith.constant 1 : i32
    %113 = vector.broadcast %c1_i32_64 : i32 to vector<8x8xi32>
    %114 = arith.addi %111, %113 : vector<8x8xi32>
    %115 = arith.cmpi eq, %112, %114 : vector<8x8xi32>
    %cst_65 = arith.constant -1.000000e+30 : f32
    %cst_66 = arith.constant 0.000000e+00 : f32
    %116 = vector.broadcast %cst_65 : f32 to vector<8x8xf32>
    %117 = vector.broadcast %cst_66 : f32 to vector<8x8xf32>
    %118 = arith.select %115, %116, %117 : vector<8x8xi1>, vector<8x8xf32>
    %c0_67 = arith.constant 0 : index
    %c0_68 = arith.constant 0 : index
    %119 = vector.load %arg36[%c0_67, %c0_68] : memref<1x8xf32, #tpu.memory_space<vmem>>, vector<1x8xf32>
    %120 = vector.broadcast %119 : vector<1x8xf32> to vector<8x8xf32>
    %121 = arith.addf %118, %120 : vector<8x8xf32>
    %122 = vector.extract_strided_slice %80 {offsets = [0, 0], sizes = [8, 32], strides = [1, 1]} : vector<8x64xf32> to vector<8x32xf32>
    %123 = vector.extract_strided_slice %80 {offsets = [0, 32], sizes = [8, 32], strides = [1, 1]} : vector<8x64xf32> to vector<8x32xf32>
    %c0_69 = arith.constant 0 : index
    %c0_70 = arith.constant 0 : index
    %124 = vector.load %arg12[%c0_69, %c0_70] : memref<32x32xf32, #tpu.memory_space<vmem>>, vector<32x32xf32>
    %c0_71 = arith.constant 0 : index
    %c0_72 = arith.constant 0 : index
    %125 = vector.load %arg13[%c0_71, %c0_72] : memref<1x32xf32, #tpu.memory_space<vmem>>, vector<1x32xf32>
    %126 = vector.extract_strided_slice %110 {offsets = [0, 0], sizes = [8, 8], strides = [1, 1]} : vector<8x32xf32> to vector<8x8xf32>
    %127 = vector.extract_strided_slice %122 {offsets = [0, 0], sizes = [8, 8], strides = [1, 1]} : vector<8x32xf32> to vector<8x8xf32>
    %cst_73 = arith.constant dense<0.000000e+00> : vector<8x8xf32>
    %128 = tpu.matmul %126, %127, %cst_73 {dimension_numbers = #tpu.dot_dimension_numbers<[1], [1], [0], [0], [0, 0, 1, 0], [], []>} : vector<8x8xf32>, vector<8x8xf32>, vector<8x8xf32> -> vector<8x8xf32>
    %129 = arith.addf %128, %121 : vector<8x8xf32>
    %cst_74 = arith.constant dense<0xFF800000> : vector<8xf32>
    %130 = vector.multi_reduction <maximumf>, %129, %cst_74 [1] : vector<8x8xf32> to vector<8xf32>
    %131 = vector.shape_cast %130 : vector<8xf32> to vector<8x1xf32>
    %132 = vector.broadcast %131 : vector<8x1xf32> to vector<8x8xf32>
    %133 = arith.subf %129, %132 : vector<8x8xf32>
    %134 = math.exp %133 : vector<8x8xf32>
    %cst_75 = arith.constant dense<0.000000e+00> : vector<8xf32>
    %135 = vector.multi_reduction <add>, %134, %cst_75 [1] : vector<8x8xf32> to vector<8xf32>
    %136 = vector.shape_cast %135 : vector<8xf32> to vector<8x1xf32>
    %137 = tpu.reciprocal %136 : vector<8x1xf32> -> vector<8x1xf32>
    %138 = vector.broadcast %137 : vector<8x1xf32> to vector<8x8xf32>
    %139 = arith.mulf %134, %138 : vector<8x8xf32>
    %140 = vector.extract_strided_slice %123 {offsets = [0, 0], sizes = [8, 8], strides = [1, 1]} : vector<8x32xf32> to vector<8x8xf32>
    %cst_76 = arith.constant dense<0.000000e+00> : vector<8x8xf32>
    %141 = tpu.matmul %139, %140, %cst_76 {dimension_numbers = #tpu.dot_dimension_numbers<[1], [0], [0], [1], [0, 0, 1, 1], [], []>} : vector<8x8xf32>, vector<8x8xf32>, vector<8x8xf32> -> vector<8x8xf32>
    %c0_77 = arith.constant 0 : index
    %c0_78 = arith.constant 0 : index
    %142 = vector.load %arg37[%c0_77, %c0_78] : memref<8x32xf32, #tpu.memory_space<vmem>>, vector<8x8xf32>
    tpu.vector_store %arg37[%c0_77, %c0_78], %141 {strides = array<i32>} : memref<8x32xf32, #tpu.memory_space<vmem>>, vector<8x8xf32>,
    %143 = vector.extract_strided_slice %110 {offsets = [0, 8], sizes = [8, 8], strides = [1, 1]} : vector<8x32xf32> to vector<8x8xf32>
    %144 = vector.extract_strided_slice %122 {offsets = [0, 8], sizes = [8, 8], strides = [1, 1]} : vector<8x32xf32> to vector<8x8xf32>
    %cst_79 = arith.constant dense<0.000000e+00> : vector<8x8xf32>
    %145 = tpu.matmul %143, %144, %cst_79 {dimension_numbers = #tpu.dot_dimension_numbers<[1], [1], [0], [0], [0, 0, 1, 0], [], []>} : vector<8x8xf32>, vector<8x8xf32>, vector<8x8xf32> -> vector<8x8xf32>
    %146 = arith.addf %145, %121 : vector<8x8xf32>
    %cst_80 = arith.constant dense<0xFF800000> : vector<8xf32>
    %147 = vector.multi_reduction <maximumf>, %146, %cst_80 [1] : vector<8x8xf32> to vector<8xf32>
    %148 = vector.shape_cast %147 : vector<8xf32> to vector<8x1xf32>
    %149 = vector.broadcast %148 : vector<8x1xf32> to vector<8x8xf32>
    %150 = arith.subf %146, %149 : vector<8x8xf32>
    %151 = math.exp %150 : vector<8x8xf32>
    %cst_81 = arith.constant dense<0.000000e+00> : vector<8xf32>
    %152 = vector.multi_reduction <add>, %151, %cst_81 [1] : vector<8x8xf32> to vector<8xf32>
    %153 = vector.shape_cast %152 : vector<8xf32> to vector<8x1xf32>
    %154 = tpu.reciprocal %153 : vector<8x1xf32> -> vector<8x1xf32>
    %155 = vector.broadcast %154 : vector<8x1xf32> to vector<8x8xf32>
    %156 = arith.mulf %151, %155 : vector<8x8xf32>
    %157 = vector.extract_strided_slice %123 {offsets = [0, 8], sizes = [8, 8], strides = [1, 1]} : vector<8x32xf32> to vector<8x8xf32>
    %cst_82 = arith.constant dense<0.000000e+00> : vector<8x8xf32>
    %158 = tpu.matmul %156, %157, %cst_82 {dimension_numbers = #tpu.dot_dimension_numbers<[1], [0], [0], [1], [0, 0, 1, 1], [], []>} : vector<8x8xf32>, vector<8x8xf32>, vector<8x8xf32> -> vector<8x8xf32>
    %c0_83 = arith.constant 0 : index
    %c8 = arith.constant 8 : index
    %159 = vector.load %arg37[%c0_83, %c8] : memref<8x32xf32, #tpu.memory_space<vmem>>, vector<8x8xf32>
    tpu.vector_store %arg37[%c0_83, %c8], %158 {strides = array<i32>} : memref<8x32xf32, #tpu.memory_space<vmem>>, vector<8x8xf32>,
    %160 = vector.extract_strided_slice %110 {offsets = [0, 16], sizes = [8, 8], strides = [1, 1]} : vector<8x32xf32> to vector<8x8xf32>
    %161 = vector.extract_strided_slice %122 {offsets = [0, 16], sizes = [8, 8], strides = [1, 1]} : vector<8x32xf32> to vector<8x8xf32>
    %cst_84 = arith.constant dense<0.000000e+00> : vector<8x8xf32>
    %162 = tpu.matmul %160, %161, %cst_84 {dimension_numbers = #tpu.dot_dimension_numbers<[1], [1], [0], [0], [0, 0, 1, 0], [], []>} : vector<8x8xf32>, vector<8x8xf32>, vector<8x8xf32> -> vector<8x8xf32>
    %163 = arith.addf %162, %121 : vector<8x8xf32>
    %cst_85 = arith.constant dense<0xFF800000> : vector<8xf32>
    %164 = vector.multi_reduction <maximumf>, %163, %cst_85 [1] : vector<8x8xf32> to vector<8xf32>
    %165 = vector.shape_cast %164 : vector<8xf32> to vector<8x1xf32>
    %166 = vector.broadcast %165 : vector<8x1xf32> to vector<8x8xf32>
    %167 = arith.subf %163, %166 : vector<8x8xf32>
    %168 = math.exp %167 : vector<8x8xf32>
    %cst_86 = arith.constant dense<0.000000e+00> : vector<8xf32>
    %169 = vector.multi_reduction <add>, %168, %cst_86 [1] : vector<8x8xf32> to vector<8xf32>
    %170 = vector.shape_cast %169 : vector<8xf32> to vector<8x1xf32>
    %171 = tpu.reciprocal %170 : vector<8x1xf32> -> vector<8x1xf32>
    %172 = vector.broadcast %171 : vector<8x1xf32> to vector<8x8xf32>
    %173 = arith.mulf %168, %172 : vector<8x8xf32>
    %174 = vector.extract_strided_slice %123 {offsets = [0, 16], sizes = [8, 8], strides = [1, 1]} : vector<8x32xf32> to vector<8x8xf32>
    %cst_87 = arith.constant dense<0.000000e+00> : vector<8x8xf32>
    %175 = tpu.matmul %173, %174, %cst_87 {dimension_numbers = #tpu.dot_dimension_numbers<[1], [0], [0], [1], [0, 0, 1, 1], [], []>} : vector<8x8xf32>, vector<8x8xf32>, vector<8x8xf32> -> vector<8x8xf32>
    %c0_88 = arith.constant 0 : index
    %c16 = arith.constant 16 : index
    %176 = vector.load %arg37[%c0_88, %c16] : memref<8x32xf32, #tpu.memory_space<vmem>>, vector<8x8xf32>
    tpu.vector_store %arg37[%c0_88, %c16], %175 {strides = array<i32>} : memref<8x32xf32, #tpu.memory_space<vmem>>, vector<8x8xf32>,
    %177 = vector.extract_strided_slice %110 {offsets = [0, 24], sizes = [8, 8], strides = [1, 1]} : vector<8x32xf32> to vector<8x8xf32>
    %178 = vector.extract_strided_slice %122 {offsets = [0, 24], sizes = [8, 8], strides = [1, 1]} : vector<8x32xf32> to vector<8x8xf32>
    %cst_89 = arith.constant dense<0.000000e+00> : vector<8x8xf32>
    %179 = tpu.matmul %177, %178, %cst_89 {dimension_numbers = #tpu.dot_dimension_numbers<[1], [1], [0], [0], [0, 0, 1, 0], [], []>} : vector<8x8xf32>, vector<8x8xf32>, vector<8x8xf32> -> vector<8x8xf32>
    %180 = arith.addf %179, %121 : vector<8x8xf32>
    %cst_90 = arith.constant dense<0xFF800000> : vector<8xf32>
    %181 = vector.multi_reduction <maximumf>, %180, %cst_90 [1] : vector<8x8xf32> to vector<8xf32>
    %182 = vector.shape_cast %181 : vector<8xf32> to vector<8x1xf32>
    %183 = vector.broadcast %182 : vector<8x1xf32> to vector<8x8xf32>
    %184 = arith.subf %180, %183 : vector<8x8xf32>
    %185 = math.exp %184 : vector<8x8xf32>
    %cst_91 = arith.constant dense<0.000000e+00> : vector<8xf32>
    %186 = vector.multi_reduction <add>, %185, %cst_91 [1] : vector<8x8xf32> to vector<8xf32>
    %187 = vector.shape_cast %186 : vector<8xf32> to vector<8x1xf32>
    %188 = tpu.reciprocal %187 : vector<8x1xf32> -> vector<8x1xf32>
    %189 = vector.broadcast %188 : vector<8x1xf32> to vector<8x8xf32>
    %190 = arith.mulf %185, %189 : vector<8x8xf32>
    %191 = vector.extract_strided_slice %123 {offsets = [0, 24], sizes = [8, 8], strides = [1, 1]} : vector<8x32xf32> to vector<8x8xf32>
    %cst_92 = arith.constant dense<0.000000e+00> : vector<8x8xf32>
    %192 = tpu.matmul %190, %191, %cst_92 {dimension_numbers = #tpu.dot_dimension_numbers<[1], [0], [0], [1], [0, 0, 1, 1], [], []>} : vector<8x8xf32>, vector<8x8xf32>, vector<8x8xf32> -> vector<8x8xf32>
    %c0_93 = arith.constant 0 : index
    %c24 = arith.constant 24 : index
    %193 = vector.load %arg37[%c0_93, %c24] : memref<8x32xf32, #tpu.memory_space<vmem>>, vector<8x8xf32>
    tpu.vector_store %arg37[%c0_93, %c24], %192 {strides = array<i32>} : memref<8x32xf32, #tpu.memory_space<vmem>>, vector<8x8xf32>,
    %c0_94 = arith.constant 0 : index
    %c0_95 = arith.constant 0 : index
    %194 = vector.load %arg37[%c0_94, %c0_95] : memref<8x32xf32, #tpu.memory_space<vmem>>, vector<8x32xf32>
    %cst_96 = arith.constant dense<0.000000e+00> : vector<8x32xf32>
    %195 = tpu.matmul %194, %124, %cst_96 {dimension_numbers = #tpu.dot_dimension_numbers<[1], [0], [0], [1], [0, 0, 1, 1], [], []>} : vector<8x32xf32>, vector<32x32xf32>, vector<8x32xf32> -> vector<8x32xf32>
    %196 = vector.broadcast %125 : vector<1x32xf32> to vector<8x32xf32>
    %197 = arith.addf %195, %196 : vector<8x32xf32>
    %198 = arith.addf %81, %197 : vector<8x32xf32>
    %c0_97 = arith.constant 0 : index
    %c0_98 = arith.constant 0 : index
    %199 = vector.load %arg14[%c0_97, %c0_98] : memref<1x32xf32, #tpu.memory_space<vmem>>, vector<1x32xf32>
    %c0_99 = arith.constant 0 : index
    %c0_100 = arith.constant 0 : index
    %200 = vector.load %arg15[%c0_99, %c0_100] : memref<1x32xf32, #tpu.memory_space<vmem>>, vector<1x32xf32>
    %cst_101 = arith.constant dense<0.000000e+00> : vector<8xf32>
    %201 = vector.multi_reduction <add>, %198, %cst_101 [1] : vector<8x32xf32> to vector<8xf32>
    %202 = vector.shape_cast %201 : vector<8xf32> to vector<8x1xf32>
    %cst_102 = arith.constant 3.200000e+01 : f32
    %203 = vector.broadcast %cst_102 : f32 to vector<8x1xf32>
    %204 = arith.divf %202, %203 : vector<8x1xf32>
    %205 = vector.broadcast %204 : vector<8x1xf32> to vector<8x32xf32>
    %206 = arith.subf %198, %205 : vector<8x32xf32>
    %207 = arith.mulf %206, %206 : vector<8x32xf32>
    %cst_103 = arith.constant dense<0.000000e+00> : vector<8xf32>
    %208 = vector.multi_reduction <add>, %207, %cst_103 [1] : vector<8x32xf32> to vector<8xf32>
    %209 = vector.shape_cast %208 : vector<8xf32> to vector<8x1xf32>
    %cst_104 = arith.constant 3.200000e+01 : f32
    %210 = vector.broadcast %cst_104 : f32 to vector<8x1xf32>
    %211 = arith.divf %209, %210 : vector<8x1xf32>
    %212 = vector.broadcast %204 : vector<8x1xf32> to vector<8x32xf32>
    %213 = arith.subf %198, %212 : vector<8x32xf32>
    %cst_105 = arith.constant 9.99999974E-6 : f32
    %214 = vector.broadcast %cst_105 : f32 to vector<8x1xf32>
    %215 = arith.addf %211, %214 : vector<8x1xf32>
    %216 = math.rsqrt %215 : vector<8x1xf32>
    %217 = vector.broadcast %216 : vector<8x1xf32> to vector<8x32xf32>
    %218 = arith.mulf %213, %217 : vector<8x32xf32>
    %219 = vector.broadcast %199 : vector<1x32xf32> to vector<8x32xf32>
    %220 = arith.mulf %218, %219 : vector<8x32xf32>
    %221 = vector.broadcast %200 : vector<1x32xf32> to vector<8x32xf32>
    %222 = arith.addf %220, %221 : vector<8x32xf32>
    %c0_106 = arith.constant 0 : index
    %c0_107 = arith.constant 0 : index
    %223 = vector.load %arg16[%c0_106, %c0_107] : memref<32x32xf32, #tpu.memory_space<vmem>>, vector<32x32xf32>
    %cst_108 = arith.constant dense<0.000000e+00> : vector<8x32xf32>
    %224 = tpu.matmul %222, %223, %cst_108 {dimension_numbers = #tpu.dot_dimension_numbers<[1], [0], [0], [1], [0, 0, 1, 1], [], []>} : vector<8x32xf32>, vector<32x32xf32>, vector<8x32xf32> -> vector<8x32xf32>
    %c0_109 = arith.constant 0 : index
    %c0_110 = arith.constant 0 : index
    %225 = vector.load %arg17[%c0_109, %c0_110] : memref<1x32xf32, #tpu.memory_space<vmem>>, vector<1x32xf32>
    %226 = vector.broadcast %225 : vector<1x32xf32> to vector<8x32xf32>
    %227 = arith.addf %224, %226 : vector<8x32xf32>
    %c0_111 = arith.constant 0 : index
    %c0_112 = arith.constant 0 : index
    %228 = vector.load %arg20[%c0_111, %c0_112] : memref<32x32xf32, #tpu.memory_space<vmem>>, vector<32x32xf32>
    %c0_113 = arith.constant 0 : index
    %c0_114 = arith.constant 0 : index
    %229 = vector.load %arg21[%c0_113, %c0_114] : memref<1x32xf32, #tpu.memory_space<vmem>>, vector<1x32xf32>
    %230 = vector.extract_strided_slice %227 {offsets = [0, 0], sizes = [8, 8], strides = [1, 1]} : vector<8x32xf32> to vector<8x8xf32>
    %231 = vector.extract_strided_slice %31 {offsets = [0, 0], sizes = [16, 8], strides = [1, 1]} : vector<16x32xf32> to vector<16x8xf32>
    %cst_115 = arith.constant dense<0.000000e+00> : vector<8x16xf32>
    %232 = tpu.matmul %230, %231, %cst_115 {dimension_numbers = #tpu.dot_dimension_numbers<[1], [1], [0], [0], [0, 0, 1, 0], [], []>} : vector<8x8xf32>, vector<16x8xf32>, vector<8x16xf32> -> vector<8x16xf32>
    %cst_116 = arith.constant dense<0xFF800000> : vector<8xf32>
    %233 = vector.multi_reduction <maximumf>, %232, %cst_116 [1] : vector<8x16xf32> to vector<8xf32>
    %234 = vector.shape_cast %233 : vector<8xf32> to vector<8x1xf32>
    %235 = vector.broadcast %234 : vector<8x1xf32> to vector<8x16xf32>
    %236 = arith.subf %232, %235 : vector<8x16xf32>
    %237 = math.exp %236 : vector<8x16xf32>
    %cst_117 = arith.constant dense<0.000000e+00> : vector<8xf32>
    %238 = vector.multi_reduction <add>, %237, %cst_117 [1] : vector<8x16xf32> to vector<8xf32>
    %239 = vector.shape_cast %238 : vector<8xf32> to vector<8x1xf32>
    %240 = tpu.reciprocal %239 : vector<8x1xf32> -> vector<8x1xf32>
    %241 = vector.broadcast %240 : vector<8x1xf32> to vector<8x16xf32>
    %242 = arith.mulf %237, %241 : vector<8x16xf32>
    %243 = vector.extract_strided_slice %32 {offsets = [0, 0], sizes = [16, 8], strides = [1, 1]} : vector<16x32xf32> to vector<16x8xf32>
    %cst_118 = arith.constant dense<0.000000e+00> : vector<8x8xf32>
    %244 = tpu.matmul %242, %243, %cst_118 {dimension_numbers = #tpu.dot_dimension_numbers<[1], [0], [0], [1], [0, 0, 1, 1], [], []>} : vector<8x16xf32>, vector<16x8xf32>, vector<8x8xf32> -> vector<8x8xf32>
    %c0_119 = arith.constant 0 : index
    %c0_120 = arith.constant 0 : index
    %245 = vector.load %arg37[%c0_119, %c0_120] : memref<8x32xf32, #tpu.memory_space<vmem>>, vector<8x8xf32>
    tpu.vector_store %arg37[%c0_119, %c0_120], %244 {strides = array<i32>} : memref<8x32xf32, #tpu.memory_space<vmem>>, vector<8x8xf32>,
    %246 = vector.extract_strided_slice %227 {offsets = [0, 8], sizes = [8, 8], strides = [1, 1]} : vector<8x32xf32> to vector<8x8xf32>
    %247 = vector.extract_strided_slice %31 {offsets = [0, 8], sizes = [16, 8], strides = [1, 1]} : vector<16x32xf32> to vector<16x8xf32>
    %cst_121 = arith.constant dense<0.000000e+00> : vector<8x16xf32>
    %248 = tpu.matmul %246, %247, %cst_121 {dimension_numbers = #tpu.dot_dimension_numbers<[1], [1], [0], [0], [0, 0, 1, 0], [], []>} : vector<8x8xf32>, vector<16x8xf32>, vector<8x16xf32> -> vector<8x16xf32>
    %cst_122 = arith.constant dense<0xFF800000> : vector<8xf32>
    %249 = vector.multi_reduction <maximumf>, %248, %cst_122 [1] : vector<8x16xf32> to vector<8xf32>
    %250 = vector.shape_cast %249 : vector<8xf32> to vector<8x1xf32>
    %251 = vector.broadcast %250 : vector<8x1xf32> to vector<8x16xf32>
    %252 = arith.subf %248, %251 : vector<8x16xf32>
    %253 = math.exp %252 : vector<8x16xf32>
    %cst_123 = arith.constant dense<0.000000e+00> : vector<8xf32>
    %254 = vector.multi_reduction <add>, %253, %cst_123 [1] : vector<8x16xf32> to vector<8xf32>
    %255 = vector.shape_cast %254 : vector<8xf32> to vector<8x1xf32>
    %256 = tpu.reciprocal %255 : vector<8x1xf32> -> vector<8x1xf32>
    %257 = vector.broadcast %256 : vector<8x1xf32> to vector<8x16xf32>
    %258 = arith.mulf %253, %257 : vector<8x16xf32>
    %259 = vector.extract_strided_slice %32 {offsets = [0, 8], sizes = [16, 8], strides = [1, 1]} : vector<16x32xf32> to vector<16x8xf32>
    %cst_124 = arith.constant dense<0.000000e+00> : vector<8x8xf32>
    %260 = tpu.matmul %258, %259, %cst_124 {dimension_numbers = #tpu.dot_dimension_numbers<[1], [0], [0], [1], [0, 0, 1, 1], [], []>} : vector<8x16xf32>, vector<16x8xf32>, vector<8x8xf32> -> vector<8x8xf32>
    %c0_125 = arith.constant 0 : index
    %c8_126 = arith.constant 8 : index
    %261 = vector.load %arg37[%c0_125, %c8_126] : memref<8x32xf32, #tpu.memory_space<vmem>>, vector<8x8xf32>
    tpu.vector_store %arg37[%c0_125, %c8_126], %260 {strides = array<i32>} : memref<8x32xf32, #tpu.memory_space<vmem>>, vector<8x8xf32>,
    %262 = vector.extract_strided_slice %227 {offsets = [0, 16], sizes = [8, 8], strides = [1, 1]} : vector<8x32xf32> to vector<8x8xf32>
    %263 = vector.extract_strided_slice %31 {offsets = [0, 16], sizes = [16, 8], strides = [1, 1]} : vector<16x32xf32> to vector<16x8xf32>
    %cst_127 = arith.constant dense<0.000000e+00> : vector<8x16xf32>
    %264 = tpu.matmul %262, %263, %cst_127 {dimension_numbers = #tpu.dot_dimension_numbers<[1], [1], [0], [0], [0, 0, 1, 0], [], []>} : vector<8x8xf32>, vector<16x8xf32>, vector<8x16xf32> -> vector<8x16xf32>
    %cst_128 = arith.constant dense<0xFF800000> : vector<8xf32>
    %265 = vector.multi_reduction <maximumf>, %264, %cst_128 [1] : vector<8x16xf32> to vector<8xf32>
    %266 = vector.shape_cast %265 : vector<8xf32> to vector<8x1xf32>
    %267 = vector.broadcast %266 : vector<8x1xf32> to vector<8x16xf32>
    %268 = arith.subf %264, %267 : vector<8x16xf32>
    %269 = math.exp %268 : vector<8x16xf32>
    %cst_129 = arith.constant dense<0.000000e+00> : vector<8xf32>
    %270 = vector.multi_reduction <add>, %269, %cst_129 [1] : vector<8x16xf32> to vector<8xf32>
    %271 = vector.shape_cast %270 : vector<8xf32> to vector<8x1xf32>
    %272 = tpu.reciprocal %271 : vector<8x1xf32> -> vector<8x1xf32>
    %273 = vector.broadcast %272 : vector<8x1xf32> to vector<8x16xf32>
    %274 = arith.mulf %269, %273 : vector<8x16xf32>
    %275 = vector.extract_strided_slice %32 {offsets = [0, 16], sizes = [16, 8], strides = [1, 1]} : vector<16x32xf32> to vector<16x8xf32>
    %cst_130 = arith.constant dense<0.000000e+00> : vector<8x8xf32>
    %276 = tpu.matmul %274, %275, %cst_130 {dimension_numbers = #tpu.dot_dimension_numbers<[1], [0], [0], [1], [0, 0, 1, 1], [], []>} : vector<8x16xf32>, vector<16x8xf32>, vector<8x8xf32> -> vector<8x8xf32>
    %c0_131 = arith.constant 0 : index
    %c16_132 = arith.constant 16 : index
    %277 = vector.load %arg37[%c0_131, %c16_132] : memref<8x32xf32, #tpu.memory_space<vmem>>, vector<8x8xf32>
    tpu.vector_store %arg37[%c0_131, %c16_132], %276 {strides = array<i32>} : memref<8x32xf32, #tpu.memory_space<vmem>>, vector<8x8xf32>,
    %278 = vector.extract_strided_slice %227 {offsets = [0, 24], sizes = [8, 8], strides = [1, 1]} : vector<8x32xf32> to vector<8x8xf32>
    %279 = vector.extract_strided_slice %31 {offsets = [0, 24], sizes = [16, 8], strides = [1, 1]} : vector<16x32xf32> to vector<16x8xf32>
    %cst_133 = arith.constant dense<0.000000e+00> : vector<8x16xf32>
    %280 = tpu.matmul %278, %279, %cst_133 {dimension_numbers = #tpu.dot_dimension_numbers<[1], [1], [0], [0], [0, 0, 1, 0], [], []>} : vector<8x8xf32>, vector<16x8xf32>, vector<8x16xf32> -> vector<8x16xf32>
    %cst_134 = arith.constant dense<0xFF800000> : vector<8xf32>
    %281 = vector.multi_reduction <maximumf>, %280, %cst_134 [1] : vector<8x16xf32> to vector<8xf32>
    %282 = vector.shape_cast %281 : vector<8xf32> to vector<8x1xf32>
    %283 = vector.broadcast %282 : vector<8x1xf32> to vector<8x16xf32>
    %284 = arith.subf %280, %283 : vector<8x16xf32>
    %285 = math.exp %284 : vector<8x16xf32>
    %cst_135 = arith.constant dense<0.000000e+00> : vector<8xf32>
    %286 = vector.multi_reduction <add>, %285, %cst_135 [1] : vector<8x16xf32> to vector<8xf32>
    %287 = vector.shape_cast %286 : vector<8xf32> to vector<8x1xf32>
    %288 = tpu.reciprocal %287 : vector<8x1xf32> -> vector<8x1xf32>
    %289 = vector.broadcast %288 : vector<8x1xf32> to vector<8x16xf32>
    %290 = arith.mulf %285, %289 : vector<8x16xf32>
    %291 = vector.extract_strided_slice %32 {offsets = [0, 24], sizes = [16, 8], strides = [1, 1]} : vector<16x32xf32> to vector<16x8xf32>
    %cst_136 = arith.constant dense<0.000000e+00> : vector<8x8xf32>
    %292 = tpu.matmul %290, %291, %cst_136 {dimension_numbers = #tpu.dot_dimension_numbers<[1], [0], [0], [1], [0, 0, 1, 1], [], []>} : vector<8x16xf32>, vector<16x8xf32>, vector<8x8xf32> -> vector<8x8xf32>
    %c0_137 = arith.constant 0 : index
    %c24_138 = arith.constant 24 : index
    %293 = vector.load %arg37[%c0_137, %c24_138] : memref<8x32xf32, #tpu.memory_space<vmem>>, vector<8x8xf32>
    tpu.vector_store %arg37[%c0_137, %c24_138], %292 {strides = array<i32>} : memref<8x32xf32, #tpu.memory_space<vmem>>, vector<8x8xf32>,
    %c0_139 = arith.constant 0 : index
    %c0_140 = arith.constant 0 : index
    %294 = vector.load %arg37[%c0_139, %c0_140] : memref<8x32xf32, #tpu.memory_space<vmem>>, vector<8x32xf32>
    %cst_141 = arith.constant dense<0.000000e+00> : vector<8x32xf32>
    %295 = tpu.matmul %294, %228, %cst_141 {dimension_numbers = #tpu.dot_dimension_numbers<[1], [0], [0], [1], [0, 0, 1, 1], [], []>} : vector<8x32xf32>, vector<32x32xf32>, vector<8x32xf32> -> vector<8x32xf32>
    %296 = vector.broadcast %229 : vector<1x32xf32> to vector<8x32xf32>
    %297 = arith.addf %295, %296 : vector<8x32xf32>
    %298 = arith.addf %198, %297 : vector<8x32xf32>
    %c0_142 = arith.constant 0 : index
    %c0_143 = arith.constant 0 : index
    %299 = vector.load %arg22[%c0_142, %c0_143] : memref<1x32xf32, #tpu.memory_space<vmem>>, vector<1x32xf32>
    %c0_144 = arith.constant 0 : index
    %c0_145 = arith.constant 0 : index
    %300 = vector.load %arg23[%c0_144, %c0_145] : memref<1x32xf32, #tpu.memory_space<vmem>>, vector<1x32xf32>
    %cst_146 = arith.constant dense<0.000000e+00> : vector<8xf32>
    %301 = vector.multi_reduction <add>, %298, %cst_146 [1] : vector<8x32xf32> to vector<8xf32>
    %302 = vector.shape_cast %301 : vector<8xf32> to vector<8x1xf32>
    %cst_147 = arith.constant 3.200000e+01 : f32
    %303 = vector.broadcast %cst_147 : f32 to vector<8x1xf32>
    %304 = arith.divf %302, %303 : vector<8x1xf32>
    %305 = vector.broadcast %304 : vector<8x1xf32> to vector<8x32xf32>
    %306 = arith.subf %298, %305 : vector<8x32xf32>
    %307 = arith.mulf %306, %306 : vector<8x32xf32>
    %cst_148 = arith.constant dense<0.000000e+00> : vector<8xf32>
    %308 = vector.multi_reduction <add>, %307, %cst_148 [1] : vector<8x32xf32> to vector<8xf32>
    %309 = vector.shape_cast %308 : vector<8xf32> to vector<8x1xf32>
    %cst_149 = arith.constant 3.200000e+01 : f32
    %310 = vector.broadcast %cst_149 : f32 to vector<8x1xf32>
    %311 = arith.divf %309, %310 : vector<8x1xf32>
    %312 = vector.broadcast %304 : vector<8x1xf32> to vector<8x32xf32>
    %313 = arith.subf %298, %312 : vector<8x32xf32>
    %cst_150 = arith.constant 9.99999974E-6 : f32
    %314 = vector.broadcast %cst_150 : f32 to vector<8x1xf32>
    %315 = arith.addf %311, %314 : vector<8x1xf32>
    %316 = math.rsqrt %315 : vector<8x1xf32>
    %317 = vector.broadcast %316 : vector<8x1xf32> to vector<8x32xf32>
    %318 = arith.mulf %313, %317 : vector<8x32xf32>
    %319 = vector.broadcast %299 : vector<1x32xf32> to vector<8x32xf32>
    %320 = arith.mulf %318, %319 : vector<8x32xf32>
    %321 = vector.broadcast %300 : vector<1x32xf32> to vector<8x32xf32>
    %322 = arith.addf %320, %321 : vector<8x32xf32>
    %c0_151 = arith.constant 0 : index
    %c0_152 = arith.constant 0 : index
    %323 = vector.load %arg24[%c0_151, %c0_152] : memref<32x128xf32, #tpu.memory_space<vmem>>, vector<32x128xf32>
    %cst_153 = arith.constant dense<0.000000e+00> : vector<8x128xf32>
    %324 = tpu.matmul %322, %323, %cst_153 {dimension_numbers = #tpu.dot_dimension_numbers<[1], [0], [0], [1], [0, 0, 1, 1], [], []>} : vector<8x32xf32>, vector<32x128xf32>, vector<8x128xf32> -> vector<8x128xf32>
    %c0_154 = arith.constant 0 : index
    %c0_155 = arith.constant 0 : index
    %325 = vector.load %arg25[%c0_154, %c0_155] : memref<1x128xf32, #tpu.memory_space<vmem>>, vector<1x128xf32>
    %326 = vector.broadcast %325 : vector<1x128xf32> to vector<8x128xf32>
    %327 = arith.addf %324, %326 : vector<8x128xf32>
    %cst_156 = arith.constant 5.000000e-01 : f32
    %328 = vector.broadcast %cst_156 : f32 to vector<8x128xf32>
    %329 = arith.mulf %328, %327 : vector<8x128xf32>
    %cst_157 = arith.constant 0.707106769 : f32
    %330 = vector.broadcast %cst_157 : f32 to vector<8x128xf32>
    %331 = arith.mulf %327, %330 : vector<8x128xf32>
    %cst_158 = arith.constant 0.000000e+00 : f32
    %332 = vector.broadcast %cst_158 : f32 to vector<8x128xf32>
    %333 = arith.cmpf oge, %331, %332 : vector<8x128xf32>
    %cst_159 = arith.constant 1.000000e+00 : f32
    %cst_160 = arith.constant -1.000000e+00 : f32
    %334 = vector.broadcast %cst_159 : f32 to vector<8x128xf32>
    %335 = vector.broadcast %cst_160 : f32 to vector<8x128xf32>
    %336 = arith.select %333, %334, %335 : vector<8x128xi1>, vector<8x128xf32>
    %337 = math.absf %331 : vector<8x128xf32>
    %cst_161 = arith.constant 0.327591091 : f32
    %338 = vector.broadcast %cst_161 : f32 to vector<8x128xf32>
    %339 = arith.mulf %338, %337 : vector<8x128xf32>
    %cst_162 = arith.constant 1.000000e+00 : f32
    %340 = vector.broadcast %cst_162 : f32 to vector<8x128xf32>
    %341 = arith.addf %340, %339 : vector<8x128xf32>
    %342 = tpu.reciprocal %341 : vector<8x128xf32> -> vector<8x128xf32>
    %cst_163 = arith.constant 1.06140542 : f32
    %343 = vector.broadcast %cst_163 : f32 to vector<8x128xf32>
    %344 = arith.mulf %343, %342 : vector<8x128xf32>
    %cst_164 = arith.constant -1.45315206 : f32
    %345 = vector.broadcast %cst_164 : f32 to vector<8x128xf32>
    %346 = arith.addf %344, %345 : vector<8x128xf32>
    %347 = arith.mulf %346, %342 : vector<8x128xf32>
    %cst_165 = arith.constant 1.42141378 : f32
    %348 = vector.broadcast %cst_165 : f32 to vector<8x128xf32>
    %349 = arith.addf %347, %348 : vector<8x128xf32>
    %350 = arith.mulf %349, %342 : vector<8x128xf32>
    %cst_166 = arith.constant -0.284496725 : f32
    %351 = vector.broadcast %cst_166 : f32 to vector<8x128xf32>
    %352 = arith.addf %350, %351 : vector<8x128xf32>
    %353 = arith.mulf %352, %342 : vector<8x128xf32>
    %cst_167 = arith.constant 0.254829586 : f32
    %354 = vector.broadcast %cst_167 : f32 to vector<8x128xf32>
    %355 = arith.addf %353, %354 : vector<8x128xf32>
    %356 = arith.mulf %355, %342 : vector<8x128xf32>
    %cst_168 = arith.constant 0.000000e+00 : f32
    %357 = vector.broadcast %cst_168 : f32 to vector<8x128xf32>
    %358 = arith.subf %357, %337 : vector<8x128xf32>
    %359 = arith.mulf %358, %337 : vector<8x128xf32>
    %360 = math.exp %359 : vector<8x128xf32>
    %361 = arith.mulf %356, %360 : vector<8x128xf32>
    %cst_169 = arith.constant 1.000000e+00 : f32
    %362 = vector.broadcast %cst_169 : f32 to vector<8x128xf32>
    %363 = arith.subf %362, %361 : vector<8x128xf32>
    %364 = arith.mulf %336, %363 : vector<8x128xf32>
    %cst_170 = arith.constant 1.000000e+00 : f32
    %365 = vector.broadcast %cst_170 : f32 to vector<8x128xf32>
    %366 = arith.addf %365, %364 : vector<8x128xf32>
    %367 = arith.mulf %329, %366 : vector<8x128xf32>
    %c0_171 = arith.constant 0 : index
    %c0_172 = arith.constant 0 : index
    %368 = vector.load %arg26[%c0_171, %c0_172] : memref<128x32xf32, #tpu.memory_space<vmem>>, vector<128x32xf32>
    %cst_173 = arith.constant dense<0.000000e+00> : vector<8x32xf32>
    %369 = tpu.matmul %367, %368, %cst_173 {dimension_numbers = #tpu.dot_dimension_numbers<[1], [0], [0], [1], [0, 0, 1, 1], [], []>} : vector<8x128xf32>, vector<128x32xf32>, vector<8x32xf32> -> vector<8x32xf32>
    %370 = arith.addf %298, %369 : vector<8x32xf32>
    %c0_174 = arith.constant 0 : index
    %c0_175 = arith.constant 0 : index
    %371 = vector.load %arg27[%c0_174, %c0_175] : memref<1x32xf32, #tpu.memory_space<vmem>>, vector<1x32xf32>
    %372 = vector.broadcast %371 : vector<1x32xf32> to vector<8x32xf32>
    %373 = arith.addf %370, %372 : vector<8x32xf32>
    %c0_176 = arith.constant 0 : index
    %c0_177 = arith.constant 0 : index
    %374 = vector.load %arg28[%c0_176, %c0_177] : memref<1x32xf32, #tpu.memory_space<vmem>>, vector<1x32xf32>
    %c0_178 = arith.constant 0 : index
    %c0_179 = arith.constant 0 : index
    %375 = vector.load %arg29[%c0_178, %c0_179] : memref<1x32xf32, #tpu.memory_space<vmem>>, vector<1x32xf32>
    %cst_180 = arith.constant dense<0.000000e+00> : vector<8xf32>
    %376 = vector.multi_reduction <add>, %373, %cst_180 [1] : vector<8x32xf32> to vector<8xf32>
    %377 = vector.shape_cast %376 : vector<8xf32> to vector<8x1xf32>
    %cst_181 = arith.constant 3.200000e+01 : f32
    %378 = vector.broadcast %cst_181 : f32 to vector<8x1xf32>
    %379 = arith.divf %377, %378 : vector<8x1xf32>
    %380 = vector.broadcast %379 : vector<8x1xf32> to vector<8x32xf32>
    %381 = arith.subf %373, %380 : vector<8x32xf32>
    %382 = arith.mulf %381, %381 : vector<8x32xf32>
    %cst_182 = arith.constant dense<0.000000e+00> : vector<8xf32>
    %383 = vector.multi_reduction <add>, %382, %cst_182 [1] : vector<8x32xf32> to vector<8xf32>
    %384 = vector.shape_cast %383 : vector<8xf32> to vector<8x1xf32>
    %cst_183 = arith.constant 3.200000e+01 : f32
    %385 = vector.broadcast %cst_183 : f32 to vector<8x1xf32>
    %386 = arith.divf %384, %385 : vector<8x1xf32>
    %387 = vector.broadcast %379 : vector<8x1xf32> to vector<8x32xf32>
    %388 = arith.subf %373, %387 : vector<8x32xf32>
    %cst_184 = arith.constant 9.99999974E-6 : f32
    %389 = vector.broadcast %cst_184 : f32 to vector<8x1xf32>
    %390 = arith.addf %386, %389 : vector<8x1xf32>
    %391 = math.rsqrt %390 : vector<8x1xf32>
    %392 = vector.broadcast %391 : vector<8x1xf32> to vector<8x32xf32>
    %393 = arith.mulf %388, %392 : vector<8x32xf32>
    %394 = vector.broadcast %374 : vector<1x32xf32> to vector<8x32xf32>
    %395 = arith.mulf %393, %394 : vector<8x32xf32>
    %396 = vector.broadcast %375 : vector<1x32xf32> to vector<8x32xf32>
    %397 = arith.addf %395, %396 : vector<8x32xf32>
    %c0_185 = arith.constant 0 : index
    %c0_186 = arith.constant 0 : index
    %398 = vector.load %arg30[%c0_185, %c0_186] : memref<32x128xf32, #tpu.memory_space<vmem>>, vector<32x128xf32>
    %cst_187 = arith.constant dense<0.000000e+00> : vector<8x128xf32>
    %399 = tpu.matmul %397, %398, %cst_187 {dimension_numbers = #tpu.dot_dimension_numbers<[1], [0], [0], [1], [0, 0, 1, 1], [], []>} : vector<8x32xf32>, vector<32x128xf32>, vector<8x128xf32> -> vector<8x128xf32>
    %c0_188 = arith.constant 0 : index
    %c0_189 = arith.constant 0 : index
    %400 = vector.load %arg31[%c0_188, %c0_189] : memref<1x128xf32, #tpu.memory_space<vmem>>, vector<1x128xf32>
    %401 = vector.broadcast %400 : vector<1x128xf32> to vector<8x128xf32>
    %402 = arith.addf %399, %401 : vector<8x128xf32>
    %c0_190 = arith.constant 0 : index
    %c0_191 = arith.constant 0 : index
    %c0_192 = arith.constant 0 : index
    %403 = vector.load %arg32[%c0_190, %c0_191, %c0_192] : memref<1x8x128xf32, #tpu.memory_space<vmem>>, vector<1x8x128xf32>
    %404 = vector.shape_cast %403 : vector<1x8x128xf32> to vector<8x128xf32>
    %405 = vector.shape_cast %402 : vector<8x128xf32> to vector<1x8x128xf32>
    tpu.vector_store %arg32[%c0_190, %c0_191, %c0_192], %405 {strides = array<i32>} : memref<1x8x128xf32, #tpu.memory_space<vmem>>, vector<1x8x128xf32>,
    return
  }
  func.func @transform_0(%arg0: i32) -> (i32, i32, i32) {
    %c0_i32 = arith.constant 0 : i32
    %c0_i32_0 = arith.constant 0 : i32
    %c0_i32_1 = arith.constant 0 : i32
    return %arg0, %c0_i32, %c0_i32_0 : i32, i32, i32
  }
  func.func @transform_1(%arg0: i32) -> (i32, i32) {
    %c0_i32 = arith.constant 0 : i32
    %c0_i32_0 = arith.constant 0 : i32
    %c0_i32_1 = arith.constant 0 : i32
    return %c0_i32, %c0_i32_0 : i32, i32
  }
  func.func @transform_2(%arg0: i32) -> (i32, i32) {
    %c0_i32 = arith.constant 0 : i32
    %c0_i32_0 = arith.constant 0 : i32
    %c0_i32_1 = arith.constant 0 : i32
    return %c0_i32, %c0_i32_0 : i32, i32
  }
  func.func @transform_3(%arg0: i32) -> (i32, i32) {
    %c0_i32 = arith.constant 0 : i32
    %c0_i32_0 = arith.constant 0 : i32
    %c0_i32_1 = arith.constant 0 : i32
    return %c0_i32, %c0_i32_0 : i32, i32
  }
  func.func @transform_4(%arg0: i32) -> (i32, i32) {
    %c0_i32 = arith.constant 0 : i32
    %c0_i32_0 = arith.constant 0 : i32
    %c0_i32_1 = arith.constant 0 : i32
    return %c0_i32, %c0_i32_0 : i32, i32
  }
  func.func @transform_5(%arg0: i32) -> (i32, i32) {
    %c0_i32 = arith.constant 0 : i32
    %c0_i32_0 = arith.constant 0 : i32
    %c0_i32_1 = arith.constant 0 : i32
    return %c0_i32, %c0_i32_0 : i32, i32
  }
  func.func @transform_6(%arg0: i32) -> (i32, i32) {
    %c0_i32 = arith.constant 0 : i32
    %c0_i32_0 = arith.constant 0 : i32
    %c0_i32_1 = arith.constant 0 : i32
    return %c0_i32, %c0_i32_0 : i32, i32
  }
  func.func @transform_7(%arg0: i32) -> (i32, i32) {
    %c0_i32 = arith.constant 0 : i32
    %c0_i32_0 = arith.constant 0 : i32
    %c0_i32_1 = arith.constant 0 : i32
    return %c0_i32, %c0_i32_0 : i32, i32
  }
  func.func @transform_8(%arg0: i32) -> (i32, i32) {
    %c0_i32 = arith.constant 0 : i32
    %c0_i32_0 = arith.constant 0 : i32
    %c0_i32_1 = arith.constant 0 : i32
    return %c0_i32, %c0_i32_0 : i32, i32
  }
  func.func @transform_9(%arg0: i32) -> (i32, i32) {
    %c0_i32 = arith.constant 0 : i32
    %c0_i32_0 = arith.constant 0 : i32
    %c0_i32_1 = arith.constant 0 : i32
    return %c0_i32, %c0_i32_0 : i32, i32
  }
  func.func @transform_10(%arg0: i32) -> (i32, i32) {
    %c0_i32 = arith.constant 0 : i32
    %c0_i32_0 = arith.constant 0 : i32
    %c0_i32_1 = arith.constant 0 : i32
    return %c0_i32, %c0_i32_0 : i32, i32
  }
  func.func @transform_11(%arg0: i32) -> (i32, i32) {
    %c0_i32 = arith.constant 0 : i32
    %c0_i32_0 = arith.constant 0 : i32
    %c0_i32_1 = arith.constant 0 : i32
    return %c0_i32, %c0_i32_0 : i32, i32
  }
  func.func @transform_12(%arg0: i32) -> (i32, i32) {
    %c0_i32 = arith.constant 0 : i32
    %c0_i32_0 = arith.constant 0 : i32
    %c0_i32_1 = arith.constant 0 : i32
    return %c0_i32, %c0_i32_0 : i32, i32
  }
  func.func @transform_13(%arg0: i32) -> (i32, i32) {
    %c0_i32 = arith.constant 0 : i32
    %c0_i32_0 = arith.constant 0 : i32
    %c0_i32_1 = arith.constant 0 : i32
    return %c0_i32, %c0_i32_0 : i32, i32
  }
  func.func @transform_14(%arg0: i32) -> (i32, i32) {
    %c0_i32 = arith.constant 0 : i32
    %c0_i32_0 = arith.constant 0 : i32
    %c0_i32_1 = arith.constant 0 : i32
    return %c0_i32, %c0_i32_0 : i32, i32
  }
  func.func @transform_15(%arg0: i32) -> (i32, i32) {
    %c0_i32 = arith.constant 0 : i32
    %c0_i32_0 = arith.constant 0 : i32
    %c0_i32_1 = arith.constant 0 : i32
    return %c0_i32, %c0_i32_0 : i32, i32
  }
  func.func @transform_16(%arg0: i32) -> (i32, i32) {
    %c0_i32 = arith.constant 0 : i32
    %c0_i32_0 = arith.constant 0 : i32
    %c0_i32_1 = arith.constant 0 : i32
    return %c0_i32, %c0_i32_0 : i32, i32
  }
  func.func @transform_17(%arg0: i32) -> (i32, i32) {
    %c0_i32 = arith.constant 0 : i32
    %c0_i32_0 = arith.constant 0 : i32
    %c0_i32_1 = arith.constant 0 : i32
    return %c0_i32, %c0_i32_0 : i32, i32
  }
  func.func @transform_18(%arg0: i32) -> (i32, i32) {
    %c0_i32 = arith.constant 0 : i32
    %c0_i32_0 = arith.constant 0 : i32
    %c0_i32_1 = arith.constant 0 : i32
    return %c0_i32, %c0_i32_0 : i32, i32
  }
  func.func @transform_19(%arg0: i32) -> (i32, i32) {
    %c0_i32 = arith.constant 0 : i32
    %c0_i32_0 = arith.constant 0 : i32
    %c0_i32_1 = arith.constant 0 : i32
    return %c0_i32, %c0_i32_0 : i32, i32
  }
  func.func @transform_20(%arg0: i32) -> (i32, i32) {
    %c0_i32 = arith.constant 0 : i32
    %c0_i32_0 = arith.constant 0 : i32
    %c0_i32_1 = arith.constant 0 : i32
    return %c0_i32, %c0_i32_0 : i32, i32
  }
  func.func @transform_21(%arg0: i32) -> (i32, i32) {
    %c0_i32 = arith.constant 0 : i32
    %c0_i32_0 = arith.constant 0 : i32
    %c0_i32_1 = arith.constant 0 : i32
    return %c0_i32, %c0_i32_0 : i32, i32
  }
  func.func @transform_22(%arg0: i32) -> (i32, i32) {
    %c0_i32 = arith.constant 0 : i32
    %c0_i32_0 = arith.constant 0 : i32
    %c0_i32_1 = arith.constant 0 : i32
    return %c0_i32, %c0_i32_0 : i32, i32
  }
  func.func @transform_23(%arg0: i32) -> (i32, i32) {
    %c0_i32 = arith.constant 0 : i32
    %c0_i32_0 = arith.constant 0 : i32
    %c0_i32_1 = arith.constant 0 : i32
    return %c0_i32, %c0_i32_0 : i32, i32
  }
  func.func @transform_24(%arg0: i32) -> (i32, i32) {
    %c0_i32 = arith.constant 0 : i32
    %c0_i32_0 = arith.constant 0 : i32
    %c0_i32_1 = arith.constant 0 : i32
    return %c0_i32, %c0_i32_0 : i32, i32
  }
  func.func @transform_25(%arg0: i32) -> (i32, i32) {
    %c0_i32 = arith.constant 0 : i32
    %c0_i32_0 = arith.constant 0 : i32
    %c0_i32_1 = arith.constant 0 : i32
    return %c0_i32, %c0_i32_0 : i32, i32
  }
  func.func @transform_26(%arg0: i32) -> (i32, i32) {
    %c0_i32 = arith.constant 0 : i32
    %c0_i32_0 = arith.constant 0 : i32
    %c0_i32_1 = arith.constant 0 : i32
    return %c0_i32, %c0_i32_0 : i32, i32
  }
  func.func @transform_27(%arg0: i32) -> (i32, i32) {
    %c0_i32 = arith.constant 0 : i32
    %c0_i32_0 = arith.constant 0 : i32
    %c0_i32_1 = arith.constant 0 : i32
    return %c0_i32, %c0_i32_0 : i32, i32
  }
  func.func @transform_28(%arg0: i32) -> (i32, i32) {
    %c0_i32 = arith.constant 0 : i32
    %c0_i32_0 = arith.constant 0 : i32
    %c0_i32_1 = arith.constant 0 : i32
    return %c0_i32, %c0_i32_0 : i32, i32
  }
  func.func @transform_29(%arg0: i32) -> (i32, i32) {
    %c0_i32 = arith.constant 0 : i32
    %c0_i32_0 = arith.constant 0 : i32
    %c0_i32_1 = arith.constant 0 : i32
    return %c0_i32, %c0_i32_0 : i32, i32
  }
  func.func @transform_30(%arg0: i32) -> (i32, i32) {
    %c0_i32 = arith.constant 0 : i32
    %c0_i32_0 = arith.constant 0 : i32
    %c0_i32_1 = arith.constant 0 : i32
    return %c0_i32, %c0_i32_0 : i32, i32
  }
  func.func @transform_31(%arg0: i32) -> (i32, i32, i32) {
    %c0_i32 = arith.constant 0 : i32
    %c0_i32_0 = arith.constant 0 : i32
    %c0_i32_1 = arith.constant 0 : i32
    return %arg0, %c0_i32, %c0_i32_0 : i32, i32, i32
  }
}

</mosaic_0001>

<bundles_post_ra>
// kernel: _lambda_.2
= control target key start
LH: loop header
LB: loop body
LE: loop exit
PB: predicated region body
PF: predicated region fallthrough
CT: control target
= control target key end

     0   :  { %s2045_s25 = smov 0   ;;  %s2047_s26 = smov 0   ;;  %s2467_s0 = inlined_call_operand.vmem [shape: f32[2,16,32], index: 0, kind: input, shape index: {}]   ;;  %s2468_s1 = inlined_call_operand.vmem [shape: f32[2,1,32], index: 1, kind: input, shape index: {}]   ;;  %s2469_s2 = inlined_call_operand.vmem [shape: f32[2,1,32], index: 2, kind: input, shape index: {}]   ;;  %s2470_s3 = inlined_call_operand.vmem [shape: f32[2,32,96], index: 3, kind: input, shape index: {}]   ;;  %s2471_s4 = inlined_call_operand.vmem [shape: f32[2,1,96], index: 4, kind: input, shape index: {}]   ;;  %s2472_s5 = inlined_call_operand.vmem [shape: f32[2,32,32], index: 5, kind: input, shape index: {}]   ;;  %s2473_s6 = inlined_call_operand.vmem [shape: f32[2,1,32], index: 6, kind: input, shape index: {}]   ;;  %s2474_s7 = inlined_call_operand.vmem [shape: f32[2,1,32], index: 7, kind: input, shape index: {}]   ;;  %s2475_s8 = inlined_call_operand.vmem [shape: f32[2,1,32], index: 8, kind: input, shape index: {}]   ;;  %s2476_s9 = inlined_call_operand.vmem [shape: f32[2,32,128], index: 9, kind: input, shape index: {}]   ;;  %s2477_s10 = inlined_call_operand.vmem [shape: f32[2,1,128], index: 10, kind: input, shape index: {}]   ;;  %s2478_s11 = inlined_call_operand.vmem [shape: f32[2,128,32], index: 11, kind: input, shape index: {}]   ;;  %s2479_s12 = inlined_call_operand.vmem [shape: f32[2,1,32], index: 12, kind: input, shape index: {}]   ;;  %s2480_s13 = inlined_call_operand.vmem [shape: f32[2,16,32], index: 13, kind: output, shape index: {}]  }
   0x1   :  { %2485 = sst [smem:[#allocation9_spill]] %s2467_s0  ;;  %s2049_s27 = smov 0  }
   0x2   :  { %2486 = sst [smem:[#allocation10_spill]] %s2469_s2  ;;  %s2051_s28 = smov 0  }
   0x3   :  { %2487 = sst [smem:[#allocation11_spill]] %s2470_s3  ;;  %s2053_s29 = smov 0  }
   0x4   :  { %2488 = sst [smem:[#allocation12_spill]] %s2472_s5 }
   0x5   :  { %2489 = sst [smem:[#allocation13_spill]] %s2480_s13 }
   0x6 LB: > { %2490 = sst [smem:[#allocation3_spill]] %s1941_s25  ;;  %s32_s30 = sadd.s32 1, %s1949_s27  ;;  %s1957_s29 = sphi %s2053_s29, %s23_s29   ;;  %s1953_s28 = sphi %s2051_s28, %s2519_s28   ;;  %s1949_s27 = sphi %s2049_s27, %s2518_s27   ;;  %s1945_s26 = sphi %s2047_s26, %s2517_s26   ;;  %s1941_s25 = sphi %s2045_s25, %s2516_s25  }
   0x7   : > { %2491 = sst [smem:[#allocation4_spill]] %s1949_s27  ;;  %s35_s14 = sadd.s32 1, %s1953_s28 }
   0x8   : > { %2492 = sst [smem:[#allocation5_spill]] %s1953_s28  ;;  %p33_p0 = scmp.ge.s32.totalorder %s32_s30, 2 }
   0x9   : > { %2493 = sst [smem:[#allocation6_spill]] %s1957_s29  ;;  %p1731_p1 = scmp.ge.s32.totalorder %s1957_s29, 1 }
   0xa   : > { %p503_p2 = scmp.lt.s32.totalorder %s1957_s29, 5  ;;  %s2521_s30 = smov (%p33_p0, %s32_s30), 0 }
   0xb   : > { %2494 = sst [smem:[#allocation7_spill]] %s2521_s30  ;;  %s2523_s14 = smov (!%p33_p0, %s35_s14), %s1953_s28 }
   0xc   : > { %p504_p3 = pnand %p1731_p1, %p503_p2  ;;  %p37_p4 = scmp.ge.s32.totalorder %s2523_s14, 2 }
   0xd   : > { %p591_p5 = scmp.lt.s32.totalorder (!%p504_p3), %s1945_s26, 1  ;;  %p596_p6 = scmp.lt.s32.totalorder (!%p504_p3), %s1941_s25, 1 }
   0xe   : > { %s2525_s14 = smov (%p37_p4, %s2523_s14), 0  ;;  %507 = sbr.rel (%p504_p3) target bundleno = 2363 (0x93b), region = 72 }
   0xf   : > { %2495 = sst [smem:[#allocation8_spill]] %s2525_s14 }
  0x10   : > { %s2496_s0 = sld [smem:[#allocation9_spill]] (!%p504_p3) }
  0x11   : > { %s2498_s3 = sld [smem:[#allocation11_spill]] (!%p504_p3) }
  0x12   : > { %s2499_s5 = sld [smem:[#allocation12_spill]] (!%p504_p3) }
  0x13   : > { %s2527_s26 = smov (!%p591_p5, %s1945_s26), 1 }
  0x14   : > { %s2079_s15 = scalar_select %p596_p6, %s1941_s25, 1 }
  0x15   : > { %s1777_s16 = sshll.u32 %s2527_s26, 4 }
  0x16   : > { %s595_s19 = scalar_lea.vmem %s2496_s0, %s1777_s16  ;;  %s1778_s30 = sshll.u32 %s2079_s15, 5 }
  0x17   : > { %s2096_s29 = scalar_lea.vmem %s2498_s3, %s1778_s30  ;;  %s2122_s26 = scalar_lea.vmem %s2476_s9, %s1778_s30 }
  0x18   : > { %s2105_s0 = scalar_lea.vmem %s2499_s5, %s1778_s30  ;;  %s631_s13 = scalar_lea.vmem %s2477_s10, %s2079_s15 }
  0x19   : > { %s1781_s5 = sshll.u32 %s2079_s15, 7  ;;  %s639_s23 = scalar_lea.vmem %s2479_s12, %s2079_s15 }
  0x1a   : > { %s2136_s22 = scalar_lea.vmem %s2478_s11, %s1781_s5  ;;  %s2500_s3 = sld [smem:[#allocation13_spill]] }
  0x1b   : > { %s2501_s30 = sld [smem:[#allocation3_spill]] }
  0x20   : > { %s2141_s2 = scalar_lea.vmem %s2500_s3, %s1777_s16 }
  0x21   : > { %p1744_p7 = scmp.ne.s32.totalorder %s2501_s30, 0 }
  0x23   : > { %648 = sbr.rel (%p1744_p7) target bundleno = 43 (0x2b), region = 76 }
  0x28   : > { %v649_v0 = vld [vmem:[%s595_s19] sm:$0xff]  ;;  %vm651_vm0 = vcmask 261120   ;;  %v650_v1 = vld [vmem:[%s595_s19 + $0x8] sm:$0xff] }
  0x29   : > { %652 = vst.msk [vmem:[%s2141_s2] sm:$0xff] %vm651_vm0, %v649_v0 }
  0x2a   : > { %653 = vst.msk [vmem:[%s2141_s2 + $0x8] sm:$0xff] %vm651_vm0, %v650_v1 }
  0x2b PF: > { %vm658_vm1 = vcmask 261120   ;;  %v1959_v6 = vmov 32.0   ;;  %v723_v23 = vld [vmem:[%s2096_s29 + $0x18] sm:$0xff]  ;;  %v722_v24 = vld [vmem:[%s2096_s29 + $0x10] sm:$0xff]  ;;  %v721_v25 = vld [vmem:[%s2096_s29 + $0x8] sm:$0xff]  ;;  %s2503_s25 = sld [smem:[#allocation10_spill]]  ;;  %s2505_s21 = scalar_lea.vmem %s2471_s4, %s2079_s15 }
  0x2c   : > { %1869 = vrcp.f32 %v1959_v6  ;;  %746 = vmatpush.msra.mxu0 %v723_v23  ;;  %v720_v26 = vld [vmem:[%s2096_s29] sm:$0xff]  ;;  %s2502_s29 = scalar_lea.vmem %s2468_s1, %s2079_s15  ;;  %s1960_s14 = smov 96   ;;  %vm768_vm9 = vcmask 64512   ;;  %vm800_vm10 = vcmask 130048  }
  0x2d   : > { %v1861_v41 = vld [vmem:[%s2502_s29] ss:$0 sm:$0xff]  ;;  %s1961_s24 = smov 88   ;;  %s1962_s27 = smov 120  }
  0x2e   : > { %747 = vmatpush.msra.mxu0 %v722_v24  ;;  %v1863_v56 = vld [vmem:[%s2505_s21] ss:$0 sm:$0xff]  ;;  %s1963_s28 = smov 64   ;;  %s1964_s30 = smov 104  }
  0x2f   : > { %s1965_s3 = smov 80   ;;  %s1966_s5 = smov 112  }
  0x30   : > { %v2147_v2 = vld [vmem:[%s2141_s2] sm:$0xff]  ;;  %748 = vmatpush.msra.mxu0 %v721_v25  ;;  %s1967_s29 = smov 72   ;;  %s1968_s16 = smov 56  }
  0x31   : > { %v659_v3 = vsel %vm658_vm1, %v2147_v2, 0.0  ;;  %v2152_v4 = vld [vmem:[%s2141_s2 + $0x8] sm:$0xff]  ;;  %s2504_s17 = scalar_lea.vmem %s2503_s25, %s2079_s15  ;;  %s1969_s19 = smov 48  }
  0x32   : > { %660 = vadd.xlane.f32.xlu0 %v659_v3  ;;  %v662_v5 = vsel %vm658_vm1, %v2152_v4, 0.0  ;;  %v1870_v7 = vpop.eup %1869  ;;  %749 = vmatpush.msra.mxu0 %v720_v26  ;;  %v1862_v45 = vld [vmem:[%s2504_s17] ss:$0 sm:$0xff]  ;;  %s1970_s25 = smov 40   ;;  %s1971_s17 = smov 16  }
  0x33   : > { %v666_v8 = vmul.f32 32.0, %v1870_v7  ;;  %vm670_vm2 = vweird.f32 %v1870_v7  ;;  %s1972_s18 = smov 8   ;;  %s1973_s20 = smov 24  }
  0x35   : > { %v667_v9 = vsub.f32 1.0, %v666_v8 }
  0x37   : > { %v668_v10 = vmul.f32 %v1870_v7, %v667_v9 }
  0x39   : > { %v669_v11 = vadd.f32 %v1870_v7, %v668_v10 }
  0x3a   : > { %663 = vadd.xlane.f32.xlu0 %v662_v5 }
  0x3b   : > { %v2156_v12 = vsel %vm670_vm2, %v1870_v7, %v669_v11 }
  0xa5   : > { %v661_v13 = vpop.xlane.xlu0 %660 }
  0xa6   : > { %v672_v14 = vmul.f32 %v2156_v12, %v661_v13 }
  0xa8   : > { %v674_v15 = vsub.f32 %v2147_v2, %v672_v14 }
  0xaa   : > { %v676_v16 = vmul.f32 %v674_v15, %v674_v15 }
  0xac   : > { %v678_v17 = vsel %vm658_vm1, %v676_v16, 0.0 }
  0xad   : > { %679 = vadd.xlane.f32.xlu1 %v678_v17  ;;  %v664_v18 = vpop.xlane.xlu0 %663 }
  0xae   : > { %v673_v19 = vmul.f32 %v2156_v12, %v664_v18 }
  0xb0   : > { %v675_v20 = vsub.f32 %v2152_v4, %v673_v19 }
  0xb2   : > { %v677_v21 = vmul.f32 %v675_v20, %v675_v20 }
  0xb4   : > { %v681_v22 = vsel %vm658_vm1, %v677_v21, 0.0 }
  0xb5   : > { %682 = vadd.xlane.f32.xlu1 %v681_v22 }
 0x120   : > { %v680_v27 = vpop.xlane.xlu1 %679 }
 0x121   : > { %v684_v28 = vmul.f32 %v680_v27, %v2156_v12 }
 0x123   : > { %v686_v29 = vadd.f32 1e-06, %v684_v28 }
 0x125   : > { %1871 = vrsqrt.f32 %v686_v29  ;;  %vm694_vm4 = vweird.f32 %v686_v29 }
 0x128   : > { %v683_v30 = vpop.xlane.xlu1 %682 }
 0x129   : > { %v685_v31 = vmul.f32 %v683_v30, %v2156_v12 }
 0x12b   : > { %v1872_v32 = vpop.eup %1871  ;;  %v687_v33 = vadd.f32 1e-06, %v685_v31 }
 0x12c   : > { %v689_v34 = vmul.f32 %v1872_v32, %v686_v29  ;;  %vm695_vm3 = vweird.f32 %v1872_v32 }
 0x12d   : > { %1873 = vrsqrt.f32 %v687_v33  ;;  %vm696_vm5 = vmor %vm694_vm4, %vm695_vm3  ;;  %vm704_vm7 = vweird.f32 %v687_v33 }
 0x12e   : > { %v690_v35 = vmul.f32 %v1872_v32, %v689_v34 }
 0x130   : > { %v691_v36 = vmul.f32 0.5, %v690_v35 }
 0x132   : > { %v692_v37 = vsub.f32 1.5, %v691_v36 }
 0x133   : > { %v1874_v38 = vpop.eup %1873 }
 0x134   : > { %v693_v39 = vmul.f32 %v1872_v32, %v692_v37  ;;  %v699_v40 = vmul.f32 %v1874_v38, %v687_v33  ;;  %vm705_vm6 = vweird.f32 %v1874_v38 }
 0x135   : > { %vm706_vm8 = vmor %vm704_vm7, %vm705_vm6 }
 0x136   : > { %v697_v42 = vsel %vm696_vm5, %v1872_v32, %v693_v39  ;;  %v700_v43 = vmul.f32 %v1874_v38, %v699_v40 }
 0x137   : > { %v708_v44 = vmul.f32 %v697_v42, %v674_v15 }
 0x138   : > { %v701_v46 = vmul.f32 0.5, %v700_v43 }
 0x139   : > { %v713_v47 = vmul.f32 %v1861_v41, %v708_v44 }
 0x13a   : > { %v702_v48 = vsub.f32 1.5, %v701_v46 }
 0x13b   : > { %v718_v49 = vadd.f32 %v1862_v45, %v713_v47 }
 0x13c   : > { %v703_v50 = vmul.f32 %v1874_v38, %v702_v48 }
 0x13d   : > { %1745 = vmatmul.msk.f32.vlgmr.msra.gmra.mxu0 %vm658_vm1, %v718_v49 }
 0x13e   : > { %v707_v51 = vsel %vm706_vm8, %v1874_v38, %v703_v50 }
 0x13f   : > { %v709_v52 = vmul.f32 %v707_v51, %v675_v20 }
 0x141   : > { %v714_v53 = vmul.f32 %v1861_v41, %v709_v52 }
 0x143   : > { %v719_v54 = vadd.f32 %v1862_v45, %v714_v53 }
 0x145   : > { %1746 = vmatmul.msk.f32.gmra.mxu0 %vm658_vm1, %v719_v54 }
 0x1ba   : > { %v751_v55 = vpop.f32.mrf.mxu0 }
 0x1bb   : > { %v752_v59 = vadd.f32 %v1863_v56, %v751_v55 }
 0x1c2   : > { %v754_v57 = vpop.f32.mrf.mxu0 }
 0x1c3   : > { %v2187_v58 = vadd.f32 %v1863_v56, %v754_v57 }
 0x1c5   : > { %766 = vrot.lane.b32.xlu2 %v2187_v58, %s1960_s14  ;;  %v2199_v3 = vpack.i.bf16 %v752_v59, %v2187_v58 }
 0x1cd   : > { %764 = vrot.lane.b32.xlu2 %v752_v59, %s1960_s14  ;;  %s2512_s14 = scalar_lea.vmem %s2473_s6, %s2079_s15 }
 0x21f   : > { %v767_v60 = vpop.permute.xlu2 %766 }
 0x220   : > { %1747 = vmatpush.xpose.msk.msra.mxu1 %vm768_vm9, %v767_v60 }
 0x227   : > { %v765_v61 = vpop.permute.xlu2 %764 }
 0x228   : > { %1748 = vmatpush.xpose.msk.msra.mxu1 %vm768_vm9, %v765_v61 }
 0x22b   : > { %1749 = vmatmul.msk.f32.vlgmr.msra.gmra.mxu1 %vm768_vm9, %v752_v59 }
 0x233   : > { %1750 = vmatmul.msk.f32.gmra.mxu1 %vm768_vm9, %v2187_v58 }
 0x2a8   : > { %v794_v62 = vpop.f32.mrf.mxu1 }
 0x2a9   : > { %v801_v63 = vsel %vm800_vm10, %v794_v62, -inf }
 0x2aa   : > { %802 = vmax.xlane.f32.xlu0 %v801_v63 }
 0x2b0   : > { %v797_v0 = vpop.f32.mrf.mxu1 }
 0x2b1   : > { %v804_v1 = vsel %vm800_vm10, %v797_v0, -inf }
 0x2b2   : > { %805 = vmax.xlane.f32.xlu1 %v804_v1 }
 0x2be   : > { %892 = vrot.lane.b32.xlu0 %v2187_v58, %s1961_s24 }
 0x2c6   : > { %886 = vrot.lane.b32.xlu0 %v752_v59, %s1962_s27 }
 0x2cb   : > { %1842 = vrot.lane.b32.xlu1 %v2199_v3, %s1963_s28 }
 0x2d3   : > { %890 = vrot.lane.b32.xlu1 %v752_v59, %s1961_s24 }
 0x2db   : > { %888 = vrot.lane.b32.xlu1 %v2187_v58, %s1962_s27  ;;  %s2513_s27 = scalar_lea.vmem %s2474_s7, %s2079_s15 }
 0x2e3   : > { %1152 = vrot.lane.b32.xlu1 %v752_v59, %s1964_s30 }
 0x2eb   : > { %1023 = vrot.lane.b32.xlu1 %v752_v59, %s1965_s3 }
 0x2f3   : > { %1019 = vrot.lane.b32.xlu1 %v752_v59, %s1966_s5 }
 0x31d   : > { %v803_v5 = vpop.xlane.xlu0 %802 }
 0x31e   : > { %v807_v6 = vsub.f32 %v794_v62, %v803_v5 }
 0x320   : > { %v809_v7 = vmul.f32 1.442695, %v807_v6 }
 0x322   : > { %1875 = vpow2.f32 %v809_v7 }
 0x325   : > { %v806_v8 = vpop.xlane.xlu1 %805 }
 0x326   : > { %v808_v9 = vsub.f32 %v797_v0, %v806_v8 }
 0x328   : > { %v1876_v10 = vpop.eup %1875  ;;  %v811_v11 = vmul.f32 1.442695, %v808_v9 }
 0x329   : > { %v813_v13 = vsel %vm800_vm10, %v1876_v10, 0.0 }
 0x32a   : > { %1877 = vpow2.f32 %v811_v11  ;;  %814 = vadd.xlane.f32.xlu2 %v813_v13 }
 0x330   : > { %v1878_v14 = vpop.eup %1877  ;;  %v893_v15 = vpop.permute.xlu0 %892 }
 0x331   : > { %1783 = vmatpush.xpose.msk.msra.mxu3 %vm768_vm9, %v893_v15  ;;  %v816_v16 = vsel %vm800_vm10, %v1878_v14, 0.0 }
 0x332   : > { %817 = vadd.xlane.f32.xlu0 %v816_v16 }
 0x338   : > { %v887_v22 = vpop.permute.xlu0 %886 }
 0x33d   : > { %v1843_v17 = vpop.permute.xlu1 %1842 }
 0x33e   : > { %v1844_v18 = vunpack.i.l.bf16 %v1843_v17  ;;  %v1845_v19 = vunpack.i.h.bf16 %v1843_v17 }
 0x340   : > { %875 = vmatpush.msra.mxu2 %v1844_v18 }
 0x342   : > { %1158 = vrot.lane.b32.xlu2 %v2187_v58, %s1967_s29  ;;  %876 = vmatpush.msra.mxu2 %v1845_v19 }
 0x344   : > { %1753 = vmatpush.xpose.msk.msrb.mxu2 %vm768_vm9, %v893_v15 }
 0x345   : > { %v891_v20 = vpop.permute.xlu1 %890 }
 0x346   : > { %1156 = vrot.lane.b32.xlu0 %v752_v59, %s1967_s29  ;;  %1784 = vmatpush.xpose.msk.msra.mxu3 %vm768_vm9, %v891_v20 }
 0x348   : > { %1754 = vmatpush.xpose.msk.msrb.mxu2 %vm768_vm9, %v891_v20 }
 0x34a   : > { %1021 = vrot.lane.b32.xlu2 %v2187_v58, %s1966_s5 }
 0x34d   : > { %v889_v21 = vpop.permute.xlu1 %888 }
 0x34e   : > { %1025 = vrot.lane.b32.xlu0 %v2187_v58, %s1965_s3  ;;  %1756 = vmatmul.msk.f32.vlgmr.msra.gmra.mxu3 %vm768_vm9, %v889_v21  ;;  %s2514_s3 = scalar_lea.vmem %s2475_s8, %s2079_s15 }
 0x355   : > { %v1153_v43 = vpop.permute.xlu1 %1152 }
 0x356   : > { %1154 = vrot.lane.b32.xlu0 %v2187_v58, %s1964_s30 }
 0x35d   : > { %v1024_v50 = vpop.permute.xlu1 %1023 }
 0x365   : > { %v1020_v52 = vpop.permute.xlu1 %1019 }
 0x39d   : > { %v815_v23 = vpop.xlane.xlu2 %814 }
 0x39e   : > { %1879 = vrcp.f32 %v815_v23  ;;  %v830_v29 = vand.u32 2147483648, %v815_v23  ;;  %v828_v31 = vand.u32 2147483647, %v815_v23  ;;  %vm824_vm12 = vweird.f32 %v815_v23 }
 0x3a0   : > { %v831_v34 = vor.u32 1.1754944e-38, %v830_v29  ;;  %vm829_vm14 = vcmp.eq.f32.partialorder %v828_v31, 8.507059e+37 }
 0x3a4   : > { %v1880_v24 = vpop.eup %1879 }
 0x3a5   : > { %v820_v25 = vmul.f32 %v1880_v24, %v815_v23  ;;  %v1159_v26 = vpop.permute.xlu2 %1158  ;;  %v818_v27 = vpop.xlane.xlu0 %817  ;;  %vm825_vm11 = vweird.f32 %v1880_v24 }
 0x3a6   : > { %1881 = vrcp.f32 %v818_v27  ;;  %1765 = vmatpush.xpose.msk.msrb.mxu3 %vm768_vm9, %v1159_v26  ;;  %vm826_vm13 = vmor %vm824_vm12, %vm825_vm11  ;;  %v844_v40 = vand.u32 2147483648, %v818_v27  ;;  %v842_v42 = vand.u32 2147483647, %v818_v27  ;;  %vm838_vm0 = vweird.f32 %v818_v27 }
 0x3a7   : > { %v821_v28 = vsub.f32 1.0, %v820_v25 }
 0x3a8   : > { %v845_v45 = vor.u32 1.1754944e-38, %v844_v40  ;;  %vm843_vm3 = vcmp.eq.f32.partialorder %v842_v42, 8.507059e+37 }
 0x3a9   : > { %v822_v30 = vmul.f32 %v1880_v24, %v821_v28 }
 0x3ab   : > { %v823_v32 = vadd.f32 %v1880_v24, %v822_v30 }
 0x3ac   : > { %v1882_v33 = vpop.eup %1881 }
 0x3ad   : > { %v834_v35 = vmul.f32 %v1882_v33, %v818_v27  ;;  %v827_v36 = vsel %vm826_vm13, %v1880_v24, %v823_v32  ;;  %vm839_vm15 = vweird.f32 %v1882_v33  ;;  %v1022_v54 = vpop.permute.xlu2 %1021 }
 0x3ae   : > { %v832_v37 = vsel %vm829_vm14, %v831_v34, %v827_v36  ;;  %vm840_vm2 = vmor %vm838_vm0, %vm839_vm15 }
 0x3af   : > { %v835_v38 = vsub.f32 1.0, %v834_v35  ;;  %v847_v39 = vmul.f32 %v1876_v10, %v832_v37 }
 0x3b1   : > { %v836_v41 = vmul.f32 %v1882_v33, %v835_v38  ;;  %1751 = vmatmul.msk.f32.vlgmr.msra.gmra.mxu2 %vm800_vm10, %v847_v39 }
 0x3b3   : > { %v837_v44 = vadd.f32 %v1882_v33, %v836_v41 }
 0x3b5   : > { %v841_v46 = vsel %vm840_vm2, %v1882_v33, %v837_v44 }
 0x3b6   : > { %v846_v47 = vsel %vm843_vm3, %v845_v45, %v841_v46 }
 0x3b7   : > { %v848_v48 = vmul.f32 %v1878_v14, %v846_v47 }
 0x3b8   : > { %v1157_v49 = vpop.permute.xlu0 %1156 }
 0x3b9   : > { %1752 = vmatmul.msk.f32.gmra.mxu2 %vm800_vm10, %v848_v48  ;;  %1766 = vmatpush.xpose.msk.msrb.mxu3 %vm768_vm9, %v1157_v49 }
 0x3bc   : > { %1767 = vmatmul.msk.f32.vlgmr.msrb.gmra.mxu3 %vm768_vm9, %v1153_v43 }
 0x3c0   : > { %v1026_v51 = vpop.permute.xlu0 %1025 }
 0x3c1   : > { %1755 = vmatmul.msk.f32.vlgmr.msrb.gmra.mxu2 %vm768_vm9, %v887_v22  ;;  %1759 = vmatpush.xpose.msk.msrb.mxu0 %vm768_vm9, %v1026_v51 }
 0x3c5   : > { %1760 = vmatpush.xpose.msk.msrb.mxu0 %vm768_vm9, %v1024_v50 }
 0x3c8   : > { %v1155_v53 = vpop.permute.xlu0 %1154  ;;  %1761 = vmatmul.msk.f32.vlgmr.msrb.gmra.mxu0 %vm768_vm9, %v1020_v52 }
 0x3c9   : > { %1768 = vmatmul.msk.f32.gmra.mxu3 %vm768_vm9, %v1155_v53 }
 0x3d0   : > { %1762 = vmatmul.msk.f32.gmra.mxu0 %vm768_vm9, %v1022_v54 }
 0x3d1   : > { %v922_v55 = vpop.f32.mrf.mxu3 }
 0x3d2   : > { %v928_v56 = vsel %vm800_vm10, %v922_v55, -inf }
 0x3d3   : > { %929 = vmax.xlane.f32.xlu1 %v928_v56 }
 0x434   : > { %v878_v57 = vpop.f32.mrf.mxu2 }
 0x435   : > { %884 = vst.msk [vmem:[#allocation2] sm:$0xff] %vm768_vm9, %v878_v57 }
 0x43c   : > { %v881_v58 = vpop.f32.mrf.mxu2 }
 0x43d   : > { %885 = vst.msk [vmem:[#allocation2 + $0x8] sm:$0xff] %vm768_vm9, %v881_v58 }
 0x43f   : > { %v1185_v59 = vpop.f32.mrf.mxu3 }
 0x440   : > { %v1191_v60 = vsel %vm800_vm10, %v1185_v59, -inf }
 0x441   : > { %1192 = vmax.xlane.f32.xlu2 %v1191_v60 }
 0x444   : > { %v919_v5 = vpop.f32.mrf.mxu2 }
 0x445   : > { %v1052_v61 = vpop.f32.mrf.mxu0  ;;  %v925_v10 = vsel %vm800_vm10, %v919_v5, -inf }
 0x446   : > { %v930_v62 = vpop.xlane.xlu1 %929  ;;  %v1058_v63 = vsel %vm800_vm10, %v1052_v61, -inf }
 0x447   : > { %v932_v0 = vsub.f32 %v922_v55, %v930_v62  ;;  %1059 = vmax.xlane.f32.xlu0 %v1058_v63 }
 0x449   : > { %v935_v1 = vmul.f32 1.442695, %v932_v0 }
 0x44b   : > { %1883 = vpow2.f32 %v935_v1 }
 0x44c   : > { %v1188_v6 = vpop.f32.mrf.mxu3 }
 0x44d   : > { %v1055_v7 = vpop.f32.mrf.mxu0  ;;  %v1194_v8 = vsel %vm800_vm10, %v1188_v6, -inf }
 0x44e   : > { %1195 = vmax.xlane.f32.xlu2 %v1194_v8  ;;  %v1061_v9 = vsel %vm800_vm10, %v1055_v7, -inf }
 0x44f   : > { %1062 = vmax.xlane.f32.xlu1 %v1061_v9  ;;  %926 = vmax.xlane.f32.xlu0 %v925_v10 }
 0x451   : > { %v2237_v11 = vpop.eup %1883 }
 0x452   : > { %v940_v13 = vsel %vm800_vm10, %v2237_v11, 0.0 }
 0x456   : > { %941 = vadd.xlane.f32.xlu2 %v940_v13 }
 0x463   : > { %1847 = vrot.lane.b32.xlu0 %v2199_v3, %s1968_s16 }
 0x4b4   : > { %v1193_v14 = vpop.xlane.xlu2 %1192 }
 0x4b5   : > { %v1197_v15 = vsub.f32 %v1185_v59, %v1193_v14 }
 0x4b7   : > { %v1199_v16 = vmul.f32 1.442695, %v1197_v15 }
 0x4b9   : > { %1885 = vpow2.f32 %v1199_v16 }
 0x4ba   : > { %v1060_v17 = vpop.xlane.xlu0 %1059 }
 0x4bb   : > { %v1064_v18 = vsub.f32 %v1052_v61, %v1060_v17 }
 0x4bd   : > { %v1066_v19 = vmul.f32 1.442695, %v1064_v18 }
 0x4bf   : > { %v2242_v20 = vpop.eup %1885  ;;  %1887 = vpow2.f32 %v1066_v19 }
 0x4c0   : > { %v1203_v21 = vsel %vm800_vm10, %v2242_v20, 0.0 }
 0x4c1   : > { %v1196_v22 = vpop.xlane.xlu2 %1195  ;;  %1204 = vadd.xlane.f32.xlu1 %v1203_v21 }
 0x4c2   : > { %v1198_v23 = vsub.f32 %v1188_v6, %v1196_v22  ;;  %v1063_v24 = vpop.xlane.xlu1 %1062  ;;  %v927_v25 = vpop.xlane.xlu0 %926 }
 0x4c3   : > { %v1065_v26 = vsub.f32 %v1055_v7, %v1063_v24  ;;  %v931_v27 = vsub.f32 %v919_v5, %v927_v25 }
 0x4c4   : > { %v1201_v28 = vmul.f32 1.442695, %v1198_v23 }
 0x4c5   : > { %v2246_v29 = vpop.eup %1887  ;;  %v1068_v30 = vmul.f32 1.442695, %v1065_v26  ;;  %v933_v31 = vmul.f32 1.442695, %v931_v27 }
 0x4c6   : > { %1889 = vpow2.f32 %v1201_v28  ;;  %v1070_v32 = vsel %vm800_vm10, %v2246_v29, 0.0 }
 0x4c7   : > { %1891 = vpow2.f32 %v1068_v30  ;;  %1071 = vadd.xlane.f32.xlu2 %v1070_v32 }
 0x4c8   : > { %1893 = vpow2.f32 %v933_v31 }
 0x4c9   : > { %v2264_v42 = vpop.xlane.xlu2 %941 }
 0x4ca   : > { %v968_v1 = vand.u32 2147483648, %v2264_v42  ;;  %vm962_vm11 = vweird.f32 %v2264_v42  ;;  %v966_v22 = vand.u32 2147483647, %v2264_v42 }
 0x4cc   : > { %v2250_v33 = vpop.eup %1889  ;;  %v969_v26 = vor.u32 1.1754944e-38, %v968_v1  ;;  %vm967_vm0 = vcmp.eq.f32.partialorder %v966_v22, 8.507059e+37 }
 0x4cd   : > { %v2252_v34 = vpop.eup %1891  ;;  %v1206_v35 = vsel %vm800_vm10, %v2250_v33, 0.0 }
 0x4ce   : > { %v2256_v36 = vpop.eup %1893  ;;  %1207 = vadd.xlane.f32.xlu1 %v1206_v35  ;;  %v1073_v37 = vsel %vm800_vm10, %v2252_v34, 0.0 }
 0x4cf   : > { %1074 = vadd.xlane.f32.xlu2 %v1073_v37  ;;  %v937_v38 = vsel %vm800_vm10, %v2256_v36, 0.0 }
 0x4d0   : > { %938 = vadd.xlane.f32.xlu0 %v937_v38 }
 0x4d5   : > { %v1848_v39 = vpop.permute.xlu0 %1847 }
 0x4d6   : > { %v1849_v40 = vunpack.i.l.bf16 %v1848_v39  ;;  %v1850_v41 = vunpack.i.h.bf16 %v1848_v39 }
 0x4d8   : > { %999 = vmatpush.msra.mxu2 %v1849_v40 }
 0x4da   : > { %1000 = vmatpush.msra.mxu2 %v1850_v41 }
 0x4e4   : > { %1857 = vrot.lane.b32.xlu0 %v2199_v3, %s1969_s19 }
 0x4e7   : > { %1852 = vrot.lane.b32.xlu1 %v2199_v3, %s1970_s25 }
 0x534   : > { %v2273_v47 = vpop.xlane.xlu1 %1204 }
 0x53a   : > { %v1072_v43 = vpop.xlane.xlu2 %1071 }
 0x53b   : > { %1895 = vrcp.f32 %v1072_v43  ;;  %v1087_v7 = vand.u32 2147483648, %v1072_v43  ;;  %vm1081_vm8 = vweird.f32 %v1072_v43  ;;  %v1085_v9 = vand.u32 2147483647, %v1072_v43 }
 0x53c   : > { %1897 = vrcp.f32 %v2264_v42 }
 0x53d   : > { %v1088_v23 = vor.u32 1.1754944e-38, %v1087_v7  ;;  %vm1086_vm15 = vcmp.eq.f32.partialorder %v1085_v9, 8.507059e+37  ;;  %v760_v7 = vld [vmem:[%s2105_s0 + $0x18] sm:$0xff]  ;;  %v758_v9 = vld [vmem:[%s2105_s0 + $0x8] sm:$0xff] }
 0x53e   : > { %1308 = vmatpush.msra.mxu0 %v760_v7  ;;  %v1506_v7 = vld [vmem:[%s2136_s22 + $0x70] sm:$0xff] }
 0x541   : > { %v2267_v44 = vpop.eup %1895  ;;  %v2282_v54 = vpop.xlane.xlu1 %1207 }
 0x542   : > { %v2269_v45 = vpop.xlane.xlu2 %1074  ;;  %v2271_v46 = vpop.eup %1897  ;;  %v1077_v49 = vmul.f32 %v2267_v44, %v1072_v43  ;;  %vm1082_vm5 = vweird.f32 %v2267_v44 }
 0x543   : > { %1899 = vrcp.f32 %v2269_v45  ;;  %v939_v48 = vpop.xlane.xlu0 %938  ;;  %v958_v3 = vmul.f32 %v2271_v46, %v2264_v42  ;;  %vm963_vm7 = vweird.f32 %v2271_v46  ;;  %vm2299_vm12 = vmor %vm1081_vm8, %vm1082_vm5  ;;  %v1101_v37 = vand.u32 2147483648, %v2269_v45 }
 0x544   : > { %1901 = vrcp.f32 %v939_v48  ;;  %v1078_v50 = vsub.f32 1.0, %v1077_v49  ;;  %v954_v61 = vand.u32 2147483648, %v939_v48  ;;  %v952_v0 = vand.u32 2147483647, %v939_v48  ;;  %vm2313_vm14 = vmor %vm962_vm11, %vm963_vm7 }
 0x545   : > { %1903 = vrcp.f32 %v2273_v47  ;;  %v959_v53 = vsub.f32 1.0, %v958_v3  ;;  %vm948_vm6 = vweird.f32 %v939_v48  ;;  %vm1095_vm3 = vweird.f32 %v2269_v45 }
 0x546   : > { %v1079_v57 = vmul.f32 %v2267_v44, %v1078_v50  ;;  %1905 = vrcp.f32 %v2282_v54  ;;  %v955_v10 = vor.u32 1.1754944e-38, %v954_v61  ;;  %vm953_vm13 = vcmp.eq.f32.partialorder %v952_v0, 8.507059e+37 }
 0x547   : > { %v960_v60 = vmul.f32 %v2271_v46, %v959_v53  ;;  %v1099_v43 = vand.u32 2147483647, %v2269_v45  ;;  %v1220_v49 = vand.u32 2147483648, %v2273_v47  ;;  %v1102_v50 = vor.u32 1.1754944e-38, %v1101_v37 }
 0x548   : > { %v1080_v5 = vadd.f32 %v2267_v44, %v1079_v57 }
 0x549   : > { %v2280_v51 = vpop.eup %1899  ;;  %v961_v13 = vadd.f32 %v2271_v46, %v960_v60  ;;  %vm1100_vm8 = vcmp.eq.f32.partialorder %v1099_v43, 8.507059e+37  ;;  %v1232_v60 = vand.u32 2147483647, %v2282_v54  ;;  %v1378_v43 = vld [vmem:[%s2122_s26 + $0x8] sm:$0xff] }
 0x54a   : > { %v1902_v52 = vpop.eup %1901  ;;  %v1091_v58 = vmul.f32 %v2280_v51, %v2269_v45  ;;  %v1084_v21 = vsel %vm2299_vm12, %v2267_v44, %v1080_v5  ;;  %vm1096_vm2 = vweird.f32 %v2280_v51  ;;  %v1218_v45 = vand.u32 2147483647, %v2273_v47 }
 0x54b   : > { %v944_v55 = vmul.f32 %v1902_v52, %v939_v48  ;;  %v2284_v56 = vpop.eup %1903  ;;  %vm949_vm4 = vweird.f32 %v1902_v52  ;;  %v965_v28 = vsel %vm2313_vm14, %v2271_v46, %v961_v13  ;;  %v1089_v35 = vsel %vm1086_vm15, %v1088_v23, %v1084_v21  ;;  %vm2332_vm5 = vmor %vm1095_vm3, %vm1096_vm2  ;;  %v1864_v21 = vld [vmem:[%s2512_s14] ss:$0 sm:$0xff] }
 0x54c   : > { %v1210_v62 = vmul.f32 %v2284_v56, %v2273_v47  ;;  %v1092_v6 = vsub.f32 1.0, %v1091_v58  ;;  %vm950_vm9 = vmor %vm948_vm6, %vm949_vm4  ;;  %v2303_v17 = vpop.eup %1905  ;;  %v970_v40 = vsel %vm967_vm0, %v969_v26, %v965_v28  ;;  %v1104_v42 = vmul.f32 %v2246_v29, %v1089_v35 }
 0x54d   : > { %v945_v59 = vsub.f32 1.0, %v944_v55  ;;  %v1224_v31 = vmul.f32 %v2303_v17, %v2282_v54  ;;  %vm1215_vm4 = vweird.f32 %v2284_v56  ;;  %vm1214_vm6 = vweird.f32 %v2273_v47 }
 0x54e   : > { %v1211_v14 = vsub.f32 1.0, %v1210_v62  ;;  %v1093_v18 = vmul.f32 %v2280_v51, %v1092_v6  ;;  %vm1216_vm7 = vmor %vm1214_vm6, %vm1215_vm4  ;;  %v1221_v58 = vor.u32 1.1754944e-38, %v1220_v49  ;;  %vm1229_vm11 = vweird.f32 %v2303_v17 }
 0x54f   : > { %v946_v63 = vmul.f32 %v1902_v52, %v945_v59  ;;  %v1225_v46 = vsub.f32 1.0, %v1224_v31  ;;  %vm1228_vm12 = vweird.f32 %v2282_v54  ;;  %vm1233_vm14 = vcmp.eq.f32.partialorder %v1232_v60, 8.507059e+37  ;;  %v1866_v60 = vld [vmem:[%s2514_s3] ss:$0 sm:$0xff] }
 0x550   : > { %v1212_v30 = vmul.f32 %v2284_v56, %v1211_v14  ;;  %vm1149_vm15 = vcmask 195712   ;;  %vm1282_vm0 = vcmask 261312  }
 0x551   : > { %v947_v8 = vadd.f32 %v1902_v52, %v946_v63  ;;  %v1226_v55 = vmul.f32 %v2303_v17, %v1225_v46 }
 0x552   : > { %v1213_v44 = vadd.f32 %v2284_v56, %v1212_v30 }
 0x553   : > { %v951_v16 = vsel %vm950_vm9, %v1902_v52, %v947_v8  ;;  %v972_v52 = vmul.f32 %v2237_v11, %v970_v40  ;;  %vm1219_vm9 = vcmp.eq.f32.partialorder %v1218_v45, 8.507059e+37  ;;  %v1227_v47 = vadd.f32 %v2303_v17, %v1226_v55  ;;  %v759_v8 = vld [vmem:[%s2105_s0 + $0x10] sm:$0xff] }
 0x554   : > { %v956_v19 = vsel %vm953_vm13, %v955_v10, %v951_v16  ;;  %v1217_v53 = vsel %vm1216_vm7, %v2284_v56, %v1213_v44  ;;  %v1234_v11 = vand.u32 2147483648, %v2282_v54  ;;  %vm1230_vm13 = vmor %vm1228_vm12, %vm1229_vm11  ;;  %1309 = vmatpush.msra.mxu0 %v759_v8  ;;  %v757_v10 = vld [vmem:[%s2105_s0] sm:$0xff] }
 0x555   : > { %v971_v24 = vmul.f32 %v2256_v36, %v956_v19  ;;  %v1094_v36 = vadd.f32 %v2280_v51, %v1093_v18  ;;  %v1231_v61 = vsel %vm1230_vm13, %v2303_v17, %v1227_v47  ;;  %v1377_v44 = vld [vmem:[%s2122_s26] sm:$0xff] }
 0x556   : > { %v1858_v27 = vpop.permute.xlu0 %1857  ;;  %1310 = vmatpush.msra.mxu0 %v758_v9  ;;  %v1505_v9 = vld [vmem:[%s2136_s22 + $0x68] sm:$0xff] }
 0x557   : > { %1757 = vmatmul.msk.f32.vlgmr.msra.gmra.mxu2 %vm800_vm10, %v971_v24  ;;  %v1859_v32 = vunpack.i.l.bf16 %v1858_v27  ;;  %v1860_v39 = vunpack.i.h.bf16 %v1858_v27  ;;  %v1098_v29 = vsel %vm2332_vm5, %v2280_v51, %v1094_v36  ;;  %v1222_v51 = vsel %vm1219_vm9, %v1221_v58, %v1217_v53 }
 0x558   : > { %v1103_v57 = vsel %vm1100_vm8, %v1102_v50, %v1098_v29  ;;  %v1237_v56 = vmul.f32 %v2242_v20, %v1222_v51  ;;  %1311 = vmatpush.msra.mxu0 %v757_v10 }
 0x559   : > { %1132 = vmatpush.msrb.mxu1 %v1859_v32  ;;  %v1853_v38 = vpop.permute.xlu1 %1852  ;;  %v1105_v59 = vmul.f32 %v2252_v34, %v1103_v57  ;;  %v1235_v34 = vor.u32 1.1754944e-38, %v1234_v11 }
 0x55a   : > { %v1854_v41 = vunpack.i.l.bf16 %v1853_v38  ;;  %v1855_v3 = vunpack.i.h.bf16 %v1853_v38 }
 0x55b   : > { %1133 = vmatpush.msrb.mxu1 %v1860_v39  ;;  %v1236_v62 = vsel %vm1233_vm14, %v1235_v34, %v1231_v61 }
 0x55c   : > { %1763 = vmatmul.msk.f32.vlgmr.msrb.gmra.mxu1 %vm800_vm10, %v1104_v42  ;;  %1265 = vmatpush.msrb.mxu2 %v1854_v41  ;;  %v1238_v63 = vmul.f32 %v2250_v33, %v1236_v62  ;;  %v1380_v41 = vld [vmem:[%s2122_s26 + $0x18] sm:$0xff]  ;;  %v1379_v42 = vld [vmem:[%s2122_s26 + $0x10] sm:$0xff] }
 0x55d   : > { %1403 = vmatpush.msra.mxu1 %v1380_v41 }
 0x55e   : > { %1266 = vmatpush.msrb.mxu2 %v1855_v3 }
 0x55f   : > { %1758 = vmatmul.msk.f32.gmra.mxu2 %vm800_vm10, %v972_v52  ;;  %1404 = vmatpush.msra.mxu1 %v1379_v42 }
 0x561   : > { %1405 = vmatpush.msra.mxu1 %v1378_v43  ;;  %v1494_v43 = vld [vmem:[%s2136_s22 + $0x10] sm:$0xff] }
 0x563   : > { %1406 = vmatpush.msra.mxu1 %v1377_v44  ;;  %v1493_v44 = vld [vmem:[%s2136_s22 + $0x8] sm:$0xff] }
 0x564   : > { %1764 = vmatmul.msk.f32.gmra.mxu1 %vm800_vm10, %v1105_v59  ;;  %v1865_v59 = vld [vmem:[%s2513_s27] ss:$0 sm:$0xff] }
 0x567   : > { %1769 = vmatmul.msk.f32.vlgmr.msrb.gmra.mxu2 %vm800_vm10, %v1237_v56 }
 0x56f   : > { %1770 = vmatmul.msk.f32.gmra.mxu2 %vm800_vm10, %v1238_v63  ;;  %vm1016_vm10 = vcmask 130112  }
 0x5d9   : > { %v1135_v0 = vpop.f32.mrf.mxu1 }
 0x5da   : > { %1143 = vrot.lane.b32.xlu0 %v1135_v0, %s1971_s17  ;;  %v1002_v1 = vpop.f32.mrf.mxu2 }
 0x5db   : > { %1010 = vrot.lane.b32.xlu2 %v1002_v1, %s1972_s18 }
 0x5e1   : > { %v1138_v5 = vpop.f32.mrf.mxu1 }
 0x5e2   : > { %v1005_v20 = vpop.f32.mrf.mxu2 }
 0x5e3   : > { %1012 = vrot.lane.b32.xlu1 %v1005_v20, %s1972_s18 }
 0x5ea   : > { %v1268_v54 = vpop.f32.mrf.mxu2 }
 0x5eb   : > { %1276 = vrot.lane.b32.xlu0 %v1268_v54, %s1973_s20 }
 0x5f2   : > { %v1271_v6 = vpop.f32.mrf.mxu2 }
 0x5f3   : > { %1145 = vrot.lane.b32.xlu0 %v1138_v5, %s1971_s17  ;;  %1278 = vrot.lane.b32.xlu2 %v1271_v6, %s1973_s20  ;;  %v1507_v6 = vld [vmem:[%s2136_s22 + $0x78] sm:$0xff] }
 0x5f4   : > { %1508 = vmatpush.msra.mxu3 %v1507_v6 }
 0x5f6   : > { %1509 = vmatpush.msra.mxu3 %v1506_v7 }
 0x5f8   : > { %1510 = vmatpush.msra.mxu3 %v1505_v9 }
 0x635   : > { %v1011_v33 = vpop.permute.xlu2 %1010 }
 0x636   : > { %1017 = vst.msk [vmem:[#allocation2] sm:$0xff] %vm1016_vm10, %v1011_v33  ;;  %v1867_v33 = vld [vmem:[%s631_s13] ss:$0 sm:$0xff] }
 0x64c   : > { %v1144_v13 = vpop.permute.xlu0 %1143 }
 0x64d   : > { %1150 = vst.msk [vmem:[#allocation2] sm:$0xff] %vm1149_vm15, %v1144_v13  ;;  %v1279_v18 = vpop.permute.xlu2 %1278  ;;  %v1504_v13 = vld [vmem:[%s2136_s22 + $0x60] sm:$0xff] }
 0x64e   : > { %1511 = vmatpush.msra.mxu3 %v1504_v13 }
 0x655   : > { %v1013_v14 = vpop.permute.xlu1 %1012 }
 0x656   : > { %1018 = vst.msk [vmem:[#allocation2 + $0x8] sm:$0xff] %vm1016_vm10, %v1013_v14 }
 0x65d   : > { %v1277_v15 = vpop.permute.xlu0 %1276 }
 0x65e   : > { %1283 = vst.msk [vmem:[#allocation2] sm:$0xff] %vm1282_vm0, %v1277_v15  ;;  %v1503_v15 = vld [vmem:[%s2136_s22 + $0x58] sm:$0xff] }
 0x65f   : > { %1512 = vmatpush.msra.mxu3 %v1503_v15 }
 0x665   : > { %v1146_v16 = vpop.permute.xlu0 %1145  ;;  %v1285_v17 = vld [vmem:[#allocation2] sm:$0xff] }
 0x666   : > { %1151 = vst.msk [vmem:[#allocation2 + $0x8] sm:$0xff] %vm1149_vm15, %v1146_v16  ;;  %1771 = vmatmul.msk.f32.vlgmr.msra.gmra.mxu0 %vm658_vm1, %v1285_v17  ;;  %v1502_v17 = vld [vmem:[%s2136_s22 + $0x50] sm:$0xff] }
 0x667   : > { %1284 = vst.msk [vmem:[#allocation2 + $0x8] sm:$0xff] %vm1282_vm0, %v1279_v18  ;;  %1513 = vmatpush.msra.mxu3 %v1502_v17 }
 0x66e   : > { %v1286_v19 = vld [vmem:[#allocation2 + $0x8] sm:$0xff] }
 0x66f   : > { %1772 = vmatmul.msk.f32.gmra.mxu0 %vm658_vm1, %v1286_v19  ;;  %v1501_v19 = vld [vmem:[%s2136_s22 + $0x48] sm:$0xff] }
 0x670   : > { %1514 = vmatpush.msra.mxu3 %v1501_v19 }
 0x6e3   : > { %v1313_v22 = vpop.f32.mrf.mxu0 }
 0x6e4   : > { %v1314_v23 = vadd.f32 %v1864_v21, %v1313_v22 }
 0x6e6   : > { %v2371_v24 = vadd.f32 %v1314_v23, %v2147_v2 }
 0x6e8   : > { %v1323_v25 = vsel %vm658_vm1, %v2371_v24, 0.0 }
 0x6e9   : > { %1324 = vadd.xlane.f32.xlu1 %v1323_v25  ;;  %v1500_v25 = vld [vmem:[%s2136_s22 + $0x40] sm:$0xff] }
 0x6ea   : > { %1515 = vmatpush.msra.mxu3 %v1500_v25 }
 0x6ec   : > { %v1316_v26 = vpop.f32.mrf.mxu0 }
 0x6ed   : > { %v1317_v27 = vadd.f32 %v1864_v21, %v1316_v26 }
 0x6ef   : > { %v2376_v28 = vadd.f32 %v1317_v27, %v2152_v4  ;;  %v1499_v27 = vld [vmem:[%s2136_s22 + $0x38] sm:$0xff] }
 0x6f0   : > { %1516 = vmatpush.msra.mxu3 %v1499_v27 }
 0x6f1   : > { %v1326_v30 = vsel %vm658_vm1, %v2376_v28, 0.0 }
 0x6f2   : > { %1327 = vadd.xlane.f32.xlu0 %v1326_v30 }
 0x75c   : > { %v1325_v31 = vpop.xlane.xlu1 %1324 }
 0x75d   : > { %v1329_v2 = vmul.f32 %v1325_v31, %v2156_v12  ;;  %v1498_v31 = vld [vmem:[%s2136_s22 + $0x30] sm:$0xff] }
 0x75e   : > { %1517 = vmatpush.msra.mxu3 %v1498_v31 }
 0x75f   : > { %v1331_v32 = vsub.f32 %v2371_v24, %v1329_v2 }
 0x761   : > { %v1333_v35 = vmul.f32 %v1331_v32, %v1331_v32 }
 0x763   : > { %v1335_v36 = vsel %vm658_vm1, %v1333_v35, 0.0 }
 0x764   : > { %1336 = vadd.xlane.f32.xlu2 %v1335_v36 }
 0x765   : > { %v1328_v37 = vpop.xlane.xlu0 %1327 }
 0x766   : > { %v1330_v4 = vmul.f32 %v1328_v37, %v2156_v12 }
 0x768   : > { %v1332_v38 = vsub.f32 %v2376_v28, %v1330_v4  ;;  %v1496_v4 = vld [vmem:[%s2136_s22 + $0x20] sm:$0xff] }
 0x76a   : > { %v1334_v39 = vmul.f32 %v1332_v38, %v1332_v38 }
 0x76c   : > { %v1338_v40 = vsel %vm658_vm1, %v1334_v39, 0.0  ;;  %v1495_v39 = vld [vmem:[%s2136_s22 + $0x18] sm:$0xff] }
 0x76d   : > { %1339 = vadd.xlane.f32.xlu1 %v1338_v40 }
 0x7d7   : > { %v1337_v46 = vpop.xlane.xlu2 %1336 }
 0x7d8   : > { %v1341_v48 = vmul.f32 %v1337_v46, %v2156_v12 }
 0x7da   : > { %v1343_v49 = vadd.f32 1e-06, %v1341_v48  ;;  %v1492_v48 = vld [vmem:[%s2136_s22] sm:$0xff] }
 0x7dc   : > { %1907 = vrsqrt.f32 %v1343_v49  ;;  %vm1351_vm3 = vweird.f32 %v1343_v49 }
 0x7e0   : > { %v1340_v3 = vpop.xlane.xlu1 %1339 }
 0x7e1   : > { %v1342_v29 = vmul.f32 %v1340_v3, %v2156_v12 }
 0x7e2   : > { %v1908_v45 = vpop.eup %1907 }
 0x7e3   : > { %v1346_v50 = vmul.f32 %v1908_v45, %v1343_v49  ;;  %v1344_v52 = vadd.f32 1e-06, %v1342_v29  ;;  %vm1352_vm2 = vweird.f32 %v1908_v45 }
 0x7e4   : > { %vm1353_vm4 = vmor %vm1351_vm3, %vm1352_vm2 }
 0x7e5   : > { %v1347_v53 = vmul.f32 %v1908_v45, %v1346_v50  ;;  %1909 = vrsqrt.f32 %v1344_v52  ;;  %vm1361_vm6 = vweird.f32 %v1344_v52 }
 0x7e7   : > { %v1348_v55 = vmul.f32 0.5, %v1347_v53 }
 0x7e9   : > { %v1349_v57 = vsub.f32 1.5, %v1348_v55 }
 0x7eb   : > { %v1910_v58 = vpop.eup %1909  ;;  %v1350_v51 = vmul.f32 %v1908_v45, %v1349_v57 }
 0x7ec   : > { %v1356_v47 = vmul.f32 %v1910_v58, %v1344_v52  ;;  %vm1362_vm5 = vweird.f32 %v1910_v58 }
 0x7ed   : > { %v1354_v12 = vsel %vm1353_vm4, %v1908_v45, %v1350_v51  ;;  %vm1363_vm7 = vmor %vm1361_vm6, %vm1362_vm5 }
 0x7ee   : > { %v1365_v11 = vmul.f32 %v1354_v12, %v1331_v32  ;;  %v1357_v56 = vmul.f32 %v1910_v58, %v1356_v47  ;;  %v1497_v32 = vld [vmem:[%s2136_s22 + $0x28] sm:$0xff] }
 0x7ef   : > { %1518 = vmatpush.msra.mxu3 %v1497_v32 }
 0x7f0   : > { %v1370_v61 = vmul.f32 %v1865_v59, %v1365_v11  ;;  %v1358_v34 = vmul.f32 0.5, %v1357_v56 }
 0x7f1   : > { %1519 = vmatpush.msra.mxu3 %v1496_v4 }
 0x7f2   : > { %v1359_v62 = vsub.f32 1.5, %v1358_v34  ;;  %v1375_v63 = vadd.f32 %v1866_v60, %v1370_v61 }
 0x7f3   : > { %1520 = vmatpush.msra.mxu3 %v1495_v39 }
 0x7f4   : > { %v1360_v0 = vmul.f32 %v1910_v58, %v1359_v62  ;;  %1773 = vmatmul.msk.f32.vlgmr.msra.gmra.mxu1 %vm658_vm1, %v1375_v63 }
 0x7f5   : > { %1521 = vmatpush.msra.mxu3 %v1494_v43 }
 0x7f6   : > { %v1364_v1 = vsel %vm1363_vm7, %v1910_v58, %v1360_v0 }
 0x7f7   : > { %v1366_v20 = vmul.f32 %v1364_v1, %v1332_v38  ;;  %1522 = vmatpush.msra.mxu3 %v1493_v44 }
 0x7f9   : > { %v1371_v54 = vmul.f32 %v1865_v59, %v1366_v20  ;;  %1523 = vmatpush.msra.mxu3 %v1492_v48 }
 0x7fb   : > { %v1376_v5 = vadd.f32 %v1866_v60, %v1371_v54 }
 0x7fd   : > { %1774 = vmatmul.msk.f32.gmra.mxu1 %vm658_vm1, %v1376_v5 }
 0x871   : > { %v1408_v8 = vpop.f32.mrf.mxu1 }
 0x872   : > { %v2412_v10 = vadd.f32 %v1867_v33, %v1408_v8 }
 0x874   : > { %v2416_v14 = vmul.f32 0.70710677, %v2412_v10 }
 0x876   : > { %v1422_v16 = vand.u32 2147483647, %v2416_v14  ;;  %vm1418_vm0 = vcmp.ge.f32.partialorder %v2416_v14, 0.0 }
 0x878   : > { %v1424_v18 = vmul.f32 0.3275911, %v1422_v16  ;;  %v1474_v50 = vsub.f32 0.0, %v1422_v16 }
 0x87a   : > { %v1426_v21 = vadd.f32 1.0, %v1424_v18  ;;  %v1411_v22 = vpop.f32.mrf.mxu1  ;;  %v1476_v51 = vmul.f32 %v1474_v50, %v1422_v16 }
 0x87b   : > { %v2422_v23 = vadd.f32 %v1867_v33, %v1411_v22 }
 0x87c   : > { %1911 = vrcp.f32 %v1426_v21  ;;  %v1439_v40 = vand.u32 2147483648, %v1426_v21  ;;  %v1437_v42 = vand.u32 2147483647, %v1426_v21  ;;  %vm1433_vm9 = vweird.f32 %v1426_v21 }
 0x87d   : > { %v2426_v26 = vmul.f32 0.70710677, %v2422_v23  ;;  %v1478_v61 = vmul.f32 1.442695, %v1476_v51  ;;  %v1415_v39 = vmul.f32 0.5, %v2422_v23 }
 0x87e   : > { %v1440_v49 = vor.u32 1.1754944e-38, %v1439_v40  ;;  %vm1438_vm12 = vcmp.eq.f32.partialorder %v1437_v42, 8.507059e+37 }
 0x87f   : > { %v1423_v30 = vand.u32 2147483647, %v2426_v26  ;;  %vm1419_vm2 = vcmp.ge.f32.partialorder %v2426_v26, 0.0 }
 0x881   : > { %v1425_v2 = vmul.f32 0.3275911, %v1423_v30  ;;  %v1475_v63 = vsub.f32 0.0, %v1423_v30 }
 0x882   : > { %v1912_v35 = vpop.eup %1911 }
 0x883   : > { %v1429_v36 = vmul.f32 %v1912_v35, %v1426_v21  ;;  %v1427_v37 = vadd.f32 1.0, %v1425_v2  ;;  %vm1434_vm8 = vweird.f32 %v1912_v35  ;;  %v1477_v6 = vmul.f32 %v1475_v63, %v1423_v30 }
 0x884   : > { %vm1435_vm11 = vmor %vm1433_vm9, %vm1434_vm8  ;;  %v1974_v21 = vmov -1.0   ;;  %v1414_v30 = vmul.f32 0.5, %v2412_v10  ;;  %v1868_v10 = vld [vmem:[%s639_s23] ss:$0 sm:$0xff] }
 0x885   : > { %v1430_v38 = vsub.f32 1.0, %v1429_v36  ;;  %1913 = vrcp.f32 %v1427_v37  ;;  %v1453_v58 = vand.u32 2147483648, %v1427_v37  ;;  %v1451_v47 = vand.u32 2147483647, %v1427_v37 }
 0x886   : > { %vm1447_vm14 = vweird.f32 %v1427_v37  ;;  %1915 = vpow2.f32 %v1478_v61  ;;  %v1480_v13 = vmul.f32 1.442695, %v1477_v6  ;;  %v1420_v22 = vsel %vm1418_vm0, 1.0, %v1974_v21 }
 0x887   : > { %v1431_v41 = vmul.f32 %v1912_v35, %v1430_v38  ;;  %v1454_v60 = vor.u32 1.1754944e-38, %v1453_v58  ;;  %vm1452_vm15 = vcmp.eq.f32.partialorder %v1451_v47, 8.507059e+37  ;;  %v1421_v4 = vsel %vm1419_vm2, 1.0, %v1974_v21 }
 0x888   : > { %1917 = vpow2.f32 %v1480_v13 }
 0x889   : > { %v1432_v46 = vadd.f32 %v1912_v35, %v1431_v41 }
 0x88b   : > { %v1914_v3 = vpop.eup %1913  ;;  %v1436_v29 = vsel %vm1435_vm11, %v1912_v35, %v1432_v46 }
 0x88c   : > { %v1441_v45 = vsel %vm1438_vm12, %v1440_v49, %v1436_v29  ;;  %v1443_v52 = vmul.f32 %v1914_v3, %v1427_v37  ;;  %vm1448_vm13 = vweird.f32 %v1914_v3  ;;  %v1916_v15 = vpop.eup %1915 }
 0x88d   : > { %v1456_v53 = vmul.f32 1.0614054, %v1441_v45  ;;  %vm1449_vm10 = vmor %vm1447_vm14, %vm1448_vm13 }
 0x88e   : > { %v1444_v55 = vsub.f32 1.0, %v1443_v52  ;;  %v1918_v35 = vpop.eup %1917 }
 0x88f   : > { %v1458_v57 = vadd.f32 -1.4531521, %v1456_v53 }
 0x890   : > { %v1445_v59 = vmul.f32 %v1914_v3, %v1444_v55 }
 0x891   : > { %v1460_v12 = vmul.f32 %v1458_v57, %v1441_v45 }
 0x892   : > { %v1446_v11 = vadd.f32 %v1914_v3, %v1445_v59 }
 0x893   : > { %v1462_v56 = vadd.f32 1.4214138, %v1460_v12 }
 0x894   : > { %v1450_v34 = vsel %vm1449_vm10, %v1914_v3, %v1446_v11 }
 0x895   : > { %v1464_v62 = vmul.f32 %v1462_v56, %v1441_v45  ;;  %v1455_v0 = vsel %vm1452_vm15, %v1454_v60, %v1450_v34 }
 0x896   : > { %v1457_v1 = vmul.f32 1.0614054, %v1455_v0 }
 0x897   : > { %v1466_v20 = vadd.f32 -0.28449672, %v1464_v62 }
 0x898   : > { %v1459_v54 = vadd.f32 -1.4531521, %v1457_v1 }
 0x899   : > { %v1468_v5 = vmul.f32 %v1466_v20, %v1441_v45 }
 0x89a   : > { %v1461_v33 = vmul.f32 %v1459_v54, %v1455_v0 }
 0x89b   : > { %v1470_v7 = vadd.f32 0.2548296, %v1468_v5 }
 0x89c   : > { %v1463_v8 = vadd.f32 1.4214138, %v1461_v33 }
 0x89d   : > { %v1472_v9 = vmul.f32 %v1470_v7, %v1441_v45 }
 0x89e   : > { %v1465_v16 = vmul.f32 %v1463_v8, %v1455_v0 }
 0x89f   : > { %v1482_v17 = vmul.f32 %v1916_v15, %v1472_v9 }
 0x8a0   : > { %v1467_v18 = vadd.f32 -0.28449672, %v1465_v16 }
 0x8a1   : > { %v1484_v19 = vsub.f32 1.0, %v1482_v17 }
 0x8a2   : > { %v1469_v25 = vmul.f32 %v1467_v18, %v1455_v0 }
 0x8a3   : > { %v1486_v27 = vmul.f32 %v1484_v19, %v1420_v22 }
 0x8a4   : > { %v1471_v31 = vadd.f32 0.2548296, %v1469_v25 }
 0x8a5   : > { %v1488_v2 = vadd.f32 1.0, %v1486_v27 }
 0x8a6   : > { %v1473_v32 = vmul.f32 %v1471_v31, %v1455_v0 }
 0x8a7   : > { %v1490_v36 = vmul.f32 %v1488_v2, %v1414_v30 }
 0x8a8   : > { %v1483_v14 = vmul.f32 %v1918_v35, %v1473_v32 }
 0x8a9   : > { %1524 = vmatmul.f32.vlgmr.msra.gmra.mxu3 %v1490_v36 }
 0x8aa   : > { %v1485_v37 = vsub.f32 1.0, %v1483_v14 }
 0x8ac   : > { %v1487_v38 = vmul.f32 %v1485_v37, %v1421_v4 }
 0x8ae   : > { %v1489_v40 = vadd.f32 1.0, %v1487_v38 }
 0x8b0   : > { %v1491_v41 = vmul.f32 %v1489_v40, %v1415_v39 }
 0x8b2   : > { %1527 = vmatmul.f32.gmra.mxu3 %v1491_v41 }
 0x92c   : > { %v1525_v42 = vpop.f32.mrf.mxu3 }
 0x92d   : > { %v1531_v43 = vadd.f32 %v1525_v42, %v2371_v24 }
 0x92f   : > { %v1537_v26 = vadd.f32 %v1868_v10, %v1531_v43 }
 0x931   : > { %1539 = vst.msk [vmem:[%s2141_s2] sm:$0xff] %vm658_vm1, %v1537_v26 }
 0x935   : > { %v1528_v44 = vpop.f32.mrf.mxu3 }
 0x936   : > { %v1532_v46 = vadd.f32 %v1528_v44, %v2376_v28 }
 0x938   : > { %v1538_v48 = vadd.f32 %v1868_v10, %v1532_v46 }
 0x93a   : > { %1540 = vst.msk [vmem:[%s2141_s2 + $0x8] sm:$0xff] %vm658_vm1, %v1538_v48 }
 0x93b PF: > { %s2515_s16 = sld [smem:[#allocation6_spill]] }
 0x93c   : > { %s2516_s25 = sld [smem:[#allocation4_spill]] }
 0x93d   : > { %s2517_s26 = sld [smem:[#allocation5_spill]] }
 0x93e   : > { %s2518_s27 = sld [smem:[#allocation7_spill]] }
 0x93f   : > { %s2519_s28 = sld [smem:[#allocation8_spill]] }
 0x941   : > { %s23_s29 = sadd.s32 1, %s2515_s16  }
 0x942   : > { %p20_p8 = scmp.ge.s32.totalorder %s23_s29, 6  }
 0x944   :  { %22 = sbr.rel (!%p20_p8) target bundleno = 6 (0x6), region = 142 }

// kernel: _lambda_.3
= control target key start
LH: loop header
LB: loop body
LE: loop exit
PB: predicated region body
PF: predicated region fallthrough
CT: control target
= control target key end

     0   :  { %s4325_s6 = smov 1   ;;  %s4326_s10 = smov 2   ;;  %s5257_s0 = inlined_call_operand.smem [shape: u32[32], index: -1, kind: input, shape index: {}] }
   0x1   :  { %s4393_s5 = sld [smem:[%s5257_s0]]   ;;  %s4327_s14 = smov 3  }
   0x2   :  { %s4398_s9 = sld [smem:[%s5257_s0 + %s4325_s6]]   ;;  %s4328_s18 = smov 4  }
   0x3   :  { %s4403_s13 = sld [smem:[%s5257_s0 + %s4326_s10]]   ;;  %s4329_s22 = smov 5  }
   0x4   :  { %s4408_s17 = sld [smem:[%s5257_s0 + %s4327_s14]]   ;;  %s4330_s26 = smov 6  }
   0x5   :  { %s4413_s21 = sld [smem:[%s5257_s0 + %s4328_s18]]   ;;  %s4331_s30 = smov 7  }
   0x6   :  { %s4418_s25 = sld [smem:[%s5257_s0 + %s4329_s22]]   ;;  %s4332_s4 = smov 8  }
   0x7   :  { %s4423_s29 = sld [smem:[%s5257_s0 + %s4330_s26]]   ;;  %s4333_s10 = smov 9  }
   0x8   :  { %s4428_s3 = sld [smem:[%s5257_s0 + %s4331_s30]]   ;;  %s4334_s15 = smov 10  }
   0x9   :  { %s4433_s8 = sld [smem:[%s5257_s0 + %s4332_s4]]   ;;  %s4335_s20 = smov 11  }
   0xa   :  { %s4438_s14 = sld [smem:[%s5257_s0 + %s4333_s10]]   ;;  %s4336_s26 = smov 12  }
   0xb   :  { %s4443_s19 = sld [smem:[%s5257_s0 + %s4334_s15]]   ;;  %s4337_s1 = smov 13  }
   0xc   :  { %s4448_s24 = sld [smem:[%s5257_s0 + %s4335_s20]]   ;;  %s4338_s7 = smov 14  }
   0xd   :  { %5287 = sst [smem:[#allocation20_spill]] %s4423_s29  ;;  %s4339_s15 = smov 15  }
   0xe   :  { %5288 = sst [smem:[#allocation21_spill]] %s4428_s3  ;;  %s4340_s22 = smov 16  }
   0xf   :  { %s4453_s30 = sld [smem:[%s5257_s0 + %s4336_s26]]   ;;  %s4341_s28 = smov 17  }
  0x10   :  { %s4458_s6 = sld [smem:[%s5257_s0 + %s4337_s1]]  }
  0x11   :  { %s4463_s12 = sld [smem:[%s5257_s0 + %s4338_s7]]   ;;  %s4342_s7 = smov 18  }
  0x12   :  { %5289 = sst [smem:[#allocation22_spill]] %s4448_s24 }
  0x13   :  { %s4468_s20 = sld [smem:[%s5257_s0 + %s4339_s15]]   ;;  %s4343_s15 = smov 19  }
  0x14   :  { %s4473_s27 = sld [smem:[%s5257_s0 + %s4340_s22]]   ;;  %s4344_s22 = smov 20  }
  0x15   :  { %5290 = sst [smem:[#allocation23_spill]] %s4453_s30 }
  0x16   :  { %5291 = sst [smem:[#allocation24_spill]] %s4458_s6 }
  0x17   :  { %5292 = sst [smem:[#allocation25_spill]] %s4463_s12 }
  0x18   :  { %s4478_s4 = sld [smem:[%s5257_s0 + %s4341_s28]]   ;;  %s4345_s28 = smov 21  }
  0x19   :  { %5293 = sst [smem:[#allocation26_spill]] %s4468_s20 }
  0x1a   :  { %5294 = sst [smem:[#allocation27_spill]] %s4473_s27 }
  0x1b   :  { %s4483_s12 = sld [smem:[%s5257_s0 + %s4342_s7]]   ;;  %s4346_s7 = smov 22  }
  0x1c   :  { %s4488_s6 = sld [smem:[%s5257_s0 + %s4343_s15]]   ;;  %s4347_s15 = smov 23  }
  0x1d   :  { %s4493_s27 = sld [smem:[%s5257_s0 + %s4344_s22]]   ;;  %s4348_s22 = smov 24  }
  0x1e   :  { %s4498_s20 = sld [smem:[%s5257_s0 + %s4345_s28]]   ;;  %s4349_s28 = smov 25  }
  0x1f   :  { %s4503_s30 = sld [smem:[%s5257_s0 + %s4346_s7]]   ;;  %s4350_s7 = smov 26  }
  0x22   :  { %5295 = sst [smem:[#allocation28_spill]] %s4488_s6 }
  0x23   :  { %5296 = sst [smem:[#allocation29_spill]] %s4493_s27 }
  0x24   :  { %5297 = sst [smem:[#allocation30_spill]] %s4498_s20 }
  0x25   :  { %5298 = sst [smem:[#allocation31_spill]] %s4503_s30 }
  0x26   :  { %s4508_s6 = sld [smem:[%s5257_s0 + %s4347_s15]]   ;;  %s4351_s15 = smov 27  }
  0x27   :  { %s4513_s27 = sld [smem:[%s5257_s0 + %s4348_s22]]   ;;  %s4352_s22 = smov 28  }
  0x28   :  { %s4518_s20 = sld [smem:[%s5257_s0 + %s4349_s28]]   ;;  %s4353_s28 = smov 29  }
  0x29   :  { %s4523_s30 = sld [smem:[%s5257_s0 + %s4350_s7]]   ;;  %s4354_s7 = smov 30  }
  0x2a   :  { %s4543_s24 = sld [smem:[%s5257_s0 + %s4354_s7]]  }
  0x2c   :  { %5299 = sst [smem:[#allocation32_spill]] %s4508_s6 }
  0x2d   :  { %5300 = sst [smem:[#allocation33_spill]] %s4513_s27 }
  0x2e   :  { %5301 = sst [smem:[#allocation34_spill]] %s4518_s20 }
  0x2f   :  { %s4528_s6 = sld [smem:[%s5257_s0 + %s4351_s15]]   ;;  %s4355_s15 = smov 31  }
  0x30   :  { %s4533_s27 = sld [smem:[%s5257_s0 + %s4352_s22]]  }
  0x31   :  { %s4538_s20 = sld [smem:[%s5257_s0 + %s4353_s28]]  }
  0x32   :  { %s4548_s29 = sld [smem:[%s5257_s0 + %s4355_s15]]  }
  0x38   :  { %5302 = sst [smem:[#allocation35_spill]] %s4548_s29 }
  0x39   :  { %68 = vsyncpa [#allocation8], 0 }
  0x3a   :  { %69 = vsyncpa [#allocation11], 0 }
  0x3b   :  { %70 = vsyncpa [#allocation14], 0 }
  0x3c   :  { %71 = vsyncpa [#allocation9], 0 }
  0x3d   :  { %73 = vsyncpa [#allocation9 + $0x1], 0  ;;  %s4550_s22 = smov 0   ;;  %s4552_s23 = smov 0  }
  0x3e   :  { %s4554_s26 = smov 0   ;;  %s4556_s28 = smov 0  }
  0x3f LB: > { %s5303_s3 = sld [smem:[#allocation21_spill]]  ;;  %s4571_s0 = sadd.s32 4294967295, %s4319_s28   ;;  %s4307_s22 = sphi %s4550_s22, %s5395_s22   ;;  %s4319_s28 = sphi %s4556_s28, %s5392_s28   ;;  %s4315_s26 = sphi %s4554_s26, %s5394_s26   ;;  %s4311_s23 = sphi %s4552_s23, %s5396_s23  }
  0x40   : > { %5304 = sst [smem:[#allocation36_spill]] %s4307_s22  ;;  %s3693_s1 = sadd.s32 4294967294, %s4319_s28  }
  0x41   : > { %5305 = sst [smem:[#allocation37_spill]] %s4315_s26  ;;  %s4575_s2 = sadd.s32 1, %s4319_s28  }
  0x42   : > { %5306 = sst [smem:[#allocation38_spill]] %s4319_s28  ;;  %s742_s7 = sadd.s32 1, %s4315_s26 }
  0x43   : > { %5307 = sst [smem:[#allocation39_spill]] %s4575_s2  ;;  %s739_s10 = ssub.s32 %s4319_s28, %s4575_s2 }
  0x44   : > { %p752_p0 = scmp.ne.s32.totalorder %s4315_s26, %s4311_s23  ;;  %p740_p1 = scmp.eq.s32.totalorder %s739_s10, 0 }
  0x45   : > { %p753_p2 = scmp.eq.s32.totalorder %s4571_s0, 1  ;;  %p758_p3 = scmp.ne.s32.totalorder %s4311_s23, %s4307_s22 }
  0x46   : > { %p759_p4 = scmp.eq.s32.totalorder %s3693_s1, 1  ;;  %p3694_p7 = scmp.ge.s32.totalorder %s4319_s28, 1 }
  0x47   : > { %s4586_s11 = scalar_select %p740_p1, %s4315_s26, %s742_s7  }
  0x48   : > { %p4588_p5 = por %p753_p2, %p752_p0  ;;  %p4592_p6 = por %p759_p4, %p758_p3 }
  0x49   : > { %5308 = sst [smem:[#allocation40_spill]] %s4586_s11  ;;  %p766_p8 = scmp.lt.s32.totalorder %s4319_s28, 3 }
  0x4a   : > { %s5309_s15 = scalar_select %p4588_p5, 1, 0 }
  0x4b   : > { %s5311_s16 = scalar_select %p4592_p6, 1, 0 }
  0x4c   : > { %5310 = sst [smem:[#allocation41_spill]] %s5309_s15  ;;  %p3831_p9 = scmp.eq.s32.totalorder %s4571_s0, 0 }
  0x4d   : > { %5312 = sst [smem:[#allocation42_spill]] %s5311_s16  ;;  %p4599_p10 = pnand %p3694_p7, %p766_p8 }
  0x4e   : > { %s865_s1 = sshll.u32 %s4528_s6, 4  ;;  %s4356_s7 = smov [#allocation10]   ;;  %s866_s1 = int_to_ptr.hbm [resolvable:$true] %s865_s1 }
  0x4f   : > { %p3814_p11 = pneg %p4599_p10  ;;  %s867_s10 = sshll.u32 %s4356_s7, 4  ;;  %s868_s10 = int_to_ptr.vmem [resolvable:$true] %s867_s10 }
  0x50   : > { %s853_s11 = sshll.u32 %s4523_s30, 4  ;;  %s877_s2 = sshll.u32 %s4533_s27, 4  ;;  %s4613_s11 = int_to_ptr.hbm [resolvable:$true] %s853_s11  ;;  %s4628_s2 = int_to_ptr.hbm [resolvable:$true] %s877_s2 }
  0x51   : > { %p4609_p12 = pnand %p3831_p9, %p3814_p11  ;;  %s4357_s16 = smov [#allocation7]  }
  0x52   : > { %s4616_s22 = sshll.u32 %s4357_s16, 4  ;;  %s4121_s28 = sshra.s32 %s866_s1, 4  ;;  %s4122_s28 = int_to_ptr.hbm [resolvable:$true] %s4121_s28  ;;  %s856_s22 = int_to_ptr.vmem [resolvable:$true] %s4616_s22 }
  0x53   : > { %s4123_s15 = scalar_lea.hbm %s4122_s28, 1  ;;  %p4125_p0 = pneg %p4609_p12 }
  0x54   : > { %p4124_p13 = scmp.ne.s32.totalorder %s4122_s28, %s4123_s15  ;;  %s4128_s7 = scalar_lea.hbm %s4528_s6, 1 }
  0x55   : > { %p4129_p3 = scmp.lt.s32.totalorder %s4122_s28, %s4528_s6  ;;  %p4130_p4 = scmp.lt.s32.totalorder %s4128_s7, %s4123_s15 }
  0x56   : > { %p4126_p1 = pnand %p4125_p0, %p4124_p13 }
  0x57   : > { %p4131_p7 = por %p4130_p4, %p4129_p3 }
  0x58   : > { %p4127_p2 = pneg %p4126_p1 }
  0x5a   : > { %p4132_p8 = pnand %p4131_p7, %p4127_p2 }
  0x5c   : > { %4135 = shalt.err (!%p4132_p8)
}
  0x5d   : > { %3820 = dma.hbm_to_vmem [thread:$0]  (!%p4609_p12), %s866_s1, 16, %s868_s10, [#allocation11]  }
  0x5e   : > { %s4151_s16 = sshra.s32 %s4613_s11, 4  ;;  %s4158_s28 = scalar_lea.hbm %s4523_s30, 1  ;;  %s4152_s16 = int_to_ptr.hbm [resolvable:$true] %s4151_s16 }
  0x5f   : > { %s4153_s29 = scalar_lea.hbm %s4152_s16, 1  ;;  %p4159_p2 = scmp.lt.s32.totalorder %s4152_s16, %s4523_s30 }
  0x60   : > { %p4154_p11 = scmp.ne.s32.totalorder %s4152_s16, %s4153_s29  ;;  %p4160_p3 = scmp.lt.s32.totalorder %s4158_s28, %s4153_s29 }
  0x62   : > { %p4156_p13 = pnand %p4154_p11, %p4125_p0  ;;  %p4161_p4 = por %p4160_p3, %p4159_p2 }
  0x64   : > { %p4157_p1 = pneg %p4156_p13 }
  0x66   : > { %p4162_p7 = pnand %p4161_p4, %p4157_p1 }
  0x68   : > { %4165 = shalt.err (!%p4162_p7)
}
  0x69   : > { %3817 = dma.hbm_to_vmem [thread:$0]  (!%p4609_p12), %s4613_s11, 16, %s856_s22, [#allocation8]  }
  0x6a   : > { %s892_s15 = sshll.u32 %s4543_s24, 4  ;;  %s4358_s1 = smov [#allocation12]   ;;  %s4640_s15 = int_to_ptr.hbm [resolvable:$true] %s892_s15 }
  0x6b   : > { %s879_s10 = sshll.u32 %s4358_s1, 4  ;;  %s4181_s7 = sshra.s32 %s4628_s2, 4  ;;  %s880_s10 = int_to_ptr.vmem [resolvable:$true] %s879_s10  ;;  %s4182_s7 = int_to_ptr.hbm [resolvable:$true] %s4181_s7 }
  0x6c   : > { %s4183_s29 = scalar_lea.hbm %s4182_s7, 1  ;;  %s4188_s16 = scalar_lea.hbm %s4533_s27, 1 }
  0x6d   : > { %p4184_p8 = scmp.ne.s32.totalorder %s4182_s7, %s4183_s29  ;;  %p4189_p1 = scmp.lt.s32.totalorder %s4182_s7, %s4533_s27 }
  0x6e   : > { %p4190_p2 = scmp.lt.s32.totalorder %s4188_s16, %s4183_s29 }
  0x6f   : > { %p4186_p11 = pnand %p4184_p8, %p4125_p0 }
  0x70   : > { %p4191_p3 = por %p4190_p2, %p4189_p1 }
  0x71   : > { %p4187_p13 = pneg %p4186_p11 }
  0x73   : > { %p4192_p4 = pnand %p4191_p3, %p4187_p13 }
  0x75   : > { %4195 = shalt.err (!%p4192_p4)
}
  0x76   : > { %3823 = dma.hbm_to_vmem [thread:$0]  (!%p4609_p12), %s4628_s2, 16, %s880_s10, [#allocation11]  }
  0x77   : > { %s4359_s22 = smov [#allocation13]   ;;  %s4211_s28 = sshra.s32 %s4640_s15, 4  ;;  %s4212_s28 = int_to_ptr.hbm [resolvable:$true] %s4211_s28 }
  0x78   : > { %s894_s11 = sshll.u32 %s4359_s22, 4  ;;  %s4213_s1 = scalar_lea.hbm %s4212_s28, 1  ;;  %s895_s11 = int_to_ptr.vmem [resolvable:$true] %s894_s11 }
  0x79   : > { %p4214_p7 = scmp.ne.s32.totalorder %s4212_s28, %s4213_s1  ;;  %s4218_s7 = scalar_lea.hbm %s4543_s24, 1 }
  0x7a   : > { %p4219_p13 = scmp.lt.s32.totalorder %s4212_s28, %s4543_s24  ;;  %p4220_p1 = scmp.lt.s32.totalorder %s4218_s7, %s4213_s1 }
  0x7b   : > { %p4216_p8 = pnand %p4214_p7, %p4125_p0 }
  0x7c   : > { %p4221_p2 = por %p4220_p1, %p4219_p13 }
  0x7d   : > { %p4217_p11 = pneg %p4216_p8 }
  0x7f   : > { %p4222_p3 = pnand %p4221_p2, %p4217_p11 }
  0x81   : > { %4225 = shalt.err (!%p4222_p3)
}
  0x82   : > { %3826 = dma.hbm_to_vmem [thread:$0]  (!%p4609_p12), %s4640_s15, 16, %s895_s11, [#allocation14]  }
  0x83   : > { %915 = sbr.rel (%p4599_p10) target bundleno = 8876 (0x22ac), region = 144 }
  0x88   : > { %4290 = dma.done.wait (%p3831_p9), [#allocation8], 16  }
  0x89   : > { %4292 = vsyncadd (%p3831_p9), [#allocation8], 4294967280 }
  0x8a   : > { %4294 = dma.done.wait (%p3831_p9), [#allocation11], 32  }
  0x8b   : > { %4296 = vsyncadd (%p3831_p9), [#allocation11], 4294967264 }
  0x8c   : > { %4298 = dma.done.wait (%p3831_p9), [#allocation14], 16  }
  0x8d   : > { %4300 = vsyncadd (%p3831_p9), [#allocation14], 4294967280  ;;  %p1011_p10 = scmp.lt.s32.totalorder %s4571_s0, 1  ;;  %vm1020_vm0 = vcmask 261120   ;;  %v4360_v4 = vmov 32.0   ;;  %s5277_s15 = sand.u32 1, %s4311_s23   ;;  %v1124_v27 = vlaneseq }
  0x8e   : > { %3943 = vrcp.f32 %v4360_v4  ;;  %s4696_s10 = sshll.u32 %s5277_s15, 3  ;;  %v1085_v21 = vld [vmem:[%s4478_s4 + $0x18] sm:$0xff]  ;;  %v1084_v22 = vld [vmem:[%s4478_s4 + $0x10] sm:$0xff]  ;;  %v1083_v23 = vld [vmem:[%s4478_s4 + $0x8] sm:$0xff]  ;;  %vm1136_vm2 = vcmask 1046528   ;;  %v4361_v33 = vmov 0.0  }
  0x8f   : > { %s1012_s26 = scalar_select %p1011_p10, %s4571_s0, 1  ;;  %3792 = vmatpush.msra.mxu2 %v1085_v21  ;;  %1108 = vmatpush.msra.mxu0 %v1085_v21  ;;  %v1082_v24 = vld [vmem:[%s4478_s4] sm:$0xff]  ;;  %v1131_v25 = vld [vmem:[%s4403_s13 + $0x10] sm:$0x7f]  ;;  %v1130_v26 = vld [vmem:[%s4403_s13 + $0x8] sm:$0xff]  ;;  %v4708_v31 = vand.u32 127, %v1124_v27 }
  0x90   : > { %3711 = vmatpush.msk.msra.mxu1 %vm1136_vm2, %v1131_v25  ;;  %v1129_v29 = vld [vmem:[%s4403_s13] sm:$0xff]  ;;  %1120 = vst.msk [vmem:[#allocation3] sm:$0xff] %vm1020_vm0, %v4361_v33  ;;  %vm5282_vm4 = vcmask 187392   ;;  %vm1122_vm5 = vcmask 57344   ;;  %vm1160_vm12 = vcmask 253952   ;;  %s4735_s16 = smov 0  }
  0x91   : > { %s3791_s2 = sshll.u32 %s1012_s26, 4  ;;  %3793 = vmatpush.msra.mxu2 %v1084_v22  ;;  %1109 = vmatpush.msra.mxu0 %v1084_v22  ;;  %vm1126_vm3 = vcmp.eq.s32.totalorder %v4708_v31, 21  ;;  %1121 = vst.msk [vmem:[#allocation4] sm:$0xff] %vm1020_vm0, %v4361_v33  ;;  %v3940_v46 = vld [vmem:[%s4408_s17] ss:$0 sm:$0xff] }
  0x92   : > { %s1015_s18 = scalar_lea.vmem %s4393_s5, %s3791_s2  ;;  %1154 = vmatpush.msra.mxu1 %v1130_v26  ;;  %v3710_v34 = vsel %vm1126_vm3, 1.0, %v4361_v33  ;;  %1123 = vst.msk [vmem:[#allocation5] sm:$0x1] %vm1122_vm5, %v4361_v33  ;;  %v3941_v50 = vld [vmem:[%s4413_s21] ss:$0 sm:$0xff] }
  0x93   : > { %v1017_v0 = vld [vmem:[%s1015_s18 + $0x8] sm:$0xff]  ;;  %v1016_v2 = vld [vmem:[%s1015_s18] sm:$0xff]  ;;  %3794 = vmatpush.msra.mxu2 %v1083_v23  ;;  %1110 = vmatpush.msra.mxu0 %v1083_v23  ;;  %1119 = vst.msk [vmem:[#allocation2] sm:$0xff] %vm1020_vm0, %v4361_v33 }
  0x94   : > { %v1024_v1 = vsel %vm1020_vm0, %v1017_v0, 0.0  ;;  %v1021_v3 = vsel %vm1020_vm0, %v1016_v2, 0.0  ;;  %v3944_v5 = vpop.eup %3943  ;;  %1155 = vmatpush.msra.mxu1 %v1129_v29  ;;  %v3942_v61 = vld [vmem:[%s4483_s12] ss:$0 sm:$0xff] }
  0x95   : > { %1025 = vadd.xlane.f32.xlu0 %v1024_v1  ;;  %v1028_v6 = vmul.f32 32.0, %v3944_v5  ;;  %vm1032_vm1 = vweird.f32 %v3944_v5  ;;  %3795 = vmatpush.msra.mxu2 %v1082_v24 }
  0x96   : > { %1111 = vmatpush.msra.mxu0 %v1082_v24  ;;  %3712 = vmatmul.msk.f32.vlgmr.msra.gmra.mxu1 %vm5282_vm4, %v3710_v34 }
  0x97   : > { %v1029_v7 = vsub.f32 1.0, %v1028_v6 }
  0x99   : > { %v1030_v8 = vmul.f32 %v3944_v5, %v1029_v7 }
  0x9b   : > { %v1031_v9 = vadd.f32 %v3944_v5, %v1030_v8 }
  0x9d   : > { %1022 = vadd.xlane.f32.xlu0 %v1021_v3  ;;  %v4679_v10 = vsel %vm1032_vm1, %v3944_v5, %v1031_v9 }
 0x108   : > { %v1026_v11 = vpop.xlane.xlu0 %1025 }
 0x109   : > { %v1035_v12 = vmul.f32 %v4679_v10, %v1026_v11 }
 0x10b   : > { %v4682_v13 = vsub.f32 %v1017_v0, %v1035_v12 }
 0x10d   : > { %v1039_v14 = vmul.f32 %v4682_v13, %v4682_v13 }
 0x10f   : > { %v1043_v15 = vsel %vm1020_vm0, %v1039_v14, 0.0 }
 0x110   : > { %1044 = vadd.xlane.f32.xlu1 %v1043_v15  ;;  %v1023_v16 = vpop.xlane.xlu0 %1022 }
 0x111   : > { %v1034_v17 = vmul.f32 %v4679_v10, %v1023_v16 }
 0x113   : > { %v4688_v18 = vsub.f32 %v1016_v2, %v1034_v17  ;;  %v1157_v60 = vpop.f32.mrf.mxu1 }
 0x114   : > { %1161 = vst.msk [vmem:[#allocation2] sm:$0x1] %vm1160_vm12, %v1157_v60 }
 0x115   : > { %v1038_v19 = vmul.f32 %v4688_v18, %v4688_v18 }
 0x117   : > { %v1040_v20 = vsel %vm1020_vm0, %v1038_v19, 0.0 }
 0x118   : > { %1041 = vadd.xlane.f32.xlu1 %v1040_v20 }
 0x183   : > { %v1045_v28 = vpop.xlane.xlu1 %1044 }
 0x184   : > { %v1047_v30 = vmul.f32 %v1045_v28, %v4679_v10 }
 0x186   : > { %v1049_v32 = vadd.f32 1e-06, %v1047_v30 }
 0x188   : > { %3945 = vrsqrt.f32 %v1049_v32  ;;  %vm1066_vm7 = vweird.f32 %v1049_v32 }
 0x18b   : > { %v1042_v35 = vpop.xlane.xlu1 %1041 }
 0x18c   : > { %v1046_v36 = vmul.f32 %v1042_v35, %v4679_v10 }
 0x18e   : > { %v3946_v37 = vpop.eup %3945  ;;  %v1048_v38 = vadd.f32 1e-06, %v1046_v36 }
 0x18f   : > { %v1061_v39 = vmul.f32 %v3946_v37, %v1049_v32  ;;  %vm1067_vm6 = vweird.f32 %v3946_v37 }
 0x190   : > { %3947 = vrsqrt.f32 %v1048_v38  ;;  %vm1068_vm8 = vmor %vm1066_vm7, %vm1067_vm6  ;;  %vm1056_vm10 = vweird.f32 %v1048_v38 }
 0x191   : > { %v1062_v40 = vmul.f32 %v3946_v37, %v1061_v39 }
 0x193   : > { %v1063_v41 = vmul.f32 0.5, %v1062_v40 }
 0x195   : > { %v1064_v42 = vsub.f32 1.5, %v1063_v41 }
 0x196   : > { %v3948_v43 = vpop.eup %3947 }
 0x197   : > { %v1065_v44 = vmul.f32 %v3946_v37, %v1064_v42  ;;  %v1051_v45 = vmul.f32 %v3948_v43, %v1048_v38  ;;  %vm1057_vm9 = vweird.f32 %v3948_v43 }
 0x198   : > { %vm1058_vm11 = vmor %vm1056_vm10, %vm1057_vm9 }
 0x199   : > { %v1069_v47 = vsel %vm1068_vm8, %v3946_v37, %v1065_v44  ;;  %v1052_v48 = vmul.f32 %v3948_v43, %v1051_v45 }
 0x19a   : > { %v1071_v49 = vmul.f32 %v1069_v47, %v4682_v13 }
 0x19b   : > { %v1053_v51 = vmul.f32 0.5, %v1052_v48 }
 0x19c   : > { %v1076_v52 = vmul.f32 %v3940_v46, %v1071_v49 }
 0x19d   : > { %v1054_v53 = vsub.f32 1.5, %v1053_v51 }
 0x19e   : > { %v1081_v54 = vadd.f32 %v3941_v50, %v1076_v52 }
 0x19f   : > { %v1055_v55 = vmul.f32 %v3948_v43, %v1054_v53 }
 0x1a0   : > { %3709 = vmatmul.msk.f32.vlgmr.msra.gmra.mxu2 %vm1020_vm0, %v1081_v54 }
 0x1a1   : > { %v1059_v56 = vsel %vm1058_vm11, %v3948_v43, %v1055_v55 }
 0x1a2   : > { %v1070_v57 = vmul.f32 %v1059_v56, %v4688_v18 }
 0x1a4   : > { %v1075_v58 = vmul.f32 %v3940_v46, %v1070_v57 }
 0x1a6   : > { %v1080_v59 = vadd.f32 %v3941_v50, %v1075_v58 }
 0x1a8   : > { %3708 = vmatmul.msk.f32.vlgmr.msra.gmra.mxu0 %vm1020_vm0, %v1080_v59 }
 0x223   : > { %v1116_v62 = vpop.f32.mrf.mxu2 }
 0x224   : > { %v4730_v63 = vadd.f32 %v3942_v61, %v1116_v62 }
 0x225   : > { %v1113_v0 = vpop.f32.mrf.mxu0 }
 0x226   : > { %v4732_v1 = vadd.f32 %v3942_v61, %v1113_v0 }
 0x227 LB: >> { %s5278_s22 = scalar_lea.vmem [#allocation2], %s4323_s16  ;;  %s4746_s11 = scalar_lea.vmem %s4398_s9, %s4323_s16  ;;  %v1198_v6 = vld [vmem:[%s4438_s14 + $0x10] sm:$0xff]  ;;  %v1199_v7 = vld [vmem:[%s4438_s14 + $0x18] sm:$0xff]  ;;  %v1196_v9 = vld [vmem:[%s4438_s14] sm:$0xff]  ;;  %vm5281_vm7 = vcmask 64512   ;;  %s4323_s16 = sphi %s4735_s16, %s5333_s16  }
 0x228   : >> { %v1169_v2 = vld [vmem:[%s5278_s22] sm:$0x1]  ;;  %v3949_v8 = vpack.i.bf16 %v1198_v6, %v1199_v7  ;;  %1301 = vmatpush.msra.mxu1 %v1199_v7  ;;  %s4362_s28 = smov 96   ;;  %v1197_v11 = vld [vmem:[%s4438_s14 + $0x8] sm:$0xff]  ;;  %s5315_s1 = sld [smem:[#allocation20_spill]] }
 0x229   : >> { %v1172_v3 = vsel %vm1160_vm12, %v1169_v2, 0.0  ;;  %v4749_v4 = vld [vmem:[%s4746_s11] sm:$0x1]  ;;  %v3954_v12 = vpack.i.bf16 %v1196_v9, %v1197_v11  ;;  %s1245_s7 = scalar_lea.vmem [#allocation3], %s4323_s16  ;;  %s4363_s26 = smov 120  }
 0x22a   : >> { %1173 = vadd.xlane.f32.xlu0 %v1172_v3  ;;  %v1257_v5 = vsel %vm1160_vm12, %v4749_v4, 0.0  ;;  %3950 = vrot.lane.b32.xlu2 %v3949_v8, %s4362_s28  ;;  %v3979_v35 = vld [vmem:[%s4443_s19] ss:$0 sm:$0xff]  ;;  %s4364_s2 = smov 104   ;;  %s4366_s18 = smov 112  }
 0x22b   : >> { %1302 = vmatpush.msra.mxu1 %v1198_v6  ;;  %v1170_v48 = vld [vmem:[%s5303_s3] sm:$0x1]  ;;  %s4368_s15 = smov 8   ;;  %s5280_s29 = smov 24  }
 0x22c   : >> { %v1171_v52 = vld [vmem:[%s4433_s8] sm:$0x1]  ;;  %s5317_s22 = sld [smem:[#allocation23_spill]] }
 0x22d   : >> { %1303 = vmatpush.msra.mxu1 %v1197_v11  ;;  %v1255_v57 = vld [vmem:[%s4418_s25] sm:$0x1]  ;;  %v4365_v11 = vmov 0.0  }
 0x22e   : >> { %v1256_v60 = vld [vmem:[%s5315_s1] sm:$0x1]  ;;  %s1251_s1 = scalar_lea.vmem [#allocation4], %s4323_s16 }
 0x22f   : >> { %1304 = vmatpush.msra.mxu1 %v1196_v9  ;;  %v1309_v9 = vstv %s4323_s16 }
 0x230   : >> { %vm1310_vm8 = vcmp.gt.s32.totalorder %v4708_v31, %v1309_v9 }
 0x232   : >> { %1258 = vadd.xlane.f32.xlu0 %v1257_v5  ;;  %3955 = vrot.lane.b32.xlu2 %v3954_v12, %s4362_s28  ;;  %v1285_v5 = vld [vmem:[%s4443_s19] sm:$0x1]  ;;  %v4785_v12 = vsel %vm1310_vm8, -1e+30, %v4365_v11 }
 0x246   : >> { %1219 = vrot.lane.b32.xlu0 %v3979_v35, %s4362_s28 }
 0x284   : >> { %v3951_v23 = vpop.permute.xlu2 %3950 }
 0x285   : >> { %v3952_v24 = vunpack.i.l.bf16 %v3951_v23  ;;  %v3953_v25 = vunpack.i.h.bf16 %v3951_v23 }
 0x287   : >> { %1237 = vmatpush.msra.mxu2 %v3952_v24 }
 0x289   : >> { %1238 = vmatpush.msra.mxu2 %v3953_v25 }
 0x28c   : >> { %v3956_v26 = vpop.permute.xlu2 %3955 }
 0x28d   : >> { %v3957_v28 = vunpack.i.l.bf16 %v3956_v26  ;;  %v3958_v29 = vunpack.i.h.bf16 %v3956_v26 }
 0x28f   : >> { %1239 = vmatpush.msra.mxu2 %v3957_v28 }
 0x291   : >> { %1240 = vmatpush.msra.mxu2 %v3958_v29 }
 0x29d   : >> { %v1174_v13 = vpop.xlane.xlu0 %1173 }
 0x29e   : >> { %v1175_v14 = vmul.f32 %v1174_v13, %v4679_v10 }
 0x2a0   : >> { %v1176_v15 = vsub.f32 %v1169_v2, %v1175_v14 }
 0x2a2   : >> { %v1177_v16 = vmul.f32 %v1176_v15, %v1176_v15 }
 0x2a4   : >> { %v1178_v17 = vsel %vm1160_vm12, %v1177_v16, 0.0 }
 0x2a5   : >> { %1179 = vadd.xlane.f32.xlu1 %v1178_v17  ;;  %v1259_v18 = vpop.xlane.xlu0 %1258 }
 0x2a6   : >> { %v1260_v19 = vmul.f32 %v1259_v18, %v4679_v10 }
 0x2a8   : >> { %v1261_v20 = vsub.f32 %v4749_v4, %v1260_v19 }
 0x2aa   : >> { %v1262_v21 = vmul.f32 %v1261_v20, %v1261_v20 }
 0x2ac   : >> { %v1263_v22 = vsel %vm1160_vm12, %v1262_v21, 0.0 }
 0x2ad   : >> { %1264 = vadd.xlane.f32.xlu1 %v1263_v22 }
 0x2b8   : >> { %v1220_v0 = vpop.permute.xlu0 %1219 }
 0x318   : >> { %v1180_v30 = vpop.xlane.xlu1 %1179 }
 0x319   : >> { %v1181_v32 = vmul.f32 %v1180_v30, %v4679_v10 }
 0x31b   : >> { %v1182_v34 = vadd.f32 1e-05, %v1181_v32 }
 0x31d   : >> { %3980 = vrsqrt.f32 %v1182_v34  ;;  %vm1189_vm14 = vweird.f32 %v1182_v34 }
 0x320   : >> { %v1265_v36 = vpop.xlane.xlu1 %1264 }
 0x321   : >> { %v1266_v37 = vmul.f32 %v1265_v36, %v4679_v10 }
 0x323   : >> { %v3981_v38 = vpop.eup %3980  ;;  %v1267_v39 = vadd.f32 1e-05, %v1266_v37 }
 0x324   : >> { %v1184_v40 = vmul.f32 %v3981_v38, %v1182_v34  ;;  %vm1190_vm13 = vweird.f32 %v3981_v38 }
 0x325   : >> { %3982 = vrsqrt.f32 %v1267_v39  ;;  %vm1191_vm15 = vmor %vm1189_vm14, %vm1190_vm13  ;;  %vm1274_vm1 = vweird.f32 %v1267_v39 }
 0x326   : >> { %v1185_v41 = vmul.f32 %v3981_v38, %v1184_v40 }
 0x328   : >> { %v1186_v42 = vmul.f32 0.5, %v1185_v41 }
 0x32a   : >> { %v1187_v43 = vsub.f32 1.5, %v1186_v42 }
 0x32b   : >> { %v3983_v44 = vpop.eup %3982 }
 0x32c   : >> { %v1188_v45 = vmul.f32 %v3981_v38, %v1187_v43  ;;  %v1269_v46 = vmul.f32 %v3983_v44, %v1267_v39  ;;  %vm1275_vm3 = vweird.f32 %v3983_v44 }
 0x32d   : >> { %vm1276_vm6 = vmor %vm1274_vm1, %vm1275_vm3 }
 0x32e   : >> { %v1270_v47 = vmul.f32 %v3983_v44, %v1269_v46  ;;  %v1192_v49 = vsel %vm1191_vm15, %v3981_v38, %v1188_v45 }
 0x32f   : >> { %v1193_v50 = vmul.f32 %v1192_v49, %v1176_v15 }
 0x330   : >> { %v1271_v51 = vmul.f32 0.5, %v1270_v47 }
 0x331   : >> { %v1194_v53 = vmul.f32 %v1193_v50, %v1170_v48 }
 0x332   : >> { %v1272_v54 = vsub.f32 1.5, %v1271_v51 }
 0x333   : >> { %v1195_v55 = vadd.f32 %v1194_v53, %v1171_v52 }
 0x334   : >> { %v1273_v56 = vmul.f32 %v3983_v44, %v1272_v54 }
 0x335   : >> { %3713 = vmatmul.msk.f32.vlgmr.msra.gmra.mxu2 %vm1020_vm0, %v1195_v55 }
 0x336   : >> { %v1277_v58 = vsel %vm1276_vm6, %v3983_v44, %v1273_v56 }
 0x337   : >> { %v1278_v59 = vmul.f32 %v1277_v58, %v1261_v20 }
 0x339   : >> { %v1279_v61 = vmul.f32 %v1278_v59, %v1255_v57 }
 0x33b   : >> { %v1280_v62 = vadd.f32 %v1279_v61, %v1256_v60 }
 0x33d   : >> { %3714 = vmatmul.msk.f32.vlgmr.msra.gmra.mxu1 %vm1020_vm0, %v1280_v62 }
 0x3b8   : >> { %v1242_v2 = vpop.f32.mrf.mxu2 }
 0x3b9   : >> { %v1243_v3 = vadd.f32 %v1242_v2, %v1220_v0 }
 0x3ba   : >> { %v1306_v6 = vpop.f32.mrf.mxu1 }
 0x3bb   : >> { %1246 = vst.msk [vmem:[%s1245_s7] sm:$0x1] %vm1160_vm12, %v1243_v3  ;;  %v1307_v8 = vadd.f32 %v1306_v6, %v1285_v5  ;;  %s5316_s7 = sld [smem:[#allocation22_spill]] }
 0x3c2   : >> { %v1312_v7 = vld [vmem:[#allocation3] sm:$0xff] }
 0x3c3   : >> { %1396 = vrot.lane.b32.xlu0 %v1312_v7, %s4363_s26  ;;  %3715 = vmatpush.xpose.msk.msrb.mxu2 %vm5281_vm7, %v1312_v7 }
 0x3c6   : >> { %3716 = vmatmul.msk.f32.vlgmr.msrb.gmra.mxu2 %vm5281_vm7, %v1307_v8 }
 0x3cb   : >> { %1394 = vrot.lane.b32.xlu0 %v1307_v8, %s4363_s26 }
 0x3d3   : >> { %1563 = vrot.lane.b32.xlu0 %v1307_v8, %s4364_s2 }
 0x435   : >> { %v1397_v24 = vpop.permute.xlu0 %1396 }
 0x43d   : >> { %v1395_v42 = vpop.permute.xlu0 %1394 }
 0x445   : >> { %v1564_v43 = vpop.permute.xlu0 %1563 }
 0x449   : >> { %v1343_v13 = vpop.f32.mrf.mxu2 }
 0x44a   : >> { %v1344_v14 = vadd.f32 %v1343_v13, %v4785_v12 }
 0x44c   : >> { %v1346_v15 = vsel %vm1122_vm5, %v1344_v14, -inf }
 0x44d   : >> { %1347 = vmax.xlane.f32.xlu1 %v1346_v15 }
 0x466   : >> { %1248 = vrot.lane.b32.xlu1 %v1243_v3, %s4362_s28 }
 0x46e   : >> { %1565 = vrot.lane.b32.xlu1 %v1312_v7, %s4364_s2 }
 0x476   : >> { %1481 = vrot.lane.b32.xlu1 %v1312_v7, %s4366_s18 }
 0x4c0   : >> { %v1348_v16 = vpop.xlane.xlu1 %1347 }
 0x4c1   : >> { %v1349_v17 = vsub.f32 %v1344_v14, %v1348_v16 }
 0x4c3   : >> { %v1350_v18 = vmul.f32 1.442695, %v1349_v17 }
 0x4c5   : >> { %3984 = vpow2.f32 %v1350_v18 }
 0x4cb   : >> { %v3985_v19 = vpop.eup %3984 }
 0x4cc   : >> { %v1352_v20 = vsel %vm1122_vm5, %v3985_v19, 0.0 }
 0x4cd   : >> { %1353 = vadd.xlane.f32.xlu2 %v1352_v20 }
 0x4d8   : >> { %v1249_v21 = vpop.permute.xlu1 %1248 }
 0x4d9   : >> { %1252 = vst.msk [vmem:[%s1251_s1] sm:$0x1] %vm1160_vm12, %v1249_v21  ;;  %s5279_s1 = smov 16  }
 0x4e0   : >> { %v1566_v22 = vpop.permute.xlu1 %1565  ;;  %v4795_v23 = vld [vmem:[#allocation4] sm:$0xff] }
 0x4e1   : >> { %1388 = vmatpush.msra.mxu3 %v4795_v23 }
 0x4e3   : >> { %3718 = vmatpush.xpose.msk.msrb.mxu3 %vm5281_vm7, %v1397_v24 }
 0x4e5   : >> { %1479 = vrot.lane.b32.xlu2 %v1307_v8, %s4366_s18 }
 0x4e8   : >> { %v1482_v25 = vpop.permute.xlu1 %1481 }
 0x4e9   : >> { %3721 = vmatpush.xpose.msk.msrb.mxu1 %vm5281_vm7, %v1482_v25 }
 0x540   : >> { %v1354_v26 = vpop.xlane.xlu2 %1353 }
 0x541   : >> { %3986 = vrcp.f32 %v1354_v26  ;;  %v1366_v34 = vand.u32 2147483648, %v1354_v26  ;;  %v1364_v36 = vand.u32 2147483647, %v1354_v26  ;;  %vm1360_vm10 = vweird.f32 %v1354_v26 }
 0x543   : >> { %v1367_v38 = vor.u32 1.1754944e-38, %v1366_v34  ;;  %vm1365_vm13 = vcmp.eq.f32.partialorder %v1364_v36, 8.507059e+37 }
 0x547   : >> { %v3987_v28 = vpop.eup %3986 }
 0x548   : >> { %v1356_v29 = vmul.f32 %v3987_v28, %v1354_v26  ;;  %v1480_v30 = vpop.permute.xlu2 %1479  ;;  %vm1361_vm9 = vweird.f32 %v3987_v28 }
 0x549   : >> { %3722 = vmatmul.msk.f32.vlgmr.msrb.gmra.mxu1 %vm5281_vm7, %v1480_v30  ;;  %vm1362_vm11 = vmor %vm1360_vm10, %vm1361_vm9 }
 0x54a   : >> { %v1357_v32 = vsub.f32 1.0, %v1356_v29 }
 0x54c   : >> { %v1358_v35 = vmul.f32 %v3987_v28, %v1357_v32 }
 0x54e   : >> { %v1359_v37 = vadd.f32 %v3987_v28, %v1358_v35 }
 0x550   : >> { %v1363_v39 = vsel %vm1362_vm11, %v3987_v28, %v1359_v37 }
 0x551   : >> { %v1368_v40 = vsel %vm1365_vm13, %v1367_v38, %v1363_v39 }
 0x552   : >> { %v1369_v41 = vmul.f32 %v3985_v19, %v1368_v40 }
 0x554   : >> { %3717 = vmatmul.msk.f32.vlgmr.msra.gmra.mxu3 %vm5281_vm7, %v1369_v41 }
 0x555   : >> { %3724 = vmatpush.xpose.msk.msra.mxu3 %vm5281_vm7, %v1566_v22 }
 0x55c   : >> { %3719 = vmatmul.msk.f32.vlgmr.msrb.gmra.mxu3 %vm5281_vm7, %v1395_v42 }
 0x55d   : >> { %3729 = vmatpush.xpose.msk.msrb.mxu3 %vm5281_vm7, %v4730_v63 }
 0x561   : >> { %3730 = vmatpush.xpose.msk.msrb.mxu3 %vm5281_vm7, %v4732_v1 }
 0x564   : >> { %3725 = vmatmul.msk.f32.vlgmr.msra.gmra.mxu3 %vm5281_vm7, %v1564_v43 }
 0x5c6   : >> { %v1504_v44 = vpop.f32.mrf.mxu1 }
 0x5c7   : >> { %v1505_v45 = vadd.f32 %v1504_v44, %v4785_v12 }
 0x5c9   : >> { %v1507_v46 = vsel %vm1122_vm5, %v1505_v45, -inf }
 0x5ca   : >> { %1508 = vmax.xlane.f32.xlu2 %v1507_v46 }
 0x5d7   : >> { %v1390_v47 = vpop.f32.mrf.mxu3 }
 0x5d8   : >> { %1393 = vst.msk [vmem:[#allocation6] sm:$0x1] %vm1122_vm5, %v1390_v47 }
 0x5df   : >> { %v1419_v48 = vpop.f32.mrf.mxu3 }
 0x5e0   : >> { %v1420_v49 = vadd.f32 %v1419_v48, %v4785_v12 }
 0x5e2   : >> { %1531 = vrot.lane.b32.xlu2 %v4795_v23, %s4366_s18  ;;  %v1422_v50 = vsel %vm1122_vm5, %v1420_v49, -inf }
 0x5e3   : >> { %1423 = vmax.xlane.f32.xlu0 %v1422_v50 }
 0x5e7   : >> { %v1588_v51 = vpop.f32.mrf.mxu3 }
 0x5e8   : >> { %v1589_v52 = vadd.f32 %v1588_v51, %v4785_v12 }
 0x5ea   : >> { %v1591_v53 = vsel %vm1122_vm5, %v1589_v52, -inf }
 0x5eb   : >> { %1592 = vmax.xlane.f32.xlu1 %v1591_v53 }
 0x63d   : >> { %v1509_v54 = vpop.xlane.xlu2 %1508 }
 0x63e   : >> { %v1510_v55 = vsub.f32 %v1505_v45, %v1509_v54 }
 0x640   : >> { %v1511_v56 = vmul.f32 1.442695, %v1510_v55  ;;  %v1317_v55 = vld [vmem:[%s5316_s7 + $0x18] sm:$0xff] }
 0x641   : >> { %1663 = vmatpush.msra.mxu0 %v1317_v55 }
 0x642   : >> { %3988 = vpow2.f32 %v1511_v56  ;;  %v1316_v56 = vld [vmem:[%s5316_s7 + $0x10] sm:$0xff] }
 0x643   : >> { %1664 = vmatpush.msra.mxu0 %v1316_v56 }
 0x645   : >> { %v1532_v57 = vpop.permute.xlu2 %1531 }
 0x646   : >> { %1552 = vmatpush.msra.mxu1 %v1532_v57  ;;  %v1315_v57 = vld [vmem:[%s5316_s7 + $0x8] sm:$0xff] }
 0x647   : >> { %1665 = vmatpush.msra.mxu0 %v1315_v57 }
 0x648   : >> { %v3989_v58 = vpop.eup %3988 }
 0x649   : >> { %v1513_v59 = vsel %vm1122_vm5, %v3989_v58, 0.0 }
 0x64a   : >> { %1514 = vadd.xlane.f32.xlu0 %v1513_v59 }
 0x656   : >> { %v1424_v60 = vpop.xlane.xlu0 %1423 }
 0x657   : >> { %v1425_v61 = vsub.f32 %v1420_v49, %v1424_v60 }
 0x659   : >> { %v1426_v62 = vmul.f32 1.442695, %v1425_v61 }
 0x65b   : >> { %3990 = vpow2.f32 %v1426_v62 }
 0x65e   : >> { %v1593_v0 = vpop.xlane.xlu1 %1592 }
 0x65f   : >> { %v1594_v2 = vsub.f32 %v1589_v52, %v1593_v0  ;;  %v1318_v0 = vld [vmem:[%s5317_s22] sm:$0x1]  ;;  %s5319_s22 = sld [smem:[#allocation24_spill]] }
 0x661   : >> { %v3991_v3 = vpop.eup %3990  ;;  %v1595_v5 = vmul.f32 1.442695, %v1594_v2 }
 0x662   : >> { %v1428_v6 = vsel %vm1122_vm5, %v3991_v3, 0.0 }
 0x663   : >> { %3992 = vpow2.f32 %v1595_v5  ;;  %1429 = vadd.xlane.f32.xlu0 %v1428_v6 }
 0x669   : >> { %v3993_v7 = vpop.eup %3992 }
 0x66a   : >> { %v1597_v8 = vsel %vm1122_vm5, %v3993_v7, 0.0 }
 0x66b   : >> { %1598 = vadd.xlane.f32.xlu1 %v1597_v8 }
 0x677   : >> { %1615 = vrot.lane.b32.xlu0 %v4795_v23, %s4364_s2 }
 0x684   : >> { %1447 = vrot.lane.b32.xlu1 %v4795_v23, %s4363_s26 }
 0x6bd   : >> { %v1515_v9 = vpop.xlane.xlu0 %1514 }
 0x6be   : >> { %3994 = vrcp.f32 %v1515_v9  ;;  %v1527_v15 = vand.u32 2147483648, %v1515_v9  ;;  %v1525_v17 = vand.u32 2147483647, %v1515_v9  ;;  %vm1521_vm15 = vweird.f32 %v1515_v9 }
 0x6c0   : >> { %v1528_v19 = vor.u32 1.1754944e-38, %v1527_v15  ;;  %vm1526_vm3 = vcmp.eq.f32.partialorder %v1525_v17, 8.507059e+37 }
 0x6c4   : >> { %v3995_v12 = vpop.eup %3994 }
 0x6c5   : >> { %v1517_v13 = vmul.f32 %v3995_v12, %v1515_v9  ;;  %vm1522_vm14 = vweird.f32 %v3995_v12 }
 0x6c6   : >> { %vm1523_vm1 = vmor %vm1521_vm15, %vm1522_vm14 }
 0x6c7   : >> { %v1518_v14 = vsub.f32 1.0, %v1517_v13 }
 0x6c9   : >> { %v1519_v16 = vmul.f32 %v3995_v12, %v1518_v14 }
 0x6cb   : >> { %v1520_v18 = vadd.f32 %v3995_v12, %v1519_v16 }
 0x6cd   : >> { %v1524_v20 = vsel %vm1523_vm1, %v3995_v12, %v1520_v18  ;;  %vm1477_vm1 = vcmask 122944  }
 0x6ce   : >> { %v1529_v21 = vsel %vm1526_vm3, %v1528_v19, %v1524_v20  ;;  %vm1561_vm3 = vcmask 188544  }
 0x6cf   : >> { %v1530_v22 = vmul.f32 %v3989_v58, %v1529_v21  ;;  %v1314_v58 = vld [vmem:[%s5316_s7] sm:$0xff]  ;;  %s5320_s7 = sld [smem:[#allocation25_spill]] }
 0x6d0   : >> { %1666 = vmatpush.msra.mxu0 %v1314_v58 }
 0x6d1   : >> { %3723 = vmatmul.msk.f32.vlgmr.msra.gmra.mxu1 %vm5281_vm7, %v1530_v22 }
 0x6d6   : >> { %v1430_v23 = vpop.xlane.xlu0 %1429 }
 0x6d7   : >> { %3996 = vrcp.f32 %v1430_v23  ;;  %v1442_v36 = vand.u32 2147483648, %v1430_v23  ;;  %vm1436_vm8 = vweird.f32 %v1430_v23  ;;  %v1440_v37 = vand.u32 2147483647, %v1430_v23 }
 0x6d9   : >> { %v1443_v40 = vor.u32 1.1754944e-38, %v1442_v36  ;;  %vm1441_vm10 = vcmp.eq.f32.partialorder %v1440_v37, 8.507059e+37 }
 0x6dd   : >> { %v3997_v24 = vpop.eup %3996 }
 0x6de   : >> { %v1599_v25 = vpop.xlane.xlu1 %1598  ;;  %v1432_v26 = vmul.f32 %v3997_v24, %v1430_v23  ;;  %vm1437_vm6 = vweird.f32 %v3997_v24 }
 0x6df   : >> { %3998 = vrcp.f32 %v1599_v25  ;;  %vm1438_vm9 = vmor %vm1436_vm8, %vm1437_vm6  ;;  %v1611_v43 = vand.u32 2147483648, %v1599_v25  ;;  %vm1605_vm13 = vweird.f32 %v1599_v25  ;;  %v1609_v44 = vand.u32 2147483647, %v1599_v25 }
 0x6e0   : >> { %v1433_v28 = vsub.f32 1.0, %v1432_v26  ;;  %vm1645_vm6 = vcmask 254144  }
 0x6e1   : >> { %v1612_v49 = vor.u32 1.1754944e-38, %v1611_v43  ;;  %vm1610_vm15 = vcmp.eq.f32.partialorder %v1609_v44, 8.507059e+37 }
 0x6e2   : >> { %v1434_v30 = vmul.f32 %v3997_v24, %v1433_v28  ;;  %v1672_v28 = vld [vmem:[%s5319_s22] sm:$0x1]  ;;  %s5325_s22 = sld [smem:[#allocation29_spill]] }
 0x6e4   : >> { %v1435_v34 = vadd.f32 %v3997_v24, %v1434_v30  ;;  %v1673_v30 = vld [vmem:[%s5320_s7] sm:$0x1]  ;;  %s5327_s7 = sld [smem:[#allocation30_spill]] }
 0x6e5   : >> { %v3999_v29 = vpop.eup %3998 }
 0x6e6   : >> { %v1601_v32 = vmul.f32 %v3999_v29, %v1599_v25  ;;  %v1439_v38 = vsel %vm1438_vm9, %v3997_v24, %v1435_v34  ;;  %vm1606_vm11 = vweird.f32 %v3999_v29 }
 0x6e7   : >> { %v1444_v41 = vsel %vm1441_vm10, %v1443_v40, %v1439_v38  ;;  %vm1607_vm14 = vmor %vm1605_vm13, %vm1606_vm11  ;;  %vm1760_vm11 = vcmask 122880  }
 0x6e8   : >> { %v1602_v35 = vsub.f32 1.0, %v1601_v32  ;;  %v1445_v46 = vmul.f32 %v3991_v3, %v1444_v41 }
 0x6e9   : >> { %v1616_v48 = vpop.permute.xlu0 %1615 }
 0x6ea   : >> { %v1603_v39 = vmul.f32 %v3999_v29, %v1602_v35 }
 0x6ec   : >> { %v1604_v42 = vadd.f32 %v3999_v29, %v1603_v39 }
 0x6ee   : >> { %v1608_v47 = vsel %vm1607_vm14, %v3999_v29, %v1604_v42 }
 0x6ef   : >> { %v1613_v50 = vsel %vm1610_vm15, %v1612_v49, %v1608_v47 }
 0x6f0   : >> { %v1614_v51 = vmul.f32 %v3993_v7, %v1613_v50 }
 0x6f6   : >> { %v1448_v45 = vpop.permute.xlu1 %1447 }
 0x6f7   : >> { %1468 = vmatpush.msra.mxu2 %v1448_v45 }
 0x6f8   : >> { %3720 = vmatmul.msk.f32.vlgmr.msra.gmra.mxu2 %vm5281_vm7, %v1445_v46 }
 0x6f9   : >> { %1636 = vmatpush.msrb.mxu2 %v1616_v48 }
 0x700   : >> { %3726 = vmatmul.msk.f32.vlgmr.msrb.gmra.mxu2 %vm5281_vm7, %v1614_v51 }
 0x74e   : >> { %v1554_v52 = vpop.f32.mrf.mxu1 }
 0x74f   : >> { %1558 = vrot.lane.b32.xlu1 %v1554_v52, %s5279_s1  ;;  %s5318_s1 = sld [smem:[#allocation26_spill]] }
 0x755   : >> { %v1701_v14 = vld [vmem:[%s5318_s1 + $0x18] sm:$0xff]  ;;  %v1699_v15 = vld [vmem:[%s5318_s1 + $0x8] sm:$0xff]  ;;  %v1698_v16 = vld [vmem:[%s5318_s1] sm:$0xff] }
 0x756   : >> { %1718 = vmatpush.msrb.mxu1 %v1701_v14 }
 0x77b   : >> { %v1470_v53 = vpop.f32.mrf.mxu2 }
 0x77c   : >> { %1474 = vrot.lane.b32.xlu0 %v1470_v53, %s4368_s15 }
 0x783   : >> { %v1638_v54 = vpop.f32.mrf.mxu2 }
 0x784   : >> { %1642 = vrot.lane.b32.xlu0 %v1638_v54, %s5280_s29  ;;  %s5321_s29 = sld [smem:[#allocation27_spill]] }
 0x78a   : >> { %v1702_v37 = vld [vmem:[%s5321_s29] sm:$0x1]  ;;  %s4370_s29 = smov 88  }
 0x78c   : >> { %1910 = vrot.lane.b32.xlu0 %v4730_v63, %s4366_s18 }
 0x794   : >> { %1908 = vrot.lane.b32.xlu0 %v4732_v1, %s4366_s18 }
 0x79c   : >> { %1820 = vrot.lane.b32.xlu0 %v4730_v63, %s4363_s26 }
 0x7a4   : >> { %1818 = vrot.lane.b32.xlu0 %v4732_v1, %s4363_s26 }
 0x7c1   : >> { %v1559_v60 = vpop.permute.xlu1 %1558 }
 0x7ee   : >> { %v1475_v59 = vpop.permute.xlu0 %1474 }
 0x7ef   : >> { %1478 = vst.msk [vmem:[#allocation6] sm:$0x1] %vm1477_vm1, %v1475_v59 }
 0x7f0   : >> { %1562 = vst.msk [vmem:[#allocation6] sm:$0x1] %vm1561_vm3, %v1559_v60  ;;  %v4893_v60 = vpack.i.bf16 %v4732_v1, %v4730_v63 }
 0x7f6   : >> { %v1643_v61 = vpop.permute.xlu0 %1642 }
 0x7f7   : >> { %1646 = vst.msk [vmem:[#allocation6] sm:$0x1] %vm1645_vm6, %v1643_v61 }
 0x7fe   : >> { %v1647_v62 = vld [vmem:[#allocation6] sm:$0x1]  ;;  %v1911_v35 = vpop.permute.xlu0 %1910 }
 0x7ff   : >> { %3727 = vmatmul.msk.f32.vlgmr.msra.gmra.mxu0 %vm1020_vm0, %v1647_v62  ;;  %3737 = vmatpush.xpose.msk.msra.mxu3 %vm5281_vm7, %v1911_v35 }
 0x806   : >> { %v1909_v36 = vpop.permute.xlu0 %1908 }
 0x807   : >> { %3738 = vmatpush.xpose.msk.msra.mxu3 %vm5281_vm7, %v1909_v36 }
 0x80e   : >> { %v1821_v40 = vpop.permute.xlu0 %1820 }
 0x80f   : >> { %3733 = vmatpush.xpose.msk.msrb.mxu0 %vm5281_vm7, %v1821_v40 }
 0x816   : >> { %v1819_v41 = vpop.permute.xlu0 %1818 }
 0x817   : >> { %3734 = vmatpush.xpose.msk.msrb.mxu0 %vm5281_vm7, %v1819_v41 }
 0x87c   : >> { %v1668_v2 = vpop.f32.mrf.mxu0 }
 0x87d   : >> { %v1669_v3 = vadd.f32 %v1668_v2, %v1318_v0 }
 0x87f   : >> { %v4850_v5 = vadd.f32 %v1669_v3, %v4749_v4  ;;  %v1700_v4 = vld [vmem:[%s5318_s1 + $0x10] sm:$0xff]  ;;  %s5324_s1 = smov 16  }
 0x880   : >> { %1719 = vmatpush.msrb.mxu1 %v1700_v4 }
 0x881   : >> { %v1674_v6 = vsel %vm1160_vm12, %v4850_v5, 0.0 }
 0x882   : >> { %1675 = vadd.xlane.f32.xlu2 %v1674_v6  ;;  %1720 = vmatpush.msrb.mxu1 %v1699_v15 }
 0x884   : >> { %1721 = vmatpush.msrb.mxu1 %v1698_v16 }
 0x8f5   : >> { %v1676_v7 = vpop.xlane.xlu2 %1675 }
 0x8f6   : >> { %v1677_v8 = vmul.f32 %v1676_v7, %v4679_v10 }
 0x8f8   : >> { %v1678_v9 = vsub.f32 %v4850_v5, %v1677_v8 }
 0x8fa   : >> { %v1679_v12 = vmul.f32 %v1678_v9, %v1678_v9 }
 0x8fc   : >> { %v1680_v13 = vsel %vm1160_vm12, %v1679_v12, 0.0 }
 0x8fd   : >> { %1681 = vadd.xlane.f32.xlu1 %v1680_v13 }
 0x916   : >> { %2000 = vrot.lane.b32.xlu1 %v4730_v63, %s4364_s2 }
 0x970   : >> { %v1682_v17 = vpop.xlane.xlu1 %1681 }
 0x971   : >> { %v1683_v18 = vmul.f32 %v1682_v17, %v4679_v10 }
 0x973   : >> { %v1684_v19 = vadd.f32 1e-05, %v1683_v18 }
 0x975   : >> { %4000 = vrsqrt.f32 %v1684_v19  ;;  %vm1691_vm9 = vweird.f32 %v1684_v19 }
 0x97b   : >> { %v4001_v20 = vpop.eup %4000 }
 0x97c   : >> { %v1686_v21 = vmul.f32 %v4001_v20, %v1684_v19  ;;  %vm1692_vm8 = vweird.f32 %v4001_v20 }
 0x97d   : >> { %vm1693_vm10 = vmor %vm1691_vm9, %vm1692_vm8  ;;  %vm1791_vm9 = vcmask 130048  }
 0x97e   : >> { %v1687_v22 = vmul.f32 %v4001_v20, %v1686_v21 }
 0x980   : >> { %v1688_v23 = vmul.f32 0.5, %v1687_v22 }
 0x982   : >> { %v1689_v24 = vsub.f32 1.5, %v1688_v23 }
 0x984   : >> { %v1690_v25 = vmul.f32 %v4001_v20, %v1689_v24 }
 0x986   : >> { %v1694_v26 = vsel %vm1693_vm10, %v4001_v20, %v1690_v25 }
 0x987   : >> { %v1695_v29 = vmul.f32 %v1694_v26, %v1678_v9 }
 0x988   : >> { %v2001_v42 = vpop.permute.xlu1 %2000 }
 0x989   : >> { %v1696_v32 = vmul.f32 %v1695_v29, %v1672_v28  ;;  %3741 = vmatpush.xpose.msk.msra.mxu0 %vm5281_vm7, %v2001_v42 }
 0x98b   : >> { %v1697_v34 = vadd.f32 %v1696_v32, %v1673_v30 }
 0x98d   : >> { %3728 = vmatmul.msk.f32.vlgmr.msrb.gmra.mxu1 %vm1020_vm0, %v1697_v34 }
 0xa0a   : >> { %v1723_v38 = vpop.f32.mrf.mxu1 }
 0xa0b   : >> { %v1724_v39 = vadd.f32 %v1723_v38, %v1702_v37 }
 0xa0d   : >> { %1816 = vrot.lane.b32.xlu2 %v1724_v39, %s4363_s26  ;;  %1906 = vrot.lane.b32.xlu0 %v1724_v39, %s4366_s18  ;;  %s4371_s26 = smov 72   ;;  %s5323_s18 = smov 24  }
 0xa0e   : >> { %3731 = vmatmul.msk.f32.vlgmr.msrb.gmra.mxu3 %vm5281_vm7, %v1724_v39 }
 0xa15   : >> { %1998 = vrot.lane.b32.xlu0 %v4732_v1, %s4364_s2 }
 0xa1d   : >> { %1996 = vrot.lane.b32.xlu0 %v1724_v39, %s4364_s2  ;;  %s5322_s2 = sld [smem:[#allocation28_spill]] }
 0xa67   : >> { %v1817_v43 = vpop.permute.xlu2 %1816 }
 0xa68   : >> { %3735 = vmatmul.msk.f32.vlgmr.msrb.gmra.mxu0 %vm5281_vm7, %v1817_v43 }
 0xa7f   : >> { %v1907_v44 = vpop.permute.xlu0 %1906 }
 0xa80   : >> { %3739 = vmatmul.msk.f32.vlgmr.msra.gmra.mxu3 %vm5281_vm7, %v1907_v44 }
 0xa87   : >> { %v1999_v45 = vpop.permute.xlu0 %1998 }
 0xa88   : >> { %3742 = vmatpush.xpose.msk.msra.mxu0 %vm5281_vm7, %v1999_v45 }
 0xa8f   : >> { %v1997_v46 = vpop.permute.xlu0 %1996 }
 0xa90   : >> { %3743 = vmatmul.msk.f32.vlgmr.msra.gmra.mxu0 %vm5281_vm7, %v1997_v46 }
 0xa91   : >> { %v1757_v47 = vpop.f32.mrf.mxu3 }
 0xa92   : >> { %v1761_v48 = vsel %vm1760_vm11, %v1757_v47, -inf }
 0xa93   : >> { %1762 = vmax.xlane.f32.xlu0 %v1761_v48 }
 0xae5   : >> { %v1845_v49 = vpop.f32.mrf.mxu0 }
 0xae6   : >> { %v1848_v50 = vsel %vm1760_vm11, %v1845_v49, -inf }
 0xae7   : >> { %1849 = vmax.xlane.f32.xlu2 %v1848_v50 }
 0xb03   : >> { %v1935_v51 = vpop.f32.mrf.mxu3 }
 0xb04   : >> { %v1938_v52 = vsel %vm1760_vm11, %v1935_v51, -inf }
 0xb05   : >> { %1939 = vmax.xlane.f32.xlu1 %v1938_v52 }
 0xb06   : >> { %v1763_v53 = vpop.xlane.xlu0 %1762 }
 0xb07   : >> { %v1764_v54 = vsub.f32 %v1757_v47, %v1763_v53 }
 0xb09   : >> { %v1765_v55 = vmul.f32 1.442695, %v1764_v54 }
 0xb0b   : >> { %4002 = vpow2.f32 %v1765_v55 }
 0xb0d   : >> { %v2025_v56 = vpop.f32.mrf.mxu0 }
 0xb0e   : >> { %v2028_v57 = vsel %vm1760_vm11, %v2025_v56, -inf }
 0xb0f   : >> { %2029 = vmax.xlane.f32.xlu0 %v2028_v57 }
 0xb11   : >> { %v4887_v58 = vpop.eup %4002 }
 0xb12   : >> { %v1767_v59 = vsel %vm1760_vm11, %v4887_v58, 0.0 }
 0xb13   : >> { %1768 = vadd.xlane.f32.xlu2 %v1767_v59 }
 0xb23   : >> { %3965 = vrot.lane.b32.xlu0 %v4893_v60, %s4370_s29  ;;  %s5328_s29 = sld [smem:[#allocation31_spill]] }
 0xb5a   : >> { %v1850_v61 = vpop.xlane.xlu2 %1849 }
 0xb5b   : >> { %v1851_v62 = vsub.f32 %v1845_v49, %v1850_v61 }
 0xb5d   : >> { %v1852_v0 = vmul.f32 1.442695, %v1851_v62 }
 0xb5f   : >> { %4004 = vpow2.f32 %v1852_v0 }
 0xb65   : >> { %v4005_v2 = vpop.eup %4004 }
 0xb66   : >> { %v1854_v3 = vsel %vm1760_vm11, %v4005_v2, 0.0 }
 0xb67   : >> { %1855 = vadd.xlane.f32.xlu1 %v1854_v3 }
 0xb78   : >> { %v1940_v6 = vpop.xlane.xlu1 %1939 }
 0xb79   : >> { %v1941_v7 = vsub.f32 %v1935_v51, %v1940_v6 }
 0xb7b   : >> { %v1942_v8 = vmul.f32 1.442695, %v1941_v7 }
 0xb7d   : >> { %4006 = vpow2.f32 %v1942_v8 }
 0xb80   : >> { %3960 = vrot.lane.b32.xlu1 %v4893_v60, %s4362_s28  ;;  %s4372_s28 = smov 80  }
 0xb82   : >> { %v2030_v9 = vpop.xlane.xlu0 %2029 }
 0xb83   : >> { %v4899_v12 = vpop.eup %4006  ;;  %v2031_v13 = vsub.f32 %v2025_v56, %v2030_v9 }
 0xb84   : >> { %v1944_v14 = vsel %vm1760_vm11, %v4899_v12, 0.0 }
 0xb85   : >> { %v2032_v4 = vmul.f32 1.442695, %v2031_v13  ;;  %1945 = vadd.xlane.f32.xlu0 %v1944_v14 }
 0xb86   : >> { %v1769_v20 = vpop.xlane.xlu2 %1768 }
 0xb87   : >> { %4008 = vpow2.f32 %v2032_v4  ;;  %v1781_v41 = vand.u32 2147483648, %v1769_v20  ;;  %v1779_v42 = vand.u32 2147483647, %v1769_v20 }
 0xb88   : >> { %4010 = vrcp.f32 %v1769_v20 }
 0xb89   : >> { %v1782_v44 = vor.u32 1.1754944e-38, %v1781_v41  ;;  %vm1780_vm4 = vcmp.eq.f32.partialorder %v1779_v42, 8.507059e+37 }
 0xb8d   : >> { %v4903_v15 = vpop.eup %4008 }
 0xb8e   : >> { %v2034_v16 = vsel %vm1760_vm11, %v4903_v15, 0.0  ;;  %v4011_v22 = vpop.eup %4010  ;;  %vm1775_vm11 = vweird.f32 %v1769_v20 }
 0xb8f   : >> { %2035 = vadd.xlane.f32.xlu2 %v2034_v16  ;;  %v1771_v23 = vmul.f32 %v4011_v22, %v1769_v20  ;;  %vm1776_vm10 = vweird.f32 %v4011_v22 }
 0xb90   : >> { %vm1777_vm7 = vmor %vm1775_vm11, %vm1776_vm10 }
 0xb91   : >> { %v1772_v26 = vsub.f32 1.0, %v1771_v23 }
 0xb93   : >> { %v1773_v34 = vmul.f32 %v4011_v22, %v1772_v26 }
 0xb95   : >> { %v3966_v17 = vpop.permute.xlu0 %3965  ;;  %v1774_v39 = vadd.f32 %v4011_v22, %v1773_v34 }
 0xb96   : >> { %v3968_v18 = vunpack.i.h.bf16 %v3966_v17  ;;  %v3967_v19 = vunpack.i.l.bf16 %v3966_v17 }
 0xb97   : >> { %v1778_v43 = vsel %vm1777_vm7, %v4011_v22, %v1774_v39 }
 0xb98   : >> { %1895 = vmatpush.msra.mxu1 %v3967_v19  ;;  %v1783_v46 = vsel %vm1780_vm4, %v1782_v44, %v1778_v43 }
 0xb99   : >> { %3975 = vrot.lane.b32.xlu0 %v4893_v60, %s4371_s26  ;;  %v1784_v49 = vmul.f32 %v4887_v58, %v1783_v46  ;;  %s5329_s26 = sld [smem:[#allocation34_spill]] }
 0xb9a   : >> { %1896 = vmatpush.msra.mxu1 %v3968_v18 }
 0xba7   : >> { %3970 = vrot.lane.b32.xlu2 %v4893_v60, %s4372_s28  ;;  %s5330_s28 = sld [smem:[#allocation33_spill]] }
 0xbda   : >> { %v1856_v21 = vpop.xlane.xlu1 %1855 }
 0xbdb   : >> { %4012 = vrcp.f32 %v1856_v21  ;;  %v1868_v29 = vand.u32 2147483648, %v1856_v21  ;;  %v1866_v32 = vand.u32 2147483647, %v1856_v21  ;;  %vm1862_vm14 = vweird.f32 %v1856_v21 }
 0xbdd   : >> { %v1869_v36 = vor.u32 1.1754944e-38, %v1868_v29  ;;  %vm1867_vm8 = vcmp.eq.f32.partialorder %v1866_v32, 8.507059e+37  ;;  %v1728_v29 = vld [vmem:[%s5322_s2 + $0x10] sm:$0xff]  ;;  %v1726_v32 = vld [vmem:[%s5322_s2] sm:$0xff] }
 0xbe1   : >> { %v4013_v24 = vpop.eup %4012 }
 0xbe2   : >> { %v1858_v25 = vmul.f32 %v4013_v24, %v1856_v21  ;;  %vm1863_vm13 = vweird.f32 %v4013_v24 }
 0xbe3   : >> { %vm1864_vm15 = vmor %vm1862_vm14, %vm1863_vm13 }
 0xbe4   : >> { %v1859_v28 = vsub.f32 1.0, %v1858_v25 }
 0xbe6   : >> { %v1860_v30 = vmul.f32 %v4013_v24, %v1859_v28 }
 0xbe8   : >> { %v1861_v35 = vadd.f32 %v4013_v24, %v1860_v30  ;;  %v1727_v30 = vld [vmem:[%s5322_s2 + $0x8] sm:$0xff] }
 0xbea   : >> { %v1865_v37 = vsel %vm1864_vm15, %v4013_v24, %v1861_v35 }
 0xbeb   : >> { %v1870_v38 = vsel %vm1867_vm8, %v1869_v36, %v1865_v37  ;;  %v1730_v37 = vld [vmem:[%s5325_s22] sm:$0x1] }
 0xbec   : >> { %v1871_v40 = vmul.f32 %v4005_v2, %v1870_v38 }
 0xbee   : >> { %3736 = vmatmul.msk.f32.vlgmr.msra.gmra.mxu1 %vm1791_vm9, %v1871_v40 }
 0xbf2   : >> { %v3961_v45 = vpop.permute.xlu1 %3960 }
 0xbf3   : >> { %v3963_v47 = vunpack.i.h.bf16 %v3961_v45  ;;  %v3962_v48 = vunpack.i.l.bf16 %v3961_v45 }
 0xbf5   : >> { %1809 = vmatpush.msra.mxu2 %v3962_v48 }
 0xbf7   : >> { %1810 = vmatpush.msra.mxu2 %v3963_v47 }
 0xbf8   : >> { %v1946_v50 = vpop.xlane.xlu0 %1945  ;;  %3732 = vmatmul.msk.f32.vlgmr.msra.gmra.mxu2 %vm1791_vm9, %v1784_v49 }
 0xbf9   : >> { %4014 = vrcp.f32 %v1946_v50  ;;  %v1958_v56 = vand.u32 2147483648, %v1946_v50  ;;  %vm1952_vm4 = vweird.f32 %v1946_v50  ;;  %v1956_v59 = vand.u32 2147483647, %v1946_v50 }
 0xbfb   : >> { %v1959_v58 = vor.u32 1.1754944e-38, %v1958_v56  ;;  %vm1957_vm14 = vcmp.eq.f32.partialorder %v1956_v59, 8.507059e+37 }
 0xbff   : >> { %v4015_v51 = vpop.eup %4014 }
 0xc00   : >> { %v1948_v52 = vmul.f32 %v4015_v51, %v1946_v50  ;;  %vm1953_vm7 = vweird.f32 %v4015_v51 }
 0xc01   : >> { %vm1954_vm13 = vmor %vm1952_vm4, %vm1953_vm7 }
 0xc02   : >> { %v1949_v53 = vsub.f32 1.0, %v1948_v52  ;;  %v2036_v54 = vpop.xlane.xlu2 %2035 }
 0xc03   : >> { %4016 = vrcp.f32 %v2036_v54  ;;  %v2048_v4 = vand.u32 2147483648, %v2036_v54  ;;  %v2046_v17 = vand.u32 2147483647, %v2036_v54  ;;  %vm2042_vm8 = vweird.f32 %v2036_v54 }
 0xc04   : >> { %v1950_v55 = vmul.f32 %v4015_v51, %v1949_v53 }
 0xc05   : >> { %v2049_v20 = vor.u32 1.1754944e-38, %v2048_v4  ;;  %vm2047_vm11 = vcmp.eq.f32.partialorder %v2046_v17, 8.507059e+37 }
 0xc06   : >> { %v1951_v57 = vadd.f32 %v4015_v51, %v1950_v55 }
 0xc08   : >> { %v1955_v61 = vsel %vm1954_vm13, %v4015_v51, %v1951_v57 }
 0xc09   : >> { %v4017_v62 = vpop.eup %4016  ;;  %v1960_v3 = vsel %vm1957_vm14, %v1959_v58, %v1955_v61 }
 0xc0a   : >> { %v2038_v0 = vmul.f32 %v4017_v62, %v2036_v54  ;;  %v3971_v2 = vpop.permute.xlu2 %3970  ;;  %vm2043_vm15 = vweird.f32 %v4017_v62  ;;  %v1961_v18 = vmul.f32 %v4899_v12, %v1960_v3 }
 0xc0b   : >> { %v3973_v6 = vunpack.i.h.bf16 %v3971_v2  ;;  %v3972_v7 = vunpack.i.l.bf16 %v3971_v2  ;;  %v3976_v8 = vpop.permute.xlu0 %3975  ;;  %vm2044_vm10 = vmor %vm2042_vm8, %vm2043_vm15 }
 0xc0c   : >> { %v2039_v9 = vsub.f32 1.0, %v2038_v0  ;;  %v3978_v13 = vunpack.i.h.bf16 %v3976_v8  ;;  %v3977_v14 = vunpack.i.l.bf16 %v3976_v8  ;;  %v2112_v0 = vld [vmem:[%s5328_s29] sm:$0x1] }
 0xc0d   : >> { %1985 = vmatpush.msrb.mxu2 %v3972_v7  ;;  %v2218_v7 = vld [vmem:[%s5329_s26 + $0x70] sm:$0xff]  ;;  %v2141_v8 = vld [vmem:[%s5330_s28] sm:$0x1] }
 0xc0e   : >> { %v2040_v16 = vmul.f32 %v4017_v62, %v2039_v9  ;;  %2075 = vmatpush.msrb.mxu1 %v3977_v14  ;;  %v2217_v9 = vld [vmem:[%s5329_s26 + $0x68] sm:$0xff]  ;;  %v2216_v14 = vld [vmem:[%s5329_s26 + $0x60] sm:$0xff] }
 0xc0f   : >> { %1986 = vmatpush.msrb.mxu2 %v3973_v6  ;;  %v2219_v6 = vld [vmem:[%s5329_s26 + $0x78] sm:$0xff] }
 0xc10   : >> { %v2041_v19 = vadd.f32 %v4017_v62, %v2040_v16  ;;  %3740 = vmatmul.msk.f32.vlgmr.msrb.gmra.mxu2 %vm1791_vm9, %v1961_v18  ;;  %2076 = vmatpush.msrb.mxu1 %v3978_v13  ;;  %v2215_v16 = vld [vmem:[%s5329_s26 + $0x58] sm:$0xff]  ;;  %v2214_v18 = vld [vmem:[%s5329_s26 + $0x50] sm:$0xff] }
 0xc11   : >> { %2220 = vmatpush.msrb.mxu0 %v2219_v6  ;;  %v2241_v6 = vld [vmem:[#allocation7] sm:$0x1] }
 0xc12   : >> { %v2045_v21 = vsel %vm2044_vm10, %v4017_v62, %v2041_v19  ;;  %v2111_v62 = vld [vmem:[%s5327_s7] sm:$0x1] }
 0xc13   : >> { %v2050_v22 = vsel %vm2047_vm11, %v2049_v20, %v2045_v21  ;;  %2221 = vmatpush.msrb.mxu0 %v2218_v7  ;;  %v2213_v20 = vld [vmem:[%s5329_s26 + $0x48] sm:$0xff] }
 0xc14   : >> { %v2051_v23 = vmul.f32 %v4903_v15, %v2050_v22  ;;  %v1729_v15 = vld [vmem:[%s5322_s2 + $0x18] sm:$0xff]  ;;  %v2212_v22 = vld [vmem:[%s5329_s26 + $0x40] sm:$0xff]  ;;  %s2354_s2 = sadd.s32 1, %s4323_s16  }
 0xc15   : >> { %2102 = vmatpush.msrb.mxu3 %v1729_v15  ;;  %2222 = vmatpush.msrb.mxu0 %v2217_v9  ;;  %p1164_p9 = scmp.ge.s32.totalorder %s2354_s2, 7  }
 0xc16   : >> { %3744 = vmatmul.msk.f32.vlgmr.msrb.gmra.mxu1 %vm1791_vm9, %v2051_v23  ;;  %s4376_s22 = smov (%p1164_p9), 104   ;;  %s4378_s7 = smov (%p1164_p9), 80  }
 0xc17   : >> { %2103 = vmatpush.msrb.mxu3 %v1728_v29  ;;  %2223 = vmatpush.msrb.mxu0 %v2216_v14  ;;  %v2207_v29 = vld [vmem:[%s5329_s26 + $0x18] sm:$0xff]  ;;  %s4379_s29 = smov (%p1164_p9), 72   ;;  %s5356_s28 = sld [smem:[#allocation22_spill]] (%p1164_p9) }
 0xc19   : >> { %2104 = vmatpush.msrb.mxu3 %v1727_v30  ;;  %2224 = vmatpush.msrb.mxu0 %v2215_v16 }
 0xc1b   : >> { %2105 = vmatpush.msrb.mxu3 %v1726_v32  ;;  %2225 = vmatpush.msrb.mxu0 %v2214_v18  ;;  %v2206_v32 = vld [vmem:[%s5329_s26 + $0x10] sm:$0xff]  ;;  %v2272_v18 = vld [vmem:[%s4538_s20 + $0x18] sm:$0xff] }
 0xc1c   : >> { %2289 = vmatpush.msra.mxu1 %v2272_v18  ;;  %v2398_v18 = vld [vmem:[%s4438_s14] sm:$0xff] (%p1164_p9) }
 0xc1d   : >> { %2226 = vmatpush.msrb.mxu0 %v2213_v20  ;;  %v2270_v20 = vld [vmem:[%s4538_s20 + $0x8] sm:$0xff] }
 0xc1f   : >> { %2227 = vmatpush.msrb.mxu0 %v2212_v22 }
 0xc6b   : >> { %v1898_v12 = vpop.f32.mrf.mxu1 }
 0xc6c   : >> { %1902 = vrot.lane.b32.xlu1 %v1898_v12, %s4368_s15  ;;  %s5326_s15 = sld [smem:[#allocation32_spill]]  ;;  %v2211_v12 = vld [vmem:[%s5329_s26 + $0x38] sm:$0xff] }
 0xc6d   : >> { %2228 = vmatpush.msrb.mxu0 %v2211_v12 }
 0xc72   : >> { %v2140_v47 = vld [vmem:[%s5326_s15 + $0x18] sm:$0xff]  ;;  %v2139_v48 = vld [vmem:[%s5326_s15 + $0x10] sm:$0xff]  ;;  %v2138_v49 = vld [vmem:[%s5326_s15 + $0x8] sm:$0xff] }
 0xc73   : >> { %2157 = vmatpush.msra.mxu2 %v2140_v47 }
 0xc75   : >> { %2158 = vmatpush.msra.mxu2 %v2139_v48 }
 0xc77   : >> { %2159 = vmatpush.msra.mxu2 %v2138_v49 }
 0xc7b   : >> { %v1812_v24 = vpop.f32.mrf.mxu2 }
 0xc7c   : >> { %1815 = vst.msk [vmem:[#allocation6] sm:$0x1] %vm1122_vm5, %v1812_v24  ;;  %v2210_v24 = vld [vmem:[%s5329_s26 + $0x30] sm:$0xff] }
 0xc7d   : >> { %2229 = vmatpush.msrb.mxu0 %v2210_v24 }
 0xc93   : >> { %v1988_v25 = vpop.f32.mrf.mxu2  ;;  %v2078_v26 = vpop.f32.mrf.mxu1 }
 0xc94   : >> { %2082 = vrot.lane.b32.xlu0 %v2078_v26, %s5323_s18  ;;  %1992 = vrot.lane.b32.xlu2 %v1988_v25, %s5324_s1  ;;  %v2209_v25 = vld [vmem:[%s5329_s26 + $0x28] sm:$0xff]  ;;  %v2208_v26 = vld [vmem:[%s5329_s26 + $0x20] sm:$0xff]  ;;  %s5332_s18 = scalar_lea.vmem [#allocation2], %s4323_s16  ;;  %s5333_s16 = smov %s2354_s2 }
 0xc95   : >> { %2230 = vmatpush.msrb.mxu0 %v2209_v25  ;;  %s4374_s16 = smov (%p1164_p9), 96   ;;  %s4375_s1 = smov (%p1164_p9), 120  }
 0xc97   : >> { %2231 = vmatpush.msrb.mxu0 %v2208_v26 }
 0xc99   : >> { %2232 = vmatpush.msrb.mxu0 %v2207_v29 }
 0xc9b   : >> { %2233 = vmatpush.msrb.mxu0 %v2206_v32 }
 0xcde   : >> { %v1903_v28 = vpop.permute.xlu1 %1902 }
 0xcdf   : >> { %1905 = vst.msk [vmem:[#allocation6] sm:$0x1] %vm1477_vm1, %v1903_v28 }
 0xcee   : >> { %v1993_v34 = vpop.permute.xlu2 %1992 }
 0xcef   : >> { %1995 = vst.msk [vmem:[#allocation6] sm:$0x1] %vm1561_vm3, %v1993_v34 }
 0xd06   : >> { %v2083_v35 = vpop.permute.xlu0 %2082 }
 0xd07   : >> { %2085 = vst.msk [vmem:[#allocation6] sm:$0x1] %vm1645_vm6, %v2083_v35 }
 0xd0e   : >> { %v2086_v36 = vld [vmem:[#allocation6] sm:$0x1] }
 0xd0f   : >> { %3745 = vmatmul.msk.f32.vlgmr.msrb.gmra.mxu3 %vm1020_vm0, %v2086_v36 }
 0xd92   : >> { %v2107_v38 = vpop.f32.mrf.mxu3 }
 0xd93   : >> { %v2108_v39 = vadd.f32 %v2107_v38, %v1730_v37  ;;  %v2205_v37 = vld [vmem:[%s5329_s26 + $0x8] sm:$0xff]  ;;  %v2204_v38 = vld [vmem:[%s5329_s26] sm:$0xff]  ;;  %s4380_s26 = smov (%p1164_p9), 88  }
 0xd94   : >> { %2234 = vmatpush.msrb.mxu0 %v2205_v37  ;;  %v2273_v37 = vld [vmem:[#allocation13] sm:$0x1] }
 0xd95   : >> { %v4930_v40 = vadd.f32 %v2108_v39, %v4850_v5  ;;  %v2137_v5 = vld [vmem:[%s5326_s15] sm:$0xff]  ;;  %s4377_s15 = smov (%p1164_p9), 112  }
 0xd96   : >> { %2160 = vmatpush.msra.mxu2 %v2137_v5  ;;  %2235 = vmatpush.msrb.mxu0 %v2204_v38 }
 0xd97   : >> { %v2113_v41 = vsel %vm1160_vm12, %v4930_v40, 0.0 }
 0xd98   : >> { %2114 = vadd.xlane.f32.xlu1 %v2113_v41 }
 0xe0b   : >> { %v2115_v42 = vpop.xlane.xlu1 %2114 }
 0xe0c   : >> { %v2116_v43 = vmul.f32 %v2115_v42, %v4679_v10 }
 0xe0e   : >> { %v2117_v44 = vsub.f32 %v4930_v40, %v2116_v43 }
 0xe10   : >> { %v2118_v45 = vmul.f32 %v2117_v44, %v2117_v44 }
 0xe12   : >> { %v2119_v46 = vsel %vm1160_vm12, %v2118_v45, 0.0 }
 0xe13   : >> { %2120 = vadd.xlane.f32.xlu2 %v2119_v46 }
 0xe86   : >> { %v2121_v50 = vpop.xlane.xlu2 %2120 }
 0xe87   : >> { %v2122_v51 = vmul.f32 %v2121_v50, %v4679_v10 }
 0xe89   : >> { %v2123_v52 = vadd.f32 1e-05, %v2122_v51 }
 0xe8b   : >> { %4018 = vrsqrt.f32 %v2123_v52  ;;  %vm2130_vm3 = vweird.f32 %v2123_v52 }
 0xe91   : >> { %v4019_v53 = vpop.eup %4018 }
 0xe92   : >> { %v2125_v54 = vmul.f32 %v4019_v53, %v2123_v52  ;;  %vm2131_vm1 = vweird.f32 %v4019_v53 }
 0xe93   : >> { %vm2132_vm6 = vmor %vm2130_vm3, %vm2131_vm1  ;;  %vm2297_vm1 = vcmp.lt.s32.totalorder %v4708_v31, 21  ;;  %vm2299_vm3 = vcmask 1040384  }
 0xe94   : >> { %v2126_v55 = vmul.f32 %v4019_v53, %v2125_v54 }
 0xe96   : >> { %v2127_v56 = vmul.f32 0.5, %v2126_v55 }
 0xe98   : >> { %v2128_v57 = vsub.f32 1.5, %v2127_v56 }
 0xe9a   : >> { %v2129_v59 = vmul.f32 %v4019_v53, %v2128_v57 }
 0xe9c   : >> { %v2133_v61 = vsel %vm2132_vm6, %v4019_v53, %v2129_v59  ;;  %v4373_v59 = vmov -1.0  }
 0xe9d   : >> { %v2134_v58 = vmul.f32 %v2133_v61, %v2117_v44 }
 0xe9f   : >> { %v2135_v2 = vmul.f32 %v2134_v58, %v2111_v62 }
 0xea1   : >> { %v2136_v3 = vadd.f32 %v2135_v2, %v2112_v0 }
 0xea3   : >> { %3746 = vmatmul.msk.f32.vlgmr.msra.gmra.mxu2 %vm1020_vm0, %v2136_v3 }
 0xf26   : >> { %v2162_v13 = vpop.f32.mrf.mxu2 }
 0xf27   : >> { %v4950_v4 = vadd.f32 %v2162_v13, %v2141_v8 }
 0xf29   : >> { %v2166_v17 = vmul.f32 0.70710677, %v4950_v4  ;;  %v2165_v58 = vmul.f32 0.5, %v4950_v4 }
 0xf2b   : >> { %v2169_v19 = vand.u32 2147483647, %v2166_v17  ;;  %vm2167_vm15 = vcmp.ge.f32.partialorder %v2166_v17, 0.0 }
 0xf2c   : >> { %v2168_v61 = vsel %vm2167_vm15, 1.0, %v4373_v59 }
 0xf2d   : >> { %v2170_v21 = vmul.f32 0.3275911, %v2169_v19  ;;  %v2195_v44 = vsub.f32 0.0, %v2169_v19 }
 0xf2f   : >> { %v2171_v23 = vadd.f32 1.0, %v2170_v21  ;;  %v2196_v47 = vmul.f32 %v2195_v44, %v2169_v19  ;;  %v2271_v19 = vld [vmem:[%s4538_s20 + $0x10] sm:$0xff]  ;;  %v2269_v21 = vld [vmem:[%s4538_s20] sm:$0xff] }
 0xf30   : >> { %2290 = vmatpush.msra.mxu1 %v2271_v19  ;;  %v2399_v19 = vld [vmem:[%s4438_s14 + $0x8] sm:$0xff] (%p1164_p9) }
 0xf31   : >> { %4020 = vrcp.f32 %v2171_v23  ;;  %v2183_v34 = vand.u32 2147483648, %v2171_v23  ;;  %v2181_v36 = vand.u32 2147483647, %v2171_v23  ;;  %vm2177_vm4 = vweird.f32 %v2171_v23 }
 0xf32   : >> { %v2197_v5 = vmul.f32 1.442695, %v2196_v47  ;;  %2291 = vmatpush.msra.mxu1 %v2270_v20  ;;  %v4032_v20 = vpack.i.bf16 (%p1164_p9), %v2398_v18, %v2399_v19 }
 0xf33   : >> { %v2184_v41 = vor.u32 1.1754944e-38, %v2183_v34  ;;  %vm2182_vm14 = vcmp.eq.f32.partialorder %v2181_v36, 8.507059e+37  ;;  %v2244_v34 = vld [vmem:[#allocation12] sm:$0x1] }
 0xf34   : >> { %4022 = vpow2.f32 %v2197_v5  ;;  %2292 = vmatpush.msra.mxu1 %v2269_v21 }
 0xf37   : >> { %v4021_v28 = vpop.eup %4020 }
 0xf38   : >> { %v2173_v15 = vmul.f32 %v4021_v28, %v2171_v23  ;;  %vm2178_vm7 = vweird.f32 %v4021_v28 }
 0xf39   : >> { %vm2179_vm13 = vmor %vm2177_vm4, %vm2178_vm7 }
 0xf3a   : >> { %v2174_v30 = vsub.f32 1.0, %v2173_v15  ;;  %v4023_v55 = vpop.eup %4022 }
 0xf3c   : >> { %v2175_v35 = vmul.f32 %v4021_v28, %v2174_v30  ;;  %v2243_v30 = vld [vmem:[#allocation10] sm:$0x1] }
 0xf3e   : >> { %v2176_v39 = vadd.f32 %v4021_v28, %v2175_v35 }
 0xf40   : >> { %v2180_v42 = vsel %vm2179_vm13, %v4021_v28, %v2176_v39 }
 0xf41   : >> { %v2185_v43 = vsel %vm2182_vm14, %v2184_v41, %v2180_v42 }
 0xf42   : >> { %v2186_v45 = vmul.f32 1.0614054, %v2185_v43 }
 0xf44   : >> { %v2187_v46 = vadd.f32 -1.4531521, %v2186_v45 }
 0xf46   : >> { %v2188_v48 = vmul.f32 %v2187_v46, %v2185_v43 }
 0xf48   : >> { %v2189_v49 = vadd.f32 1.4214138, %v2188_v48 }
 0xf4a   : >> { %v2190_v50 = vmul.f32 %v2189_v49, %v2185_v43 }
 0xf4c   : >> { %v2191_v51 = vadd.f32 -0.28449672, %v2190_v50 }
 0xf4e   : >> { %v2192_v52 = vmul.f32 %v2191_v51, %v2185_v43  ;;  %v2326_v51 = vld [vmem:[%s4403_s13 + $0x10] sm:$0x7f] }
 0xf4f   : >> { %3749 = vmatpush.msk.msra.mxu3 %vm1136_vm2, %v2326_v51 }
 0xf50   : >> { %v2193_v53 = vadd.f32 0.2548296, %v2192_v52  ;;  %v2325_v52 = vld [vmem:[%s4403_s13 + $0x8] sm:$0xff] }
 0xf51   : >> { %2347 = vmatpush.msra.mxu3 %v2325_v52  ;;  %v4057_v52 = vld [vmem:[%s5303_s3] ss:$0 sm:$0xff] (%p1164_p9) }
 0xf52   : >> { %v2194_v54 = vmul.f32 %v2193_v53, %v2185_v43  ;;  %v2324_v53 = vld [vmem:[%s4403_s13] sm:$0xff] }
 0xf53   : >> { %2348 = vmatpush.msra.mxu3 %v2324_v53 }
 0xf54   : >> { %v2199_v56 = vmul.f32 %v4023_v55, %v2194_v54 }
 0xf56   : >> { %v2200_v57 = vsub.f32 1.0, %v2199_v56 }
 0xf58   : >> { %v2201_v62 = vmul.f32 %v2200_v57, %v2168_v61  ;;  %v2360_v57 = vstv %s2354_s2  ;;  %s5283_s2 = smov (%p1164_p9), 16  }
 0xf59   : >> { %vm2361_vm13 = vcmp.ge.s32.totalorder %v4708_v31, %v2360_v57 }
 0xf5a   : >> { %v2202_v0 = vadd.f32 1.0, %v2201_v62  ;;  %v2359_v62 = vld [vmem:[#allocation5] sm:$0x1] }
 0xf5c   : >> { %v2203_v2 = vmul.f32 %v2202_v0, %v2165_v58 }
 0xf5e   : >> { %2236 = vmatmul.f32.vlgmr.msrb.gmra.mxu0 %v2203_v2 }
 0xfdb   : >> { %v2237_v3 = vpop.f32.mrf.mxu0 }
 0xfdc   : >> { %v2240_v7 = vadd.f32 %v2237_v3, %v4930_v40 }
 0xfde   : >> { %v2242_v8 = vadd.f32 %v2241_v6, %v2240_v7  ;;  %v4026_v7 = vld [vmem:[%s4746_s11] sm:$0x1]  ;;  %s5334_s11 = sld [smem:[#allocation20_spill]] (%p1164_p9) }
 0xfe0   : >> { %v2245_v9 = vsel %vm1160_vm12, %v2242_v8, 0.0 }
 0xfe1   : >> { %2246 = vadd.xlane.f32.xlu0 %v2245_v9 }
0x1054   : >> { %v2247_v13 = vpop.xlane.xlu0 %2246 }
0x1055   : >> { %v2248_v14 = vmul.f32 %v2247_v13, %v4679_v10  ;;  %v4997_v13 = vld [vmem:[%s4398_s9] sm:$0xff] (%p1164_p9) }
0x1057   : >> { %v2249_v16 = vsub.f32 %v2242_v8, %v2248_v14  ;;  %v2450_v14 = vsel (%p1164_p9), %vm1020_vm0, %v4997_v13, 0.0 }
0x1059   : >> { %v2250_v4 = vmul.f32 %v2249_v16, %v2249_v16 }
0x105b   : >> { %v2251_v17 = vsel %vm1160_vm12, %v2250_v4, 0.0  ;;  %v2401_v4 = vld [vmem:[%s4438_s14 + $0x18] sm:$0xff] (%p1164_p9) }
0x105c   : >> { %2252 = vadd.xlane.f32.xlu1 %v2251_v17 }
0x10cf   : >> { %v2253_v40 = vpop.xlane.xlu1 %2252 }
0x10d0   : >> { %v2254_v22 = vmul.f32 %v2253_v40, %v4679_v10 }
0x10d2   : >> { %v2255_v23 = vadd.f32 1e-05, %v2254_v22 }
0x10d4   : >> { %4024 = vrsqrt.f32 %v2255_v23  ;;  %vm2262_vm10 = vweird.f32 %v2255_v23 }
0x10da   : >> { %v4025_v12 = vpop.eup %4024 }
0x10db   : >> { %v2257_v24 = vmul.f32 %v4025_v12, %v2255_v23  ;;  %vm2263_vm8 = vweird.f32 %v4025_v12 }
0x10dc   : >> { %vm2264_vm11 = vmor %vm2262_vm10, %vm2263_vm8  ;;  %vm5331_vm8 = vcmask 187392  }
0x10dd   : >> { %v2258_v25 = vmul.f32 %v4025_v12, %v2257_v24 }
0x10df   : >> { %v2259_v26 = vmul.f32 0.5, %v2258_v25 }
0x10e1   : >> { %v2260_v28 = vsub.f32 1.5, %v2259_v26 }
0x10e3   : >> { %v2261_v15 = vmul.f32 %v4025_v12, %v2260_v28 }
0x10e5   : >> { %v2265_v29 = vsel %vm2264_vm11, %v4025_v12, %v2261_v15 }
0x10e6   : >> { %v2266_v32 = vmul.f32 %v2265_v29, %v2249_v16  ;;  %v2400_v16 = vld [vmem:[%s4438_s14 + $0x10] sm:$0xff] (%p1164_p9) }
0x10e7   : > { %v4027_v17 = vpack.i.bf16 (%p1164_p9), %v2400_v16, %v2401_v4 }
0x10e8   : >> { %v2267_v35 = vmul.f32 %v2266_v32, %v2243_v30 }
0x10ea   : >> { %v2268_v36 = vadd.f32 %v2267_v35, %v2244_v34 }
0x10ec   : >> { %3747 = vmatmul.msk.f32.vlgmr.msra.gmra.mxu1 %vm1020_vm0, %v2268_v36 }
0x10ed   : > { %2496 = vmatpush.msra.mxu1 (%p1164_p9), %v2401_v4 }
0x10ef   : > { %2497 = vmatpush.msra.mxu1 (%p1164_p9), %v2400_v16 }
0x10f1   : > { %2498 = vmatpush.msra.mxu1 (%p1164_p9), %v2399_v19 }
0x10f3   : > { %2499 = vmatpush.msra.mxu1 (%p1164_p9), %v2398_v18 }
0x1169   : >> { %v2294_v38 = vpop.f32.mrf.mxu1 }
0x116a   : >> { %v2295_v39 = vadd.f32 %v2294_v38, %v2273_v37 }
0x116c   : >> { %v2298_v41 = vsel %vm2297_vm1, %v2295_v39, -inf }
0x116d   : >> { %v2300_v42 = vsel %vm2299_vm3, %v2298_v41, -inf  ;;  %v4061_v41 = vld [vmem:[%s4443_s19] ss:$0 sm:$0xff] (%p1164_p9) }
0x116e   : >> { %2301 = vmax.xlane.f32.xlu2 %v2300_v42 }
0x1186   : > { %4028 = vrot.lane.b32.xlu2 (%p1164_p9), %v4027_v17, %s4374_s16  ;;  %v2505_v17 = vshrl.u32 (%p1164_p9), %v1124_v27, 7 }
0x1188   : > { %v2506_v18 = vadd.s32 (%p1164_p9), 1, %v2505_v17 }
0x118e   : > { %4033 = vrot.lane.b32.xlu2 (%p1164_p9), %v4032_v20, %s4374_s16 }
0x11e1   : >> { %v2302_v43 = vpop.xlane.xlu2 %2301 }
0x11e2   : >> { %vm2303_vm6 = vcmp.eq.f32.partialorder %v2295_v39, %v2302_v43 }
0x11e3   : >> { %vm2304_vm7 = vmand %vm2297_vm1, %vm2303_vm6 }
0x11e4   : >> { %v2305_v44 = vsel %vm2304_vm7, %v4708_v31, 1073741824  ;;  %vm2507_vm7 = vcmp.eq.s32.totalorder (%p1164_p9), %v4708_v31, %v2506_v18 }
0x11e5   : >> { %v2306_v45 = vsel %vm2299_vm3, %v2305_v44, 2147483647  ;;  %vm5335_vm3 = vcmask (%p1164_p9), 64512   ;;  %v2508_v20 = vsel (%p1164_p9), %vm2507_vm7, -1e+30, %v4361_v33 }
0x11e6   : >> { %v2308_v46 = vshra.s32 %v2306_v45, 16  ;;  %v2307_v48 = vand.u32 65535, %v2306_v45  ;;  %vm5336_vm6 = vmmov (%p1164_p9), %vm5335_vm3 }
0x11e8   : >> { %v2310_v47 = vcvt.s32.f32 %v2308_v46  ;;  %v2309_v5 = vcvt.s32.f32 %v2307_v48 }
0x11e9   : > { %v4029_v29 = vpop.permute.xlu2 (%p1164_p9), %4028 }
0x11ea   : >> { %2311 = vmin.xlane.f32.xlu0 %v2310_v47  ;;  %v4030_v30 = vunpack.i.l.bf16 (%p1164_p9), %v4029_v29  ;;  %v4031_v32 = vunpack.i.h.bf16 (%p1164_p9), %v4029_v29 }
0x11f1   : > { %v4034_v34 = vpop.permute.xlu2 (%p1164_p9), %4033 }
0x11f2   : > { %v4035_v35 = vunpack.i.l.bf16 (%p1164_p9), %v4034_v34  ;;  %v4036_v36 = vunpack.i.h.bf16 (%p1164_p9), %v4034_v34 }
0x125d   : >> { %v2312_v49 = vpop.xlane.xlu0 %2311 }
0x125e   : >> { %vm2313_vm4 = vcmp.eq.f32.partialorder %v2310_v47, %v2312_v49  ;;  %v2318_v54 = vcvt.f32.s32 %v2312_v49 }
0x125f   : >> { %v2314_v50 = vsel %vm2313_vm4, %v2309_v5, inf  ;;  %vm5337_vm4 = vmmov (%p1164_p9), %vm5335_vm3 }
0x1260   : >> { %2315 = vmin.xlane.f32.xlu1 %v2314_v50  ;;  %v2319_v56 = vshll.u32 %v2318_v54, 16 }
0x12d3   : >> { %v2316_v55 = vpop.xlane.xlu1 %2315 }
0x12d4   : >> { %v2317_v59 = vcvt.f32.s32 %v2316_v55 }
0x12d6   : >> { %v2320_v61 = vadd.s32 %v2319_v56, %v2317_v59  ;;  %v4058_v56 = vld [vmem:[%s4433_s8] ss:$0 sm:$0xff] (%p1164_p9) }
0x12d8   : >> { %vm2321_vm14 = vcmp.eq.s32.totalorder %v4708_v31, %v2320_v61  ;;  %vm2357_vm15 = vcmp.eq.s32.totalorder %v2320_v61, 0 }
0x12d9   : >> { %v2358_v58 = vsel %vm2357_vm15, -1e+30, %v4365_v11  ;;  %v3748_v0 = vsel %vm2321_vm14, 1.0, %v4365_v11  ;;  %vm5339_vm14 = vmmov (%p1164_p9), %vm5335_vm3 }
0x12da   : >> { %v2362_v2 = vsel %vm2361_vm13, %v2358_v58, 0.0  ;;  %3750 = vmatmul.msk.f32.vlgmr.msra.gmra.mxu3 %vm5331_vm8, %v3748_v0  ;;  %v4059_v0 = vld [vmem:[%s4418_s25] ss:$0 sm:$0xff] (%p1164_p9)  ;;  %vm5338_vm13 = vmmov (%p1164_p9), %vm5335_vm3 }
0x12db   : >> { %v2363_v3 = vmin.f32 %v2359_v62, %v2362_v2  ;;  %2439 = vmatpush.msra.mxu3 (%p1164_p9), %v4030_v30  ;;  %vm5340_vm15 = vmmov (%p1164_p9), %vm5335_vm3 }
0x12dc   : > { %vm5341_vm8 = vmmov (%p1164_p9), %vm5335_vm3 }
0x12dd   : >> { %2364 = vst.msk [vmem:[#allocation5] sm:$0x1] %vm1122_vm5, %v2363_v3  ;;  %2440 = vmatpush.msra.mxu3 (%p1164_p9), %v4031_v32 }
0x12df   : > { %2441 = vmatpush.msra.mxu3 (%p1164_p9), %v4035_v35 }
0x12e1   : > { %2442 = vmatpush.msra.mxu3 (%p1164_p9), %v4036_v36 }
0x12e4   : > { %v4062_v19 = vld [vmem:[#allocation5] ss:$0 sm:$0xff] (%p1164_p9) }
0x135c   : > { %1166 = sbr.rel (!%p1164_p9) target bundleno = 551 (0x227), region = 239 }
0x135d   : >> { %v2350_v6 = vpop.f32.mrf.mxu3 }
0x135e   : >> { %v2353_v8 = vadd.f32 %v4026_v7, %v2350_v6  ;;  %v4060_v6 = vld [vmem:[%s5334_s11] ss:$0 sm:$0xff] (%p1164_p9)  ;;  %s5284_s11 = smov (%p1164_p9), 24  }
0x1360   : >> { %3751 = vst.msk [vmem:[%s5332_s18 + $0x1] sm:$0x1] %vm1160_vm12, %v2353_v8  ;;  %s5285_s18 = smov (%p1164_p9), 8  }
0x1367   : > { %v2365_v9 = vld [vmem:[#allocation2] sm:$0xff] }
0x1368   : > { %v2368_v11 = vsel %vm1020_vm0, %v2365_v9, 0.0 }
0x1369   : > { %2369 = vadd.xlane.f32.xlu0 %v2368_v11 }
0x1371   : > { %2451 = vadd.xlane.f32.xlu0 %v2450_v14 }
0x1385   : > { %2421 = vrot.lane.b32.xlu0 %v4061_v41, %s4374_s16 }
0x13dc   : > { %v2370_v21 = vpop.xlane.xlu0 %2369 }
0x13dd   : > { %v2371_v40 = vmul.f32 %v2370_v21, %v4679_v10  ;;  %v5034_v21 = vadd.f32 %v4062_v19, %v2508_v20 }
0x13df   : > { %v2372_v22 = vsub.f32 %v2365_v9, %v2371_v40 }
0x13e1   : > { %v2373_v23 = vmul.f32 %v2372_v22, %v2372_v22 }
0x13e3   : > { %v2374_v12 = vsel %vm1020_vm0, %v2373_v23, 0.0 }
0x13e4   : > { %2375 = vadd.xlane.f32.xlu1 %v2374_v12  ;;  %v2452_v24 = vpop.xlane.xlu0 %2451 }
0x13e5   : > { %v2453_v25 = vmul.f32 %v2452_v24, %v4679_v10 }
0x13e7   : > { %v2454_v26 = vsub.f32 %v4997_v13, %v2453_v25 }
0x13e9   : > { %v2455_v28 = vmul.f32 %v2454_v26, %v2454_v26 }
0x13eb   : > { %v2456_v15 = vsel %vm1020_vm0, %v2455_v28, 0.0 }
0x13ec   : > { %2457 = vadd.xlane.f32.xlu1 %v2456_v15 }
0x13f7   : > { %v2422_v9 = vpop.permute.xlu0 %2421 }
0x1457   : > { %v2376_v37 = vpop.xlane.xlu1 %2375 }
0x1458   : > { %v2377_v38 = vmul.f32 %v2376_v37, %v4679_v10 }
0x145a   : > { %v2378_v39 = vadd.f32 1e-05, %v2377_v38 }
0x145c   : > { %4075 = vrsqrt.f32 %v2378_v39  ;;  %vm2385_vm5 = vweird.f32 %v2378_v39 }
0x145f   : > { %v2458_v42 = vpop.xlane.xlu1 %2457 }
0x1460   : > { %v2459_v43 = vmul.f32 %v2458_v42, %v4679_v10 }
0x1462   : > { %v4076_v44 = vpop.eup %4075  ;;  %v2460_v45 = vadd.f32 1e-05, %v2459_v43 }
0x1463   : > { %v2380_v46 = vmul.f32 %v4076_v44, %v2378_v39  ;;  %vm2386_vm2 = vweird.f32 %v4076_v44 }
0x1464   : > { %4077 = vrsqrt.f32 %v2460_v45  ;;  %vm2387_vm12 = vmor %vm2385_vm5, %vm2386_vm2  ;;  %vm2467_vm11 = vweird.f32 %v2460_v45 }
0x1465   : > { %v2381_v47 = vmul.f32 %v4076_v44, %v2380_v46 }
0x1467   : > { %v2382_v48 = vmul.f32 0.5, %v2381_v47 }
0x1469   : > { %v2383_v49 = vsub.f32 1.5, %v2382_v48 }
0x146a   : > { %v4078_v5 = vpop.eup %4077 }
0x146b   : > { %v2384_v50 = vmul.f32 %v4076_v44, %v2383_v49  ;;  %v2462_v51 = vmul.f32 %v4078_v5, %v2460_v45  ;;  %vm2468_vm10 = vweird.f32 %v4078_v5 }
0x146c   : > { %vm2469_vm1 = vmor %vm2467_vm11, %vm2468_vm10 }
0x146d   : > { %v2463_v53 = vmul.f32 %v4078_v5, %v2462_v51  ;;  %v2388_v54 = vsel %vm2387_vm12, %v4076_v44, %v2384_v50  ;;  %vm5342_vm11 = vmmov %vm5335_vm3 }
0x146e   : > { %v2389_v55 = vmul.f32 %v2388_v54, %v2372_v22 }
0x146f   : > { %v2464_v57 = vmul.f32 0.5, %v2463_v53 }
0x1470   : > { %v2393_v59 = vmul.f32 %v4057_v52, %v2389_v55 }
0x1471   : > { %v2465_v61 = vsub.f32 1.5, %v2464_v57 }
0x1472   : > { %v2397_v62 = vadd.f32 %v4058_v56, %v2393_v59 }
0x1473   : > { %v2466_v58 = vmul.f32 %v4078_v5, %v2465_v61 }
0x1474   : > { %3752 = vmatmul.msk.f32.vlgmr.msra.gmra.mxu3 %vm1020_vm0, %v2397_v62 }
0x1475   : > { %v2470_v2 = vsel %vm2469_vm1, %v4078_v5, %v2466_v58  ;;  %vm5343_vm1 = vmmov %vm5335_vm3 }
0x1476   : > { %v2471_v3 = vmul.f32 %v2470_v2, %v2454_v26  ;;  %vm5346_vm7 = vmmov %vm5343_vm1 }
0x1478   : > { %v2475_v7 = vmul.f32 %v4059_v0, %v2471_v3 }
0x147a   : > { %v2479_v8 = vadd.f32 %v4060_v6, %v2475_v7 }
0x147c   : > { %3753 = vmatmul.msk.f32.vlgmr.msra.gmra.mxu1 %vm1020_vm0, %v2479_v8 }
0x14f7   : > { %v2444_v11 = vpop.f32.mrf.mxu3 }
0x14f8   : > { %v5022_v14 = vadd.f32 %v2444_v11, %v2422_v9 }
0x14f9   : > { %v2501_v16 = vpop.f32.mrf.mxu1 }
0x14fa   : > { %v2502_v4 = vadd.f32 %v4061_v41, %v2501_v16  ;;  %2599 = vrot.lane.b32.xlu0 %v5022_v14, %s4375_s1  ;;  %3754 = vmatpush.xpose.msk.msra.mxu2 %vm5335_vm3, %v5022_v14  ;;  %vm5344_vm3 = vmmov %vm5343_vm1 }
0x14fd   : > { %3755 = vmatmul.msk.f32.vlgmr.msra.gmra.mxu2 %vm5336_vm6, %v2502_v4  ;;  %vm5345_vm6 = vmmov %vm5343_vm1 }
0x1502   : > { %2597 = vrot.lane.b32.xlu0 %v2502_v4, %s4375_s1 }
0x150a   : > { %2765 = vrot.lane.b32.xlu0 %v2502_v4, %s4376_s22 }
0x156c   : > { %v2600_v26 = vpop.permute.xlu0 %2599 }
0x1574   : > { %v2598_v45 = vpop.permute.xlu0 %2597 }
0x157c   : > { %v2766_v46 = vpop.permute.xlu0 %2765 }
0x1580   : > { %v2543_v40 = vpop.f32.mrf.mxu2 }
0x1581   : > { %v2544_v22 = vadd.f32 %v2543_v40, %v5034_v21 }
0x1583   : > { %v2546_v23 = vsel %vm5337_vm4, %v2544_v22, -inf  ;;  %vm5347_vm4 = vmmov %vm5343_vm1 }
0x1584   : > { %2547 = vmax.xlane.f32.xlu1 %v2546_v23 }
0x159d   : > { %2570 = vrot.lane.b32.xlu1 %v5022_v14, %s4374_s16 }
0x15a5   : > { %2767 = vrot.lane.b32.xlu1 %v5022_v14, %s4376_s22 }
0x15ad   : > { %2683 = vrot.lane.b32.xlu1 %v5022_v14, %s4377_s15 }
0x15f7   : > { %v2548_v27 = vpop.xlane.xlu1 %2547 }
0x15f8   : > { %v2549_v31 = vsub.f32 %v2544_v22, %v2548_v27 }
0x15fa   : > { %v2550_v33 = vmul.f32 1.442695, %v2549_v31 }
0x15fc   : > { %4079 = vpow2.f32 %v2550_v33 }
0x1602   : > { %v4080_v12 = vpop.eup %4079 }
0x1603   : > { %v2552_v24 = vsel %vm5338_vm13, %v4080_v12, 0.0  ;;  %vm5348_vm13 = vmmov %vm5343_vm1 }
0x1604   : > { %2553 = vadd.xlane.f32.xlu2 %v2552_v24 }
0x160f   : > { %v2571_v25 = vpop.permute.xlu1 %2570 }
0x1610   : > { %2591 = vmatpush.msrb.mxu3 %v2571_v25 }
0x1612   : > { %3757 = vmatpush.xpose.msk.msra.mxu3 %vm5339_vm14, %v2600_v26  ;;  %vm5349_vm14 = vmmov %vm5343_vm1 }
0x1617   : > { %v2768_v28 = vpop.permute.xlu1 %2767 }
0x161c   : > { %2681 = vrot.lane.b32.xlu2 %v2502_v4, %s4377_s15 }
0x161f   : > { %v2684_v15 = vpop.permute.xlu1 %2683 }
0x1620   : > { %3760 = vmatpush.xpose.msk.msra.mxu0 %vm5340_vm15, %v2684_v15  ;;  %vm5350_vm15 = vmmov %vm5343_vm1 }
0x1677   : > { %v2554_v29 = vpop.xlane.xlu2 %2553 }
0x1678   : > { %4081 = vrcp.f32 %v2554_v29  ;;  %v2566_v36 = vand.u32 2147483648, %v2554_v29  ;;  %v2564_v38 = vand.u32 2147483647, %v2554_v29  ;;  %vm2560_vm5 = vweird.f32 %v2554_v29 }
0x167a   : > { %v2567_v41 = vor.u32 1.1754944e-38, %v2566_v36  ;;  %vm2565_vm10 = vcmp.eq.f32.partialorder %v2564_v38, 8.507059e+37 }
0x167e   : > { %v4082_v30 = vpop.eup %4081 }
0x167f   : > { %v2556_v32 = vmul.f32 %v4082_v30, %v2554_v29  ;;  %v2682_v34 = vpop.permute.xlu2 %2681  ;;  %vm2561_vm2 = vweird.f32 %v4082_v30 }
0x1680   : > { %3761 = vmatmul.msk.f32.vlgmr.msra.gmra.mxu0 %vm5341_vm8, %v2682_v34  ;;  %vm2562_vm12 = vmor %vm2560_vm5, %vm2561_vm2 }
0x1681   : > { %v2557_v35 = vsub.f32 1.0, %v2556_v32  ;;  %vm5351_vm8 = vmmov %vm5343_vm1 }
0x1682   : > { %vm5352_vm2 = vmmov %vm5343_vm1 }
0x1683   : > { %v2558_v37 = vmul.f32 %v4082_v30, %v2557_v35  ;;  %vm5353_vm5 = vmmov %vm5343_vm1 }
0x1685   : > { %v2559_v39 = vadd.f32 %v4082_v30, %v2558_v37 }
0x1687   : > { %v2563_v42 = vsel %vm2562_vm12, %v4082_v30, %v2559_v39  ;;  %vm5354_vm12 = vmmov %vm5343_vm1 }
0x1688   : > { %v2568_v43 = vsel %vm2565_vm10, %v2567_v41, %v2563_v42 }
0x1689   : > { %v2569_v44 = vmul.f32 %v4080_v12, %v2568_v43 }
0x168b   : > { %3756 = vmatmul.msk.f32.vlgmr.msrb.gmra.mxu3 %vm5342_vm11, %v2569_v44 }
0x168c   : > { %3763 = vmatpush.xpose.msk.msrb.mxu3 %vm5343_vm1, %v2768_v28 }
0x1693   : > { %3758 = vmatmul.msk.f32.vlgmr.msra.gmra.mxu3 %vm5344_vm3, %v2598_v45 }
0x1694   : > { %3768 = vmatpush.xpose.msk.msra.mxu3 %vm5345_vm6, %v4730_v63  ;;  %vm5355_vm6 = vmmov %vm5352_vm2 }
0x1698   : > { %3769 = vmatpush.xpose.msk.msra.mxu3 %vm5346_vm7, %v4732_v1 }
0x169b   : > { %3764 = vmatmul.msk.f32.vlgmr.msrb.gmra.mxu3 %vm5347_vm4, %v2766_v46 }
0x16fd   : > { %v2706_v47 = vpop.f32.mrf.mxu0 }
0x16fe   : > { %v2707_v48 = vadd.f32 %v2706_v47, %v5034_v21 }
0x1700   : > { %v2709_v49 = vsel %vm5348_vm13, %v2707_v48, -inf }
0x1701   : > { %2710 = vmax.xlane.f32.xlu2 %v2709_v49 }
0x170e   : > { %v2593_v5 = vpop.f32.mrf.mxu3 }
0x170f   : > { %2596 = vst.msk [vmem:[#allocation6] sm:$0xff] %vm5349_vm14, %v2593_v5 }
0x1716   : > { %v2622_v50 = vpop.f32.mrf.mxu3 }
0x1717   : > { %v2623_v51 = vadd.f32 %v2622_v50, %v5034_v21 }
0x1719   : > { %2733 = vrot.lane.b32.xlu2 %v5022_v14, %s4378_s7  ;;  %v2625_v52 = vsel %vm5350_vm15, %v2623_v51, -inf }
0x171a   : > { %2626 = vmax.xlane.f32.xlu0 %v2625_v52 }
0x171e   : > { %v2790_v53 = vpop.f32.mrf.mxu3 }
0x171f   : > { %v2791_v54 = vadd.f32 %v2790_v53, %v5034_v21 }
0x1721   : > { %v2793_v55 = vsel %vm5351_vm8, %v2791_v54, -inf }
0x1722   : > { %2794 = vmax.xlane.f32.xlu1 %v2793_v55  ;;  %v2516_v55 = vld [vmem:[%s5356_s28 + $0x10] sm:$0xff] }
0x1774   : > { %v2711_v56 = vpop.xlane.xlu2 %2710 }
0x1775   : > { %v2712_v57 = vsub.f32 %v2707_v48, %v2711_v56  ;;  %v2515_v56 = vld [vmem:[%s5356_s28 + $0x8] sm:$0xff] }
0x1777   : > { %v2713_v59 = vmul.f32 1.442695, %v2712_v57  ;;  %v2514_v57 = vld [vmem:[%s5356_s28] sm:$0xff] }
0x1779   : > { %4083 = vpow2.f32 %v2713_v59 }
0x177c   : > { %v2734_v61 = vpop.permute.xlu2 %2733 }
0x177d   : > { %2754 = vmatpush.msrb.mxu1 %v2734_v61 }
0x177f   : > { %v4084_v62 = vpop.eup %4083 }
0x1780   : > { %v2715_v58 = vsel %vm5352_vm2, %v4084_v62, 0.0 }
0x1781   : > { %2716 = vadd.xlane.f32.xlu0 %v2715_v58 }
0x178d   : > { %v2627_v0 = vpop.xlane.xlu0 %2626 }
0x178e   : > { %v2628_v2 = vsub.f32 %v2623_v51, %v2627_v0 }
0x1790   : > { %v2629_v3 = vmul.f32 1.442695, %v2628_v2 }
0x1792   : > { %4085 = vpow2.f32 %v2629_v3 }
0x1795   : > { %v2795_v6 = vpop.xlane.xlu1 %2794 }
0x1796   : > { %v2796_v7 = vsub.f32 %v2791_v54, %v2795_v6  ;;  %v2517_v54 = vld [vmem:[%s5356_s28 + $0x18] sm:$0xff]  ;;  %s5360_s28 = sld [smem:[#allocation24_spill]] }
0x1798   : > { %v4086_v8 = vpop.eup %4085  ;;  %v2797_v9 = vmul.f32 1.442695, %v2796_v7 }
0x1799   : > { %v2631_v11 = vsel %vm5353_vm5, %v4086_v8, 0.0 }
0x179a   : > { %4087 = vpow2.f32 %v2797_v9  ;;  %2632 = vadd.xlane.f32.xlu0 %v2631_v11 }
0x17a0   : > { %v5068_v16 = vpop.eup %4087 }
0x17a1   : > { %v2799_v4 = vsel %vm5354_vm12, %v5068_v16, 0.0 }
0x17a2   : > { %2800 = vadd.xlane.f32.xlu1 %v2799_v4 }
0x17ae   : > { %2817 = vrot.lane.b32.xlu0 %v5022_v14, %s4379_s29 }
0x17bb   : > { %2649 = vrot.lane.b32.xlu1 %v5022_v14, %s4380_s26 }
0x17f4   : > { %v2717_v17 = vpop.xlane.xlu0 %2716 }
0x17f5   : > { %4089 = vrcp.f32 %v2717_v17  ;;  %v2729_v21 = vand.u32 2147483648, %v2717_v17  ;;  %v2727_v22 = vand.u32 2147483647, %v2717_v17  ;;  %vm2723_vm11 = vweird.f32 %v2717_v17 }
0x17f7   : > { %v2730_v27 = vor.u32 1.1754944e-38, %v2729_v21  ;;  %vm2728_vm3 = vcmp.eq.f32.partialorder %v2727_v22, 8.507059e+37 }
0x17fb   : > { %v4090_v18 = vpop.eup %4089 }
0x17fc   : > { %v2719_v19 = vmul.f32 %v4090_v18, %v2717_v17  ;;  %vm2724_vm10 = vweird.f32 %v4090_v18 }
0x17fd   : > { %vm2725_vm1 = vmor %vm2723_vm11, %vm2724_vm10  ;;  %vm2679_vm11 = vcmask 130112  }
0x17fe   : > { %v2720_v20 = vsub.f32 1.0, %v2719_v19  ;;  %vm5357_vm10 = vmmov %vm5353_vm5 }
0x1800   : > { %v2721_v40 = vmul.f32 %v4090_v18, %v2720_v20 }
0x1802   : > { %v2722_v23 = vadd.f32 %v4090_v18, %v2721_v40 }
0x1804   : > { %v2726_v31 = vsel %vm2725_vm1, %v4090_v18, %v2722_v23  ;;  %vm2763_vm1 = vcmask 195712  }
0x1805   : > { %v2731_v33 = vsel %vm2728_vm3, %v2730_v27, %v2726_v31  ;;  %vm2847_vm3 = vcmask 261312  }
0x1806   : > { %v2732_v12 = vmul.f32 %v4084_v62, %v2731_v33 }
0x1808   : > { %3762 = vmatmul.msk.f32.vlgmr.msrb.gmra.mxu1 %vm5355_vm6, %v2732_v12  ;;  %v4064_v12 = vld [vmem:[%s5360_s28] ss:$0 sm:$0xff]  ;;  %s5383_s28 = sld [smem:[#allocation33_spill]] }
0x180d   : > { %v2633_v14 = vpop.xlane.xlu0 %2632 }
0x180e   : > { %4091 = vrcp.f32 %v2633_v14  ;;  %v2645_v35 = vand.u32 2147483648, %v2633_v14  ;;  %vm2639_vm4 = vweird.f32 %v2633_v14  ;;  %v2643_v36 = vand.u32 2147483647, %v2633_v14 }
0x1810   : > { %v2646_v39 = vor.u32 1.1754944e-38, %v2645_v35  ;;  %vm2644_vm14 = vcmp.eq.f32.partialorder %v2643_v36, 8.507059e+37 }
0x1814   : > { %v4092_v24 = vpop.eup %4091 }
0x1815   : > { %v2801_v25 = vpop.xlane.xlu1 %2800  ;;  %v2635_v26 = vmul.f32 %v4092_v24, %v2633_v14  ;;  %vm2640_vm7 = vweird.f32 %v4092_v24 }
0x1816   : > { %4093 = vrcp.f32 %v2801_v25  ;;  %vm2641_vm13 = vmor %vm2639_vm4, %vm2640_vm7  ;;  %v2813_v43 = vand.u32 2147483648, %v2801_v25  ;;  %vm2807_vm8 = vweird.f32 %v2801_v25  ;;  %v2811_v44 = vand.u32 2147483647, %v2801_v25 }
0x1817   : > { %v2636_v28 = vsub.f32 1.0, %v2635_v26 }
0x1818   : > { %v2814_v49 = vor.u32 1.1754944e-38, %v2813_v43  ;;  %vm2812_vm12 = vcmp.eq.f32.partialorder %v2811_v44, 8.507059e+37 }
0x1819   : > { %v2637_v29 = vmul.f32 %v4092_v24, %v2636_v28 }
0x181b   : > { %v2638_v34 = vadd.f32 %v4092_v24, %v2637_v29 }
0x181c   : > { %v4094_v15 = vpop.eup %4093 }
0x181d   : > { %v2803_v30 = vmul.f32 %v4094_v15, %v2801_v25  ;;  %v2642_v38 = vsel %vm2641_vm13, %v4092_v24, %v2638_v34  ;;  %vm2808_vm15 = vweird.f32 %v4094_v15  ;;  %vm5363_vm13 = vmmov %vm5353_vm5 }
0x181e   : > { %v2647_v41 = vsel %vm2644_vm14, %v2646_v39, %v2642_v38  ;;  %vm2809_vm2 = vmor %vm2807_vm8, %vm2808_vm15 }
0x181f   : > { %v2804_v32 = vsub.f32 1.0, %v2803_v30  ;;  %v2648_v46 = vmul.f32 %v4086_v8, %v2647_v41  ;;  %vm5364_vm14 = vmmov %vm5353_vm5 }
0x1820   : > { %v2818_v47 = vpop.permute.xlu0 %2817  ;;  %vm5365_vm15 = vmmov %vm5353_vm5 }
0x1821   : > { %v2805_v37 = vmul.f32 %v4094_v15, %v2804_v32  ;;  %vm5366_vm8 = vmmov %vm5353_vm5 }
0x1823   : > { %v2806_v42 = vadd.f32 %v4094_v15, %v2805_v37 }
0x1825   : > { %v2810_v48 = vsel %vm2809_vm2, %v4094_v15, %v2806_v42  ;;  %vm5367_vm2 = vmmov %vm5353_vm5 }
0x1826   : > { %v2815_v5 = vsel %vm2812_vm12, %v2814_v49, %v2810_v48  ;;  %vm5369_vm12 = vmmov %vm5367_vm2 }
0x1827   : > { %v2816_v50 = vmul.f32 %v5068_v16, %v2815_v5 }
0x182d   : > { %v2650_v45 = vpop.permute.xlu1 %2649 }
0x182e   : > { %2670 = vmatpush.msrb.mxu2 %v2650_v45 }
0x182f   : > { %3759 = vmatmul.msk.f32.vlgmr.msrb.gmra.mxu2 %vm5353_vm5, %v2648_v46  ;;  %vm5368_vm5 = vmmov %vm5367_vm2 }
0x1830   : > { %2838 = vmatpush.msra.mxu2 %v2818_v47 }
0x1832   : > { %2868 = vmatpush.msrb.mxu2 %v2517_v54 }
0x1834   : > { %2869 = vmatpush.msrb.mxu2 %v2516_v55 }
0x1836   : > { %2870 = vmatpush.msrb.mxu2 %v2515_v56 }
0x1837   : > { %3765 = vmatmul.msk.f32.vlgmr.msra.gmra.mxu2 %vm5357_vm10, %v2816_v50  ;;  %vm5370_vm10 = vmmov %vm5367_vm2 }
0x1838   : > { %2871 = vmatpush.msrb.mxu2 %v2514_v57 }
0x1885   : > { %v2756_v51 = vpop.f32.mrf.mxu1 }
0x1886   : > { %2760 = vrot.lane.b32.xlu1 %v2756_v51, %s5283_s2  ;;  %s5358_s2 = sld [smem:[#allocation23_spill]] }
0x188c   : > { %v4063_v0 = vld [vmem:[%s5358_s2] ss:$0 sm:$0xff]  ;;  %s5361_s2 = sld [smem:[#allocation25_spill]] }
0x1892   : > { %v4065_v25 = vld [vmem:[%s5361_s2] ss:$0 sm:$0xff]  ;;  %s5384_s2 = sld [smem:[#allocation35_spill]] }
0x18b2   : > { %v2672_v52 = vpop.f32.mrf.mxu2 }
0x18b3   : > { %2676 = vrot.lane.b32.xlu0 %v2672_v52, %s5285_s18  ;;  %s5362_s18 = sld [smem:[#allocation27_spill]] }
0x18b9   : > { %v4066_v30 = vld [vmem:[%s5362_s18] ss:$0 sm:$0xff]  ;;  %s5381_s18 = sld [smem:[#allocation31_spill]] }
0x18ba   : > { %v2840_v53 = vpop.f32.mrf.mxu2 }
0x18bb   : > { %2844 = vrot.lane.b32.xlu0 %v2840_v53, %s5284_s11  ;;  %s5359_s11 = sld [smem:[#allocation26_spill]] }
0x18c1   : > { %v2912_v17 = vld [vmem:[%s5359_s11 + $0x18] sm:$0xff]  ;;  %v2910_v18 = vld [vmem:[%s5359_s11 + $0x8] sm:$0xff]  ;;  %v2909_v19 = vld [vmem:[%s5359_s11] sm:$0xff] }
0x18c2   : > { %2932 = vmatpush.msra.mxu1 %v2912_v17 }
0x18c3   : > { %3123 = vrot.lane.b32.xlu0 %v4730_v63, %s4377_s15 }
0x18cb   : > { %3121 = vrot.lane.b32.xlu0 %v4732_v1, %s4377_s15 }
0x18d3   : > { %3033 = vrot.lane.b32.xlu0 %v4730_v63, %s4375_s1 }
0x18db   : > { %3031 = vrot.lane.b32.xlu0 %v4732_v1, %s4375_s1 }
0x18f8   : > { %v2761_v61 = vpop.permute.xlu1 %2760 }
0x1925   : > { %v2677_v59 = vpop.permute.xlu0 %2676 }
0x1926   : > { %2680 = vst.msk [vmem:[#allocation6] sm:$0xff] %vm2679_vm11, %v2677_v59 }
0x1927   : > { %2764 = vst.msk [vmem:[#allocation6] sm:$0xff] %vm2763_vm1, %v2761_v61 }
0x192d   : > { %v2845_v62 = vpop.permute.xlu0 %2844 }
0x192e   : > { %2848 = vst.msk [vmem:[#allocation6] sm:$0xff] %vm2847_vm3, %v2845_v62 }
0x1935   : > { %v2849_v58 = vld [vmem:[#allocation6] sm:$0xff]  ;;  %v3124_v15 = vpop.permute.xlu0 %3123 }
0x1936   : > { %3766 = vmatmul.msk.f32.vlgmr.msrb.gmra.mxu2 %vm1020_vm0, %v2849_v58  ;;  %3776 = vmatpush.xpose.msk.msrb.mxu3 %vm5363_vm13, %v3124_v15 }
0x193d   : > { %v3122_v29 = vpop.permute.xlu0 %3121 }
0x193e   : > { %3777 = vmatpush.xpose.msk.msrb.mxu3 %vm5364_vm14, %v3122_v29 }
0x1945   : > { %v3034_v35 = vpop.permute.xlu0 %3033 }
0x1946   : > { %3772 = vmatpush.xpose.msk.msrb.mxu0 %vm5366_vm8, %v3034_v35 }
0x194d   : > { %v3032_v36 = vpop.permute.xlu0 %3031 }
0x194e   : > { %3773 = vmatpush.xpose.msk.msrb.mxu0 %vm5367_vm2, %v3032_v36 }
0x19b9   : > { %v2873_v2 = vpop.f32.mrf.mxu2 }
0x19ba   : > { %v2874_v3 = vadd.f32 %v4063_v0, %v2873_v2 }
0x19bc   : > { %v5101_v6 = vadd.f32 %v2874_v3, %v4997_v13  ;;  %v2911_v13 = vld [vmem:[%s5359_s11 + $0x10] sm:$0xff]  ;;  %s5382_s11 = sld [smem:[#allocation34_spill]] }
0x19bd   : > { %2933 = vmatpush.msra.mxu1 %v2911_v13 }
0x19be   : > { %v2879_v7 = vsel %vm1020_vm0, %v5101_v6, 0.0 }
0x19bf   : > { %2880 = vadd.xlane.f32.xlu2 %v2879_v7  ;;  %2934 = vmatpush.msra.mxu1 %v2910_v18 }
0x19c1   : > { %2935 = vmatpush.msra.mxu1 %v2909_v19 }
0x1a32   : > { %v2881_v8 = vpop.xlane.xlu2 %2880 }
0x1a33   : > { %v2882_v9 = vmul.f32 %v2881_v8, %v4679_v10 }
0x1a35   : > { %v2883_v11 = vsub.f32 %v5101_v6, %v2882_v9 }
0x1a37   : > { %v2884_v16 = vmul.f32 %v2883_v11, %v2883_v11 }
0x1a39   : > { %v2885_v4 = vsel %vm1020_vm0, %v2884_v16, 0.0 }
0x1a3a   : > { %2886 = vadd.xlane.f32.xlu1 %v2885_v4 }
0x1a53   : > { %3213 = vrot.lane.b32.xlu1 %v4730_v63, %s4376_s22 }
0x1aad   : > { %v2887_v20 = vpop.xlane.xlu1 %2886 }
0x1aae   : > { %v2888_v21 = vmul.f32 %v2887_v20, %v4679_v10 }
0x1ab0   : > { %v2889_v40 = vadd.f32 1e-05, %v2888_v21 }
0x1ab2   : > { %4095 = vrsqrt.f32 %v2889_v40  ;;  %vm2896_vm7 = vweird.f32 %v2889_v40 }
0x1ab8   : > { %v4096_v22 = vpop.eup %4095 }
0x1ab9   : > { %v2891_v23 = vmul.f32 %v4096_v22, %v2889_v40  ;;  %vm2897_vm6 = vweird.f32 %v4096_v22 }
0x1aba   : > { %vm2898_vm4 = vmor %vm2896_vm7, %vm2897_vm6 }
0x1abb   : > { %v2892_v27 = vmul.f32 %v4096_v22, %v2891_v23  ;;  %vm5371_vm6 = vmmov %vm5367_vm2 }
0x1abc   : > { %vm5372_vm7 = vmmov %vm5367_vm2 }
0x1abd   : > { %v2893_v31 = vmul.f32 0.5, %v2892_v27 }
0x1abf   : > { %v2894_v63 = vsub.f32 1.5, %v2893_v31 }
0x1ac1   : > { %v2895_v33 = vmul.f32 %v4096_v22, %v2894_v63 }
0x1ac3   : > { %v2899_v14 = vsel %vm2898_vm4, %v4096_v22, %v2895_v33 }
0x1ac4   : > { %v2900_v24 = vmul.f32 %v2899_v14, %v2883_v11 }
0x1ac5   : > { %v3214_v37 = vpop.permute.xlu1 %3213 }
0x1ac6   : > { %v2904_v26 = vmul.f32 %v4064_v12, %v2900_v24  ;;  %3780 = vmatpush.xpose.msk.msra.mxu0 %vm5368_vm5, %v3214_v37 }
0x1ac8   : > { %v2908_v28 = vadd.f32 %v4065_v25, %v2904_v26 }
0x1aca   : > { %3767 = vmatmul.msk.f32.vlgmr.msra.gmra.mxu1 %vm1020_vm0, %v2908_v28 }
0x1b47   : > { %v2937_v32 = vpop.f32.mrf.mxu1 }
0x1b48   : > { %v2938_v34 = vadd.f32 %v4066_v30, %v2937_v32 }
0x1b4a   : > { %3029 = vrot.lane.b32.xlu2 %v2938_v34, %s4375_s1  ;;  %3119 = vrot.lane.b32.xlu0 %v2938_v34, %s4377_s15  ;;  %s5374_s1 = smov 8   ;;  %s5377_s15 = smov 16  }
0x1b4b   : > { %3770 = vmatmul.msk.f32.vlgmr.msra.gmra.mxu3 %vm5365_vm15, %v2938_v34 }
0x1b52   : > { %3211 = vrot.lane.b32.xlu0 %v4732_v1, %s4376_s22 }
0x1b5a   : > { %3209 = vrot.lane.b32.xlu0 %v2938_v34, %s4376_s22  ;;  %s5376_s22 = smov 24  }
0x1ba4   : > { %v3030_v38 = vpop.permute.xlu2 %3029 }
0x1ba5   : > { %3774 = vmatmul.msk.f32.vlgmr.msrb.gmra.mxu0 %vm5369_vm12, %v3030_v38 }
0x1bbc   : > { %v3120_v39 = vpop.permute.xlu0 %3119 }
0x1bbd   : > { %3778 = vmatmul.msk.f32.vlgmr.msrb.gmra.mxu3 %vm5370_vm10, %v3120_v39 }
0x1bc4   : > { %v3212_v41 = vpop.permute.xlu0 %3211 }
0x1bc5   : > { %3781 = vmatpush.xpose.msk.msra.mxu0 %vm5371_vm6, %v3212_v41 }
0x1bcc   : > { %v3210_v42 = vpop.permute.xlu0 %3209 }
0x1bcd   : > { %3782 = vmatmul.msk.f32.vlgmr.msra.gmra.mxu0 %vm5372_vm7, %v3210_v42 }
0x1bce   : > { %v2971_v1 = vpop.f32.mrf.mxu3 }
0x1bcf   : > { %v2975_v43 = vsel %vm1791_vm9, %v2971_v1, -inf }
0x1bd0   : > { %2976 = vmax.xlane.f32.xlu0 %v2975_v43 }
0x1c22   : > { %v3058_v44 = vpop.f32.mrf.mxu0 }
0x1c23   : > { %v3061_v45 = vsel %vm1791_vm9, %v3058_v44, -inf }
0x1c24   : > { %3062 = vmax.xlane.f32.xlu2 %v3061_v45 }
0x1c40   : > { %v3148_v46 = vpop.f32.mrf.mxu3 }
0x1c41   : > { %v3151_v47 = vsel %vm1791_vm9, %v3148_v46, -inf }
0x1c42   : > { %3152 = vmax.xlane.f32.xlu1 %v3151_v47 }
0x1c43   : > { %v2977_v48 = vpop.xlane.xlu0 %2976 }
0x1c44   : > { %v2978_v49 = vsub.f32 %v2971_v1, %v2977_v48 }
0x1c46   : > { %v2979_v5 = vmul.f32 1.442695, %v2978_v49 }
0x1c48   : > { %4097 = vpow2.f32 %v2979_v5 }
0x1c4a   : > { %v3238_v50 = vpop.f32.mrf.mxu0 }
0x1c4b   : > { %v3241_v51 = vsel %vm1791_vm9, %v3238_v50, -inf }
0x1c4c   : > { %3242 = vmax.xlane.f32.xlu0 %v3241_v51 }
0x1c4e   : > { %v5138_v52 = vpop.eup %4097 }
0x1c4f   : > { %v2981_v53 = vsel %vm1791_vm9, %v5138_v52, 0.0 }
0x1c50   : > { %2982 = vadd.xlane.f32.xlu2 %v2981_v53 }
0x1c60   : > { %4043 = vrot.lane.b32.xlu0 %v4893_v60, %s4380_s26  ;;  %s5380_s26 = sld [smem:[#allocation30_spill]] }
0x1c97   : > { %v3063_v54 = vpop.xlane.xlu2 %3062 }
0x1c98   : > { %v3064_v55 = vsub.f32 %v3058_v44, %v3063_v54 }
0x1c9a   : > { %v3065_v56 = vmul.f32 1.442695, %v3064_v55 }
0x1c9c   : > { %4099 = vpow2.f32 %v3065_v56 }
0x1ca2   : > { %v4100_v57 = vpop.eup %4099 }
0x1ca3   : > { %v3067_v59 = vsel %vm1791_vm9, %v4100_v57, 0.0 }
0x1ca4   : > { %3068 = vadd.xlane.f32.xlu1 %v3067_v59 }
0x1cb5   : > { %v3153_v61 = vpop.xlane.xlu1 %3152 }
0x1cb6   : > { %v3154_v62 = vsub.f32 %v3148_v46, %v3153_v61 }
0x1cb8   : > { %v3155_v58 = vmul.f32 1.442695, %v3154_v62 }
0x1cba   : > { %4101 = vpow2.f32 %v3155_v58 }
0x1cbd   : > { %4038 = vrot.lane.b32.xlu1 %v4893_v60, %s4374_s16  ;;  %s5373_s16 = sld [smem:[#allocation28_spill]] }
0x1cbf   : > { %v3243_v0 = vpop.xlane.xlu0 %3242 }
0x1cc0   : > { %v5147_v2 = vpop.eup %4101  ;;  %v3244_v3 = vsub.f32 %v3238_v50, %v3243_v0 }
0x1cc1   : > { %v3157_v7 = vsel %vm1791_vm9, %v5147_v2, 0.0 }
0x1cc2   : > { %v3245_v8 = vmul.f32 1.442695, %v3244_v3  ;;  %3158 = vadd.xlane.f32.xlu0 %v3157_v7 }
0x1cc3   : > { %v2983_v13 = vpop.xlane.xlu2 %2982 }
0x1cc4   : > { %4103 = vpow2.f32 %v3245_v8  ;;  %v2995_v28 = vand.u32 2147483648, %v2983_v13  ;;  %vm2989_vm2 = vweird.f32 %v2983_v13  ;;  %v2993_v15 = vand.u32 2147483647, %v2983_v13 }
0x1cc5   : > { %4105 = vrcp.f32 %v2983_v13 }
0x1cc6   : > { %v2996_v30 = vor.u32 1.1754944e-38, %v2995_v28  ;;  %vm2994_vm12 = vcmp.eq.f32.partialorder %v2993_v15, 8.507059e+37 }
0x1cca   : > { %v5151_v9 = vpop.eup %4103 }
0x1ccb   : > { %v3247_v11 = vsel %vm1791_vm9, %v5151_v9, 0.0  ;;  %v4106_v19 = vpop.eup %4105 }
0x1ccc   : > { %3248 = vadd.xlane.f32.xlu2 %v3247_v11  ;;  %v2985_v20 = vmul.f32 %v4106_v19, %v2983_v13  ;;  %vm2990_vm8 = vweird.f32 %v4106_v19 }
0x1ccd   : > { %vm2991_vm5 = vmor %vm2989_vm2, %vm2990_vm8  ;;  %vm5375_vm2 = vcmask 64512  }
0x1cce   : > { %v2986_v22 = vsub.f32 1.0, %v2985_v20  ;;  %v2940_v20 = vld [vmem:[%s5373_s16] sm:$0xff] }
0x1cd2   : > { %v4044_v16 = vpop.permute.xlu0 %4043 }
0x1cd3   : > { %v4046_v4 = vunpack.i.h.bf16 %v4044_v16  ;;  %v4045_v17 = vunpack.i.l.bf16 %v4044_v16 }
0x1cd5   : > { %3108 = vmatpush.msrb.mxu1 %v4045_v17 }
0x1cd6   : > { %4053 = vrot.lane.b32.xlu0 %v4893_v60, %s4379_s29  ;;  %s5379_s29 = sld [smem:[#allocation32_spill]] }
0x1cd7   : > { %3109 = vmatpush.msrb.mxu1 %v4046_v4 }
0x1cdc   : > { %v3361_v28 = vld [vmem:[%s5379_s29 + $0x10] sm:$0xff]  ;;  %v3360_v15 = vld [vmem:[%s5379_s29 + $0x8] sm:$0xff] }
0x1ce4   : > { %4048 = vrot.lane.b32.xlu2 %v4893_v60, %s4378_s7  ;;  %v2987_v60 = vmul.f32 %v4106_v19, %v2986_v22  ;;  %s5378_s7 = sld [smem:[#allocation29_spill]] }
0x1ce6   : > { %v2988_v25 = vadd.f32 %v4106_v19, %v2987_v60 }
0x1ce8   : > { %v2992_v29 = vsel %vm2991_vm5, %v4106_v19, %v2988_v25  ;;  %v2941_v19 = vld [vmem:[%s5373_s16 + $0x8] sm:$0xff] }
0x1ce9   : > { %v2997_v36 = vsel %vm2994_vm12, %v2996_v30, %v2992_v29 }
0x1cea   : > { %v2998_v37 = vmul.f32 %v5138_v52, %v2997_v36 }
0x1d17   : > { %v3069_v18 = vpop.xlane.xlu1 %3068 }
0x1d18   : > { %4107 = vrcp.f32 %v3069_v18  ;;  %v3081_v27 = vand.u32 2147483648, %v3069_v18  ;;  %v3079_v63 = vand.u32 2147483647, %v3069_v18  ;;  %vm3075_vm13 = vweird.f32 %v3069_v18 }
0x1d1a   : > { %v3082_v12 = vor.u32 1.1754944e-38, %v3081_v27  ;;  %vm3080_vm15 = vcmp.eq.f32.partialorder %v3079_v63, 8.507059e+37 }
0x1d1e   : > { %v4108_v21 = vpop.eup %4107 }
0x1d1f   : > { %v3071_v40 = vmul.f32 %v4108_v21, %v3069_v18  ;;  %vm3076_vm4 = vweird.f32 %v4108_v21  ;;  %v2942_v18 = vld [vmem:[%s5373_s16 + $0x10] sm:$0xff] }
0x1d20   : > { %vm3077_vm14 = vmor %vm3075_vm13, %vm3076_vm4 }
0x1d21   : > { %v3072_v23 = vsub.f32 1.0, %v3071_v40 }
0x1d23   : > { %v3073_v31 = vmul.f32 %v4108_v21, %v3072_v23  ;;  %v4067_v23 = vld [vmem:[%s5378_s7] ss:$0 sm:$0xff] }
0x1d25   : > { %v3074_v33 = vadd.f32 %v4108_v21, %v3073_v31 }
0x1d27   : > { %v3078_v14 = vsel %vm3077_vm14, %v4108_v21, %v3074_v33 }
0x1d28   : > { %v3083_v24 = vsel %vm3080_vm15, %v3082_v12, %v3078_v14 }
0x1d29   : > { %v3084_v26 = vmul.f32 %v4100_v57, %v3083_v24 }
0x1d2b   : > { %3775 = vmatmul.msk.f32.vlgmr.msrb.gmra.mxu1 %vm1791_vm9, %v3084_v26  ;;  %v3362_v26 = vld [vmem:[%s5379_s29 + $0x18] sm:$0xff] }
0x1d2f   : > { %v4039_v32 = vpop.permute.xlu1 %4038 }
0x1d30   : > { %v4041_v34 = vunpack.i.h.bf16 %v4039_v32  ;;  %v4040_v35 = vunpack.i.l.bf16 %v4039_v32 }
0x1d32   : > { %3022 = vmatpush.msra.mxu2 %v4040_v35 }
0x1d34   : > { %3023 = vmatpush.msra.mxu2 %v4041_v34 }
0x1d35   : > { %v3159_v38 = vpop.xlane.xlu0 %3158  ;;  %3771 = vmatmul.msk.f32.vlgmr.msra.gmra.mxu2 %vm1791_vm9, %v2998_v37 }
0x1d36   : > { %4109 = vrcp.f32 %v3159_v38  ;;  %v3171_v44 = vand.u32 2147483648, %v3159_v38  ;;  %vm3165_vm6 = vweird.f32 %v3159_v38  ;;  %v3169_v46 = vand.u32 2147483647, %v3159_v38 }
0x1d38   : > { %v3172_v49 = vor.u32 1.1754944e-38, %v3171_v44  ;;  %vm3170_vm4 = vcmp.eq.f32.partialorder %v3169_v46, 8.507059e+37  ;;  %v3444_v46 = vld [vmem:[%s5382_s11 + $0x78] sm:$0xff] }
0x1d39   : > { %3445 = vmatpush.msrb.mxu0 %v3444_v46 }
0x1d3c   : > { %v4110_v39 = vpop.eup %4109 }
0x1d3d   : > { %v3161_v41 = vmul.f32 %v4110_v39, %v3159_v38  ;;  %vm3166_vm10 = vweird.f32 %v4110_v39 }
0x1d3e   : > { %vm3167_vm7 = vmor %vm3165_vm6, %vm3166_vm10 }
0x1d3f   : > { %v3162_v42 = vsub.f32 1.0, %v3161_v41  ;;  %v3249_v1 = vpop.xlane.xlu2 %3248  ;;  %v4068_v41 = vld [vmem:[%s5380_s26] ss:$0 sm:$0xff] }
0x1d40   : > { %4111 = vrcp.f32 %v3249_v1  ;;  %v3261_v59 = vand.u32 2147483648, %v3249_v1  ;;  %v3259_v62 = vand.u32 2147483647, %v3249_v1  ;;  %vm3255_vm14 = vweird.f32 %v3249_v1 }
0x1d41   : > { %v3163_v43 = vmul.f32 %v4110_v39, %v3162_v42 }
0x1d42   : > { %v3262_v3 = vor.u32 1.1754944e-38, %v3261_v59  ;;  %vm3260_vm8 = vcmp.eq.f32.partialorder %v3259_v62, 8.507059e+37  ;;  %v3437_v59 = vld [vmem:[%s5382_s11 + $0x40] sm:$0xff]  ;;  %v3436_v62 = vld [vmem:[%s5382_s11 + $0x38] sm:$0xff] }
0x1d43   : > { %v3164_v45 = vadd.f32 %v4110_v39, %v3163_v43  ;;  %v4069_v43 = vld [vmem:[%s5381_s18] ss:$0 sm:$0xff]  ;;  %s5388_s18 = sand.u32 1, %s4311_s23  }
0x1d45   : > { %v3168_v47 = vsel %vm3167_vm7, %v4110_v39, %v3164_v45 }
0x1d46   : > { %v4112_v48 = vpop.eup %4111  ;;  %v3173_v54 = vsel %vm3170_vm4, %v3172_v49, %v3168_v47  ;;  %v3443_v47 = vld [vmem:[%s5382_s11 + $0x70] sm:$0xff]  ;;  %v3442_v49 = vld [vmem:[%s5382_s11 + $0x68] sm:$0xff] }
0x1d47   : > { %v3251_v5 = vmul.f32 %v4112_v48, %v3249_v1  ;;  %v4049_v50 = vpop.permute.xlu2 %4048  ;;  %vm3256_vm13 = vweird.f32 %v4112_v48  ;;  %v3174_v58 = vmul.f32 %v5147_v2, %v3173_v54  ;;  %3446 = vmatpush.msrb.mxu0 %v3443_v47  ;;  %v3439_v54 = vld [vmem:[%s5382_s11 + $0x50] sm:$0xff] }
0x1d48   : > { %v4051_v51 = vunpack.i.h.bf16 %v4049_v50  ;;  %v4050_v52 = vunpack.i.l.bf16 %v4049_v50  ;;  %v4054_v53 = vpop.permute.xlu0 %4053  ;;  %vm3257_vm15 = vmor %vm3255_vm14, %vm3256_vm13  ;;  %v3441_v50 = vld [vmem:[%s5382_s11 + $0x60] sm:$0xff] }
0x1d49   : > { %v3252_v55 = vsub.f32 1.0, %v3251_v5  ;;  %v4056_v56 = vunpack.i.h.bf16 %v4054_v53  ;;  %v4055_v57 = vunpack.i.l.bf16 %v4054_v53  ;;  %3447 = vmatpush.msrb.mxu0 %v3442_v49  ;;  %v3505_v49 = vld [vmem:[%s4538_s20 + $0x10] sm:$0xff] }
0x1d4a   : > { %3198 = vmatpush.msrb.mxu2 %v4050_v52  ;;  %v3440_v52 = vld [vmem:[%s5382_s11 + $0x58] sm:$0xff] }
0x1d4b   : > { %v3253_v61 = vmul.f32 %v4112_v48, %v3252_v55  ;;  %3288 = vmatpush.msra.mxu1 %v4055_v57  ;;  %3448 = vmatpush.msrb.mxu0 %v3441_v50  ;;  %v3503_v50 = vld [vmem:[%s4538_s20] sm:$0xff] }
0x1d4c   : > { %3199 = vmatpush.msrb.mxu2 %v4051_v51 }
0x1d4d   : > { %v3254_v0 = vadd.f32 %v4112_v48, %v3253_v61  ;;  %3779 = vmatmul.msk.f32.vlgmr.msrb.gmra.mxu2 %vm1791_vm9, %v3174_v58  ;;  %3289 = vmatpush.msra.mxu1 %v4056_v56  ;;  %v3438_v56 = vld [vmem:[%s5382_s11 + $0x48] sm:$0xff]  ;;  %v3435_v58 = vld [vmem:[%s5382_s11 + $0x30] sm:$0xff] }
0x1d4e   : > { %3382 = vmatpush.msra.mxu2 %v3362_v26  ;;  %3449 = vmatpush.msrb.mxu0 %v3440_v52 }
0x1d4f   : > { %v3258_v7 = vsel %vm3257_vm15, %v4112_v48, %v3254_v0  ;;  %v4070_v48 = vld [vmem:[%s5383_s28] ss:$0 sm:$0xff]  ;;  %v3434_v0 = vld [vmem:[%s5382_s11 + $0x28] sm:$0xff] }
0x1d50   : > { %v3263_v8 = vsel %vm3260_vm8, %v3262_v3, %v3258_v7  ;;  %3383 = vmatpush.msra.mxu2 %v3361_v28  ;;  %3450 = vmatpush.msrb.mxu0 %v3439_v54  ;;  %v3433_v3 = vld [vmem:[%s5382_s11 + $0x20] sm:$0xff] }
0x1d51   : > { %v3264_v11 = vmul.f32 %v5151_v9, %v3263_v8  ;;  %v2943_v9 = vld [vmem:[%s5373_s16 + $0x18] sm:$0xff] }
0x1d52   : > { %3318 = vmatpush.msra.mxu3 %v2943_v9  ;;  %3384 = vmatpush.msra.mxu2 %v3360_v15  ;;  %v3430_v9 = vld [vmem:[%s5382_s11 + $0x8] sm:$0xff] }
0x1d53   : > { %3783 = vmatmul.msk.f32.vlgmr.msra.gmra.mxu1 %vm1791_vm9, %v3264_v11  ;;  %3451 = vmatpush.msrb.mxu0 %v3438_v56  ;;  %v3432_v11 = vld [vmem:[%s5382_s11 + $0x18] sm:$0xff] }
0x1d54   : > { %3319 = vmatpush.msra.mxu3 %v2942_v18  ;;  %v3429_v18 = vld [vmem:[%s5382_s11] sm:$0xff] }
0x1d55   : > { %3452 = vmatpush.msrb.mxu0 %v3437_v59 }
0x1d56   : > { %3320 = vmatpush.msra.mxu3 %v2941_v19 }
0x1d57   : > { %3453 = vmatpush.msrb.mxu0 %v3436_v62 }
0x1d58   : > { %3321 = vmatpush.msra.mxu3 %v2940_v20 }
0x1d59   : > { %3454 = vmatpush.msrb.mxu0 %v3435_v58 }
0x1d5b   : > { %3455 = vmatpush.msrb.mxu0 %v3434_v0 }
0x1d5d   : > { %3456 = vmatpush.msrb.mxu0 %v3433_v3 }
0x1d5f   : > { %3457 = vmatpush.msrb.mxu0 %v3432_v11 }
0x1da8   : > { %v3111_v2 = vpop.f32.mrf.mxu1 }
0x1da9   : > { %3115 = vrot.lane.b32.xlu1 %v3111_v2, %s5374_s1  ;;  %s3788_s1 = sshll.u32 %s4571_s0, 3  ;;  %s4261_s0 = scalar_lea.hbm %s5384_s2, 16 }
0x1db8   : > { %v3025_v16 = vpop.f32.mrf.mxu2 }
0x1db9   : > { %3028 = vst.msk [vmem:[#allocation6] sm:$0xff] %vm5375_vm2, %v3025_v16  ;;  %v3431_v16 = vld [vmem:[%s5382_s11 + $0x10] sm:$0xff]  ;;  %s3536_s11 = scalar_lea.sflag [#allocation9], %s5388_s18 }
0x1dba   : > { %3458 = vmatpush.msrb.mxu0 %v3431_v16 }
0x1dbc   : > { %3459 = vmatpush.msrb.mxu0 %v3430_v9 }
0x1dbe   : > { %3460 = vmatpush.msrb.mxu0 %v3429_v18 }
0x1dd0   : > { %v3201_v4 = vpop.f32.mrf.mxu2  ;;  %v3291_v17 = vpop.f32.mrf.mxu1 }
0x1dd1   : > { %3295 = vrot.lane.b32.xlu0 %v3291_v17, %s5376_s22  ;;  %3205 = vrot.lane.b32.xlu2 %v3201_v4, %s5377_s15  ;;  %s3546_s22 = scalar_lea.hbm %s5384_s2, %s3788_s1  ;;  %s5386_s15 = scalar_lea.vmem [#allocation15], %s4696_s10 }
0x1dd2   : > { %s3548_s7 = sshll.u32 %s5386_s15, 4  ;;  %s5387_s26 = smov %s5386_s15  ;;  %s3549_s7 = int_to_ptr.vmem [resolvable:$true] %s3548_s7 }
0x1e1b   : > { %v3116_v13 = vpop.permute.xlu1 %3115 }
0x1e1c   : > { %3118 = vst.msk [vmem:[#allocation6] sm:$0xff] %vm2679_vm11, %v3116_v13 }
0x1e2b   : > { %v3206_v21 = vpop.permute.xlu2 %3205 }
0x1e2c   : > { %3208 = vst.msk [vmem:[#allocation6] sm:$0xff] %vm2763_vm1, %v3206_v21 }
0x1e43   : > { %v3296_v40 = vpop.permute.xlu0 %3295 }
0x1e44   : > { %3298 = vst.msk [vmem:[#allocation6] sm:$0xff] %vm2847_vm3, %v3296_v40 }
0x1e4b   : > { %v3299_v22 = vld [vmem:[#allocation6] sm:$0xff] }
0x1e4c   : > { %3784 = vmatmul.msk.f32.vlgmr.msra.gmra.mxu3 %vm1020_vm0, %v3299_v22 }
0x1ecf   : > { %v3323_v27 = vpop.f32.mrf.mxu3 }
0x1ed0   : > { %v3324_v31 = vadd.f32 %v4067_v23, %v3323_v27 }
0x1ed2   : > { %v5180_v63 = vadd.f32 %v3324_v31, %v5101_v6  ;;  %v3359_v6 = vld [vmem:[%s5379_s29] sm:$0xff]  ;;  %s3550_s29 = sshll.u32 %s3546_s22, 4  ;;  %s3551_s29 = int_to_ptr.hbm [resolvable:$true] %s3550_s29 }
0x1ed3   : > { %3385 = vmatpush.msra.mxu2 %v3359_v6  ;;  %s4255_s28 = sshra.s32 %s3551_s29, 4  ;;  %s4256_s28 = int_to_ptr.hbm [resolvable:$true] %s4255_s28 }
0x1ed4   : > { %v3329_v60 = vsel %vm1020_vm0, %v5180_v63, 0.0  ;;  %s4257_s3 = scalar_lea.hbm %s4256_s28, 8  ;;  %p4262_p7 = scmp.lt.s32.totalorder %s4256_s28, %s5384_s2 }
0x1ed5   : > { %3330 = vadd.xlane.f32.xlu1 %v3329_v60  ;;  %p4258_p12 = scmp.ne.s32.totalorder %s4256_s28, %s4257_s3  ;;  %p4263_p8 = scmp.lt.s32.totalorder %s4261_s0, %s4257_s3 }
0x1ed7   : > { %p4259_p0 = pnand %p4258_p12, %p4588_p5  ;;  %p4264_p11 = por %p4263_p8, %p4262_p7 }
0x1ed9   : > { %p4260_p4 = pneg %p4259_p0 }
0x1edb   : > { %p4265_p13 = pnand %p4264_p11, %p4260_p4 }
0x1f48   : > { %v3331_v33 = vpop.xlane.xlu1 %3330 }
0x1f49   : > { %v3332_v12 = vmul.f32 %v3331_v33, %v4679_v10 }
0x1f4b   : > { %v3333_v14 = vsub.f32 %v5180_v63, %v3332_v12 }
0x1f4d   : > { %v3334_v24 = vmul.f32 %v3333_v14, %v3333_v14 }
0x1f4f   : > { %v3335_v25 = vsel %vm1020_vm0, %v3334_v24, 0.0 }
0x1f50   : > { %3336 = vadd.xlane.f32.xlu2 %v3335_v25 }
0x1fc3   : > { %v3337_v29 = vpop.xlane.xlu2 %3336 }
0x1fc4   : > { %v3338_v30 = vmul.f32 %v3337_v29, %v4679_v10 }
0x1fc6   : > { %v3339_v32 = vadd.f32 1e-05, %v3338_v30  ;;  %v4384_v30 = vmov -1.0  }
0x1fc8   : > { %4113 = vrsqrt.f32 %v3339_v32  ;;  %vm3346_vm11 = vweird.f32 %v3339_v32 }
0x1fce   : > { %v4114_v34 = vpop.eup %4113 }
0x1fcf   : > { %v3341_v35 = vmul.f32 %v4114_v34, %v3339_v32  ;;  %vm3347_vm9 = vweird.f32 %v4114_v34 }
0x1fd0   : > { %vm3348_vm1 = vmor %vm3346_vm11, %vm3347_vm9 }
0x1fd1   : > { %v3342_v36 = vmul.f32 %v4114_v34, %v3341_v35 }
0x1fd3   : > { %v3343_v37 = vmul.f32 0.5, %v3342_v36 }
0x1fd5   : > { %v3344_v38 = vsub.f32 1.5, %v3343_v37 }
0x1fd7   : > { %v3345_v39 = vmul.f32 %v4114_v34, %v3344_v38  ;;  %v4071_v38 = vld [vmem:[#allocation7] ss:$0 sm:$0xff] }
0x1fd9   : > { %v3349_v42 = vsel %vm3348_vm1, %v4114_v34, %v3345_v39 }
0x1fda   : > { %v3350_v1 = vmul.f32 %v3349_v42, %v3333_v14 }
0x1fdc   : > { %v3354_v44 = vmul.f32 %v4068_v41, %v3350_v1 }
0x1fde   : > { %v3358_v45 = vadd.f32 %v4069_v43, %v3354_v44 }
0x1fe0   : > { %3785 = vmatmul.msk.f32.vlgmr.msra.gmra.mxu2 %vm1020_vm0, %v3358_v45 }
0x2063   : > { %v3387_v5 = vpop.f32.mrf.mxu2 }
0x2064   : > { %v5200_v51 = vadd.f32 %v4070_v48, %v3387_v5  ;;  %v3506_v48 = vld [vmem:[%s4538_s20 + $0x18] sm:$0xff]  ;;  %v3504_v5 = vld [vmem:[%s4538_s20 + $0x8] sm:$0xff] }
0x2065   : > { %3526 = vmatpush.msrb.mxu1 %v3506_v48 }
0x2066   : > { %v3391_v53 = vmul.f32 0.70710677, %v5200_v51  ;;  %v3390_v35 = vmul.f32 0.5, %v5200_v51 }
0x2067   : > { %3527 = vmatpush.msrb.mxu1 %v3505_v49 }
0x2068   : > { %v3394_v55 = vand.u32 2147483647, %v3391_v53  ;;  %vm3392_vm6 = vcmp.ge.f32.partialorder %v3391_v53, 0.0 }
0x2069   : > { %v3393_v32 = vsel %vm3392_vm6, 1.0, %v4384_v30  ;;  %3528 = vmatpush.msrb.mxu1 %v3504_v5 }
0x206a   : > { %v3395_v57 = vmul.f32 0.3275911, %v3394_v55  ;;  %v3420_v22 = vsub.f32 0.0, %v3394_v55 }
0x206b   : > { %3529 = vmatpush.msrb.mxu1 %v3503_v50 }
0x206c   : > { %v3396_v61 = vadd.f32 1.0, %v3395_v57  ;;  %v3421_v31 = vmul.f32 %v3420_v22, %v3394_v55 }
0x206e   : > { %4115 = vrcp.f32 %v3396_v61  ;;  %v3408_v4 = vand.u32 2147483648, %v3396_v61  ;;  %v3406_v13 = vand.u32 2147483647, %v3396_v61  ;;  %vm3402_vm5 = vweird.f32 %v3396_v61 }
0x206f   : > { %v3422_v12 = vmul.f32 1.442695, %v3421_v31 }
0x2070   : > { %v3409_v20 = vor.u32 1.1754944e-38, %v3408_v4  ;;  %vm3407_vm10 = vcmp.eq.f32.partialorder %v3406_v13, 8.507059e+37 }
0x2071   : > { %4117 = vpow2.f32 %v3422_v12 }
0x2074   : > { %v4116_v7 = vpop.eup %4115 }
0x2075   : > { %v3398_v8 = vmul.f32 %v4116_v7, %v3396_v61  ;;  %vm3403_vm3 = vweird.f32 %v4116_v7  ;;  %v4072_v61 = vld [vmem:[#allocation10] ss:$0 sm:$0xff] }
0x2076   : > { %vm3404_vm12 = vmor %vm3402_vm5, %vm3403_vm3 }
0x2077   : > { %v3399_v2 = vsub.f32 1.0, %v3398_v8  ;;  %v4118_v15 = vpop.eup %4117 }
0x2079   : > { %v3400_v17 = vmul.f32 %v4116_v7, %v3399_v2 }
0x207b   : > { %v3401_v19 = vadd.f32 %v4116_v7, %v3400_v17 }
0x207d   : > { %v3405_v21 = vsel %vm3404_vm12, %v4116_v7, %v3401_v19  ;;  %v4074_v7 = vld [vmem:[#allocation13] ss:$0 sm:$0xff] }
0x207e   : > { %v3410_v40 = vsel %vm3407_vm10, %v3409_v20, %v3405_v21 }
0x207f   : > { %v3411_v23 = vmul.f32 1.0614054, %v3410_v40 }
0x2081   : > { %v3412_v27 = vadd.f32 -1.4531521, %v3411_v23 }
0x2083   : > { %v3413_v60 = vmul.f32 %v3412_v27, %v3410_v40 }
0x2085   : > { %v3414_v33 = vadd.f32 1.4214138, %v3413_v60 }
0x2087   : > { %v3415_v14 = vmul.f32 %v3414_v33, %v3410_v40 }
0x2089   : > { %v3416_v24 = vadd.f32 -0.28449672, %v3415_v14 }
0x208b   : > { %v3417_v25 = vmul.f32 %v3416_v24, %v3410_v40 }
0x208d   : > { %v3418_v26 = vadd.f32 0.2548296, %v3417_v25 }
0x208f   : > { %v3419_v28 = vmul.f32 %v3418_v26, %v3410_v40 }
0x2091   : > { %v3424_v6 = vmul.f32 %v4118_v15, %v3419_v28 }
0x2093   : > { %v3425_v29 = vsub.f32 1.0, %v3424_v6 }
0x2095   : > { %v3426_v34 = vmul.f32 %v3425_v29, %v3393_v32 }
0x2097   : > { %v3427_v36 = vadd.f32 1.0, %v3426_v34 }
0x2099   : > { %v3428_v37 = vmul.f32 %v3427_v36, %v3390_v35 }
0x209b   : > { %3461 = vmatmul.f32.vlgmr.msrb.gmra.mxu0 %v3428_v37 }
0x2118   : > { %v3462_v39 = vpop.f32.mrf.mxu0 }
0x2119   : > { %v3465_v41 = vadd.f32 %v3462_v39, %v5180_v63 }
0x211b   : > { %v3470_v42 = vadd.f32 %v4071_v38, %v3465_v41 }
0x211d   : > { %v3473_v1 = vsel %vm1020_vm0, %v3470_v42, 0.0 }
0x211e   : > { %3474 = vadd.xlane.f32.xlu0 %v3473_v1 }
0x2191   : > { %v3475_v43 = vpop.xlane.xlu0 %3474 }
0x2192   : > { %v3476_v44 = vmul.f32 %v3475_v43, %v4679_v10 }
0x2194   : > { %v3477_v45 = vsub.f32 %v3470_v42, %v3476_v44 }
0x2196   : > { %v3478_v46 = vmul.f32 %v3477_v45, %v3477_v45 }
0x2198   : > { %v3479_v47 = vsel %vm1020_vm0, %v3478_v46, 0.0 }
0x2199   : > { %3480 = vadd.xlane.f32.xlu1 %v3479_v47 }
0x220c   : > { %v3481_v63 = vpop.xlane.xlu1 %3480 }
0x220d   : > { %v3482_v51 = vmul.f32 %v3481_v63, %v4679_v10  ;;  %v4073_v10 = vld [vmem:[#allocation12] ss:$0 sm:$0xff] }
0x220f   : > { %v3483_v52 = vadd.f32 1e-05, %v3482_v51 }
0x2211   : > { %4119 = vrsqrt.f32 %v3483_v52  ;;  %vm3490_vm4 = vweird.f32 %v3483_v52 }
0x2217   : > { %v4120_v53 = vpop.eup %4119 }
0x2218   : > { %v3485_v54 = vmul.f32 %v4120_v53, %v3483_v52  ;;  %vm3491_vm7 = vweird.f32 %v4120_v53 }
0x2219   : > { %vm3492_vm13 = vmor %vm3490_vm4, %vm3491_vm7 }
0x221a   : > { %v3486_v55 = vmul.f32 %v4120_v53, %v3485_v54 }
0x221c   : > { %v3487_v56 = vmul.f32 0.5, %v3486_v55 }
0x221e   : > { %v3488_v57 = vsub.f32 1.5, %v3487_v56 }
0x2220   : > { %v3489_v59 = vmul.f32 %v4120_v53, %v3488_v57 }
0x2222   : > { %v3493_v62 = vsel %vm3492_vm13, %v4120_v53, %v3489_v59 }
0x2223   : > { %v3494_v58 = vmul.f32 %v3493_v62, %v3477_v45 }
0x2225   : > { %v3498_v0 = vmul.f32 %v4072_v61, %v3494_v58 }
0x2227   : > { %v3502_v3 = vadd.f32 %v4073_v10, %v3498_v0 }
0x2229   : > { %3786 = vmatmul.msk.f32.vlgmr.msrb.gmra.mxu1 %vm1020_vm0, %v3502_v3 }
0x22a6   : > { %v3531_v8 = vpop.f32.mrf.mxu1 }
0x22a7   : > { %v3532_v11 = vadd.f32 %v4074_v7, %v3531_v8 }
0x22a9   : > { %3534 = vst [vmem:[%s5387_s26] sm:$0xff] %v3532_v11 }
0x22aa   : > { %4268 = shalt.err (!%p4265_p13)
}
0x22ab   : > { %3812 = dma.vmem_to_hbm [thread:$0]  (%p4588_p5), %s3549_s7, 128, %s3551_s29, %s3536_s11  }
0x22ac PF: > { %s5389_s10 = sld [smem:[#allocation38_spill]] }
0x22ad   : > { %s5390_s1 = sld [smem:[#allocation36_spill]] }
0x22b2   : > { %p3839_p1 = scmp.ge.s32.totalorder %s5389_s10, 2 }
0x22b3   : > { %s3562_s15 = sand.u32 1, %s5390_s1  }
0x22b4   : > { %p3828_p2 = pnand %p3839_p1, %p4592_p6  ;;  %s3563_s26 = scalar_lea.sflag [#allocation9], %s3562_s15 }
0x22b6   : > { %p3829_p3 = pneg %p3828_p2 }
0x22b8   : > { %4302 = dma.done.wait (%p3829_p3), %s3563_s26, 128  }
0x22b9   : > { %4304 = vsyncadd (%p3829_p3), %s3563_s26, 4294967168  ;;  %s5392_s28 = sld [smem:[#allocation39_spill]]  ;;  %s5395_s22 = smov %s4311_s23 }
0x22ba   : > { %s5393_s3 = sld [smem:[#allocation37_spill]] }
0x22bb   : > { %s5394_s26 = sld [smem:[#allocation40_spill]] }
0x22bf   : > { %p76_p10 = scmp.ge.s32.totalorder %s5392_s28, 4  }
0x22c0   : > { %s5396_s23 = smov %s5393_s3 }
0x22c1   :  { %78 = sbr.rel (!%p76_p10) target bundleno = 63 (0x3f), region = 250 }
0x22c6   :  { %3569 = vsyncpa [#allocation8], 1 }
0x22c7   :  { %3571 = vsyncpa [#allocation8 + $0x1], 1 }
0x22c8   :  { %3572 = vsyncpa [#allocation11], 1 }
0x22c9   :  { %3573 = vsyncpa [#allocation14], 1 }
0x22ca   :  { %3574 = vsyncpa [#allocation9], 1 }
0x22cb   :  { %3576 = vsyncpa [#allocation9 + $0x1], 1 }

</bundles_post_ra>
